<compile_context>
chip_gen: v7x
topology: tpu7x:2x2x1
jax: 0.10.0
libtpu: 0.0.40
codegen_flags: <defaults>
</compile_context>

<pallas_src>
import functools

import jax
import jax.numpy as jnp
from jax.experimental import pallas as pl
from jax.experimental.pallas import tpu as pltpu

EPS = 1e-5                      # nn.BatchNorm2d default eps
VMEM_LIMIT = 32 * 1024 * 1024   # safe on v5e/v6e (128 MiB) and v7x (64 MiB per TC)


def _round_up(x, m):
    return ((x + m - 1) // m) * m


# ----------------------------- Pallas kernels ------------------------------ #

def _conv_matmul_stats_kernel(w_ref, p_ref, g_ref, b_ref,
                              y_ref, scale_ref, shift_ref,
                              sum_sc, sq_sc, *, m_total, tm):
    """Conv pass 1: (Cout,K)@(K,TM) matmul + global BN-stat accumulation.

    w_ref:   (Cout, K)   bf16 flattened conv weight (row order kh,kw,cin)
    p_ref:   (K, TM)     bf16 im2col patch tile (columns = b,oh,ow)
    g_ref:   (Cout, 1)   f32 BN gamma
    b_ref:   (Cout, 1)   f32 BN beta
    y_ref:   (Cout, TM)  f32 pre-BN conv output tile
    scale/shift_ref: (Cout, 1) f32, written once at the last tile
    sum_sc/sq_sc:    (Cout, 1) f32 VMEM accumulators (persist across the grid)
    """
    i = pl.program_id(0)

    @pl.when(i == 0)
    def _():
        sum_sc[...] = jnp.zeros_like(sum_sc)
        sq_sc[...] = jnp.zeros_like(sq_sc)

    # MXU matmul, f32 accumulation.  No conv bias: it is cancelled by BN's mean.
    y = jnp.dot(w_ref[...], p_ref[...], preferred_element_type=jnp.float32)
    y_ref[...] = y

    # Mask out-of-range columns of the (possibly partial) edge tile before
    # accumulating the train-mode BatchNorm batch statistics.
    col = jax.lax.broadcasted_iota(jnp.int32, y.shape, 1) + i * tm
    yv = jnp.where(col < m_total, y, 0.0)
    sum_sc[...] += jnp.sum(yv, axis=1, keepdims=True)
    sq_sc[...] += jnp.sum(yv * yv, axis=1, keepdims=True)

    @pl.when(i == pl.num_programs(0) - 1)
    def _():
        inv_m = 1.0 / m_total                                   # static
        mean = sum_sc[...] * inv_m
        var = jnp.maximum(sq_sc[...] * inv_m - mean * mean, 0.0)  # biased var
        scale = g_ref[...] * jax.lax.rsqrt(var + EPS)
        scale_ref[...] = scale
        shift_ref[...] = b_ref[...] - mean * scale


def _bn_relu_kernel(y_ref, scale_ref, shift_ref, o_ref):
    """Conv pass 2: y*scale + shift, ReLU, cast to bf16.  Lane-dense (Cout,TM) tiles."""
    o_ref[...] = jnp.maximum(
        y_ref[...] * scale_ref[...] + shift_ref[...], 0.0).astype(o_ref.dtype)


def _mlp_head_kernel(x_ref, w4_ref, b4_ref, wh_ref, bh_ref, o_ref):
    """Fused fc4 + ReLU + head: (TB,3136)@(3136,512) -> ReLU -> (TB,512)@(512,1)."""
    h = jnp.dot(x_ref[...], w4_ref[...], preferred_element_type=jnp.float32)
    h = jnp.maximum(h + b4_ref[...], 0.0)
    o_ref[...] = jnp.dot(h, wh_ref[...], preferred_element_type=jnp.float32) + bh_ref[...]


# ------------------------------ kernel wrappers ----------------------------- #

def _conv_bn_relu(patches, w_flat, gamma, beta, *, tm=1024):
    """patches (K, M) bf16, w_flat (Cout, K) bf16, gamma/beta (Cout, 1) f32.

    Returns train-mode-BN + ReLU activations, shape (Cout, M), bf16.
    """
    cout, k = w_flat.shape
    _, m = patches.shape
    tm = min(tm, _round_up(m, 128))          # lane-dim tile, multiple of 128
    grid = (pl.cdiv(m, tm),)

    # Pass 1: matmul + global per-channel sum/sumsq -> scale/shift.
    y, scale, shift = pl.pallas_call(
        functools.partial(_conv_matmul_stats_kernel, m_total=m, tm=tm),
        out_shape=(jax.ShapeDtypeStruct((cout, m), jnp.float32),
                   jax.ShapeDtypeStruct((cout, 1), jnp.float32),
                   jax.ShapeDtypeStruct((cout, 1), jnp.float32)),
        grid=grid,
        in_specs=[pl.BlockSpec((cout, k), lambda i: (0, 0)),
                  pl.BlockSpec((k, tm), lambda i: (0, i)),
                  pl.BlockSpec((cout, 1), lambda i: (0, 0)),
                  pl.BlockSpec((cout, 1), lambda i: (0, 0))],
        out_specs=(pl.BlockSpec((cout, tm), lambda i: (0, i)),
                   pl.BlockSpec((cout, 1), lambda i: (0, 0)),
                   pl.BlockSpec((cout, 1), lambda i: (0, 0))),
        scratch_shapes=[pltpu.VMEM((cout, 1), jnp.float32),
                        pltpu.VMEM((cout, 1), jnp.float32)],
        compiler_params=pltpu.CompilerParams(
            dimension_semantics=("arbitrary",),     # stats reduce across M tiles
            vmem_limit_bytes=VMEM_LIMIT),
        cost_estimate=pl.CostEstimate(
            flops=2 * cout * k * m + 4 * cout * m,
            transcendentals=cout,
            bytes_accessed=cout * k * 2 + k * m * 2 + cout * m * 4 + cout * 16),
    )(w_flat, patches, gamma, beta)

    # Pass 2: normalize + ReLU (independent tiles -> parallel / megacore on v7x).
    out = pl.pallas_call(
        _bn_relu_kernel,
        out_shape=jax.ShapeDtypeStruct((cout, m), jnp.bfloat16),
        grid=grid,
        in_specs=[pl.BlockSpec((cout, tm), lambda i: (0, i)),
                  pl.BlockSpec((cout, 1), lambda i: (0, 0)),
                  pl.BlockSpec((cout, 1), lambda i: (0, 0))],
        out_specs=pl.BlockSpec((cout, tm), lambda i: (0, i)),
        compiler_params=pltpu.CompilerParams(
            dimension_semantics=("parallel",),
            vmem_limit_bytes=VMEM_LIMIT),
        cost_estimate=pl.CostEstimate(
            flops=3 * cout * m, transcendentals=0,
            bytes_accessed=cout * m * 4 + cout * m * 2 + cout * 8),
    )(y, scale, shift)
    return out


def _mlp_head(flat, w4, b4, wh, bh, *, tb=128):
    """Fused fc4+ReLU+head.  flat: (B, 3136) bf16 -> logits (B, 1) f32."""
    bsz, k = flat.shape
    nh = w4.shape[1]
    tb = min(tb, _round_up(bsz, 8))
    grid = (pl.cdiv(bsz, tb),)
    return pl.pallas_call(
        _mlp_head_kernel,
        out_shape=jax.ShapeDtypeStruct((bsz, 1), jnp.float32),
        grid=grid,
        in_specs=[pl.BlockSpec((tb, k), lambda i: (i, 0)),
                  pl.BlockSpec((k, nh), lambda i: (0, 0)),
                  pl.BlockSpec((1, nh), lambda i: (0, 0)),
                  pl.BlockSpec((nh, 1), lambda i: (0, 0)),
                  pl.BlockSpec((1, 1), lambda i: (0, 0))],
        out_specs=pl.BlockSpec((tb, 1), lambda i: (i, 0)),
        compiler_params=pltpu.CompilerParams(
            dimension_semantics=("parallel",),
            vmem_limit_bytes=VMEM_LIMIT),
        cost_estimate=pl.CostEstimate(
            flops=2 * bsz * k * nh + 2 * bsz * nh,
            transcendentals=0,
            bytes_accessed=bsz * k * 2 + k * nh * 2 + nh * 8 + bsz * 4),
    )(flat, w4, b4, wh, bh)


# --------------------------------- glue ------------------------------------ #

def _im2col_cm(x, k, s):
    """Channel-major im2col (no transposes).

    x: (C, B, H, W) -> patches (k*k*C, B*OH*OW); patch-row order (kh, kw, cin),
    patch-column order (b, oh, ow).
    """
    C, B, H, W = x.shape
    OH = (H - k) // s + 1
    OW = (W - k) // s + 1
    slabs = []
    for dh in range(k):
        for dw in range(k):
            slabs.append(x[:, :, dh:dh + s * (OH - 1) + 1:s,
                                 dw:dw + s * (OW - 1) + 1:s])
    p = jnp.concatenate(slabs, axis=0)              # (k*k*C, B, OH, OW)
    return p.reshape(k * k * C, B * OH * OW), OH, OW


def init_params(key, in_channels=1):
    """Synthetic parameters with the same shapes/distributions as the PyTorch module.

    Conv weights are stored pre-flattened as (Cout, KH*KW*Cin) bf16 matching the
    im2col row order.  Conv biases are OMITTED: a per-channel bias added before
    train-mode BatchNorm is exactly cancelled by the mean subtraction.
    (To load a real checkpoint: w.transpose(0,2,3,1).reshape(Cout,-1).)
    """
    ks = jax.random.split(key, 5)

    def conv_w(k, cout, cin, ksz):
        bound = 1.0 / (cin * ksz * ksz) ** 0.5
        w = jax.random.uniform(k, (cout, cin, ksz, ksz), jnp.float32, -bound, bound)
        return (jnp.transpose(w, (0, 2, 3, 1))            # (Cout, KH, KW, Cin)
                   .reshape(cout, ksz * ksz * cin)
                   .astype(jnp.bfloat16))

    def lin_p(k, fin, fout):
        bound = 1.0 / fin ** 0.5
        kw, kb = jax.random.split(k)
        w = jax.random.uniform(kw, (fin, fout), jnp.float32, -bound, bound)
        b = jax.random.uniform(kb, (1, fout), jnp.float32, -bound, bound)
        return w, b

    w4, b4 = lin_p(ks[3], 7 * 7 * 64, 512)
    wh, bh = lin_p(ks[4], 512, 1)

    return {
        "w1": conv_w(ks[0], 32, in_channels, 8),
        "g1": jnp.ones((32, 1), jnp.float32), "be1": jnp.zeros((32, 1), jnp.float32),
        "w2": conv_w(ks[1], 64, 32, 4),
        "g2": jnp.ones((64, 1), jnp.float32), "be2": jnp.zeros((64, 1), jnp.float32),
        "w3": conv_w(ks[2], 64, 64, 3),
        "g3": jnp.ones((64, 1), jnp.float32), "be3": jnp.zeros((64, 1), jnp.float32),
        "w4": w4.astype(jnp.bfloat16), "b4": b4,
        "wh": wh, "bh": bh,
    }


def conv_initiation_classifier_forward(x_u8, params):
    """x_u8: (B, 84, 84) uint8 -> logits (B, 1) float32 (train-mode BN semantics)."""
    B = x_u8.shape[0]
    x = (x_u8.astype(jnp.float32) * (1.0 / 255.0)).astype(jnp.bfloat16)
    x = x[None]                                    # (C=1, B, 84, 84) channel-major

    # conv1 (8x8, s4) + bn1 + relu  -> (32, B, 20, 20)
    p1, oh1, ow1 = _im2col_cm(x, 8, 4)
    a1 = _conv_bn_relu(p1, params["w1"], params["g1"], params["be1"]).reshape(32, B, oh1, ow1)

    # conv2 (4x4, s2) + bn2 + relu  -> (64, B, 9, 9)
    p2, oh2, ow2 = _im2col_cm(a1, 4, 2)
    a2 = _conv_bn_relu(p2, params["w2"], params["g2"], params["be2"]).reshape(64, B, oh2, ow2)

    # conv3 (3x3, s1) + bn3 + relu  -> (64, B, 7, 7)
    p3, oh3, ow3 = _im2col_cm(a2, 3, 1)
    a3 = _conv_bn_relu(p3, params["w3"], params["g3"], params["be3"]).reshape(64, B, oh3, ow3)

    # PyTorch's x.view(B, -1) flattens NCHW (feature order c,h,w).  The only
    # remaining activation transpose, and it is tiny (B x 3136).
    flat = a3.transpose(1, 0, 2, 3).reshape(B, 64 * oh3 * ow3)

    # Fused fc4 + ReLU + head.
    # TODO(synk): conv3's BN-normalize pass could also be folded into this call.
    return _mlp_head(flat, params["w4"], params["b4"], params["wh"], params["bh"])


# --------------------------------- main ------------------------------------ #

if __name__ == "__main__":
    key = jax.random.PRNGKey(0)
    k_x, k_p = jax.random.split(key)

    # fc4 expects 7*7*64 features -> the spatial input must be 84x84 (Atari-style).
    B = 2
    x = jax.random.randint(k_x, (B, 84, 84), 0, 256, dtype=jnp.int32).astype(jnp.uint8)
    params = init_params(k_p, in_channels=1)

    logits = jax.jit(conv_initiation_classifier_forward)(x, params)
    logits = jax.block_until_ready(logits)

    assert logits.shape == (B, 1) and logits.dtype == jnp.float32
    assert bool(jnp.all(jnp.isfinite(logits)))
    print("KERNEL_OK")
</pallas_src>

<mosaic_0001>
module attributes {stable_mosaic.version = 11 : i64} {
  func.func @_conv_matmul_stats_kernel(%arg0: i32, %arg1: memref<32x64xbf16, #tpu.memory_space<vmem>>, %arg2: memref<64x896xbf16, #tpu.memory_space<vmem>>, %arg3: memref<32x1xf32, #tpu.memory_space<vmem>>, %arg4: memref<32x1xf32, #tpu.memory_space<vmem>>, %arg5: memref<32x896xf32, #tpu.memory_space<vmem>>, %arg6: memref<32x1xf32, #tpu.memory_space<vmem>>, %arg7: memref<32x1xf32, #tpu.memory_space<vmem>>, %arg8: memref<32x1xf32, #tpu.memory_space<vmem>>, %arg9: memref<32x1xf32, #tpu.memory_space<vmem>>) attributes {dimension_semantics = [#tpu.dimension_semantics<arbitrary>], iteration_bounds = array<i64: 1>, scalar_prefetch = 0 : i64, scratch_operands = 2 : i64, tpu.core_type = #tpu.core_type<tc>, window_params = [{pipeline_mode = #tpu.pipeline_mode<synchronous>, transform_indices = @transform_0, window_bounds = array<i64: 32, 64>}, {transform_indices = @transform_1, window_bounds = array<i64: 64, 896>}, {pipeline_mode = #tpu.pipeline_mode<synchronous>, transform_indices = @transform_2, window_bounds = array<i64: 32, 1>}, {pipeline_mode = #tpu.pipeline_mode<synchronous>, transform_indices = @transform_3, window_bounds = array<i64: 32, 1>}, {transform_indices = @transform_4, window_bounds = array<i64: 32, 896>}, {pipeline_mode = #tpu.pipeline_mode<synchronous>, transform_indices = @transform_5, window_bounds = array<i64: 32, 1>}, {pipeline_mode = #tpu.pipeline_mode<synchronous>, transform_indices = @transform_6, window_bounds = array<i64: 32, 1>}]} {
    %c0_i32 = arith.constant 0 : i32
    %0 = arith.cmpi eq, %arg0, %c0_i32 : i32
    %1 = arith.extui %0 : i1 to i32
    %c0_i32_0 = arith.constant 0 : i32
    %2 = arith.cmpi ne, %1, %c0_i32_0 : i32
    scf.if %2 {
      %cst_19 = arith.constant 0.000000e+00 : f32
      %29 = vector.broadcast %cst_19 : f32 to vector<32x1xf32>
      %c0_20 = arith.constant 0 : index
      %c0_21 = arith.constant 0 : index
      %30 = vector.load %arg8[%c0_20, %c0_21] : memref<32x1xf32, #tpu.memory_space<vmem>>, vector<32x1xf32>
      tpu.vector_store %arg8[%c0_20, %c0_21], %29 {strides = array<i32>} : memref<32x1xf32, #tpu.memory_space<vmem>>, vector<32x1xf32>,
      %cst_22 = arith.constant 0.000000e+00 : f32
      %31 = vector.broadcast %cst_22 : f32 to vector<32x1xf32>
      %c0_23 = arith.constant 0 : index
      %c0_24 = arith.constant 0 : index
      %32 = vector.load %arg9[%c0_23, %c0_24] : memref<32x1xf32, #tpu.memory_space<vmem>>, vector<32x1xf32>
      tpu.vector_store %arg9[%c0_23, %c0_24], %31 {strides = array<i32>} : memref<32x1xf32, #tpu.memory_space<vmem>>, vector<32x1xf32>,
    } else {
    }
    %c0 = arith.constant 0 : index
    %c0_1 = arith.constant 0 : index
    %3 = vector.load %arg1[%c0, %c0_1] : memref<32x64xbf16, #tpu.memory_space<vmem>>, vector<32x64xbf16>
    %c0_2 = arith.constant 0 : index
    %c0_3 = arith.constant 0 : index
    %4 = vector.load %arg2[%c0_2, %c0_3] : memref<64x896xbf16, #tpu.memory_space<vmem>>, vector<64x896xbf16>
    %cst = arith.constant dense<0.000000e+00> : vector<32x896xf32>
    %5 = tpu.matmul %3, %4, %cst {dimension_numbers = #tpu.dot_dimension_numbers<[1], [0], [0], [1], [0, 0, 1, 1], [], []>} : vector<32x64xbf16>, vector<64x896xbf16>, vector<32x896xf32> -> vector<32x896xf32>
    %c0_4 = arith.constant 0 : index
    %c0_5 = arith.constant 0 : index
    %6 = vector.load %arg5[%c0_4, %c0_5] : memref<32x896xf32, #tpu.memory_space<vmem>>, vector<32x896xf32>
    tpu.vector_store %arg5[%c0_4, %c0_5], %5 {strides = array<i32>} : memref<32x896xf32, #tpu.memory_space<vmem>>, vector<32x896xf32>,
    %7 = tpu.iota {dimensions = array<i32: 1>} : vector<32x896xi32>
    %c896_i32 = arith.constant 896 : i32
    %8 = arith.muli %arg0, %c896_i32 : i32
    %9 = vector.broadcast %8 : i32 to vector<32x896xi32>
    %10 = arith.addi %7, %9 : vector<32x896xi32>
    %c800_i32 = arith.constant 800 : i32
    %11 = vector.broadcast %c800_i32 : i32 to vector<32x896xi32>
    %12 = arith.cmpi slt, %10, %11 : vector<32x896xi32>
    %cst_6 = arith.constant 0.000000e+00 : f32
    %13 = vector.broadcast %cst_6 : f32 to vector<32x896xf32>
    %14 = arith.select %12, %5, %13 : vector<32x896xi1>, vector<32x896xf32>
    %c0_7 = arith.constant 0 : index
    %c0_8 = arith.constant 0 : index
    %15 = vector.load %arg8[%c0_7, %c0_8] : memref<32x1xf32, #tpu.memory_space<vmem>>, vector<32x1xf32>
    %cst_9 = arith.constant dense<0.000000e+00> : vector<32xf32>
    %16 = vector.multi_reduction <add>, %14, %cst_9 [1] : vector<32x896xf32> to vector<32xf32>
    %17 = vector.shape_cast %16 : vector<32xf32> to vector<32x1xf32>
    %18 = arith.addf %15, %17 : vector<32x1xf32>
    %c0_10 = arith.constant 0 : index
    %c0_11 = arith.constant 0 : index
    %19 = vector.load %arg8[%c0_10, %c0_11] : memref<32x1xf32, #tpu.memory_space<vmem>>, vector<32x1xf32>
    tpu.vector_store %arg8[%c0_10, %c0_11], %18 {strides = array<i32>} : memref<32x1xf32, #tpu.memory_space<vmem>>, vector<32x1xf32>,
    %c0_12 = arith.constant 0 : index
    %c0_13 = arith.constant 0 : index
    %20 = vector.load %arg9[%c0_12, %c0_13] : memref<32x1xf32, #tpu.memory_space<vmem>>, vector<32x1xf32>
    %21 = arith.mulf %14, %14 : vector<32x896xf32>
    %cst_14 = arith.constant dense<0.000000e+00> : vector<32xf32>
    %22 = vector.multi_reduction <add>, %21, %cst_14 [1] : vector<32x896xf32> to vector<32xf32>
    %23 = vector.shape_cast %22 : vector<32xf32> to vector<32x1xf32>
    %24 = arith.addf %20, %23 : vector<32x1xf32>
    %c0_15 = arith.constant 0 : index
    %c0_16 = arith.constant 0 : index
    %25 = vector.load %arg9[%c0_15, %c0_16] : memref<32x1xf32, #tpu.memory_space<vmem>>, vector<32x1xf32>
    tpu.vector_store %arg9[%c0_15, %c0_16], %24 {strides = array<i32>} : memref<32x1xf32, #tpu.memory_space<vmem>>, vector<32x1xf32>,
    %c0_i32_17 = arith.constant 0 : i32
    %26 = arith.cmpi eq, %arg0, %c0_i32_17 : i32
    %27 = arith.extui %26 : i1 to i32
    %c0_i32_18 = arith.constant 0 : i32
    %28 = arith.cmpi ne, %27, %c0_i32_18 : i32
    scf.if %28 {
      %c0_19 = arith.constant 0 : index
      %c0_20 = arith.constant 0 : index
      %29 = vector.load %arg8[%c0_19, %c0_20] : memref<32x1xf32, #tpu.memory_space<vmem>>, vector<32x1xf32>
      %cst_21 = arith.constant 1.250000e-03 : f32
      %30 = vector.broadcast %cst_21 : f32 to vector<32x1xf32>
      %31 = arith.mulf %29, %30 : vector<32x1xf32>
      %c0_22 = arith.constant 0 : index
      %c0_23 = arith.constant 0 : index
      %32 = vector.load %arg9[%c0_22, %c0_23] : memref<32x1xf32, #tpu.memory_space<vmem>>, vector<32x1xf32>
      %cst_24 = arith.constant 1.250000e-03 : f32
      %33 = vector.broadcast %cst_24 : f32 to vector<32x1xf32>
      %34 = arith.mulf %32, %33 : vector<32x1xf32>
      %35 = arith.mulf %31, %31 : vector<32x1xf32>
      %36 = arith.subf %34, %35 : vector<32x1xf32>
      %cst_25 = arith.constant 0.000000e+00 : f32
      %37 = vector.broadcast %cst_25 : f32 to vector<32x1xf32>
      %38 = arith.maximumf %36, %37 : vector<32x1xf32>
      %c0_26 = arith.constant 0 : index
      %c0_27 = arith.constant 0 : index
      %39 = vector.load %arg3[%c0_26, %c0_27] : memref<32x1xf32, #tpu.memory_space<vmem>>, vector<32x1xf32>
      %cst_28 = arith.constant 9.99999974E-6 : f32
      %40 = vector.broadcast %cst_28 : f32 to vector<32x1xf32>
      %41 = arith.addf %38, %40 : vector<32x1xf32>
      %42 = math.rsqrt %41 : vector<32x1xf32>
      %43 = arith.mulf %39, %42 : vector<32x1xf32>
      %c0_29 = arith.constant 0 : index
      %c0_30 = arith.constant 0 : index
      %44 = vector.load %arg6[%c0_29, %c0_30] : memref<32x1xf32, #tpu.memory_space<vmem>>, vector<32x1xf32>
      tpu.vector_store %arg6[%c0_29, %c0_30], %43 {strides = array<i32>} : memref<32x1xf32, #tpu.memory_space<vmem>>, vector<32x1xf32>,
      %c0_31 = arith.constant 0 : index
      %c0_32 = arith.constant 0 : index
      %45 = vector.load %arg4[%c0_31, %c0_32] : memref<32x1xf32, #tpu.memory_space<vmem>>, vector<32x1xf32>
      %46 = arith.mulf %31, %43 : vector<32x1xf32>
      %47 = arith.subf %45, %46 : vector<32x1xf32>
      %c0_33 = arith.constant 0 : index
      %c0_34 = arith.constant 0 : index
      %48 = vector.load %arg7[%c0_33, %c0_34] : memref<32x1xf32, #tpu.memory_space<vmem>>, vector<32x1xf32>
      tpu.vector_store %arg7[%c0_33, %c0_34], %47 {strides = array<i32>} : memref<32x1xf32, #tpu.memory_space<vmem>>, vector<32x1xf32>,
    } else {
    }
    return
  }
  func.func @transform_0(%arg0: i32) -> (i32, i32) {
    %c0_i32 = arith.constant 0 : i32
    %c0_i32_0 = arith.constant 0 : i32
    %c0_i32_1 = arith.constant 0 : i32
    return %c0_i32, %c0_i32_0 : i32, i32
  }
  func.func @transform_1(%arg0: i32) -> (i32, i32) {
    %c0_i32 = arith.constant 0 : i32
    %c0_i32_0 = arith.constant 0 : i32
    return %c0_i32, %arg0 : i32, i32
  }
  func.func @transform_2(%arg0: i32) -> (i32, i32) {
    %c0_i32 = arith.constant 0 : i32
    %c0_i32_0 = arith.constant 0 : i32
    %c0_i32_1 = arith.constant 0 : i32
    return %c0_i32, %c0_i32_0 : i32, i32
  }
  func.func @transform_3(%arg0: i32) -> (i32, i32) {
    %c0_i32 = arith.constant 0 : i32
    %c0_i32_0 = arith.constant 0 : i32
    %c0_i32_1 = arith.constant 0 : i32
    return %c0_i32, %c0_i32_0 : i32, i32
  }
  func.func @transform_4(%arg0: i32) -> (i32, i32) {
    %c0_i32 = arith.constant 0 : i32
    %c0_i32_0 = arith.constant 0 : i32
    return %c0_i32, %arg0 : i32, i32
  }
  func.func @transform_5(%arg0: i32) -> (i32, i32) {
    %c0_i32 = arith.constant 0 : i32
    %c0_i32_0 = arith.constant 0 : i32
    %c0_i32_1 = arith.constant 0 : i32
    return %c0_i32, %c0_i32_0 : i32, i32
  }
  func.func @transform_6(%arg0: i32) -> (i32, i32) {
    %c0_i32 = arith.constant 0 : i32
    %c0_i32_0 = arith.constant 0 : i32
    %c0_i32_1 = arith.constant 0 : i32
    return %c0_i32, %c0_i32_0 : i32, i32
  }
}

module attributes {stable_mosaic.version = 11 : i64} {
  func.func @_bn_relu_kernel(%arg0: i32, %arg1: memref<32x896xf32, #tpu.memory_space<vmem>>, %arg2: memref<32x1xf32, #tpu.memory_space<vmem>>, %arg3: memref<32x1xf32, #tpu.memory_space<vmem>>, %arg4: memref<32x896xbf16, #tpu.memory_space<vmem>>) attributes {dimension_semantics = [#tpu.dimension_semantics<parallel>], iteration_bounds = array<i64: 1>, scalar_prefetch = 0 : i64, scratch_operands = 0 : i64, tpu.core_type = #tpu.core_type<tc>, window_params = [{transform_indices = @transform_0, window_bounds = array<i64: 32, 896>}, {pipeline_mode = #tpu.pipeline_mode<synchronous>, transform_indices = @transform_1, window_bounds = array<i64: 32, 1>}, {pipeline_mode = #tpu.pipeline_mode<synchronous>, transform_indices = @transform_2, window_bounds = array<i64: 32, 1>}, {transform_indices = @transform_3, window_bounds = array<i64: 32, 896>}]} {
    %c0 = arith.constant 0 : index
    %c0_0 = arith.constant 0 : index
    %0 = vector.load %arg1[%c0, %c0_0] : memref<32x896xf32, #tpu.memory_space<vmem>>, vector<32x896xf32>
    %c0_1 = arith.constant 0 : index
    %c0_2 = arith.constant 0 : index
    %1 = vector.load %arg2[%c0_1, %c0_2] : memref<32x1xf32, #tpu.memory_space<vmem>>, vector<32x1xf32>
    %2 = vector.broadcast %1 : vector<32x1xf32> to vector<32x896xf32>
    %3 = arith.mulf %0, %2 : vector<32x896xf32>
    %c0_3 = arith.constant 0 : index
    %c0_4 = arith.constant 0 : index
    %4 = vector.load %arg3[%c0_3, %c0_4] : memref<32x1xf32, #tpu.memory_space<vmem>>, vector<32x1xf32>
    %5 = vector.broadcast %4 : vector<32x1xf32> to vector<32x896xf32>
    %6 = arith.addf %3, %5 : vector<32x896xf32>
    %cst = arith.constant 0.000000e+00 : f32
    %7 = vector.broadcast %cst : f32 to vector<32x896xf32>
    %8 = arith.maximumf %6, %7 : vector<32x896xf32>
    %9 = arith.truncf %8 : vector<32x896xf32> to vector<32x896xbf16>
    %c0_5 = arith.constant 0 : index
    %c0_6 = arith.constant 0 : index
    %10 = vector.load %arg4[%c0_5, %c0_6] : memref<32x896xbf16, #tpu.memory_space<vmem>>, vector<32x896xbf16>
    tpu.vector_store %arg4[%c0_5, %c0_6], %9 {strides = array<i32>} : memref<32x896xbf16, #tpu.memory_space<vmem>>, vector<32x896xbf16>,
    return
  }
  func.func @transform_0(%arg0: i32) -> (i32, i32) {
    %c0_i32 = arith.constant 0 : i32
    %c0_i32_0 = arith.constant 0 : i32
    return %c0_i32, %arg0 : i32, i32
  }
  func.func @transform_1(%arg0: i32) -> (i32, i32) {
    %c0_i32 = arith.constant 0 : i32
    %c0_i32_0 = arith.constant 0 : i32
    %c0_i32_1 = arith.constant 0 : i32
    return %c0_i32, %c0_i32_0 : i32, i32
  }
  func.func @transform_2(%arg0: i32) -> (i32, i32) {
    %c0_i32 = arith.constant 0 : i32
    %c0_i32_0 = arith.constant 0 : i32
    %c0_i32_1 = arith.constant 0 : i32
    return %c0_i32, %c0_i32_0 : i32, i32
  }
  func.func @transform_3(%arg0: i32) -> (i32, i32) {
    %c0_i32 = arith.constant 0 : i32
    %c0_i32_0 = arith.constant 0 : i32
    return %c0_i32, %arg0 : i32, i32
  }
}

module attributes {stable_mosaic.version = 11 : i64} {
  func.func @_conv_matmul_stats_kernel(%arg0: i32, %arg1: memref<64x512xbf16, #tpu.memory_space<vmem>>, %arg2: memref<512x256xbf16, #tpu.memory_space<vmem>>, %arg3: memref<64x1xf32, #tpu.memory_space<vmem>>, %arg4: memref<64x1xf32, #tpu.memory_space<vmem>>, %arg5: memref<64x256xf32, #tpu.memory_space<vmem>>, %arg6: memref<64x1xf32, #tpu.memory_space<vmem>>, %arg7: memref<64x1xf32, #tpu.memory_space<vmem>>, %arg8: memref<64x1xf32, #tpu.memory_space<vmem>>, %arg9: memref<64x1xf32, #tpu.memory_space<vmem>>) attributes {dimension_semantics = [#tpu.dimension_semantics<arbitrary>], iteration_bounds = array<i64: 1>, scalar_prefetch = 0 : i64, scratch_operands = 2 : i64, tpu.core_type = #tpu.core_type<tc>, window_params = [{pipeline_mode = #tpu.pipeline_mode<synchronous>, transform_indices = @transform_0, window_bounds = array<i64: 64, 512>}, {transform_indices = @transform_1, window_bounds = array<i64: 512, 256>}, {pipeline_mode = #tpu.pipeline_mode<synchronous>, transform_indices = @transform_2, window_bounds = array<i64: 64, 1>}, {pipeline_mode = #tpu.pipeline_mode<synchronous>, transform_indices = @transform_3, window_bounds = array<i64: 64, 1>}, {transform_indices = @transform_4, window_bounds = array<i64: 64, 256>}, {pipeline_mode = #tpu.pipeline_mode<synchronous>, transform_indices = @transform_5, window_bounds = array<i64: 64, 1>}, {pipeline_mode = #tpu.pipeline_mode<synchronous>, transform_indices = @transform_6, window_bounds = array<i64: 64, 1>}]} {
    %c0_i32 = arith.constant 0 : i32
    %0 = arith.cmpi eq, %arg0, %c0_i32 : i32
    %1 = arith.extui %0 : i1 to i32
    %c0_i32_0 = arith.constant 0 : i32
    %2 = arith.cmpi ne, %1, %c0_i32_0 : i32
    scf.if %2 {
      %cst_19 = arith.constant 0.000000e+00 : f32
      %29 = vector.broadcast %cst_19 : f32 to vector<64x1xf32>
      %c0_20 = arith.constant 0 : index
      %c0_21 = arith.constant 0 : index
      %30 = vector.load %arg8[%c0_20, %c0_21] : memref<64x1xf32, #tpu.memory_space<vmem>>, vector<64x1xf32>
      tpu.vector_store %arg8[%c0_20, %c0_21], %29 {strides = array<i32>} : memref<64x1xf32, #tpu.memory_space<vmem>>, vector<64x1xf32>,
      %cst_22 = arith.constant 0.000000e+00 : f32
      %31 = vector.broadcast %cst_22 : f32 to vector<64x1xf32>
      %c0_23 = arith.constant 0 : index
      %c0_24 = arith.constant 0 : index
      %32 = vector.load %arg9[%c0_23, %c0_24] : memref<64x1xf32, #tpu.memory_space<vmem>>, vector<64x1xf32>
      tpu.vector_store %arg9[%c0_23, %c0_24], %31 {strides = array<i32>} : memref<64x1xf32, #tpu.memory_space<vmem>>, vector<64x1xf32>,
    } else {
    }
    %c0 = arith.constant 0 : index
    %c0_1 = arith.constant 0 : index
    %3 = vector.load %arg1[%c0, %c0_1] : memref<64x512xbf16, #tpu.memory_space<vmem>>, vector<64x512xbf16>
    %c0_2 = arith.constant 0 : index
    %c0_3 = arith.constant 0 : index
    %4 = vector.load %arg2[%c0_2, %c0_3] : memref<512x256xbf16, #tpu.memory_space<vmem>>, vector<512x256xbf16>
    %cst = arith.constant dense<0.000000e+00> : vector<64x256xf32>
    %5 = tpu.matmul %3, %4, %cst {dimension_numbers = #tpu.dot_dimension_numbers<[1], [0], [0], [1], [0, 0, 1, 1], [], []>} : vector<64x512xbf16>, vector<512x256xbf16>, vector<64x256xf32> -> vector<64x256xf32>
    %c0_4 = arith.constant 0 : index
    %c0_5 = arith.constant 0 : index
    %6 = vector.load %arg5[%c0_4, %c0_5] : memref<64x256xf32, #tpu.memory_space<vmem>>, vector<64x256xf32>
    tpu.vector_store %arg5[%c0_4, %c0_5], %5 {strides = array<i32>} : memref<64x256xf32, #tpu.memory_space<vmem>>, vector<64x256xf32>,
    %7 = tpu.iota {dimensions = array<i32: 1>} : vector<64x256xi32>
    %c256_i32 = arith.constant 256 : i32
    %8 = arith.muli %arg0, %c256_i32 : i32
    %9 = vector.broadcast %8 : i32 to vector<64x256xi32>
    %10 = arith.addi %7, %9 : vector<64x256xi32>
    %c162_i32 = arith.constant 162 : i32
    %11 = vector.broadcast %c162_i32 : i32 to vector<64x256xi32>
    %12 = arith.cmpi slt, %10, %11 : vector<64x256xi32>
    %cst_6 = arith.constant 0.000000e+00 : f32
    %13 = vector.broadcast %cst_6 : f32 to vector<64x256xf32>
    %14 = arith.select %12, %5, %13 : vector<64x256xi1>, vector<64x256xf32>
    %c0_7 = arith.constant 0 : index
    %c0_8 = arith.constant 0 : index
    %15 = vector.load %arg8[%c0_7, %c0_8] : memref<64x1xf32, #tpu.memory_space<vmem>>, vector<64x1xf32>
    %cst_9 = arith.constant dense<0.000000e+00> : vector<64xf32>
    %16 = vector.multi_reduction <add>, %14, %cst_9 [1] : vector<64x256xf32> to vector<64xf32>
    %17 = vector.shape_cast %16 : vector<64xf32> to vector<64x1xf32>
    %18 = arith.addf %15, %17 : vector<64x1xf32>
    %c0_10 = arith.constant 0 : index
    %c0_11 = arith.constant 0 : index
    %19 = vector.load %arg8[%c0_10, %c0_11] : memref<64x1xf32, #tpu.memory_space<vmem>>, vector<64x1xf32>
    tpu.vector_store %arg8[%c0_10, %c0_11], %18 {strides = array<i32>} : memref<64x1xf32, #tpu.memory_space<vmem>>, vector<64x1xf32>,
    %c0_12 = arith.constant 0 : index
    %c0_13 = arith.constant 0 : index
    %20 = vector.load %arg9[%c0_12, %c0_13] : memref<64x1xf32, #tpu.memory_space<vmem>>, vector<64x1xf32>
    %21 = arith.mulf %14, %14 : vector<64x256xf32>
    %cst_14 = arith.constant dense<0.000000e+00> : vector<64xf32>
    %22 = vector.multi_reduction <add>, %21, %cst_14 [1] : vector<64x256xf32> to vector<64xf32>
    %23 = vector.shape_cast %22 : vector<64xf32> to vector<64x1xf32>
    %24 = arith.addf %20, %23 : vector<64x1xf32>
    %c0_15 = arith.constant 0 : index
    %c0_16 = arith.constant 0 : index
    %25 = vector.load %arg9[%c0_15, %c0_16] : memref<64x1xf32, #tpu.memory_space<vmem>>, vector<64x1xf32>
    tpu.vector_store %arg9[%c0_15, %c0_16], %24 {strides = array<i32>} : memref<64x1xf32, #tpu.memory_space<vmem>>, vector<64x1xf32>,
    %c0_i32_17 = arith.constant 0 : i32
    %26 = arith.cmpi eq, %arg0, %c0_i32_17 : i32
    %27 = arith.extui %26 : i1 to i32
    %c0_i32_18 = arith.constant 0 : i32
    %28 = arith.cmpi ne, %27, %c0_i32_18 : i32
    scf.if %28 {
      %c0_19 = arith.constant 0 : index
      %c0_20 = arith.constant 0 : index
      %29 = vector.load %arg8[%c0_19, %c0_20] : memref<64x1xf32, #tpu.memory_space<vmem>>, vector<64x1xf32>
      %cst_21 = arith.constant 0.00617283955 : f32
      %30 = vector.broadcast %cst_21 : f32 to vector<64x1xf32>
      %31 = arith.mulf %29, %30 : vector<64x1xf32>
      %c0_22 = arith.constant 0 : index
      %c0_23 = arith.constant 0 : index
      %32 = vector.load %arg9[%c0_22, %c0_23] : memref<64x1xf32, #tpu.memory_space<vmem>>, vector<64x1xf32>
      %cst_24 = arith.constant 0.00617283955 : f32
      %33 = vector.broadcast %cst_24 : f32 to vector<64x1xf32>
      %34 = arith.mulf %32, %33 : vector<64x1xf32>
      %35 = arith.mulf %31, %31 : vector<64x1xf32>
      %36 = arith.subf %34, %35 : vector<64x1xf32>
      %cst_25 = arith.constant 0.000000e+00 : f32
      %37 = vector.broadcast %cst_25 : f32 to vector<64x1xf32>
      %38 = arith.maximumf %36, %37 : vector<64x1xf32>
      %c0_26 = arith.constant 0 : index
      %c0_27 = arith.constant 0 : index
      %39 = vector.load %arg3[%c0_26, %c0_27] : memref<64x1xf32, #tpu.memory_space<vmem>>, vector<64x1xf32>
      %cst_28 = arith.constant 9.99999974E-6 : f32
      %40 = vector.broadcast %cst_28 : f32 to vector<64x1xf32>
      %41 = arith.addf %38, %40 : vector<64x1xf32>
      %42 = math.rsqrt %41 : vector<64x1xf32>
      %43 = arith.mulf %39, %42 : vector<64x1xf32>
      %c0_29 = arith.constant 0 : index
      %c0_30 = arith.constant 0 : index
      %44 = vector.load %arg6[%c0_29, %c0_30] : memref<64x1xf32, #tpu.memory_space<vmem>>, vector<64x1xf32>
      tpu.vector_store %arg6[%c0_29, %c0_30], %43 {strides = array<i32>} : memref<64x1xf32, #tpu.memory_space<vmem>>, vector<64x1xf32>,
      %c0_31 = arith.constant 0 : index
      %c0_32 = arith.constant 0 : index
      %45 = vector.load %arg4[%c0_31, %c0_32] : memref<64x1xf32, #tpu.memory_space<vmem>>, vector<64x1xf32>
      %46 = arith.mulf %31, %43 : vector<64x1xf32>
      %47 = arith.subf %45, %46 : vector<64x1xf32>
      %c0_33 = arith.constant 0 : index
      %c0_34 = arith.constant 0 : index
      %48 = vector.load %arg7[%c0_33, %c0_34] : memref<64x1xf32, #tpu.memory_space<vmem>>, vector<64x1xf32>
      tpu.vector_store %arg7[%c0_33, %c0_34], %47 {strides = array<i32>} : memref<64x1xf32, #tpu.memory_space<vmem>>, vector<64x1xf32>,
    } else {
    }
    return
  }
  func.func @transform_0(%arg0: i32) -> (i32, i32) {
    %c0_i32 = arith.constant 0 : i32
    %c0_i32_0 = arith.constant 0 : i32
    %c0_i32_1 = arith.constant 0 : i32
    return %c0_i32, %c0_i32_0 : i32, i32
  }
  func.func @transform_1(%arg0: i32) -> (i32, i32) {
    %c0_i32 = arith.constant 0 : i32
    %c0_i32_0 = arith.constant 0 : i32
    return %c0_i32, %arg0 : i32, i32
  }
  func.func @transform_2(%arg0: i32) -> (i32, i32) {
    %c0_i32 = arith.constant 0 : i32
    %c0_i32_0 = arith.constant 0 : i32
    %c0_i32_1 = arith.constant 0 : i32
    return %c0_i32, %c0_i32_0 : i32, i32
  }
  func.func @transform_3(%arg0: i32) -> (i32, i32) {
    %c0_i32 = arith.constant 0 : i32
    %c0_i32_0 = arith.constant 0 : i32
    %c0_i32_1 = arith.constant 0 : i32
    return %c0_i32, %c0_i32_0 : i32, i32
  }
  func.func @transform_4(%arg0: i32) -> (i32, i32) {
    %c0_i32 = arith.constant 0 : i32
    %c0_i32_0 = arith.constant 0 : i32
    return %c0_i32, %arg0 : i32, i32
  }
  func.func @transform_5(%arg0: i32) -> (i32, i32) {
    %c0_i32 = arith.constant 0 : i32
    %c0_i32_0 = arith.constant 0 : i32
    %c0_i32_1 = arith.constant 0 : i32
    return %c0_i32, %c0_i32_0 : i32, i32
  }
  func.func @transform_6(%arg0: i32) -> (i32, i32) {
    %c0_i32 = arith.constant 0 : i32
    %c0_i32_0 = arith.constant 0 : i32
    %c0_i32_1 = arith.constant 0 : i32
    return %c0_i32, %c0_i32_0 : i32, i32
  }
}

module attributes {stable_mosaic.version = 11 : i64} {
  func.func @_bn_relu_kernel(%arg0: i32, %arg1: memref<64x256xf32, #tpu.memory_space<vmem>>, %arg2: memref<64x1xf32, #tpu.memory_space<vmem>>, %arg3: memref<64x1xf32, #tpu.memory_space<vmem>>, %arg4: memref<64x256xbf16, #tpu.memory_space<vmem>>) attributes {dimension_semantics = [#tpu.dimension_semantics<parallel>], iteration_bounds = array<i64: 1>, scalar_prefetch = 0 : i64, scratch_operands = 0 : i64, tpu.core_type = #tpu.core_type<tc>, window_params = [{transform_indices = @transform_0, window_bounds = array<i64: 64, 256>}, {pipeline_mode = #tpu.pipeline_mode<synchronous>, transform_indices = @transform_1, window_bounds = array<i64: 64, 1>}, {pipeline_mode = #tpu.pipeline_mode<synchronous>, transform_indices = @transform_2, window_bounds = array<i64: 64, 1>}, {transform_indices = @transform_3, window_bounds = array<i64: 64, 256>}]} {
    %c0 = arith.constant 0 : index
    %c0_0 = arith.constant 0 : index
    %0 = vector.load %arg1[%c0, %c0_0] : memref<64x256xf32, #tpu.memory_space<vmem>>, vector<64x256xf32>
    %c0_1 = arith.constant 0 : index
    %c0_2 = arith.constant 0 : index
    %1 = vector.load %arg2[%c0_1, %c0_2] : memref<64x1xf32, #tpu.memory_space<vmem>>, vector<64x1xf32>
    %2 = vector.broadcast %1 : vector<64x1xf32> to vector<64x256xf32>
    %3 = arith.mulf %0, %2 : vector<64x256xf32>
    %c0_3 = arith.constant 0 : index
    %c0_4 = arith.constant 0 : index
    %4 = vector.load %arg3[%c0_3, %c0_4] : memref<64x1xf32, #tpu.memory_space<vmem>>, vector<64x1xf32>
    %5 = vector.broadcast %4 : vector<64x1xf32> to vector<64x256xf32>
    %6 = arith.addf %3, %5 : vector<64x256xf32>
    %cst = arith.constant 0.000000e+00 : f32
    %7 = vector.broadcast %cst : f32 to vector<64x256xf32>
    %8 = arith.maximumf %6, %7 : vector<64x256xf32>
    %9 = arith.truncf %8 : vector<64x256xf32> to vector<64x256xbf16>
    %c0_5 = arith.constant 0 : index
    %c0_6 = arith.constant 0 : index
    %10 = vector.load %arg4[%c0_5, %c0_6] : memref<64x256xbf16, #tpu.memory_space<vmem>>, vector<64x256xbf16>
    tpu.vector_store %arg4[%c0_5, %c0_6], %9 {strides = array<i32>} : memref<64x256xbf16, #tpu.memory_space<vmem>>, vector<64x256xbf16>,
    return
  }
  func.func @transform_0(%arg0: i32) -> (i32, i32) {
    %c0_i32 = arith.constant 0 : i32
    %c0_i32_0 = arith.constant 0 : i32
    return %c0_i32, %arg0 : i32, i32
  }
  func.func @transform_1(%arg0: i32) -> (i32, i32) {
    %c0_i32 = arith.constant 0 : i32
    %c0_i32_0 = arith.constant 0 : i32
    %c0_i32_1 = arith.constant 0 : i32
    return %c0_i32, %c0_i32_0 : i32, i32
  }
  func.func @transform_2(%arg0: i32) -> (i32, i32) {
    %c0_i32 = arith.constant 0 : i32
    %c0_i32_0 = arith.constant 0 : i32
    %c0_i32_1 = arith.constant 0 : i32
    return %c0_i32, %c0_i32_0 : i32, i32
  }
  func.func @transform_3(%arg0: i32) -> (i32, i32) {
    %c0_i32 = arith.constant 0 : i32
    %c0_i32_0 = arith.constant 0 : i32
    return %c0_i32, %arg0 : i32, i32
  }
}

module attributes {stable_mosaic.version = 11 : i64} {
  func.func @_bn_relu_kernel(%arg0: i32, %arg1: memref<64x128xf32, #tpu.memory_space<vmem>>, %arg2: memref<64x1xf32, #tpu.memory_space<vmem>>, %arg3: memref<64x1xf32, #tpu.memory_space<vmem>>, %arg4: memref<64x128xbf16, #tpu.memory_space<vmem>>) attributes {dimension_semantics = [#tpu.dimension_semantics<parallel>], iteration_bounds = array<i64: 1>, scalar_prefetch = 0 : i64, scratch_operands = 0 : i64, tpu.core_type = #tpu.core_type<tc>, window_params = [{transform_indices = @transform_0, window_bounds = array<i64: 64, 128>}, {pipeline_mode = #tpu.pipeline_mode<synchronous>, transform_indices = @transform_1, window_bounds = array<i64: 64, 1>}, {pipeline_mode = #tpu.pipeline_mode<synchronous>, transform_indices = @transform_2, window_bounds = array<i64: 64, 1>}, {transform_indices = @transform_3, window_bounds = array<i64: 64, 128>}]} {
    %c0 = arith.constant 0 : index
    %c0_0 = arith.constant 0 : index
    %0 = vector.load %arg1[%c0, %c0_0] : memref<64x128xf32, #tpu.memory_space<vmem>>, vector<64x128xf32>
    %c0_1 = arith.constant 0 : index
    %c0_2 = arith.constant 0 : index
    %1 = vector.load %arg2[%c0_1, %c0_2] : memref<64x1xf32, #tpu.memory_space<vmem>>, vector<64x1xf32>
    %2 = vector.broadcast %1 : vector<64x1xf32> to vector<64x128xf32>
    %3 = arith.mulf %0, %2 : vector<64x128xf32>
    %c0_3 = arith.constant 0 : index
    %c0_4 = arith.constant 0 : index
    %4 = vector.load %arg3[%c0_3, %c0_4] : memref<64x1xf32, #tpu.memory_space<vmem>>, vector<64x1xf32>
    %5 = vector.broadcast %4 : vector<64x1xf32> to vector<64x128xf32>
    %6 = arith.addf %3, %5 : vector<64x128xf32>
    %cst = arith.constant 0.000000e+00 : f32
    %7 = vector.broadcast %cst : f32 to vector<64x128xf32>
    %8 = arith.maximumf %6, %7 : vector<64x128xf32>
    %9 = arith.truncf %8 : vector<64x128xf32> to vector<64x128xbf16>
    %c0_5 = arith.constant 0 : index
    %c0_6 = arith.constant 0 : index
    %10 = vector.load %arg4[%c0_5, %c0_6] : memref<64x128xbf16, #tpu.memory_space<vmem>>, vector<64x128xbf16>
    tpu.vector_store %arg4[%c0_5, %c0_6], %9 {strides = array<i32>} : memref<64x128xbf16, #tpu.memory_space<vmem>>, vector<64x128xbf16>,
    return
  }
  func.func @transform_0(%arg0: i32) -> (i32, i32) {
    %c0_i32 = arith.constant 0 : i32
    %c0_i32_0 = arith.constant 0 : i32
    return %c0_i32, %arg0 : i32, i32
  }
  func.func @transform_1(%arg0: i32) -> (i32, i32) {
    %c0_i32 = arith.constant 0 : i32
    %c0_i32_0 = arith.constant 0 : i32
    %c0_i32_1 = arith.constant 0 : i32
    return %c0_i32, %c0_i32_0 : i32, i32
  }
  func.func @transform_2(%arg0: i32) -> (i32, i32) {
    %c0_i32 = arith.constant 0 : i32
    %c0_i32_0 = arith.constant 0 : i32
    %c0_i32_1 = arith.constant 0 : i32
    return %c0_i32, %c0_i32_0 : i32, i32
  }
  func.func @transform_3(%arg0: i32) -> (i32, i32) {
    %c0_i32 = arith.constant 0 : i32
    %c0_i32_0 = arith.constant 0 : i32
    return %c0_i32, %arg0 : i32, i32
  }
}

module attributes {stable_mosaic.version = 11 : i64} {
  func.func @_conv_matmul_stats_kernel(%arg0: i32, %arg1: memref<64x576xbf16, #tpu.memory_space<vmem>>, %arg2: memref<576x128xbf16, #tpu.memory_space<vmem>>, %arg3: memref<64x1xf32, #tpu.memory_space<vmem>>, %arg4: memref<64x1xf32, #tpu.memory_space<vmem>>, %arg5: memref<64x128xf32, #tpu.memory_space<vmem>>, %arg6: memref<64x1xf32, #tpu.memory_space<vmem>>, %arg7: memref<64x1xf32, #tpu.memory_space<vmem>>, %arg8: memref<64x1xf32, #tpu.memory_space<vmem>>, %arg9: memref<64x1xf32, #tpu.memory_space<vmem>>) attributes {dimension_semantics = [#tpu.dimension_semantics<arbitrary>], iteration_bounds = array<i64: 1>, scalar_prefetch = 0 : i64, scratch_operands = 2 : i64, tpu.core_type = #tpu.core_type<tc>, window_params = [{pipeline_mode = #tpu.pipeline_mode<synchronous>, transform_indices = @transform_0, window_bounds = array<i64: 64, 576>}, {transform_indices = @transform_1, window_bounds = array<i64: 576, 128>}, {pipeline_mode = #tpu.pipeline_mode<synchronous>, transform_indices = @transform_2, window_bounds = array<i64: 64, 1>}, {pipeline_mode = #tpu.pipeline_mode<synchronous>, transform_indices = @transform_3, window_bounds = array<i64: 64, 1>}, {transform_indices = @transform_4, window_bounds = array<i64: 64, 128>}, {pipeline_mode = #tpu.pipeline_mode<synchronous>, transform_indices = @transform_5, window_bounds = array<i64: 64, 1>}, {pipeline_mode = #tpu.pipeline_mode<synchronous>, transform_indices = @transform_6, window_bounds = array<i64: 64, 1>}]} {
    %c0_i32 = arith.constant 0 : i32
    %0 = arith.cmpi eq, %arg0, %c0_i32 : i32
    %1 = arith.extui %0 : i1 to i32
    %c0_i32_0 = arith.constant 0 : i32
    %2 = arith.cmpi ne, %1, %c0_i32_0 : i32
    scf.if %2 {
      %cst_19 = arith.constant 0.000000e+00 : f32
      %29 = vector.broadcast %cst_19 : f32 to vector<64x1xf32>
      %c0_20 = arith.constant 0 : index
      %c0_21 = arith.constant 0 : index
      %30 = vector.load %arg8[%c0_20, %c0_21] : memref<64x1xf32, #tpu.memory_space<vmem>>, vector<64x1xf32>
      tpu.vector_store %arg8[%c0_20, %c0_21], %29 {strides = array<i32>} : memref<64x1xf32, #tpu.memory_space<vmem>>, vector<64x1xf32>,
      %cst_22 = arith.constant 0.000000e+00 : f32
      %31 = vector.broadcast %cst_22 : f32 to vector<64x1xf32>
      %c0_23 = arith.constant 0 : index
      %c0_24 = arith.constant 0 : index
      %32 = vector.load %arg9[%c0_23, %c0_24] : memref<64x1xf32, #tpu.memory_space<vmem>>, vector<64x1xf32>
      tpu.vector_store %arg9[%c0_23, %c0_24], %31 {strides = array<i32>} : memref<64x1xf32, #tpu.memory_space<vmem>>, vector<64x1xf32>,
    } else {
    }
    %c0 = arith.constant 0 : index
    %c0_1 = arith.constant 0 : index
    %3 = vector.load %arg1[%c0, %c0_1] : memref<64x576xbf16, #tpu.memory_space<vmem>>, vector<64x576xbf16>
    %c0_2 = arith.constant 0 : index
    %c0_3 = arith.constant 0 : index
    %4 = vector.load %arg2[%c0_2, %c0_3] : memref<576x128xbf16, #tpu.memory_space<vmem>>, vector<576x128xbf16>
    %cst = arith.constant dense<0.000000e+00> : vector<64x128xf32>
    %5 = tpu.matmul %3, %4, %cst {dimension_numbers = #tpu.dot_dimension_numbers<[1], [0], [0], [1], [0, 0, 1, 1], [], []>} : vector<64x576xbf16>, vector<576x128xbf16>, vector<64x128xf32> -> vector<64x128xf32>
    %c0_4 = arith.constant 0 : index
    %c0_5 = arith.constant 0 : index
    %6 = vector.load %arg5[%c0_4, %c0_5] : memref<64x128xf32, #tpu.memory_space<vmem>>, vector<64x128xf32>
    tpu.vector_store %arg5[%c0_4, %c0_5], %5 {strides = array<i32>} : memref<64x128xf32, #tpu.memory_space<vmem>>, vector<64x128xf32>,
    %7 = tpu.iota {dimensions = array<i32: 1>} : vector<64x128xi32>
    %c128_i32 = arith.constant 128 : i32
    %8 = arith.muli %arg0, %c128_i32 : i32
    %9 = vector.broadcast %8 : i32 to vector<64x128xi32>
    %10 = arith.addi %7, %9 : vector<64x128xi32>
    %c98_i32 = arith.constant 98 : i32
    %11 = vector.broadcast %c98_i32 : i32 to vector<64x128xi32>
    %12 = arith.cmpi slt, %10, %11 : vector<64x128xi32>
    %cst_6 = arith.constant 0.000000e+00 : f32
    %13 = vector.broadcast %cst_6 : f32 to vector<64x128xf32>
    %14 = arith.select %12, %5, %13 : vector<64x128xi1>, vector<64x128xf32>
    %c0_7 = arith.constant 0 : index
    %c0_8 = arith.constant 0 : index
    %15 = vector.load %arg8[%c0_7, %c0_8] : memref<64x1xf32, #tpu.memory_space<vmem>>, vector<64x1xf32>
    %cst_9 = arith.constant dense<0.000000e+00> : vector<64xf32>
    %16 = vector.multi_reduction <add>, %14, %cst_9 [1] : vector<64x128xf32> to vector<64xf32>
    %17 = vector.shape_cast %16 : vector<64xf32> to vector<64x1xf32>
    %18 = arith.addf %15, %17 : vector<64x1xf32>
    %c0_10 = arith.constant 0 : index
    %c0_11 = arith.constant 0 : index
    %19 = vector.load %arg8[%c0_10, %c0_11] : memref<64x1xf32, #tpu.memory_space<vmem>>, vector<64x1xf32>
    tpu.vector_store %arg8[%c0_10, %c0_11], %18 {strides = array<i32>} : memref<64x1xf32, #tpu.memory_space<vmem>>, vector<64x1xf32>,
    %c0_12 = arith.constant 0 : index
    %c0_13 = arith.constant 0 : index
    %20 = vector.load %arg9[%c0_12, %c0_13] : memref<64x1xf32, #tpu.memory_space<vmem>>, vector<64x1xf32>
    %21 = arith.mulf %14, %14 : vector<64x128xf32>
    %cst_14 = arith.constant dense<0.000000e+00> : vector<64xf32>
    %22 = vector.multi_reduction <add>, %21, %cst_14 [1] : vector<64x128xf32> to vector<64xf32>
    %23 = vector.shape_cast %22 : vector<64xf32> to vector<64x1xf32>
    %24 = arith.addf %20, %23 : vector<64x1xf32>
    %c0_15 = arith.constant 0 : index
    %c0_16 = arith.constant 0 : index
    %25 = vector.load %arg9[%c0_15, %c0_16] : memref<64x1xf32, #tpu.memory_space<vmem>>, vector<64x1xf32>
    tpu.vector_store %arg9[%c0_15, %c0_16], %24 {strides = array<i32>} : memref<64x1xf32, #tpu.memory_space<vmem>>, vector<64x1xf32>,
    %c0_i32_17 = arith.constant 0 : i32
    %26 = arith.cmpi eq, %arg0, %c0_i32_17 : i32
    %27 = arith.extui %26 : i1 to i32
    %c0_i32_18 = arith.constant 0 : i32
    %28 = arith.cmpi ne, %27, %c0_i32_18 : i32
    scf.if %28 {
      %c0_19 = arith.constant 0 : index
      %c0_20 = arith.constant 0 : index
      %29 = vector.load %arg8[%c0_19, %c0_20] : memref<64x1xf32, #tpu.memory_space<vmem>>, vector<64x1xf32>
      %cst_21 = arith.constant 0.0102040814 : f32
      %30 = vector.broadcast %cst_21 : f32 to vector<64x1xf32>
      %31 = arith.mulf %29, %30 : vector<64x1xf32>
      %c0_22 = arith.constant 0 : index
      %c0_23 = arith.constant 0 : index
      %32 = vector.load %arg9[%c0_22, %c0_23] : memref<64x1xf32, #tpu.memory_space<vmem>>, vector<64x1xf32>
      %cst_24 = arith.constant 0.0102040814 : f32
      %33 = vector.broadcast %cst_24 : f32 to vector<64x1xf32>
      %34 = arith.mulf %32, %33 : vector<64x1xf32>
      %35 = arith.mulf %31, %31 : vector<64x1xf32>
      %36 = arith.subf %34, %35 : vector<64x1xf32>
      %cst_25 = arith.constant 0.000000e+00 : f32
      %37 = vector.broadcast %cst_25 : f32 to vector<64x1xf32>
      %38 = arith.maximumf %36, %37 : vector<64x1xf32>
      %c0_26 = arith.constant 0 : index
      %c0_27 = arith.constant 0 : index
      %39 = vector.load %arg3[%c0_26, %c0_27] : memref<64x1xf32, #tpu.memory_space<vmem>>, vector<64x1xf32>
      %cst_28 = arith.constant 9.99999974E-6 : f32
      %40 = vector.broadcast %cst_28 : f32 to vector<64x1xf32>
      %41 = arith.addf %38, %40 : vector<64x1xf32>
      %42 = math.rsqrt %41 : vector<64x1xf32>
      %43 = arith.mulf %39, %42 : vector<64x1xf32>
      %c0_29 = arith.constant 0 : index
      %c0_30 = arith.constant 0 : index
      %44 = vector.load %arg6[%c0_29, %c0_30] : memref<64x1xf32, #tpu.memory_space<vmem>>, vector<64x1xf32>
      tpu.vector_store %arg6[%c0_29, %c0_30], %43 {strides = array<i32>} : memref<64x1xf32, #tpu.memory_space<vmem>>, vector<64x1xf32>,
      %c0_31 = arith.constant 0 : index
      %c0_32 = arith.constant 0 : index
      %45 = vector.load %arg4[%c0_31, %c0_32] : memref<64x1xf32, #tpu.memory_space<vmem>>, vector<64x1xf32>
      %46 = arith.mulf %31, %43 : vector<64x1xf32>
      %47 = arith.subf %45, %46 : vector<64x1xf32>
      %c0_33 = arith.constant 0 : index
      %c0_34 = arith.constant 0 : index
      %48 = vector.load %arg7[%c0_33, %c0_34] : memref<64x1xf32, #tpu.memory_space<vmem>>, vector<64x1xf32>
      tpu.vector_store %arg7[%c0_33, %c0_34], %47 {strides = array<i32>} : memref<64x1xf32, #tpu.memory_space<vmem>>, vector<64x1xf32>,
    } else {
    }
    return
  }
  func.func @transform_0(%arg0: i32) -> (i32, i32) {
    %c0_i32 = arith.constant 0 : i32
    %c0_i32_0 = arith.constant 0 : i32
    %c0_i32_1 = arith.constant 0 : i32
    return %c0_i32, %c0_i32_0 : i32, i32
  }
  func.func @transform_1(%arg0: i32) -> (i32, i32) {
    %c0_i32 = arith.constant 0 : i32
    %c0_i32_0 = arith.constant 0 : i32
    return %c0_i32, %arg0 : i32, i32
  }
  func.func @transform_2(%arg0: i32) -> (i32, i32) {
    %c0_i32 = arith.constant 0 : i32
    %c0_i32_0 = arith.constant 0 : i32
    %c0_i32_1 = arith.constant 0 : i32
    return %c0_i32, %c0_i32_0 : i32, i32
  }
  func.func @transform_3(%arg0: i32) -> (i32, i32) {
    %c0_i32 = arith.constant 0 : i32
    %c0_i32_0 = arith.constant 0 : i32
    %c0_i32_1 = arith.constant 0 : i32
    return %c0_i32, %c0_i32_0 : i32, i32
  }
  func.func @transform_4(%arg0: i32) -> (i32, i32) {
    %c0_i32 = arith.constant 0 : i32
    %c0_i32_0 = arith.constant 0 : i32
    return %c0_i32, %arg0 : i32, i32
  }
  func.func @transform_5(%arg0: i32) -> (i32, i32) {
    %c0_i32 = arith.constant 0 : i32
    %c0_i32_0 = arith.constant 0 : i32
    %c0_i32_1 = arith.constant 0 : i32
    return %c0_i32, %c0_i32_0 : i32, i32
  }
  func.func @transform_6(%arg0: i32) -> (i32, i32) {
    %c0_i32 = arith.constant 0 : i32
    %c0_i32_0 = arith.constant 0 : i32
    %c0_i32_1 = arith.constant 0 : i32
    return %c0_i32, %c0_i32_0 : i32, i32
  }
}

module attributes {stable_mosaic.version = 11 : i64} {
  func.func @_mlp_head_kernel(%arg0: i32, %arg1: memref<8x3136xbf16, #tpu.memory_space<vmem>>, %arg2: memref<3136x512xbf16, #tpu.memory_space<vmem>>, %arg3: memref<1x512xf32, #tpu.memory_space<vmem>>, %arg4: memref<512x1xf32, #tpu.memory_space<vmem>>, %arg5: memref<1x1xf32, #tpu.memory_space<vmem>>, %arg6: memref<8x1xf32, #tpu.memory_space<vmem>>) attributes {dimension_semantics = [#tpu.dimension_semantics<parallel>], iteration_bounds = array<i64: 1>, scalar_prefetch = 0 : i64, scratch_operands = 0 : i64, tpu.core_type = #tpu.core_type<tc>, window_params = [{transform_indices = @transform_0, window_bounds = array<i64: 8, 3136>}, {pipeline_mode = #tpu.pipeline_mode<synchronous>, transform_indices = @transform_1, window_bounds = array<i64: 3136, 512>}, {pipeline_mode = #tpu.pipeline_mode<synchronous>, transform_indices = @transform_2, window_bounds = array<i64: 1, 512>}, {pipeline_mode = #tpu.pipeline_mode<synchronous>, transform_indices = @transform_3, window_bounds = array<i64: 512, 1>}, {pipeline_mode = #tpu.pipeline_mode<synchronous>, transform_indices = @transform_4, window_bounds = array<i64: 1, 1>}, {transform_indices = @transform_5, window_bounds = array<i64: 8, 1>}]} {
    %c0 = arith.constant 0 : index
    %c0_0 = arith.constant 0 : index
    %0 = vector.load %arg1[%c0, %c0_0] : memref<8x3136xbf16, #tpu.memory_space<vmem>>, vector<8x3136xbf16>
    %c0_1 = arith.constant 0 : index
    %c0_2 = arith.constant 0 : index
    %1 = vector.load %arg2[%c0_1, %c0_2] : memref<3136x512xbf16, #tpu.memory_space<vmem>>, vector<3136x512xbf16>
    %cst = arith.constant dense<0.000000e+00> : vector<8x512xf32>
    %2 = tpu.matmul %0, %1, %cst {dimension_numbers = #tpu.dot_dimension_numbers<[1], [0], [0], [1], [0, 0, 1, 1], [], []>} : vector<8x3136xbf16>, vector<3136x512xbf16>, vector<8x512xf32> -> vector<8x512xf32>
    %c0_3 = arith.constant 0 : index
    %c0_4 = arith.constant 0 : index
    %3 = vector.load %arg3[%c0_3, %c0_4] : memref<1x512xf32, #tpu.memory_space<vmem>>, vector<1x512xf32>
    %4 = vector.broadcast %3 : vector<1x512xf32> to vector<8x512xf32>
    %5 = arith.addf %2, %4 : vector<8x512xf32>
    %cst_5 = arith.constant 0.000000e+00 : f32
    %6 = vector.broadcast %cst_5 : f32 to vector<8x512xf32>
    %7 = arith.maximumf %5, %6 : vector<8x512xf32>
    %c0_6 = arith.constant 0 : index
    %c0_7 = arith.constant 0 : index
    %8 = vector.load %arg4[%c0_6, %c0_7] : memref<512x1xf32, #tpu.memory_space<vmem>>, vector<512x1xf32>
    %cst_8 = arith.constant dense<0.000000e+00> : vector<8x1xf32>
    %9 = tpu.matmul %7, %8, %cst_8 {dimension_numbers = #tpu.dot_dimension_numbers<[1], [0], [0], [1], [0, 0, 1, 1], [], []>} : vector<8x512xf32>, vector<512x1xf32>, vector<8x1xf32> -> vector<8x1xf32>
    %c0_9 = arith.constant 0 : index
    %c0_10 = arith.constant 0 : index
    %10 = vector.load %arg5[%c0_9, %c0_10] : memref<1x1xf32, #tpu.memory_space<vmem>>, vector<1x1xf32>
    %11 = vector.broadcast %10 : vector<1x1xf32> to vector<8x1xf32>
    %12 = arith.addf %9, %11 : vector<8x1xf32>
    %c0_11 = arith.constant 0 : index
    %c0_12 = arith.constant 0 : index
    %13 = vector.load %arg6[%c0_11, %c0_12] : memref<8x1xf32, #tpu.memory_space<vmem>>, vector<8x1xf32>
    tpu.vector_store %arg6[%c0_11, %c0_12], %12 {strides = array<i32>} : memref<8x1xf32, #tpu.memory_space<vmem>>, vector<8x1xf32>,
    return
  }
  func.func @transform_0(%arg0: i32) -> (i32, i32) {
    %c0_i32 = arith.constant 0 : i32
    %c0_i32_0 = arith.constant 0 : i32
    return %arg0, %c0_i32 : i32, i32
  }
  func.func @transform_1(%arg0: i32) -> (i32, i32) {
    %c0_i32 = arith.constant 0 : i32
    %c0_i32_0 = arith.constant 0 : i32
    %c0_i32_1 = arith.constant 0 : i32
    return %c0_i32, %c0_i32_0 : i32, i32
  }
  func.func @transform_2(%arg0: i32) -> (i32, i32) {
    %c0_i32 = arith.constant 0 : i32
    %c0_i32_0 = arith.constant 0 : i32
    %c0_i32_1 = arith.constant 0 : i32
    return %c0_i32, %c0_i32_0 : i32, i32
  }
  func.func @transform_3(%arg0: i32) -> (i32, i32) {
    %c0_i32 = arith.constant 0 : i32
    %c0_i32_0 = arith.constant 0 : i32
    %c0_i32_1 = arith.constant 0 : i32
    return %c0_i32, %c0_i32_0 : i32, i32
  }
  func.func @transform_4(%arg0: i32) -> (i32, i32) {
    %c0_i32 = arith.constant 0 : i32
    %c0_i32_0 = arith.constant 0 : i32
    %c0_i32_1 = arith.constant 0 : i32
    return %c0_i32, %c0_i32_0 : i32, i32
  }
  func.func @transform_5(%arg0: i32) -> (i32, i32) {
    %c0_i32 = arith.constant 0 : i32
    %c0_i32_0 = arith.constant 0 : i32
    return %arg0, %c0_i32 : i32, i32
  }
}

</mosaic_0001>

<bundles_post_ra>
// kernel: conv_initiation_classifier_forward.8
= control target key start
LH: loop header
LB: loop body
LE: loop exit
PB: predicated region body
PF: predicated region fallthrough
CT: control target
= control target key end

     0   :  { %v317_v0 = vmov 0   ;;  %s518_s1 = inlined_call_operand.vmem [shape: f32[32,1], index: 1, kind: input, shape index: {}]   ;;  %s519_s2 = inlined_call_operand.vmem [shape: f32[32,1], index: 2, kind: input, shape index: {}]   ;;  %s520_s0 = inlined_call_operand.vmem [shape: f32[32,800], index: 0, kind: input, shape index: {}]   ;;  %s521_s3 = inlined_call_operand.vmem [shape: bf16[32,800], index: 3, kind: output, shape index: {}]  }
   0x1   :  { %316 = vset.pattern.permute.xlu1 %v317_v0  ;;  %315 = vset.pattern.permute.xlu0 %v317_v0  ;;  %v44_v1 = vld [vmem:[%s518_s1 + $0x10] sm:$0xff]  ;;  %v42_v2 = vld [vmem:[%s518_s1] sm:$0xff]  ;;  %v45_v3 = vld [vmem:[%s518_s1 + $0x18] sm:$0xff] }
   0x2   :  { %58 = vperm.xlu1 %316, %v44_v1   ;;  %48 = vperm.xlu0 %315, %v42_v2   ;;  %v43_v4 = vld [vmem:[%s518_s1 + $0x8] sm:$0xff]  ;;  %v94_v6 = vld [vmem:[%s519_s2] sm:$0xff]  ;;  %v97_v7 = vld [vmem:[%s519_s2 + $0x18] sm:$0xff] }
   0x3   :  { %v95_v5 = vld [vmem:[%s519_s2 + $0x8] sm:$0xff]  ;;  %v96_v8 = vld [vmem:[%s519_s2 + $0x10] sm:$0xff]  ;;  %v14_v9 = vld [vmem:[%s520_s0] sm:$0xff] }
   0x4   :  { %v15_v10 = vld [vmem:[%s520_s0 + $0x8] sm:$0xff]  ;;  %v16_v11 = vld [vmem:[%s520_s0 + $0x10] sm:$0xff]  ;;  %v17_v12 = vld [vmem:[%s520_s0 + $0x18] sm:$0xff] }
   0x5   :  { %v18_v13 = vld [vmem:[%s520_s0 + $0x20] sm:$0xff]  ;;  %v19_v14 = vld [vmem:[%s520_s0 + $0x28] sm:$0xff]  ;;  %v20_v15 = vld [vmem:[%s520_s0 + $0x30] sm:$0xff] }
   0x6   :  { %63 = vperm.xlu1 %316, %v45_v3   ;;  %53 = vperm.xlu0 %315, %v43_v4   ;;  %v21_v18 = vld [vmem:[%s520_s0 + $0x38] sm:$0xff]  ;;  %v22_v19 = vld [vmem:[%s520_s0 + $0x40] sm:$0xff]  ;;  %v28_v20 = vld [vmem:[%s520_s0 + $0x70] sm:$0xff] }
   0x7   :  { %v29_v21 = vld [vmem:[%s520_s0 + $0x78] sm:$0xff]  ;;  %v23_v22 = vld [vmem:[%s520_s0 + $0x48] sm:$0xff]  ;;  %v24_v23 = vld [vmem:[%s520_s0 + $0x50] sm:$0xff] }
   0x8   :  { %v30_v24 = vld [vmem:[%s520_s0 + $0x80] sm:$0xff]  ;;  %v31_v25 = vld [vmem:[%s520_s0 + $0x88] sm:$0xff]  ;;  %v32_v26 = vld [vmem:[%s520_s0 + $0x90] sm:$0xff] }
   0x9   :  { %v25_v31 = vld [vmem:[%s520_s0 + $0x58] sm:$0xff]  ;;  %v34_v33 = vld [vmem:[%s520_s0 + $0xa0] sm:$0xff]  ;;  %v27_v38 = vld [vmem:[%s520_s0 + $0x68] sm:$0xff] }
   0xa   :  { %105 = vperm.xlu1 %316, %v95_v5   ;;  %100 = vperm.xlu0 %315, %v94_v6   ;;  %v33_v32 = vld [vmem:[%s520_s0 + $0x98] sm:$0xff]  ;;  %v26_v37 = vld [vmem:[%s520_s0 + $0x60] sm:$0xff]  ;;  %v35_v39 = vld [vmem:[%s520_s0 + $0xa8] sm:$0xff] }
   0xb   :  { %v36_v43 = vld [vmem:[%s520_s0 + $0xb0] sm:$0xff]  ;;  %v37_v44 = vld [vmem:[%s520_s0 + $0xb8] sm:$0xff]  ;;  %v38_v45 = vld [vmem:[%s520_s0 + $0xc0] sm:$0xff] }
   0xc   :  { %v39_v52 = vld [vmem:[%s520_s0 + $0xc8] sm:$0xff]  ;;  %v40_v53 = vld [vmem:[%s520_s0 + $0xd0] sm:$0xff]  ;;  %v41_v54 = vld [vmem:[%s520_s0 + $0xd8] sm:$0xff] }
   0xe   :  { %115 = vperm.xlu1 %316, %v97_v7   ;;  %110 = vperm.xlu0 %315, %v96_v8  }
  0x81   :  { %v59_v16 = vpop.permute.xlu1 %58  ;;  %v49_v17 = vpop.permute.xlu0 %48 }
  0x82   :  { %v66_v27 = vmul.f32 %v49_v17, %v14_v9  ;;  %v67_v28 = vmul.f32 %v49_v17, %v15_v10  ;;  %v68_v29 = vmul.f32 %v49_v17, %v16_v11  ;;  %v69_v30 = vmul.f32 %v49_v17, %v17_v12 }
  0x83   :  { %v70_v34 = vmul.f32 %v49_v17, %v18_v13  ;;  %v71_v35 = vmul.f32 %v49_v17, %v19_v14  ;;  %v419_v36 = vmul.f32 %v49_v17, %v20_v15  ;;  %v430_v40 = vmul.f32 %v59_v16, %v28_v20 }
  0x84   :  { %v441_v46 = vmul.f32 %v59_v16, %v29_v21  ;;  %v443_v47 = vmul.f32 %v59_v16, %v30_v24  ;;  %v445_v48 = vmul.f32 %v59_v16, %v31_v25  ;;  %v447_v49 = vmul.f32 %v59_v16, %v32_v26 }
  0x85   :  { %v64_v41 = vpop.permute.xlu1 %63  ;;  %v54_v42 = vpop.permute.xlu0 %53  ;;  %v458_v55 = vmul.f32 %v59_v16, %v33_v32  ;;  %v460_v56 = vmul.f32 %v59_v16, %v34_v33 }
  0x86   :  { %v73_v50 = vmul.f32 %v54_v42, %v21_v18  ;;  %v74_v51 = vmul.f32 %v54_v42, %v22_v19  ;;  %v75_v57 = vmul.f32 %v54_v42, %v23_v22  ;;  %v76_v58 = vmul.f32 %v54_v42, %v24_v23 }
  0x87   :  { %v77_v59 = vmul.f32 %v54_v42, %v25_v31  ;;  %v78_v60 = vmul.f32 %v54_v42, %v26_v37  ;;  %v79_v61 = vmul.f32 %v54_v42, %v27_v38  ;;  %v87_v62 = vmul.f32 %v64_v41, %v35_v39 }
  0x88   :  { %v88_v63 = vmul.f32 %v64_v41, %v36_v43  ;;  %v89_v0 = vmul.f32 %v64_v41, %v37_v44  ;;  %v90_v3 = vmul.f32 %v64_v41, %v38_v45  ;;  %v91_v4 = vmul.f32 %v64_v41, %v39_v52 }
  0x89   :  { %v106_v1 = vpop.permute.xlu1 %105  ;;  %v101_v2 = vpop.permute.xlu0 %100  ;;  %v92_v5 = vmul.f32 %v64_v41, %v40_v53  ;;  %v93_v6 = vmul.f32 %v64_v41, %v41_v54 }
  0x8a   :  { %v125_v7 = vadd.f32 %v106_v1, %v73_v50  ;;  %v126_v8 = vadd.f32 %v106_v1, %v74_v51  ;;  %v127_v9 = vadd.f32 %v106_v1, %v75_v57  ;;  %v128_v10 = vadd.f32 %v106_v1, %v76_v58 }
  0x8b   :  { %v129_v11 = vadd.f32 %v106_v1, %v77_v59  ;;  %v130_v12 = vadd.f32 %v106_v1, %v78_v60  ;;  %v131_v13 = vadd.f32 %v106_v1, %v79_v61  ;;  %v118_v14 = vadd.f32 %v101_v2, %v66_v27 }
  0x8c   :  { %v153_v15 = vmax.f32 %v125_v7, 0.0  ;;  %v154_v16 = vmax.f32 %v126_v8, 0.0  ;;  %v155_v17 = vmax.f32 %v127_v9, 0.0  ;;  %v156_v18 = vmax.f32 %v128_v10, 0.0 }
  0x8d   :  { %v157_v19 = vmax.f32 %v129_v11, 0.0  ;;  %v158_v20 = vmax.f32 %v130_v12, 0.0  ;;  %v159_v21 = vmax.f32 %v131_v13, 0.0  ;;  %v119_v22 = vadd.f32 %v101_v2, %v67_v28  ;;  %v116_v31 = vpop.permute.xlu1 %115  ;;  %v111_v53 = vpop.permute.xlu0 %110 }
  0x8e   :  { %v302_v23 = vpack.c.bf16 %v154_v16, %v153_v15  ;;  %v303_v24 = vpack.c.bf16 %v156_v18, %v155_v17  ;;  %v120_v25 = vadd.f32 %v101_v2, %v68_v29  ;;  %v121_v26 = vadd.f32 %v101_v2, %v69_v30 }
  0x8f   :  { %v304_v32 = vpack.c.bf16 %v158_v20, %v157_v19  ;;  %v305_v33 = vpack.c.bf16 %v159_v21, %v159_v21  ;;  %v122_v37 = vadd.f32 %v101_v2, %v70_v34  ;;  %v123_v38 = vadd.f32 %v101_v2, %v71_v35 }
  0x90   :  { %266 = vst [vmem:[%s521_s3 + $0x1c] sm:$0xff] %v302_v23  ;;  %267 = vst [vmem:[%s521_s3 + $0x24] sm:$0xff] %v303_v24  ;;  %v124_v27 = vadd.f32 %v101_v2, %v419_v36  ;;  %v146_v28 = vmax.f32 %v118_v14, 0.0  ;;  %v147_v39 = vmax.f32 %v119_v22, 0.0  ;;  %v148_v41 = vmax.f32 %v120_v25, 0.0 }
  0x91   :  { %268 = vst [vmem:[%s521_s3 + $0x2c] sm:$0xff] %v304_v32  ;;  %269 = vst [vmem:[%s521_s3 + $0x34] sm:$0xf] %v305_v33  ;;  %v149_v29 = vmax.f32 %v121_v26, 0.0  ;;  %v150_v30 = vmax.f32 %v122_v37, 0.0  ;;  %v151_v34 = vmax.f32 %v123_v38, 0.0  ;;  %v139_v35 = vadd.f32 %v116_v31, %v87_v62 }
  0x92   :  { %v152_v42 = vmax.f32 %v124_v27, 0.0  ;;  %v298_v43 = vpack.c.bf16 %v147_v39, %v146_v28  ;;  %v140_v44 = vadd.f32 %v116_v31, %v88_v63  ;;  %v141_v45 = vadd.f32 %v116_v31, %v89_v0 }
  0x93   :  { %v299_v36 = vpack.c.bf16 %v149_v29, %v148_v41  ;;  %v300_v50 = vpack.c.bf16 %v151_v34, %v150_v30  ;;  %v142_v51 = vadd.f32 %v116_v31, %v90_v3  ;;  %v143_v52 = vadd.f32 %v116_v31, %v91_v4 }
  0x94   :  { %v301_v54 = vpack.c.bf16 %v152_v42, %v152_v42  ;;  %262 = vst [vmem:[%s521_s3] sm:$0xff] %v298_v43  ;;  %v144_v57 = vadd.f32 %v116_v31, %v92_v5  ;;  %v145_v58 = vadd.f32 %v116_v31, %v93_v6  ;;  %v167_v59 = vmax.f32 %v139_v35, 0.0 }
  0x95   :  { %263 = vst [vmem:[%s521_s3 + $0x8] sm:$0xff] %v299_v36  ;;  %264 = vst [vmem:[%s521_s3 + $0x10] sm:$0xff] %v300_v50  ;;  %v168_v60 = vmax.f32 %v140_v44, 0.0  ;;  %v169_v61 = vmax.f32 %v141_v45, 0.0  ;;  %v170_v62 = vmax.f32 %v142_v51, 0.0  ;;  %v171_v63 = vmax.f32 %v143_v52, 0.0 }
  0x96   :  { %265 = vst [vmem:[%s521_s3 + $0x18] sm:$0xf] %v301_v54  ;;  %v172_v0 = vmax.f32 %v144_v57, 0.0  ;;  %v173_v1 = vmax.f32 %v145_v58, 0.0  ;;  %v132_v2 = vadd.f32 %v111_v53, %v430_v40  ;;  %v133_v3 = vadd.f32 %v111_v53, %v441_v46 }
  0x97   :  { %v310_v4 = vpack.c.bf16 %v168_v60, %v167_v59  ;;  %v311_v5 = vpack.c.bf16 %v170_v62, %v169_v61  ;;  %v134_v6 = vadd.f32 %v111_v53, %v443_v47  ;;  %v135_v7 = vadd.f32 %v111_v53, %v445_v48 }
  0x98   :  { %v312_v8 = vpack.c.bf16 %v172_v0, %v171_v63  ;;  %v313_v9 = vpack.c.bf16 %v173_v1, %v173_v1  ;;  %v136_v10 = vadd.f32 %v111_v53, %v447_v49  ;;  %v137_v11 = vadd.f32 %v111_v53, %v458_v55 }
  0x99   :  { %274 = vst [vmem:[%s521_s3 + $0x54] sm:$0xff] %v310_v4  ;;  %275 = vst [vmem:[%s521_s3 + $0x5c] sm:$0xff] %v311_v5  ;;  %v138_v40 = vadd.f32 %v111_v53, %v460_v56  ;;  %v160_v46 = vmax.f32 %v132_v2, 0.0  ;;  %v161_v47 = vmax.f32 %v133_v3, 0.0  ;;  %v162_v12 = vmax.f32 %v134_v6, 0.0 }
  0x9a   :  { %276 = vst [vmem:[%s521_s3 + $0x64] sm:$0xff] %v312_v8  ;;  %277 = vst [vmem:[%s521_s3 + $0x6c] sm:$0xf] %v313_v9  ;;  %v163_v48 = vmax.f32 %v135_v7, 0.0  ;;  %v164_v49 = vmax.f32 %v136_v10, 0.0  ;;  %v165_v55 = vmax.f32 %v137_v11, 0.0 }
  0x9b   :  { %v166_v13 = vmax.f32 %v138_v40, 0.0  ;;  %v306_v14 = vpack.c.bf16 %v161_v47, %v160_v46 }
  0x9c   :  { %v307_v15 = vpack.c.bf16 %v163_v48, %v162_v12  ;;  %v308_v16 = vpack.c.bf16 %v165_v55, %v164_v49 }
  0x9d   :  { %v309_v17 = vpack.c.bf16 %v166_v13, %v166_v13  ;;  %270 = vst [vmem:[%s521_s3 + $0x38] sm:$0xff] %v306_v14 }
  0x9e   :  { %271 = vst [vmem:[%s521_s3 + $0x40] sm:$0xff] %v307_v15  ;;  %272 = vst [vmem:[%s521_s3 + $0x48] sm:$0xff] %v308_v16 }
  0x9f   :  { %273 = vst [vmem:[%s521_s3 + $0x50] sm:$0xf] %v309_v17 }

// kernel: conv_initiation_classifier_forward.7
= control target key start
LH: loop header
LB: loop body
LE: loop exit
PB: predicated region body
PF: predicated region fallthrough
CT: control target
= control target key end

     0   :  { %12 = vsyncpa [#allocation5], 0  ;;  %s865_s21 = smov [#allocation4]   ;;  %s1185_s0 = inlined_call_operand.hbm [shape: bf16[32,64], index: 0, kind: input, shape index: {}]   ;;  %s1186_s1 = inlined_call_operand.vmem [shape: bf16[64,800], index: 1, kind: input, shape index: {}]   ;;  %s1187_s2 = inlined_call_operand.vmem [shape: f32[32,1], index: 2, kind: input, shape index: {}]   ;;  %s1188_s3 = inlined_call_operand.vmem [shape: f32[32,1], index: 3, kind: input, shape index: {}]   ;;  %s1189_s4 = inlined_call_operand.vmem [shape: f32[32,800], index: 4, kind: output, shape index: {0}]   ;;  %s1190_s5 = inlined_call_operand.vmem [shape: f32[32,1], index: 5, kind: output, shape index: {1}]   ;;  %s1191_s6 = inlined_call_operand.vmem [shape: f32[32,1], index: 6, kind: output, shape index: {2}]  }
   0x1   :  { %s18_s22 = sshll.u32 %s865_s21, 4  ;;  %s841_s25 = scalar_lea.hbm %s1185_s0, 256  ;;  %s19_s22 = int_to_ptr.vmem [resolvable:$true] %s18_s22 }
   0x2   :  { %p842_p0 = scmp.ne.s32.totalorder %s1185_s0, %s841_s25  ;;  %p845_p1 = scmp.lt.u32.totalorder %s841_s25, %s1185_s0 }
   0x4   :  { %p847_p2 = pnand %p845_p1, %p842_p0 }
   0x6   :  { %850 = shalt.err (!%p847_p2)
}
   0x7   :  { %s851_s30 = scalar_lea.vmem %s19_s22, 256  ;;  %p856_p4 = scmp.lt.s32.totalorder %s19_s22, %s19_s22 }
   0x8   :  { %p852_p3 = scmp.ne.s32.totalorder %s19_s22, %s851_s30  ;;  %p857_p5 = scmp.lt.s32.totalorder %s851_s30, %s851_s30 }
   0xa   :  { %p858_p6 = por %p857_p5, %p856_p4 }
   0xc   :  { %p859_p7 = pnand %p858_p6, %p852_p3 }
   0xe   :  { %862 = shalt.err (!%p859_p7)
}
   0xf   :  { %s866_s7 = smov 64   ;;  %s867_s8 = smov 4  }
  0x10   :  { %24 = dma.hbm_to_vmem [thread:$0]  %s1185_s0, 256, %s19_s22, [#allocation5], %s866_s7, %s866_s7, %s867_s8  }
  0x11   :  { %863 = dma.done.wait [#allocation5], 256  }
  0x12   :  { %864 = vsyncadd [#allocation5], 4294967040  ;;  %v868_v0 = vmov 0   ;;  %v791_v1 = vld [vmem:[%s1186_s1 + $0x4] ss:$28 sps:$4 sm:$0xff]   ;;  %vm238_vm0 = vcmask 523264   ;;  %v481_v45 = vlaneseq }
  0x13   :  { %277 = vmatprep.mubr.bf16.mxu0 %v868_v0  ;;  %330 = vmatprep.mubr.bf16.mxu1 %v868_v0  ;;  %v793_v2 = vld [vmem:[%s1186_s1 + $0xc] ss:$28 sps:$4 sm:$0xff]   ;;  %v795_v3 = vld [vmem:[%s1186_s1] ss:$28 sps:$4 sm:$0xff]   ;;  %v801_v7 = vld [vmem:[%s1186_s1 + $0x38] ss:$28 sps:$4 sm:$0xff]  }
  0x14   :  { %245 = vmatprep.subr.bf16.mxu0 %v791_v1  ;;  %v796_v4 = vld [vmem:[%s1186_s1 + $0x8] ss:$28 sps:$4 sm:$0xff]   ;;  %298 = vmatprep.subr.bf16.mxu1 %v793_v2  ;;  %v797_v5 = vld [vmem:[%s1186_s1 + $0x3c] ss:$28 sps:$4 sm:$0xff]   ;;  %v803_v9 = vld [vmem:[%s1186_s1 + $0x74] ss:$28 sps:$4 sm:$0xff]  }
  0x15   :  { %246 = vmatpush1.bf16.msra.mxu0 %v795_v3  ;;  %299 = vmatpush1.bf16.msra.mxu1 %v796_v4  ;;  %v799_v6 = vld [vmem:[%s1186_s1 + $0x44] ss:$28 sps:$4 sm:$0xff]   ;;  %v805_v10 = vld [vmem:[%s1186_s1 + $0x7c] ss:$28 sps:$4 sm:$0xff]   ;;  %v807_v11 = vld [vmem:[%s1186_s1 + $0x70] ss:$28 sps:$4 sm:$0xff]  }
  0x16   :  { %247 = vmatprep.subr.bf16.mxu0 %v797_v5  ;;  %v802_v8 = vld [vmem:[%s1186_s1 + $0x40] ss:$28 sps:$4 sm:$0xff]   ;;  %300 = vmatprep.subr.bf16.mxu1 %v799_v6  ;;  %v808_v12 = vld [vmem:[%s1186_s1 + $0x78] ss:$28 sps:$4 sm:$0xff]   ;;  %v809_v13 = vld [vmem:[%s1186_s1 + $0xac] ss:$28 sps:$4 sm:$0xff]  }
  0x17   :  { %v811_v14 = vld [vmem:[%s1186_s1 + $0xb4] ss:$28 sps:$4 sm:$0xff]   ;;  %v813_v15 = vld [vmem:[%s1186_s1 + $0xa8] ss:$28 sps:$4 sm:$0xff]   ;;  %v825_v27 = vld [vmem:[%s1186_s1 + $0x80] ss:$28 sps:$4 sm:$0xff]  }
  0x18   :  { %v814_v16 = vld [vmem:[%s1186_s1 + $0xb0] ss:$28 sps:$4 sm:$0xff]   ;;  %v819_v18 = vld [vmem:[%s1186_s1 + $0x18] ss:$28 sps:$4 sm:$0xff]   ;;  %v815_v19 = vld [vmem:[#allocation4] sm:$0xff]   ;;  %vm39_vm1 = vcmask 7168  }
  0x19   :  { %248 = vmatpush1.bf16.msra.mxu0 %v801_v7  ;;  %301 = vmatpush1.bf16.msra.mxu1 %v802_v8  ;;  %v818_v17 = vld [vmem:[%s1186_s1 + $0x14] ss:$28 sps:$4 sm:$0xff]   ;;  %v822_v21 = vld [vmem:[%s1186_s1 + $0x4c] ss:$28 sps:$4 sm:$0xff]   ;;  %v827_v24 = vld [vmem:[%s1186_s1 + $0x84] ss:$28 sps:$4 sm:$0xff]  }
  0x1a   :  { %249 = vmatprep.subr.bf16.mxu0 %v803_v9  ;;  %302 = vmatprep.subr.bf16.mxu1 %v805_v10  ;;  %v816_v20 = vld [vmem:[%s1186_s1 + $0x10] ss:$28 sps:$4 sm:$0xff]   ;;  %v820_v23 = vld [vmem:[%s1186_s1 + $0x48] ss:$28 sps:$4 sm:$0xff]   ;;  %v831_v28 = vld [vmem:[%s1186_s1 + $0xbc] ss:$28 sps:$4 sm:$0xff]  }
  0x1b   :  { %v823_v22 = vld [vmem:[%s1186_s1 + $0x50] ss:$28 sps:$4 sm:$0xff]   ;;  %v828_v25 = vld [vmem:[%s1186_s1 + $0x88] ss:$28 sps:$4 sm:$0xff]   ;;  %v832_v29 = vld [vmem:[%s1186_s1 + $0xc0] ss:$28 sps:$4 sm:$0xff]  }
  0x1c   :  { %v824_v26 = vld [vmem:[#allocation4 + $0x8] sm:$0xff]   ;;  %v829_v30 = vld [vmem:[%s1186_s1 + $0xb8] ss:$28 sps:$4 sm:$0xff]   ;;  %v869_v31 = vmov 0.0   ;;  %v482_v56 = vand.u32 127, %v481_v45 }
  0x1d   :  { %250 = vmatpush1.bf16.msra.mxu0 %v807_v11  ;;  %303 = vmatpush1.bf16.msra.mxu1 %v808_v12  ;;  %40 = vst.msk [vmem:[#allocation2] sm:$0xff] %vm39_vm1, %v869_v31  ;;  %41 = vst.msk [vmem:[#allocation2 + $0x8] sm:$0xff] %vm39_vm1, %v869_v31 }
  0x1e   :  { %251 = vmatprep.subr.bf16.mxu0 %v809_v13  ;;  %304 = vmatprep.subr.bf16.mxu1 %v811_v14  ;;  %42 = vst.msk [vmem:[#allocation2 + $0x10] sm:$0xff] %vm39_vm1, %v869_v31  ;;  %43 = vst.msk [vmem:[#allocation2 + $0x18] sm:$0xff] %vm39_vm1, %v869_v31  ;;  %v1067_v11 = vadd.s32 768, %v482_v56 }
  0x1f   :  { %44 = vst.msk [vmem:[#allocation3] sm:$0xff] %vm39_vm1, %v869_v31  ;;  %45 = vst.msk [vmem:[#allocation3 + $0x8] sm:$0xff] %vm39_vm1, %v869_v31 }
  0x20   :  { %46 = vst.msk [vmem:[#allocation3 + $0x10] sm:$0xff] %vm39_vm1, %v869_v31  ;;  %47 = vst.msk [vmem:[#allocation3 + $0x18] sm:$0xff] %vm39_vm1, %v869_v31  ;;  %vm504_vm2 = vcmp.lt.s32.totalorder %v1067_v11, 800 }
  0x21   :  { %252 = vmatpush1.bf16.msra.mxu0 %v813_v15  ;;  %305 = vmatpush1.bf16.msra.mxu1 %v814_v16 }
  0x22   :  { %351 = vmatprep.subr.bf16.mxu0 %v818_v17  ;;  %774 = vmatprep.subr.bf16.mxu1 %v819_v18 }
  0x24   :  { %760 = vmatmul.mubr.msk.bf16.vlgmr.msra.gmra.mrb[0].mxu0 %vm238_vm0, %v815_v19  ;;  %762 = vmatmul.mubr.msk.bf16.vlgmr.msra.gmra.mrb[0].mxu1 %vm238_vm0, %v815_v19  ;;  %v533_v11 = vld [vmem:[#allocation2] sm:$0xff] }
  0x25   :  { %352 = vmatpush1.bf16.msra.mxu0 %v816_v20  ;;  %775 = vmatpush3.bf16.msra.mxu1 %v819_v18 }
  0x26   :  { %353 = vmatprep.subr.bf16.mxu0 %v822_v21  ;;  %776 = vmatprep.subr.bf16.mxu1 %v823_v22 }
  0x27   :  { %287 = vmatprep.mubr.bf16.mxu0 %v868_v0  ;;  %340 = vmatprep.mubr.bf16.mxu1 %v868_v0 }
  0x29   :  { %354 = vmatpush1.bf16.msra.mxu0 %v820_v23  ;;  %777 = vmatpush3.bf16.msra.mxu1 %v823_v22 }
  0x2a   :  { %355 = vmatprep.subr.bf16.mxu0 %v827_v24  ;;  %778 = vmatprep.subr.bf16.mxu1 %v828_v25 }
  0x2c   :  { %761 = vmatmul.mubr.msk.bf16.gmra.mrb[4].mxu0 %vm238_vm0, %v824_v26  ;;  %763 = vmatmul.mubr.msk.bf16.gmra.mrb[4].mxu1 %vm238_vm0, %v824_v26 }
  0x2d   :  { %356 = vmatpush1.bf16.msra.mxu0 %v825_v27  ;;  %779 = vmatpush3.bf16.msra.mxu1 %v828_v25 }
  0x2e   :  { %357 = vmatprep.subr.bf16.mxu0 %v831_v28  ;;  %780 = vmatprep.subr.bf16.mxu1 %v832_v29 }
  0x2f   :  { %383 = vmatprep.mubr.bf16.mxu0 %v868_v0  ;;  %782 = vmatprep.mubr.msk.bf16.mxu1 %vm238_vm0, %v815_v19 }
  0x31   :  { %358 = vmatpush1.bf16.msra.mxu0 %v829_v30  ;;  %781 = vmatpush3.bf16.msra.mxu1 %v832_v29 }
  0x34   :  { %764 = vmatmul.mubr.msk.bf16.vlgmr.msra.gmra.mrb[8].mxu0 %vm238_vm0, %v815_v19  ;;  %783 = vmatmul.mubr.msk.bf16.vlgmr.msra.gmra.mrb[8].mxu1 %vm238_vm0, %v824_v26 }
  0x35   :  { %393 = vmatprep.mubr.bf16.mxu0 %v868_v0 }
  0x3c   :  { %765 = vmatmul.mubr.msk.bf16.gmra.mrb[12].mxu0 %vm238_vm0, %v824_v26 }
  0xf7   :  { %v279_v32 = vpop.f32.mrb[0].mxu0  ;;  %v332_v33 = vpop.f32.mrb[0].mxu1 }
  0xf8   :  { %453 = vst [vmem:[%s1189_s4] sm:$0xff] %v279_v32  ;;  %v582_v34 = vmul.f32 %v279_v32, %v279_v32  ;;  %455 = vst [vmem:[%s1189_s4 + $0x10] sm:$0xff] %v332_v33  ;;  %v281_v35 = vpop.f32.mrb[1].mxu0  ;;  %v334_v36 = vpop.f32.mrb[1].mxu1  ;;  %v584_v37 = vmul.f32 %v332_v33, %v332_v33 }
  0xf9   :  { %454 = vst [vmem:[%s1189_s4 + $0x8] sm:$0xff] %v281_v35  ;;  %v537_v38 = vadd.f32 %v281_v35, %v279_v32  ;;  %v583_v39 = vmul.f32 %v281_v35, %v281_v35  ;;  %456 = vst [vmem:[%s1189_s4 + $0x18] sm:$0xff] %v334_v36  ;;  %v283_v40 = vpop.f32.mrb[2].mxu0  ;;  %v336_v41 = vpop.f32.mrb[2].mxu1  ;;  %v585_v50 = vmul.f32 %v334_v36, %v334_v36 }
  0xfa   :  { %460 = vst [vmem:[%s1189_s4 + $0x38] sm:$0xff] %v283_v40  ;;  %v589_v42 = vmul.f32 %v283_v40, %v283_v40  ;;  %462 = vst [vmem:[%s1189_s4 + $0x48] sm:$0xff] %v336_v41  ;;  %v285_v43 = vpop.f32.mrb[3].mxu0  ;;  %v338_v44 = vpop.f32.mrb[3].mxu1  ;;  %v591_v51 = vmul.f32 %v336_v41, %v336_v41 }
  0xfb   :  { %v610_v46 = vadd.f32 %v583_v39, %v582_v34  ;;  %v538_v47 = vadd.f32 %v537_v38, %v332_v33  ;;  %461 = vst [vmem:[%s1189_s4 + $0x40] sm:$0xff] %v285_v43  ;;  %v545_v48 = vadd.f32 %v285_v43, %v283_v40  ;;  %v590_v49 = vmul.f32 %v285_v43, %v285_v43 }
  0xfc   :  { %463 = vst [vmem:[%s1189_s4 + $0x50] sm:$0xff] %v338_v44  ;;  %v592_v59 = vmul.f32 %v338_v44, %v338_v44 }
  0xfd   :  { %v539_v52 = vadd.f32 %v538_v47, %v334_v36  ;;  %v611_v53 = vadd.f32 %v610_v46, %v584_v37  ;;  %v618_v54 = vadd.f32 %v590_v49, %v589_v42  ;;  %v546_v55 = vadd.f32 %v545_v48, %v336_v41 }
  0xff   :  { %v1047_v57 = vadd.f32 %v611_v53, %v585_v50  ;;  %v547_v58 = vadd.f32 %v546_v55, %v338_v44  ;;  %v619_v60 = vadd.f32 %v618_v54, %v591_v51  ;;  %v289_v61 = vpop.f32.mrb[4].mxu0  ;;  %v342_v62 = vpop.f32.mrb[4].mxu1 }
 0x100   :  { %467 = vst [vmem:[%s1189_s4 + $0x70] sm:$0xff] %v289_v61  ;;  %v596_v63 = vmul.f32 %v289_v61, %v289_v61  ;;  %469 = vst [vmem:[%s1189_s4 + $0x80] sm:$0xff] %v342_v62  ;;  %v291_v0 = vpop.f32.mrb[5].mxu0  ;;  %v344_v1 = vpop.f32.mrb[5].mxu1  ;;  %v598_v3 = vmul.f32 %v342_v62, %v342_v62 }
 0x101   :  { %v620_v2 = vadd.f32 %v619_v60, %v592_v59  ;;  %468 = vst [vmem:[%s1189_s4 + $0x78] sm:$0xff] %v291_v0  ;;  %v553_v4 = vadd.f32 %v291_v0, %v289_v61  ;;  %v597_v5 = vmul.f32 %v291_v0, %v291_v0  ;;  %470 = vst [vmem:[%s1189_s4 + $0x88] sm:$0xff] %v344_v1  ;;  %v293_v6 = vpop.f32.mrb[6].mxu0  ;;  %v346_v7 = vpop.f32.mrb[6].mxu1 }
 0x102   :  { %474 = vst [vmem:[%s1189_s4 + $0xa8] sm:$0xff] %v293_v6  ;;  %v603_v8 = vmul.f32 %v293_v6, %v293_v6  ;;  %476 = vst [vmem:[%s1189_s4 + $0xb8] sm:$0xff] %v346_v7  ;;  %v295_v9 = vpop.f32.mrb[7].mxu0  ;;  %v348_v10 = vpop.f32.mrb[7].mxu1  ;;  %v599_v16 = vmul.f32 %v344_v1, %v344_v1  ;;  %v605_v17 = vmul.f32 %v346_v7, %v346_v7 }
 0x103   :  { %v626_v12 = vadd.f32 %v597_v5, %v596_v63  ;;  %v554_v13 = vadd.f32 %v553_v4, %v342_v62  ;;  %475 = vst [vmem:[%s1189_s4 + $0xb0] sm:$0xff] %v295_v9  ;;  %v561_v14 = vadd.f32 %v295_v9, %v293_v6  ;;  %v604_v15 = vmul.f32 %v295_v9, %v295_v9 }
 0x104   :  { %477 = vst [vmem:[%s1189_s4 + $0xc0] sm:$0xff] %v348_v10  ;;  %v606_v24 = vmul.f32 %v348_v10, %v348_v10 }
 0x105   :  { %v555_v18 = vadd.f32 %v554_v13, %v344_v1  ;;  %v627_v19 = vadd.f32 %v626_v12, %v598_v3  ;;  %v634_v20 = vadd.f32 %v604_v15, %v603_v8  ;;  %v562_v21 = vadd.f32 %v561_v14, %v346_v7 }
 0x107   :  { %v628_v22 = vadd.f32 %v627_v19, %v599_v16  ;;  %v563_v23 = vadd.f32 %v562_v21, %v348_v10  ;;  %v635_v25 = vadd.f32 %v634_v20, %v605_v17  ;;  %v385_v26 = vpop.f32.mrb[8].mxu0  ;;  %v784_v27 = vpop.f32.mrb[8].mxu1  ;;  %v534_v19 = vld [vmem:[#allocation2 + $0x8] sm:$0xff] }
 0x108   :  { %457 = vst [vmem:[%s1189_s4 + $0x20] sm:$0xff] %v385_v26  ;;  %v540_v28 = vadd.f32 %v539_v52, %v385_v26  ;;  %473 = vst [vmem:[%s1189_s4 + $0xa0] sm:$0xff] %v784_v27  ;;  %v387_v29 = vpop.f32.mrb[9].mxu0  ;;  %v438_v30 = vpop.f32.mrb[9].mxu1  ;;  %v586_v32 = vmul.f32 %v385_v26, %v385_v26  ;;  %v525_v61 = vsel %vm504_vm2, %v784_v27, 0.0 }
 0x109   :  { %v636_v31 = vadd.f32 %v635_v25, %v606_v24  ;;  %458 = vst [vmem:[%s1189_s4 + $0x28] sm:$0xff] %v387_v29  ;;  %459 = vst [vmem:[%s1189_s4 + $0x30] sm:$0xff] %v438_v30  ;;  %v389_v33 = vpop.f32.mrb[10].mxu0  ;;  %v785_v34 = vpop.f32.mrb[10].mxu1  ;;  %v511_v35 = vsel %vm504_vm2, %v438_v30, 0.0  ;;  %v587_v41 = vmul.f32 %v387_v29, %v387_v29  ;;  %v602_v8 = vmul.f32 %v525_v61, %v525_v61  ;;  %v578_v24 = vld [vmem:[#allocation3] sm:$0xff] }
 0x10a   :  { %464 = vst [vmem:[%s1189_s4 + $0x58] sm:$0xff] %v389_v33  ;;  %v548_v36 = vadd.f32 %v547_v58, %v389_v33  ;;  %v593_v37 = vmul.f32 %v389_v33, %v389_v33  ;;  %480 = vst [vmem:[%s1189_s4 + $0xd8] sm:$0xff] %v785_v34  ;;  %v391_v38 = vpop.f32.mrb[11].mxu0  ;;  %v441_v39 = vpop.f32.mrb[11].mxu1  ;;  %v541_v40 = vadd.f32 %v540_v28, %v387_v29  ;;  %v535_v25 = vld [vmem:[#allocation2 + $0x10] sm:$0xff] }
 0x10b   :  { %465 = vst [vmem:[%s1189_s4 + $0x60] sm:$0xff] %v391_v38  ;;  %v594_v42 = vmul.f32 %v391_v38, %v391_v38  ;;  %466 = vst [vmem:[%s1189_s4 + $0x68] sm:$0xff] %v441_v39  ;;  %v518_v43 = vsel %vm504_vm2, %v441_v39, 0.0  ;;  %v588_v47 = vmul.f32 %v511_v35, %v511_v35  ;;  %v613_v48 = vadd.f32 %v1047_v57, %v586_v32  ;;  %v580_v30 = vld [vmem:[#allocation3 + $0x10] sm:$0xff]  ;;  %v581_v39 = vld [vmem:[#allocation3 + $0x18] sm:$0xff] }
 0x10c   :  { %v542_v44 = vadd.f32 %v541_v40, %v511_v35  ;;  %v621_v45 = vadd.f32 %v620_v2, %v593_v37  ;;  %v549_v46 = vadd.f32 %v548_v36, %v391_v38  ;;  %v595_v49 = vmul.f32 %v518_v43, %v518_v43 }
 0x10d   :  { %v614_v53 = vadd.f32 %v613_v48, %v587_v41  ;;  %v532_v2 = vsel %vm504_vm2, %v785_v34, 0.0 }
 0x10e   :  { %543 = vadd.xlane.f32.xlu0 %v542_v44  ;;  %v622_v50 = vadd.f32 %v621_v45, %v594_v42  ;;  %v550_v51 = vadd.f32 %v549_v46, %v518_v43  ;;  %v609_v10 = vmul.f32 %v532_v2, %v532_v2 }
 0x10f   :  { %v395_v52 = vpop.f32.mrb[12].mxu0  ;;  %v615_v60 = vadd.f32 %v614_v53, %v588_v47 }
 0x110   :  { %471 = vst [vmem:[%s1189_s4 + $0x90] sm:$0xff] %v395_v52  ;;  %v556_v54 = vadd.f32 %v555_v18, %v395_v52  ;;  %v600_v55 = vmul.f32 %v395_v52, %v395_v52  ;;  %v397_v56 = vpop.f32.mrb[13].mxu0  ;;  %v623_v58 = vadd.f32 %v622_v50, %v595_v49  ;;  %v579_v18 = vld [vmem:[#allocation3 + $0x8] sm:$0xff] }
 0x111   :  { %472 = vst [vmem:[%s1189_s4 + $0x98] sm:$0xff] %v397_v56  ;;  %v601_v59 = vmul.f32 %v397_v56, %v397_v56  ;;  %v399_v57 = vpop.f32.mrb[14].mxu0 }
 0x112   :  { %478 = vst [vmem:[%s1189_s4 + $0xc8] sm:$0xff] %v399_v57  ;;  %v564_v62 = vadd.f32 %v563_v23, %v399_v57  ;;  %v607_v63 = vmul.f32 %v399_v57, %v399_v57  ;;  %624 = vadd.xlane.f32.xlu1 %v623_v58  ;;  %551 = vadd.xlane.f32.xlu0 %v550_v51  ;;  %v401_v0 = vpop.f32.mrb[15].mxu0 }
 0x113   :  { %v557_v1 = vadd.f32 %v556_v54, %v397_v56  ;;  %479 = vst [vmem:[%s1189_s4 + $0xd0] sm:$0xff] %v401_v0  ;;  %v608_v3 = vmul.f32 %v401_v0, %v401_v0  ;;  %v629_v4 = vadd.f32 %v628_v22, %v600_v55 }
 0x114   :  { %v565_v5 = vadd.f32 %v564_v62, %v401_v0  ;;  %v637_v7 = vadd.f32 %v636_v31, %v607_v63  ;;  %v536_v31 = vld [vmem:[#allocation2 + $0x18] sm:$0xff] }
 0x115   :  { %v558_v6 = vadd.f32 %v557_v1, %v525_v61  ;;  %v630_v9 = vadd.f32 %v629_v4, %v601_v59 }
 0x116   :  { %616 = vadd.xlane.f32.xlu0 %v615_v60  ;;  %v566_v12 = vadd.f32 %v565_v5, %v532_v2  ;;  %v638_v13 = vadd.f32 %v637_v7, %v608_v3 }
 0x117   :  { %559 = vadd.xlane.f32.xlu1 %v558_v6  ;;  %v631_v14 = vadd.f32 %v630_v9, %v602_v8  ;;  %v682_v6 = vld [vmem:[%s1187_s2 + $0x8] sm:$0xff]  ;;  %v681_v9 = vld [vmem:[%s1187_s2] sm:$0xff] }
 0x118   :  { %v639_v15 = vadd.f32 %v638_v13, %v609_v10  ;;  %v702_v13 = vld [vmem:[%s1188_s3 + $0x8] sm:$0xff] }
 0x11a   :  { %632 = vadd.xlane.f32.xlu0 %v631_v14 }
 0x11b   :  { %567 = vadd.xlane.f32.xlu1 %v566_v12 }
 0x11f   :  { %640 = vadd.xlane.f32.xlu1 %v639_v15 }
 0x19b   :  { %v544_v16 = vpop.xlane.xlu0 %543 }
 0x19c   :  { %v569_v17 = vadd.f32 %v544_v16, %v533_v11  ;;  %v701_v11 = vld [vmem:[%s1188_s3] sm:$0xff]  ;;  %v683_v16 = vld [vmem:[%s1187_s2 + $0x10] sm:$0xff] }
 0x19e   :  { %574 = vst.msk [vmem:[#allocation2] sm:$0xff] %vm39_vm1, %v569_v17 }
 0x19f   :  { %v625_v20 = vpop.xlane.xlu1 %624  ;;  %v552_v21 = vpop.xlane.xlu0 %551 }
 0x1a0   :  { %v643_v22 = vadd.f32 %v625_v20, %v579_v18  ;;  %v570_v23 = vadd.f32 %v552_v21, %v534_v19 }
 0x1a2   :  { %647 = vst.msk [vmem:[#allocation3 + $0x8] sm:$0xff] %vm39_vm1, %v643_v22  ;;  %575 = vst.msk [vmem:[#allocation2 + $0x8] sm:$0xff] %vm39_vm1, %v570_v23  ;;  %v703_v22 = vld [vmem:[%s1188_s3 + $0x10] sm:$0xff]  ;;  %v684_v23 = vld [vmem:[%s1187_s2 + $0x18] sm:$0xff] }
 0x1a3   :  { %v617_v26 = vpop.xlane.xlu0 %616 }
 0x1a4   :  { %v560_v27 = vpop.xlane.xlu1 %559  ;;  %v642_v28 = vadd.f32 %v617_v26, %v578_v24 }
 0x1a5   :  { %v571_v29 = vadd.f32 %v560_v27, %v535_v25  ;;  %v653_v32 = vld [vmem:[#allocation2] sm:$0xff] }
 0x1a6   :  { %646 = vst.msk [vmem:[#allocation3] sm:$0xff] %vm39_vm1, %v642_v28  ;;  %v657_v40 = vmul.f32 0.00125, %v653_v32  ;;  %v704_v28 = vld [vmem:[%s1188_s3 + $0x18] sm:$0xff] }
 0x1a7   :  { %576 = vst.msk [vmem:[#allocation2 + $0x10] sm:$0xff] %vm39_vm1, %v571_v29  ;;  %v633_v33 = vpop.xlane.xlu0 %632 }
 0x1a8   :  { %v568_v34 = vpop.xlane.xlu1 %567  ;;  %v644_v35 = vadd.f32 %v633_v33, %v580_v30  ;;  %v669_v48 = vmul.f32 %v657_v40, %v657_v40 }
 0x1a9   :  { %v572_v36 = vadd.f32 %v568_v34, %v536_v31  ;;  %v662_v37 = vld [vmem:[#allocation3 + $0x8] sm:$0xff] }
 0x1aa   :  { %v654_v38 = vld [vmem:[#allocation2 + $0x8] sm:$0xff]  ;;  %648 = vst.msk [vmem:[#allocation3 + $0x10] sm:$0xff] %vm39_vm1, %v644_v35  ;;  %v666_v43 = vmul.f32 0.00125, %v662_v37 }
 0x1ab   :  { %v658_v41 = vmul.f32 0.00125, %v654_v38  ;;  %577 = vst.msk [vmem:[#allocation2 + $0x18] sm:$0xff] %vm39_vm1, %v572_v36 }
 0x1ac   :  { %v641_v42 = vpop.xlane.xlu1 %640 }
 0x1ad   :  { %v670_v44 = vmul.f32 %v658_v41, %v658_v41  ;;  %v645_v45 = vadd.f32 %v641_v42, %v581_v39  ;;  %v661_v46 = vld [vmem:[#allocation3] sm:$0xff] }
 0x1ae   :  { %v655_v47 = vld [vmem:[#allocation2 + $0x10] sm:$0xff]  ;;  %v665_v50 = vmul.f32 0.00125, %v661_v46 }
 0x1af   :  { %v674_v49 = vsub.f32 %v666_v43, %v670_v44  ;;  %v659_v51 = vmul.f32 0.00125, %v655_v47  ;;  %649 = vst.msk [vmem:[#allocation3 + $0x18] sm:$0xff] %vm39_vm1, %v645_v45 }
 0x1b0   :  { %v673_v53 = vsub.f32 %v665_v50, %v669_v48 }
 0x1b1   :  { %v678_v52 = vmax.f32 %v674_v49, 0.0  ;;  %v663_v54 = vld [vmem:[#allocation3 + $0x10] sm:$0xff]  ;;  %v671_v59 = vmul.f32 %v659_v51, %v659_v51 }
 0x1b2   :  { %v656_v55 = vld [vmem:[#allocation2 + $0x18] sm:$0xff]  ;;  %v677_v58 = vmax.f32 %v673_v53, 0.0  ;;  %v667_v57 = vmul.f32 0.00125, %v663_v54 }
 0x1b3   :  { %v686_v56 = vadd.f32 1e-05, %v678_v52  ;;  %v660_v60 = vmul.f32 0.00125, %v656_v55 }
 0x1b4   :  { %v685_v61 = vadd.f32 1e-05, %v677_v58  ;;  %v675_v62 = vsub.f32 %v667_v57, %v671_v59 }
 0x1b5   :  { %833 = vrsqrt.f32 %v686_v56  ;;  %v672_v1 = vmul.f32 %v660_v60, %v660_v60 }
 0x1b6   :  { %v664_v63 = vld [vmem:[#allocation3 + $0x18] sm:$0xff]  ;;  %835 = vrsqrt.f32 %v685_v61  ;;  %v679_v0 = vmax.f32 %v675_v62, 0.0 }
 0x1b7   :  { %v668_v2 = vmul.f32 0.00125, %v664_v63 }
 0x1b8   :  { %v687_v3 = vadd.f32 1e-05, %v679_v0 }
 0x1b9   :  { %v676_v4 = vsub.f32 %v668_v2, %v672_v1 }
 0x1ba   :  { %837 = vrsqrt.f32 %v687_v3 }
 0x1bb   :  { %v680_v5 = vmax.f32 %v676_v4, 0.0 }
 0x1bd   :  { %v688_v7 = vadd.f32 1e-05, %v680_v5 }
 0x1bf   :  { %v834_v8 = vpop.eup %833  ;;  %839 = vrsqrt.f32 %v688_v7 }
 0x1c0   :  { %v694_v10 = vmul.f32 %v834_v8, %v682_v6  ;;  %v836_v12 = vpop.eup %835 }
 0x1c1   :  { %v693_v15 = vmul.f32 %v836_v12, %v681_v9 }
 0x1c2   :  { %698 = vst.msk [vmem:[%s1190_s5 + $0x8] sm:$0xff] %vm39_vm1, %v694_v10  ;;  %v706_v14 = vmul.f32 %v694_v10, %v658_v41 }
 0x1c3   :  { %697 = vst.msk [vmem:[%s1190_s5] sm:$0xff] %vm39_vm1, %v693_v15  ;;  %v705_v18 = vmul.f32 %v693_v15, %v657_v40 }
 0x1c4   :  { %v710_v17 = vsub.f32 %v702_v13, %v706_v14  ;;  %v838_v19 = vpop.eup %837 }
 0x1c5   :  { %v709_v20 = vsub.f32 %v701_v11, %v705_v18  ;;  %v695_v21 = vmul.f32 %v838_v19, %v683_v16 }
 0x1c6   :  { %714 = vst.msk [vmem:[%s1191_s6 + $0x8] sm:$0xff] %vm39_vm1, %v710_v17 }
 0x1c7   :  { %713 = vst.msk [vmem:[%s1191_s6] sm:$0xff] %vm39_vm1, %v709_v20  ;;  %699 = vst.msk [vmem:[%s1190_s5 + $0x10] sm:$0xff] %vm39_vm1, %v695_v21  ;;  %v707_v24 = vmul.f32 %v695_v21, %v659_v51 }
 0x1c9   :  { %v840_v25 = vpop.eup %839  ;;  %v711_v26 = vsub.f32 %v703_v22, %v707_v24 }
 0x1ca   :  { %v696_v27 = vmul.f32 %v840_v25, %v684_v23 }
 0x1cb   :  { %715 = vst.msk [vmem:[%s1191_s6 + $0x10] sm:$0xff] %vm39_vm1, %v711_v26 }
 0x1cc   :  { %700 = vst.msk [vmem:[%s1190_s5 + $0x18] sm:$0xff] %vm39_vm1, %v696_v27  ;;  %v708_v29 = vmul.f32 %v696_v27, %v660_v60 }
 0x1ce   :  { %v712_v30 = vsub.f32 %v704_v28, %v708_v29 }
 0x1d0   :  { %716 = vst.msk [vmem:[%s1191_s6 + $0x18] sm:$0xff] %vm39_vm1, %v712_v30 }
 0x1d1   :  { %729 = vsyncpa [#allocation5], 1 }

// kernel: conv_initiation_classifier_forward.10
= control target key start
LH: loop header
LB: loop body
LE: loop exit
PB: predicated region body
PF: predicated region fallthrough
CT: control target
= control target key end

     0   :  { %v253_v0 = vmov 0   ;;  %s398_s1 = inlined_call_operand.vmem [shape: f32[64,1], index: 1, kind: input, shape index: {}]   ;;  %s399_s2 = inlined_call_operand.vmem [shape: f32[64,1], index: 2, kind: input, shape index: {}]   ;;  %s400_s0 = inlined_call_operand.vmem [shape: f32[64,162], index: 0, kind: input, shape index: {}]   ;;  %s401_s3 = inlined_call_operand.vmem [shape: bf16[64,162], index: 3, kind: output, shape index: {}]  }
   0x1   :  { %252 = vset.pattern.permute.xlu1 %v253_v0  ;;  %251 = vset.pattern.permute.xlu0 %v253_v0  ;;  %v32_v1 = vld [vmem:[%s398_s1 + $0x10] sm:$0xff]  ;;  %v30_v2 = vld [vmem:[%s398_s1] sm:$0xff]  ;;  %v33_v3 = vld [vmem:[%s398_s1 + $0x18] sm:$0xff] }
   0x2   :  { %50 = vperm.xlu1 %252, %v32_v1   ;;  %40 = vperm.xlu0 %251, %v30_v2   ;;  %v31_v4 = vld [vmem:[%s398_s1 + $0x8] sm:$0xff]  ;;  %v34_v6 = vld [vmem:[%s398_s1 + $0x20] sm:$0xff]  ;;  %v37_v7 = vld [vmem:[%s398_s1 + $0x38] sm:$0xff] }
   0x3   :  { %v35_v5 = vld [vmem:[%s398_s1 + $0x28] sm:$0xff]  ;;  %v36_v8 = vld [vmem:[%s398_s1 + $0x30] sm:$0xff]  ;;  %v94_v10 = vld [vmem:[%s399_s2] sm:$0xff] }
   0x4   :  { %v95_v9 = vld [vmem:[%s399_s2 + $0x8] sm:$0xff]  ;;  %v97_v11 = vld [vmem:[%s399_s2 + $0x18] sm:$0xff]  ;;  %v96_v12 = vld [vmem:[%s399_s2 + $0x10] sm:$0xff] }
   0x5   :  { %v99_v13 = vld [vmem:[%s399_s2 + $0x28] sm:$0xff]  ;;  %v98_v14 = vld [vmem:[%s399_s2 + $0x20] sm:$0xff]  ;;  %v101_v15 = vld [vmem:[%s399_s2 + $0x38] sm:$0xff] }
   0x6   :  { %55 = vperm.xlu1 %252, %v33_v3   ;;  %45 = vperm.xlu0 %251, %v31_v4   ;;  %v100_v16 = vld [vmem:[%s399_s2 + $0x30] sm:$0xff]  ;;  %v14_v23 = vld [vmem:[%s400_s0] sm:$0xff]  ;;  %v15_v24 = vld [vmem:[%s400_s0 + $0x8] sm:$0xff] }
   0x7   :  { %v16_v25 = vld [vmem:[%s400_s0 + $0x10] sm:$0xff]  ;;  %v17_v26 = vld [vmem:[%s400_s0 + $0x18] sm:$0xff]  ;;  %v18_v37 = vld [vmem:[%s400_s0 + $0x20] sm:$0xff] }
   0x8   :  { %v20_v31 = vld [vmem:[%s400_s0 + $0x30] sm:$0xff]  ;;  %v21_v32 = vld [vmem:[%s400_s0 + $0x38] sm:$0xff]  ;;  %v19_v38 = vld [vmem:[%s400_s0 + $0x28] sm:$0xff] }
   0x9   :  { %v24_v45 = vld [vmem:[%s400_s0 + $0x50] sm:$0xff]  ;;  %v25_v52 = vld [vmem:[%s400_s0 + $0x58] sm:$0xff]  ;;  %v22_v53 = vld [vmem:[%s400_s0 + $0x40] sm:$0xff] }
   0xa   :  { %65 = vperm.xlu1 %252, %v35_v5   ;;  %60 = vperm.xlu0 %251, %v34_v6   ;;  %v23_v56 = vld [vmem:[%s400_s0 + $0x48] sm:$0xff]  ;;  %v28_v2 = vld [vmem:[%s400_s0 + $0x70] sm:$0xff]  ;;  %v29_v3 = vld [vmem:[%s400_s0 + $0x78] sm:$0xff] }
   0xe   :  { %75 = vperm.xlu1 %252, %v37_v7   ;;  %70 = vperm.xlu0 %251, %v36_v8   ;;  %v26_v7 = vld [vmem:[%s400_s0 + $0x60] sm:$0xff] }
  0x12   :  { %109 = vperm.xlu1 %252, %v95_v9   ;;  %104 = vperm.xlu0 %251, %v94_v10  }
  0x16   :  { %119 = vperm.xlu1 %252, %v97_v11   ;;  %114 = vperm.xlu0 %251, %v96_v12   ;;  %v27_v12 = vld [vmem:[%s400_s0 + $0x68] sm:$0xff] }
  0x1a   :  { %129 = vperm.xlu1 %252, %v99_v13   ;;  %124 = vperm.xlu0 %251, %v98_v14  }
  0x1e   :  { %139 = vperm.xlu1 %252, %v101_v15   ;;  %134 = vperm.xlu0 %251, %v100_v16  }
  0x81   :  { %v51_v17 = vpop.permute.xlu1 %50  ;;  %v41_v18 = vpop.permute.xlu0 %40 }
  0x82   :  { %v78_v29 = vmul.f32 %v41_v18, %v14_v23  ;;  %v79_v30 = vmul.f32 %v41_v18, %v15_v24  ;;  %v82_v50 = vmul.f32 %v51_v17, %v18_v37  ;;  %v83_v51 = vmul.f32 %v51_v17, %v19_v38 }
  0x85   :  { %v56_v19 = vpop.permute.xlu1 %55  ;;  %v46_v20 = vpop.permute.xlu0 %45 }
  0x86   :  { %v80_v33 = vmul.f32 %v46_v20, %v16_v25  ;;  %v81_v34 = vmul.f32 %v46_v20, %v17_v26  ;;  %v84_v43 = vmul.f32 %v56_v19, %v20_v31  ;;  %v85_v44 = vmul.f32 %v56_v19, %v21_v32 }
  0x89   :  { %v66_v21 = vpop.permute.xlu1 %65  ;;  %v61_v22 = vpop.permute.xlu0 %60 }
  0x8a   :  { %v88_v61 = vmul.f32 %v66_v21, %v24_v45  ;;  %v89_v0 = vmul.f32 %v66_v21, %v25_v52  ;;  %v86_v1 = vmul.f32 %v61_v22, %v22_v53  ;;  %v87_v6 = vmul.f32 %v61_v22, %v23_v56 }
  0x8d   :  { %v76_v27 = vpop.permute.xlu1 %75  ;;  %v334_v28 = vpop.permute.xlu0 %70 }
  0x8e   :  { %v92_v17 = vmul.f32 %v76_v27, %v28_v2  ;;  %v93_v18 = vmul.f32 %v76_v27, %v29_v3  ;;  %v90_v21 = vmul.f32 %v334_v28, %v26_v7  ;;  %v91_v25 = vmul.f32 %v334_v28, %v27_v12 }
  0x91   :  { %v110_v35 = vpop.permute.xlu1 %109  ;;  %v105_v36 = vpop.permute.xlu0 %104 }
  0x92   :  { %v144_v39 = vadd.f32 %v110_v35, %v80_v33  ;;  %v145_v40 = vadd.f32 %v110_v35, %v81_v34  ;;  %v142_v41 = vadd.f32 %v105_v36, %v78_v29  ;;  %v143_v42 = vadd.f32 %v105_v36, %v79_v30 }
  0x94   :  { %v160_v46 = vmax.f32 %v144_v39, 0.0  ;;  %v161_v47 = vmax.f32 %v145_v40, 0.0  ;;  %v158_v48 = vmax.f32 %v142_v41, 0.0  ;;  %v159_v49 = vmax.f32 %v143_v42, 0.0 }
  0x95   :  { %v120_v54 = vpop.permute.xlu1 %119  ;;  %v115_v55 = vpop.permute.xlu0 %114 }
  0x96   :  { %v243_v57 = vpack.c.bf16 %v161_v47, %v160_v46  ;;  %v242_v58 = vpack.c.bf16 %v159_v49, %v158_v48  ;;  %v148_v59 = vadd.f32 %v120_v54, %v84_v43  ;;  %v149_v60 = vadd.f32 %v120_v54, %v85_v44 }
  0x97   :  { %v146_v62 = vadd.f32 %v115_v55, %v82_v50  ;;  %v147_v63 = vadd.f32 %v115_v55, %v83_v51 }
  0x98   :  { %223 = vst [vmem:[%s401_s3 + $0x8] sm:$0xff] %v243_v57  ;;  %222 = vst [vmem:[%s401_s3] sm:$0xff] %v242_v58  ;;  %v164_v4 = vmax.f32 %v148_v59, 0.0  ;;  %v165_v5 = vmax.f32 %v149_v60, 0.0 }
  0x99   :  { %v162_v8 = vmax.f32 %v146_v62, 0.0  ;;  %v163_v9 = vmax.f32 %v147_v63, 0.0  ;;  %v130_v10 = vpop.permute.xlu1 %129  ;;  %v125_v11 = vpop.permute.xlu0 %124 }
  0x9a   :  { %v245_v13 = vpack.c.bf16 %v165_v5, %v164_v4  ;;  %v152_v14 = vadd.f32 %v130_v10, %v88_v61  ;;  %v153_v15 = vadd.f32 %v130_v10, %v89_v0  ;;  %v150_v16 = vadd.f32 %v125_v11, %v86_v1 }
  0x9b   :  { %v244_v19 = vpack.c.bf16 %v163_v9, %v162_v8  ;;  %v151_v20 = vadd.f32 %v125_v11, %v87_v6 }
  0x9c   :  { %225 = vst [vmem:[%s401_s3 + $0x18] sm:$0xff] %v245_v13  ;;  %v168_v22 = vmax.f32 %v152_v14, 0.0  ;;  %v169_v23 = vmax.f32 %v153_v15, 0.0  ;;  %v166_v24 = vmax.f32 %v150_v16, 0.0 }
  0x9d   :  { %224 = vst [vmem:[%s401_s3 + $0x10] sm:$0xff] %v244_v19  ;;  %v167_v26 = vmax.f32 %v151_v20, 0.0  ;;  %v140_v29 = vpop.permute.xlu1 %139  ;;  %v135_v27 = vpop.permute.xlu0 %134 }
  0x9e   :  { %v247_v30 = vpack.c.bf16 %v169_v23, %v168_v22  ;;  %v156_v31 = vadd.f32 %v140_v29, %v92_v17  ;;  %v157_v32 = vadd.f32 %v140_v29, %v93_v18  ;;  %v154_v33 = vadd.f32 %v135_v27, %v90_v21 }
  0x9f   :  { %v246_v34 = vpack.c.bf16 %v167_v26, %v166_v24  ;;  %v155_v35 = vadd.f32 %v135_v27, %v91_v25 }
  0xa0   :  { %227 = vst [vmem:[%s401_s3 + $0x28] sm:$0xff] %v247_v30  ;;  %v172_v36 = vmax.f32 %v156_v31, 0.0  ;;  %v173_v37 = vmax.f32 %v157_v32, 0.0  ;;  %v170_v28 = vmax.f32 %v154_v33, 0.0 }
  0xa1   :  { %226 = vst [vmem:[%s401_s3 + $0x20] sm:$0xff] %v246_v34  ;;  %v171_v38 = vmax.f32 %v155_v35, 0.0 }
  0xa2   :  { %v249_v39 = vpack.c.bf16 %v173_v37, %v172_v36 }
  0xa3   :  { %v248_v40 = vpack.c.bf16 %v171_v38, %v170_v28 }
  0xa4   :  { %229 = vst [vmem:[%s401_s3 + $0x38] sm:$0xff] %v249_v39 }
  0xa5   :  { %228 = vst [vmem:[%s401_s3 + $0x30] sm:$0xff] %v248_v40 }

// kernel: conv_initiation_classifier_forward.9
= control target key start
LH: loop header
LB: loop body
LE: loop exit
PB: predicated region body
PF: predicated region fallthrough
CT: control target
= control target key end

     0   :  { %vm24_vm0 = vcmask 7168   ;;  %s1719_s1 = inlined_call_operand.vmem [shape: bf16[512,162], index: 1, kind: input, shape index: {}]   ;;  %s1720_s0 = inlined_call_operand.vmem [shape: bf16[64,512], index: 0, kind: input, shape index: {}]   ;;  %s1721_s4 = inlined_call_operand.vmem [shape: f32[64,162], index: 4, kind: output, shape index: {0}]   ;;  %s1722_s2 = inlined_call_operand.vmem [shape: f32[64,1], index: 2, kind: input, shape index: {}]   ;;  %s1723_s3 = inlined_call_operand.vmem [shape: f32[64,1], index: 3, kind: input, shape index: {}]   ;;  %s1724_s5 = inlined_call_operand.vmem [shape: f32[64,1], index: 5, kind: output, shape index: {1}]   ;;  %s1725_s6 = inlined_call_operand.vmem [shape: f32[64,1], index: 6, kind: output, shape index: {2}]  }
   0x1   :  { %v1061_v0 = vld [vmem:[%s1719_s1 + $0x4] ss:$8 sps:$4 sm:$0xff]   ;;  %v1065_v2 = vld [vmem:[%s1719_s1] ss:$8 sps:$4 sm:$0xff]   ;;  %v1067_v4 = vld [vmem:[%s1719_s1 + $0x14] ss:$8 sps:$4 sm:$0xff]  }
   0x2   :  { %v1063_v1 = vld [vmem:[%s1719_s1 + $0x104] ss:$8 sps:$4 sm:$0xff]   ;;  %521 = vmatprep.subr.bf16.mxu1 %v1061_v0  ;;  %v1066_v3 = vld [vmem:[%s1719_s1 + $0x100] ss:$8 sps:$4 sm:$0xff]   ;;  %v1069_v5 = vld [vmem:[%s1719_s1 + $0x114] ss:$8 sps:$4 sm:$0xff]  }
   0x3   :  { %594 = vmatprep.subr.bf16.mxu0 %v1063_v1  ;;  %522 = vmatpush1.bf16.msra.mxu1 %v1065_v2  ;;  %v1071_v6 = vld [vmem:[%s1719_s1 + $0x10] ss:$8 sps:$4 sm:$0xff]   ;;  %v1073_v8 = vld [vmem:[%s1719_s1 + $0x24] ss:$8 sps:$4 sm:$0xff]   ;;  %v1077_v10 = vld [vmem:[%s1719_s1 + $0x20] ss:$8 sps:$4 sm:$0xff]  }
   0x4   :  { %595 = vmatpush1.bf16.msra.mxu0 %v1066_v3  ;;  %523 = vmatprep.subr.bf16.mxu1 %v1067_v4  ;;  %v1072_v7 = vld [vmem:[%s1719_s1 + $0x110] ss:$8 sps:$4 sm:$0xff]   ;;  %v1075_v9 = vld [vmem:[%s1719_s1 + $0x124] ss:$8 sps:$4 sm:$0xff]   ;;  %v1078_v11 = vld [vmem:[%s1719_s1 + $0x120] ss:$8 sps:$4 sm:$0xff]  }
   0x5   :  { %596 = vmatprep.subr.bf16.mxu0 %v1069_v5  ;;  %v1079_v12 = vld [vmem:[%s1719_s1 + $0x34] ss:$8 sps:$4 sm:$0xff]   ;;  %v1083_v14 = vld [vmem:[%s1719_s1 + $0x30] ss:$8 sps:$4 sm:$0xff]   ;;  %v1085_v16 = vld [vmem:[%s1719_s1 + $0x44] ss:$8 sps:$4 sm:$0xff]  }
   0x6   :  { %v1081_v13 = vld [vmem:[%s1719_s1 + $0x134] ss:$8 sps:$4 sm:$0xff]   ;;  %v1084_v15 = vld [vmem:[%s1719_s1 + $0x130] ss:$8 sps:$4 sm:$0xff]   ;;  %v1087_v17 = vld [vmem:[%s1719_s1 + $0x144] ss:$8 sps:$4 sm:$0xff]  }
   0x7   :  { %524 = vmatpush1.bf16.msra.mxu1 %v1071_v6  ;;  %v1089_v18 = vld [vmem:[%s1719_s1 + $0x40] ss:$8 sps:$4 sm:$0xff]   ;;  %v1091_v20 = vld [vmem:[%s1719_s1 + $0x54] ss:$8 sps:$4 sm:$0xff]   ;;  %v1095_v22 = vld [vmem:[%s1719_s1 + $0x50] ss:$8 sps:$4 sm:$0xff]  }
   0x8   :  { %597 = vmatpush1.bf16.msra.mxu0 %v1072_v7  ;;  %525 = vmatprep.subr.bf16.mxu1 %v1073_v8  ;;  %v1090_v19 = vld [vmem:[%s1719_s1 + $0x140] ss:$8 sps:$4 sm:$0xff]   ;;  %v1093_v21 = vld [vmem:[%s1719_s1 + $0x154] ss:$8 sps:$4 sm:$0xff]   ;;  %v1096_v23 = vld [vmem:[%s1719_s1 + $0x150] ss:$8 sps:$4 sm:$0xff]  }
   0x9   :  { %598 = vmatprep.subr.bf16.mxu0 %v1075_v9  ;;  %v1097_v24 = vld [vmem:[%s1719_s1 + $0x64] ss:$8 sps:$4 sm:$0xff]   ;;  %v1101_v26 = vld [vmem:[%s1719_s1 + $0x60] ss:$8 sps:$4 sm:$0xff]   ;;  %v1103_v28 = vld [vmem:[%s1719_s1 + $0x74] ss:$8 sps:$4 sm:$0xff]  }
   0xa   :  { %v1099_v25 = vld [vmem:[%s1719_s1 + $0x164] ss:$8 sps:$4 sm:$0xff]   ;;  %v1102_v27 = vld [vmem:[%s1719_s1 + $0x160] ss:$8 sps:$4 sm:$0xff]   ;;  %v1105_v29 = vld [vmem:[%s1719_s1 + $0x174] ss:$8 sps:$4 sm:$0xff]  }
   0xb   :  { %526 = vmatpush1.bf16.msra.mxu1 %v1077_v10  ;;  %v1107_v30 = vld [vmem:[%s1719_s1 + $0x70] ss:$8 sps:$4 sm:$0xff]   ;;  %v1109_v32 = vld [vmem:[%s1719_s1 + $0x84] ss:$8 sps:$4 sm:$0xff]   ;;  %v1113_v34 = vld [vmem:[%s1719_s1 + $0x80] ss:$8 sps:$4 sm:$0xff]  }
   0xc   :  { %599 = vmatpush1.bf16.msra.mxu0 %v1078_v11  ;;  %527 = vmatprep.subr.bf16.mxu1 %v1079_v12  ;;  %v1108_v31 = vld [vmem:[%s1719_s1 + $0x170] ss:$8 sps:$4 sm:$0xff]   ;;  %v1111_v33 = vld [vmem:[%s1719_s1 + $0x184] ss:$8 sps:$4 sm:$0xff]   ;;  %v1114_v35 = vld [vmem:[%s1719_s1 + $0x180] ss:$8 sps:$4 sm:$0xff]  }
   0xd   :  { %600 = vmatprep.subr.bf16.mxu0 %v1081_v13  ;;  %v1115_v36 = vld [vmem:[%s1719_s1 + $0x94] ss:$8 sps:$4 sm:$0xff]   ;;  %v1119_v38 = vld [vmem:[%s1719_s1 + $0x90] ss:$8 sps:$4 sm:$0xff]   ;;  %v1121_v40 = vld [vmem:[%s1719_s1 + $0xa4] ss:$8 sps:$4 sm:$0xff]  }
   0xe   :  { %v1117_v37 = vld [vmem:[%s1719_s1 + $0x194] ss:$8 sps:$4 sm:$0xff]   ;;  %v1120_v39 = vld [vmem:[%s1719_s1 + $0x190] ss:$8 sps:$4 sm:$0xff]   ;;  %v1123_v41 = vld [vmem:[%s1719_s1 + $0x1a4] ss:$8 sps:$4 sm:$0xff]  }
   0xf   :  { %528 = vmatpush1.bf16.msra.mxu1 %v1083_v14  ;;  %v1125_v42 = vld [vmem:[%s1719_s1 + $0xa0] ss:$8 sps:$4 sm:$0xff]   ;;  %v1127_v44 = vld [vmem:[%s1719_s1 + $0xb4] ss:$8 sps:$4 sm:$0xff]   ;;  %v1131_v46 = vld [vmem:[%s1719_s1 + $0xb0] ss:$8 sps:$4 sm:$0xff]  }
  0x10   :  { %601 = vmatpush1.bf16.msra.mxu0 %v1084_v15  ;;  %529 = vmatprep.subr.bf16.mxu1 %v1085_v16  ;;  %v1126_v43 = vld [vmem:[%s1719_s1 + $0x1a0] ss:$8 sps:$4 sm:$0xff]   ;;  %v1129_v45 = vld [vmem:[%s1719_s1 + $0x1b4] ss:$8 sps:$4 sm:$0xff]   ;;  %v1132_v47 = vld [vmem:[%s1719_s1 + $0x1b0] ss:$8 sps:$4 sm:$0xff]  }
  0x11   :  { %602 = vmatprep.subr.bf16.mxu0 %v1087_v17  ;;  %v1133_v48 = vld [vmem:[%s1719_s1 + $0xc4] ss:$8 sps:$4 sm:$0xff]   ;;  %v1137_v52 = vld [vmem:[%s1719_s1 + $0xc0] ss:$8 sps:$4 sm:$0xff]   ;;  %v1139_v54 = vld [vmem:[%s1719_s1 + $0xd4] ss:$8 sps:$4 sm:$0xff]   ;;  %v683_v17 = vlaneseq }
  0x12   :  { %v1159_v49 = vld [vmem:[%s1720_s0 + $0x4] ss:$16 sps:$4 sm:$0xff]   ;;  %v1162_v51 = vld [vmem:[%s1720_s0 + $0xc] ss:$16 sps:$4 sm:$0xff]   ;;  %v1138_v53 = vld [vmem:[%s1719_s1 + $0x1c0] ss:$8 sps:$4 sm:$0xff]  }
  0x13   :  { %530 = vmatpush1.bf16.msra.mxu1 %v1089_v18  ;;  %v1135_v50 = vld [vmem:[%s1719_s1 + $0x1c4] ss:$8 sps:$4 sm:$0xff]   ;;  %553 = vmatprep.mubr.bf16.mxu1 %v1159_v49  ;;  %v1141_v55 = vld [vmem:[%s1719_s1 + $0x1d4] ss:$8 sps:$4 sm:$0xff]   ;;  %v1143_v56 = vld [vmem:[%s1719_s1 + $0xd0] ss:$8 sps:$4 sm:$0xff]  }
  0x14   :  { %603 = vmatpush1.bf16.msra.mxu0 %v1090_v19  ;;  %531 = vmatprep.subr.bf16.mxu1 %v1091_v20  ;;  %v1144_v57 = vld [vmem:[%s1719_s1 + $0x1d0] ss:$8 sps:$4 sm:$0xff]   ;;  %v1145_v58 = vld [vmem:[%s1719_s1 + $0xe4] ss:$8 sps:$4 sm:$0xff]   ;;  %v1149_v60 = vld [vmem:[%s1719_s1 + $0xe0] ss:$8 sps:$4 sm:$0xff]  }
  0x15   :  { %604 = vmatprep.subr.bf16.mxu0 %v1093_v21  ;;  %626 = vmatprep.mubr.bf16.mxu0 %v1162_v51  ;;  %v1147_v59 = vld [vmem:[%s1719_s1 + $0x1e4] ss:$8 sps:$4 sm:$0xff]   ;;  %v1150_v61 = vld [vmem:[%s1719_s1 + $0x1e0] ss:$8 sps:$4 sm:$0xff]   ;;  %v1151_v62 = vld [vmem:[%s1719_s1 + $0xf4] ss:$8 sps:$4 sm:$0xff]  }
  0x16   :  { %v1153_v63 = vld [vmem:[%s1719_s1 + $0x1f4] ss:$8 sps:$4 sm:$0xff]   ;;  %v1155_v0 = vld [vmem:[%s1719_s1 + $0xf0] ss:$8 sps:$4 sm:$0xff]   ;;  %v1197_v16 = vmov 0.0   ;;  %v684_v18 = vand.u32 127, %v683_v17 }
  0x17   :  { %532 = vmatpush1.bf16.msra.mxu1 %v1095_v22  ;;  %v1156_v1 = vld [vmem:[%s1719_s1 + $0x1f0] ss:$8 sps:$4 sm:$0xff]   ;;  %v1163_v4 = vld [vmem:[%s1720_s0 + $0x24] ss:$16 sps:$4 sm:$0xff]   ;;  %v1165_v5 = vld [vmem:[%s1720_s0 + $0x2c] ss:$16 sps:$4 sm:$0xff]  }
  0x18   :  { %605 = vmatpush1.bf16.msra.mxu0 %v1096_v23  ;;  %533 = vmatprep.subr.bf16.mxu1 %v1097_v24  ;;  %v1157_v2 = vld [vmem:[%s1720_s0] ss:$16 sps:$4 sm:$0xff]   ;;  %v1160_v3 = vld [vmem:[%s1720_s0 + $0x8] ss:$16 sps:$4 sm:$0xff]   ;;  %v1169_v8 = vld [vmem:[%s1720_s0 + $0x44] ss:$16 sps:$4 sm:$0xff]  }
  0x19   :  { %606 = vmatprep.subr.bf16.mxu0 %v1099_v25  ;;  %v1167_v6 = vld [vmem:[%s1720_s0 + $0x20] ss:$16 sps:$4 sm:$0xff]   ;;  %v1168_v7 = vld [vmem:[%s1720_s0 + $0x28] ss:$16 sps:$4 sm:$0xff]   ;;  %v1171_v9 = vld [vmem:[%s1720_s0 + $0x4c] ss:$16 sps:$4 sm:$0xff]  }
  0x1a   :  { %v1173_v10 = vld [vmem:[%s1720_s0 + $0x40] ss:$16 sps:$4 sm:$0xff]   ;;  %v1174_v11 = vld [vmem:[%s1720_s0 + $0x48] ss:$16 sps:$4 sm:$0xff]   ;;  %v1175_v12 = vld [vmem:[%s1720_s0 + $0x64] ss:$16 sps:$4 sm:$0xff]  }
  0x1b   :  { %534 = vmatpush1.bf16.msra.mxu1 %v1101_v26  ;;  %v1177_v13 = vld [vmem:[%s1720_s0 + $0x6c] ss:$16 sps:$4 sm:$0xff]   ;;  %v1179_v14 = vld [vmem:[%s1720_s0 + $0x60] ss:$16 sps:$4 sm:$0xff]   ;;  %v1180_v15 = vld [vmem:[%s1720_s0 + $0x68] ss:$16 sps:$4 sm:$0xff]  }
  0x1c   :  { %607 = vmatpush1.bf16.msra.mxu0 %v1102_v27  ;;  %535 = vmatprep.subr.bf16.mxu1 %v1103_v28  ;;  %25 = vst.msk [vmem:[#allocation2] sm:$0xff] %vm24_vm0, %v1197_v16  ;;  %26 = vst.msk [vmem:[#allocation2 + $0x8] sm:$0xff] %vm24_vm0, %v1197_v16  ;;  %v1489_v19 = vadd.s32 128, %v684_v18 }
  0x1d   :  { %608 = vmatprep.subr.bf16.mxu0 %v1105_v29  ;;  %27 = vst.msk [vmem:[#allocation2 + $0x10] sm:$0xff] %vm24_vm0, %v1197_v16  ;;  %28 = vst.msk [vmem:[#allocation2 + $0x18] sm:$0xff] %vm24_vm0, %v1197_v16 }
  0x1e   :  { %29 = vst.msk [vmem:[#allocation2 + $0x20] sm:$0xff] %vm24_vm0, %v1197_v16  ;;  %30 = vst.msk [vmem:[#allocation2 + $0x28] sm:$0xff] %vm24_vm0, %v1197_v16  ;;  %vm691_vm1 = vcmp.lt.s32.totalorder %v1489_v19, 162 }
  0x1f   :  { %536 = vmatpush1.bf16.msra.mxu1 %v1107_v30  ;;  %31 = vst.msk [vmem:[#allocation2 + $0x30] sm:$0xff] %vm24_vm0, %v1197_v16  ;;  %32 = vst.msk [vmem:[#allocation2 + $0x38] sm:$0xff] %vm24_vm0, %v1197_v16 }
  0x20   :  { %609 = vmatpush1.bf16.msra.mxu0 %v1108_v31  ;;  %537 = vmatprep.subr.bf16.mxu1 %v1109_v32  ;;  %33 = vst.msk [vmem:[#allocation3] sm:$0xff] %vm24_vm0, %v1197_v16  ;;  %34 = vst.msk [vmem:[#allocation3 + $0x8] sm:$0xff] %vm24_vm0, %v1197_v16 }
  0x21   :  { %610 = vmatprep.subr.bf16.mxu0 %v1111_v33  ;;  %35 = vst.msk [vmem:[#allocation3 + $0x10] sm:$0xff] %vm24_vm0, %v1197_v16  ;;  %36 = vst.msk [vmem:[#allocation3 + $0x18] sm:$0xff] %vm24_vm0, %v1197_v16 }
  0x22   :  { %37 = vst.msk [vmem:[#allocation3 + $0x20] sm:$0xff] %vm24_vm0, %v1197_v16  ;;  %38 = vst.msk [vmem:[#allocation3 + $0x28] sm:$0xff] %vm24_vm0, %v1197_v16 }
  0x23   :  { %538 = vmatpush1.bf16.msra.mxu1 %v1113_v34  ;;  %39 = vst.msk [vmem:[#allocation3 + $0x30] sm:$0xff] %vm24_vm0, %v1197_v16  ;;  %40 = vst.msk [vmem:[#allocation3 + $0x38] sm:$0xff] %vm24_vm0, %v1197_v16 }
  0x24   :  { %611 = vmatpush1.bf16.msra.mxu0 %v1114_v35  ;;  %539 = vmatprep.subr.bf16.mxu1 %v1115_v36 }
  0x25   :  { %612 = vmatprep.subr.bf16.mxu0 %v1117_v37 }
  0x27   :  { %540 = vmatpush1.bf16.msra.mxu1 %v1119_v38 }
  0x28   :  { %613 = vmatpush1.bf16.msra.mxu0 %v1120_v39  ;;  %541 = vmatprep.subr.bf16.mxu1 %v1121_v40 }
  0x29   :  { %614 = vmatprep.subr.bf16.mxu0 %v1123_v41 }
  0x2b   :  { %542 = vmatpush1.bf16.msra.mxu1 %v1125_v42 }
  0x2c   :  { %615 = vmatpush1.bf16.msra.mxu0 %v1126_v43  ;;  %543 = vmatprep.subr.bf16.mxu1 %v1127_v44 }
  0x2d   :  { %616 = vmatprep.subr.bf16.mxu0 %v1129_v45 }
  0x2f   :  { %544 = vmatpush1.bf16.msra.mxu1 %v1131_v46 }
  0x30   :  { %617 = vmatpush1.bf16.msra.mxu0 %v1132_v47  ;;  %545 = vmatprep.subr.bf16.mxu1 %v1133_v48 }
  0x31   :  { %618 = vmatprep.subr.bf16.mxu0 %v1135_v50 }
  0x33   :  { %546 = vmatpush1.bf16.msra.mxu1 %v1137_v52 }
  0x34   :  { %619 = vmatpush1.bf16.msra.mxu0 %v1138_v53  ;;  %547 = vmatprep.subr.bf16.mxu1 %v1139_v54 }
  0x35   :  { %620 = vmatprep.subr.bf16.mxu0 %v1141_v55 }
  0x37   :  { %548 = vmatpush1.bf16.msra.mxu1 %v1143_v56 }
  0x38   :  { %621 = vmatpush1.bf16.msra.mxu0 %v1144_v57  ;;  %549 = vmatprep.subr.bf16.mxu1 %v1145_v58 }
  0x39   :  { %622 = vmatprep.subr.bf16.mxu0 %v1147_v59 }
  0x3b   :  { %550 = vmatpush1.bf16.msra.mxu1 %v1149_v60 }
  0x3c   :  { %623 = vmatpush1.bf16.msra.mxu0 %v1150_v61  ;;  %551 = vmatprep.subr.bf16.mxu1 %v1151_v62 }
  0x3d   :  { %624 = vmatprep.subr.bf16.mxu0 %v1153_v63 }
  0x3f   :  { %552 = vmatpush1.bf16.msra.mxu1 %v1155_v0 }
  0x40   :  { %625 = vmatpush1.bf16.msra.mxu0 %v1156_v1 }
  0x42   :  { %554 = vmatmul.mubr.bf16.vlgmr.msra.gmra.mrb[0].mxu1 %v1157_v2 }
  0x43   :  { %627 = vmatmul.mubr.bf16.vlgmr.msra.gmra.mrb[0].mxu0 %v1160_v3  ;;  %563 = vmatprep.mubr.bf16.mxu1 %v1163_v4 }
  0x44   :  { %636 = vmatprep.mubr.bf16.mxu0 %v1165_v5 }
  0x4a   :  { %564 = vmatmul.mubr.bf16.gmra.mrb[4].mxu1 %v1167_v6 }
  0x4b   :  { %637 = vmatmul.mubr.bf16.gmra.mrb[4].mxu0 %v1168_v7  ;;  %573 = vmatprep.mubr.bf16.mxu1 %v1169_v8 }
  0x4c   :  { %646 = vmatprep.mubr.bf16.mxu0 %v1171_v9 }
  0x52   :  { %574 = vmatmul.mubr.bf16.gmra.mrb[8].mxu1 %v1173_v10 }
  0x53   :  { %647 = vmatmul.mubr.bf16.gmra.mrb[8].mxu0 %v1174_v11  ;;  %583 = vmatprep.mubr.bf16.mxu1 %v1175_v12 }
  0x54   :  { %656 = vmatprep.mubr.bf16.mxu0 %v1177_v13 }
  0x5a   :  { %584 = vmatmul.mubr.bf16.gmra.mrb[12].mxu1 %v1179_v14 }
  0x5b   :  { %657 = vmatmul.mubr.bf16.gmra.mrb[12].mxu0 %v1180_v15 }
 0x115   :  { %v555_v20 = vpop.f32.mrb[0].mxu1 }
 0x116   :  { %v628_v21 = vpop.f32.mrb[0].mxu0  ;;  %v557_v23 = vpop.f32.mrb[1].mxu1 }
 0x117   :  { %v629_v22 = vadd.f32 %v628_v21, %v555_v20  ;;  %v630_v24 = vpop.f32.mrb[1].mxu0  ;;  %v559_v26 = vpop.f32.mrb[2].mxu1 }
 0x118   :  { %v631_v25 = vadd.f32 %v630_v24, %v557_v23  ;;  %v632_v27 = vpop.f32.mrb[2].mxu0  ;;  %v561_v29 = vpop.f32.mrb[3].mxu1 }
 0x119   :  { %667 = vst [vmem:[%s1721_s4] sm:$0xff] %v629_v22  ;;  %v633_v28 = vadd.f32 %v632_v27, %v559_v26  ;;  %v634_v30 = vpop.f32.mrb[3].mxu0  ;;  %v765_v35 = vmul.f32 %v629_v22, %v629_v22 }
 0x11a   :  { %668 = vst [vmem:[%s1721_s4 + $0x8] sm:$0xff] %v631_v25  ;;  %v635_v31 = vadd.f32 %v634_v30, %v561_v29  ;;  %v693_v32 = vsel %vm691_vm1, %v631_v25, 0.0 }
 0x11b   :  { %669 = vst [vmem:[%s1721_s4 + $0x10] sm:$0xff] %v633_v28  ;;  %v716_v33 = vadd.f32 %v693_v32, %v629_v22  ;;  %v766_v34 = vmul.f32 %v693_v32, %v693_v32  ;;  %v767_v37 = vmul.f32 %v633_v28, %v633_v28 }
 0x11c   :  { %670 = vst [vmem:[%s1721_s4 + $0x18] sm:$0xff] %v635_v31  ;;  %v695_v36 = vsel %vm691_vm1, %v635_v31, 0.0 }
 0x11d   :  { %717 = vadd.xlane.f32.xlu0 %v716_v33  ;;  %v768_v38 = vmul.f32 %v695_v36, %v695_v36  ;;  %v719_v39 = vadd.f32 %v695_v36, %v633_v28  ;;  %v781_v40 = vadd.f32 %v766_v34, %v765_v35  ;;  %v565_v41 = vpop.f32.mrb[4].mxu1 }
 0x11e   :  { %v638_v42 = vpop.f32.mrb[4].mxu0  ;;  %v567_v44 = vpop.f32.mrb[5].mxu1 }
 0x11f   :  { %v639_v43 = vadd.f32 %v638_v42, %v565_v41  ;;  %v640_v45 = vpop.f32.mrb[5].mxu0  ;;  %v784_v46 = vadd.f32 %v768_v38, %v767_v37  ;;  %v569_v48 = vpop.f32.mrb[6].mxu1 }
 0x120   :  { %v641_v47 = vadd.f32 %v640_v45, %v567_v44  ;;  %v642_v49 = vpop.f32.mrb[6].mxu0  ;;  %v571_v52 = vpop.f32.mrb[7].mxu1  ;;  %v708_v45 = vld [vmem:[#allocation2] sm:$0xff] }
 0x121   :  { %671 = vst [vmem:[%s1721_s4 + $0x20] sm:$0xff] %v639_v43  ;;  %v643_v50 = vadd.f32 %v642_v49, %v569_v48  ;;  %v644_v51 = vpop.f32.mrb[7].mxu0  ;;  %785 = vadd.xlane.f32.xlu1 %v784_v46  ;;  %720 = vadd.xlane.f32.xlu0 %v719_v39  ;;  %v769_v56 = vmul.f32 %v639_v43, %v639_v43  ;;  %v758_v48 = vld [vmem:[#allocation3 + $0x8] sm:$0xff] }
 0x122   :  { %672 = vst [vmem:[%s1721_s4 + $0x28] sm:$0xff] %v641_v47  ;;  %v645_v53 = vadd.f32 %v644_v51, %v571_v52  ;;  %v697_v54 = vsel %vm691_vm1, %v641_v47, 0.0  ;;  %v709_v49 = vld [vmem:[#allocation2 + $0x8] sm:$0xff] }
 0x123   :  { %673 = vst [vmem:[%s1721_s4 + $0x30] sm:$0xff] %v643_v50  ;;  %v722_v55 = vadd.f32 %v697_v54, %v639_v43  ;;  %v770_v57 = vmul.f32 %v697_v54, %v697_v54  ;;  %v771_v59 = vmul.f32 %v643_v50, %v643_v50  ;;  %v710_v54 = vld [vmem:[#allocation2 + $0x10] sm:$0xff] }
 0x124   :  { %674 = vst [vmem:[%s1721_s4 + $0x38] sm:$0xff] %v645_v53  ;;  %v699_v58 = vsel %vm691_vm1, %v645_v53, 0.0  ;;  %v757_v53 = vld [vmem:[#allocation3] sm:$0xff] }
 0x125   :  { %782 = vadd.xlane.f32.xlu0 %v781_v40  ;;  %723 = vadd.xlane.f32.xlu1 %v722_v55  ;;  %v787_v60 = vadd.f32 %v770_v57, %v769_v56  ;;  %v725_v61 = vadd.f32 %v699_v58, %v643_v50  ;;  %v772_v62 = vmul.f32 %v699_v58, %v699_v58  ;;  %v575_v63 = vpop.f32.mrb[8].mxu1 }
 0x126   :  { %v648_v0 = vpop.f32.mrb[8].mxu0  ;;  %v577_v2 = vpop.f32.mrb[9].mxu1 }
 0x127   :  { %v649_v1 = vadd.f32 %v648_v0, %v575_v63  ;;  %v650_v3 = vpop.f32.mrb[9].mxu0  ;;  %v790_v4 = vadd.f32 %v772_v62, %v771_v59  ;;  %v579_v6 = vpop.f32.mrb[10].mxu1  ;;  %v759_v59 = vld [vmem:[#allocation3 + $0x10] sm:$0xff] }
 0x128   :  { %v651_v5 = vadd.f32 %v650_v3, %v577_v2  ;;  %v652_v7 = vpop.f32.mrb[10].mxu0  ;;  %v581_v10 = vpop.f32.mrb[11].mxu1  ;;  %v760_v2 = vld [vmem:[#allocation3 + $0x18] sm:$0xff] }
 0x129   :  { %675 = vst [vmem:[%s1721_s4 + $0x40] sm:$0xff] %v649_v1  ;;  %v653_v8 = vadd.f32 %v652_v7, %v579_v6  ;;  %v654_v9 = vpop.f32.mrb[11].mxu0  ;;  %788 = vadd.xlane.f32.xlu0 %v787_v60  ;;  %726 = vadd.xlane.f32.xlu1 %v725_v61  ;;  %v773_v11 = vmul.f32 %v649_v1, %v649_v1  ;;  %v711_v60 = vld [vmem:[#allocation2 + $0x18] sm:$0xff] }
 0x12a   :  { %676 = vst [vmem:[%s1721_s4 + $0x48] sm:$0xff] %v651_v5  ;;  %v655_v12 = vadd.f32 %v654_v9, %v581_v10  ;;  %v701_v13 = vsel %vm691_vm1, %v651_v5, 0.0  ;;  %v712_v5 = vld [vmem:[#allocation2 + $0x20] sm:$0xff] }
 0x12b   :  { %677 = vst [vmem:[%s1721_s4 + $0x50] sm:$0xff] %v653_v8  ;;  %v728_v14 = vadd.f32 %v701_v13, %v649_v1  ;;  %v774_v15 = vmul.f32 %v701_v13, %v701_v13  ;;  %v775_v17 = vmul.f32 %v653_v8, %v653_v8 }
 0x12c   :  { %678 = vst [vmem:[%s1721_s4 + $0x58] sm:$0xff] %v655_v12  ;;  %v703_v16 = vsel %vm691_vm1, %v655_v12, 0.0 }
 0x12d   :  { %791 = vadd.xlane.f32.xlu1 %v790_v4  ;;  %729 = vadd.xlane.f32.xlu0 %v728_v14  ;;  %v793_v18 = vadd.f32 %v774_v15, %v773_v11  ;;  %v731_v20 = vadd.f32 %v703_v16, %v653_v8  ;;  %v776_v21 = vmul.f32 %v703_v16, %v703_v16  ;;  %v585_v22 = vpop.f32.mrb[12].mxu1  ;;  %v761_v16 = vld [vmem:[#allocation3 + $0x20] sm:$0xff] }
 0x12e   :  { %v658_v23 = vpop.f32.mrb[12].mxu0  ;;  %v587_v25 = vpop.f32.mrb[13].mxu1 }
 0x12f   :  { %v659_v24 = vadd.f32 %v658_v23, %v585_v22  ;;  %v660_v26 = vpop.f32.mrb[13].mxu0  ;;  %v796_v27 = vadd.f32 %v776_v21, %v775_v17  ;;  %v589_v29 = vpop.f32.mrb[14].mxu1  ;;  %v713_v22 = vld [vmem:[#allocation2 + $0x28] sm:$0xff] }
 0x130   :  { %v661_v28 = vadd.f32 %v660_v26, %v587_v25  ;;  %v662_v30 = vpop.f32.mrb[14].mxu0  ;;  %v591_v33 = vpop.f32.mrb[15].mxu1 }
 0x131   :  { %679 = vst [vmem:[%s1721_s4 + $0x60] sm:$0xff] %v659_v24  ;;  %v663_v31 = vadd.f32 %v662_v30, %v589_v29  ;;  %v664_v32 = vpop.f32.mrb[15].mxu0  ;;  %794 = vadd.xlane.f32.xlu0 %v793_v18  ;;  %732 = vadd.xlane.f32.xlu1 %v731_v20  ;;  %v777_v34 = vmul.f32 %v659_v24, %v659_v24 }
 0x132   :  { %680 = vst [vmem:[%s1721_s4 + $0x68] sm:$0xff] %v661_v28  ;;  %v665_v35 = vadd.f32 %v664_v32, %v591_v33  ;;  %v705_v36 = vsel %vm691_vm1, %v661_v28, 0.0 }
 0x133   :  { %681 = vst [vmem:[%s1721_s4 + $0x70] sm:$0xff] %v663_v31  ;;  %v734_v37 = vadd.f32 %v705_v36, %v659_v24  ;;  %v778_v38 = vmul.f32 %v705_v36, %v705_v36  ;;  %v779_v40 = vmul.f32 %v663_v31, %v663_v31  ;;  %v714_v36 = vld [vmem:[#allocation2 + $0x30] sm:$0xff] }
 0x134   :  { %682 = vst [vmem:[%s1721_s4 + $0x78] sm:$0xff] %v665_v35  ;;  %v707_v39 = vsel %vm691_vm1, %v665_v35, 0.0 }
 0x135   :  { %797 = vadd.xlane.f32.xlu1 %v796_v27  ;;  %735 = vadd.xlane.f32.xlu0 %v734_v37  ;;  %v799_v41 = vadd.f32 %v778_v38, %v777_v34  ;;  %v737_v42 = vadd.f32 %v707_v39, %v663_v31  ;;  %v780_v43 = vmul.f32 %v707_v39, %v707_v39  ;;  %v762_v31 = vld [vmem:[#allocation3 + $0x28] sm:$0xff] }
 0x137   :  { %v802_v44 = vadd.f32 %v780_v43, %v779_v40 }
 0x139   :  { %800 = vadd.xlane.f32.xlu0 %v799_v41  ;;  %738 = vadd.xlane.f32.xlu1 %v737_v42 }
 0x13d   :  { %803 = vadd.xlane.f32.xlu1 %v802_v44 }
 0x1aa   :  { %v718_v46 = vpop.xlane.xlu0 %717 }
 0x1ab   :  { %v740_v47 = vadd.f32 %v718_v46, %v708_v45 }
 0x1ad   :  { %749 = vst.msk [vmem:[#allocation2] sm:$0xff] %vm24_vm0, %v740_v47  ;;  %v763_v47 = vld [vmem:[#allocation3 + $0x30] sm:$0xff] }
 0x1ae   :  { %v786_v50 = vpop.xlane.xlu1 %785  ;;  %v721_v19 = vpop.xlane.xlu0 %720 }
 0x1af   :  { %v806_v51 = vadd.f32 %v786_v50, %v758_v48  ;;  %v741_v52 = vadd.f32 %v721_v19, %v709_v49  ;;  %v715_v19 = vld [vmem:[#allocation2 + $0x38] sm:$0xff] }
 0x1b1   :  { %814 = vst.msk [vmem:[#allocation3 + $0x8] sm:$0xff] %vm24_vm0, %v806_v51  ;;  %750 = vst.msk [vmem:[#allocation2 + $0x8] sm:$0xff] %vm24_vm0, %v741_v52 }
 0x1b2   :  { %v783_v55 = vpop.xlane.xlu0 %782  ;;  %v724_v56 = vpop.xlane.xlu1 %723 }
 0x1b3   :  { %v805_v57 = vadd.f32 %v783_v55, %v757_v53  ;;  %v742_v58 = vadd.f32 %v724_v56, %v710_v54 }
 0x1b4   :  { %v824_v61 = vld [vmem:[#allocation2] sm:$0xff] }
 0x1b5   :  { %813 = vst.msk [vmem:[#allocation3] sm:$0xff] %vm24_vm0, %v805_v57  ;;  %751 = vst.msk [vmem:[#allocation2 + $0x10] sm:$0xff] %vm24_vm0, %v742_v58  ;;  %v1561_v6 = vmul.f32 0.0061728396, %v824_v61  ;;  %v764_v58 = vld [vmem:[#allocation3 + $0x38] sm:$0xff] }
 0x1b6   :  { %v789_v62 = vpop.xlane.xlu0 %788  ;;  %v727_v63 = vpop.xlane.xlu1 %726 }
 0x1b7   :  { %v807_v0 = vadd.f32 %v789_v62, %v759_v59  ;;  %v743_v1 = vadd.f32 %v727_v63, %v711_v60  ;;  %v856_v17 = vmul.f32 %v1561_v6, %v1561_v6 }
 0x1b8   :  { %v841_v3 = vld [vmem:[#allocation3 + $0x8] sm:$0xff] }
 0x1b9   :  { %v825_v4 = vld [vmem:[#allocation2 + $0x8] sm:$0xff]  ;;  %815 = vst.msk [vmem:[#allocation3 + $0x10] sm:$0xff] %vm24_vm0, %v807_v0  ;;  %752 = vst.msk [vmem:[#allocation2 + $0x18] sm:$0xff] %vm24_vm0, %v743_v1  ;;  %v849_v10 = vmul.f32 0.0061728396, %v841_v3 }
 0x1ba   :  { %v1563_v7 = vmul.f32 0.0061728396, %v825_v4  ;;  %v792_v8 = vpop.xlane.xlu1 %791  ;;  %v730_v9 = vpop.xlane.xlu0 %729  ;;  %v881_v1 = vld [vmem:[%s1722_s2 + $0x8] sm:$0xff] }
 0x1bb   :  { %v808_v12 = vadd.f32 %v792_v8, %v760_v2  ;;  %v744_v13 = vadd.f32 %v730_v9, %v712_v5  ;;  %v880_v9 = vld [vmem:[%s1722_s2] sm:$0xff] }
 0x1bc   :  { %v857_v11 = vmul.f32 %v1563_v7, %v1563_v7  ;;  %v840_v14 = vld [vmem:[#allocation3] sm:$0xff]  ;;  %v826_v15 = vld [vmem:[#allocation2 + $0x10] sm:$0xff] }
 0x1bd   :  { %v848_v20 = vmul.f32 0.0061728396, %v840_v14  ;;  %v1571_v21 = vmul.f32 0.0061728396, %v826_v15  ;;  %816 = vst.msk [vmem:[#allocation3 + $0x18] sm:$0xff] %vm24_vm0, %v808_v12  ;;  %753 = vst.msk [vmem:[#allocation2 + $0x20] sm:$0xff] %vm24_vm0, %v744_v13 }
 0x1be   :  { %v865_v18 = vsub.f32 %v849_v10, %v857_v11  ;;  %v795_v23 = vpop.xlane.xlu0 %794  ;;  %v733_v24 = vpop.xlane.xlu1 %732 }
 0x1bf   :  { %v864_v26 = vsub.f32 %v848_v20, %v856_v17  ;;  %v809_v27 = vadd.f32 %v795_v23, %v761_v16  ;;  %v745_v30 = vadd.f32 %v733_v24, %v713_v22  ;;  %v858_v34 = vmul.f32 %v1571_v21, %v1571_v21  ;;  %v921_v17 = vld [vmem:[%s1723_s3 + $0x8] sm:$0xff] }
 0x1c0   :  { %v873_v25 = vmax.f32 %v865_v18, 0.0  ;;  %v842_v28 = vld [vmem:[#allocation3 + $0x10] sm:$0xff]  ;;  %v827_v29 = vld [vmem:[#allocation2 + $0x18] sm:$0xff] }
 0x1c1   :  { %v872_v33 = vmax.f32 %v864_v26, 0.0  ;;  %v850_v35 = vmul.f32 0.0061728396, %v842_v28  ;;  %817 = vst.msk [vmem:[#allocation3 + $0x20] sm:$0xff] %vm24_vm0, %v809_v27  ;;  %v1578_v37 = vmul.f32 0.0061728396, %v827_v29 }
 0x1c2   :  { %v889_v32 = vadd.f32 1e-05, %v873_v25  ;;  %754 = vst.msk [vmem:[#allocation2 + $0x28] sm:$0xff] %vm24_vm0, %v745_v30  ;;  %v798_v38 = vpop.xlane.xlu1 %797  ;;  %v736_v39 = vpop.xlane.xlu0 %735  ;;  %v920_v25 = vld [vmem:[%s1723_s3] sm:$0xff]  ;;  %v882_v26 = vld [vmem:[%s1722_s2 + $0x10] sm:$0xff] }
 0x1c3   :  { %v888_v40 = vadd.f32 1e-05, %v872_v33  ;;  %v866_v41 = vsub.f32 %v850_v35, %v858_v34  ;;  %v810_v42 = vadd.f32 %v798_v38, %v762_v31  ;;  %v859_v43 = vmul.f32 %v1578_v37, %v1578_v37 }
 0x1c4   :  { %1181 = vrsqrt.f32 %v889_v32  ;;  %v843_v44 = vld [vmem:[#allocation3 + $0x18] sm:$0xff]  ;;  %v828_v45 = vld [vmem:[#allocation2 + $0x20] sm:$0xff]  ;;  %v746_v46 = vadd.f32 %v736_v39, %v714_v36 }
 0x1c5   :  { %1183 = vrsqrt.f32 %v888_v40  ;;  %v874_v48 = vmax.f32 %v866_v41, 0.0  ;;  %v851_v49 = vmul.f32 0.0061728396, %v843_v44  ;;  %v1583_v50 = vmul.f32 0.0061728396, %v828_v45  ;;  %818 = vst.msk [vmem:[#allocation3 + $0x28] sm:$0xff] %vm24_vm0, %v810_v42 }
 0x1c6   :  { %755 = vst.msk [vmem:[#allocation2 + $0x30] sm:$0xff] %vm24_vm0, %v746_v46  ;;  %v801_v51 = vpop.xlane.xlu0 %800  ;;  %v739_v52 = vpop.xlane.xlu1 %738  ;;  %v922_v40 = vld [vmem:[%s1723_s3 + $0x10] sm:$0xff] }
 0x1c7   :  { %v890_v53 = vadd.f32 1e-05, %v874_v48  ;;  %v867_v54 = vsub.f32 %v851_v49, %v859_v43  ;;  %v811_v55 = vadd.f32 %v801_v51, %v763_v47  ;;  %v747_v57 = vadd.f32 %v739_v52, %v715_v19  ;;  %v923_v19 = vld [vmem:[%s1723_s3 + $0x18] sm:$0xff]  ;;  %v884_v51 = vld [vmem:[%s1722_s2 + $0x20] sm:$0xff] }
 0x1c8   :  { %v844_v56 = vld [vmem:[#allocation3 + $0x20] sm:$0xff]  ;;  %v860_v60 = vmul.f32 %v1583_v50, %v1583_v50 }
 0x1c9   :  { %1185 = vrsqrt.f32 %v890_v53  ;;  %v875_v59 = vmax.f32 %v867_v54, 0.0  ;;  %v852_v61 = vmul.f32 0.0061728396, %v844_v56  ;;  %v829_v62 = vld [vmem:[#allocation2 + $0x28] sm:$0xff]  ;;  %819 = vst.msk [vmem:[#allocation3 + $0x30] sm:$0xff] %vm24_vm0, %v811_v55  ;;  %756 = vst.msk [vmem:[#allocation2 + $0x38] sm:$0xff] %vm24_vm0, %v747_v57 }
 0x1ca   :  { %v1590_v63 = vmul.f32 0.0061728396, %v829_v62  ;;  %v804_v0 = vpop.xlane.xlu1 %803  ;;  %v924_v57 = vld [vmem:[%s1723_s3 + $0x20] sm:$0xff]  ;;  %v925_v62 = vld [vmem:[%s1723_s3 + $0x28] sm:$0xff] }
 0x1cb   :  { %v891_v2 = vadd.f32 1e-05, %v875_v59  ;;  %v868_v3 = vsub.f32 %v852_v61, %v860_v60  ;;  %v812_v4 = vadd.f32 %v804_v0, %v764_v58  ;;  %v885_v58 = vld [vmem:[%s1722_s2 + $0x28] sm:$0xff]  ;;  %v886_v0 = vld [vmem:[%s1722_s2 + $0x30] sm:$0xff] }
 0x1cc   :  { %v845_v5 = vld [vmem:[#allocation3 + $0x28] sm:$0xff]  ;;  %v861_v11 = vmul.f32 %v1590_v63, %v1590_v63 }
 0x1cd   :  { %1187 = vrsqrt.f32 %v891_v2  ;;  %v876_v10 = vmax.f32 %v868_v3, 0.0  ;;  %v853_v12 = vmul.f32 0.0061728396, %v845_v5  ;;  %v830_v13 = vld [vmem:[#allocation2 + $0x30] sm:$0xff]  ;;  %820 = vst.msk [vmem:[#allocation3 + $0x38] sm:$0xff] %vm24_vm0, %v812_v4  ;;  %v887_v5 = vld [vmem:[%s1722_s2 + $0x38] sm:$0xff] }
 0x1ce   :  { %v1182_v8 = vpop.eup %1181  ;;  %v1602_v15 = vmul.f32 0.0061728396, %v830_v13  ;;  %v926_v4 = vld [vmem:[%s1723_s3 + $0x30] sm:$0xff] }
 0x1cf   :  { %v905_v14 = vmul.f32 %v1182_v8, %v881_v1  ;;  %v1184_v16 = vpop.eup %1183  ;;  %v892_v18 = vadd.f32 1e-05, %v876_v10  ;;  %v869_v20 = vsub.f32 %v853_v12, %v861_v11  ;;  %v927_v11 = vld [vmem:[%s1723_s3 + $0x38] sm:$0xff] }
 0x1d0   :  { %v904_v23 = vmul.f32 %v1184_v16, %v880_v9  ;;  %v846_v24 = vld [vmem:[#allocation3 + $0x30] sm:$0xff]  ;;  %v862_v28 = vmul.f32 %v1602_v15, %v1602_v15  ;;  %v831_v30 = vld [vmem:[#allocation2 + $0x38] sm:$0xff] }
 0x1d1   :  { %913 = vst.msk [vmem:[%s1724_s5 + $0x8] sm:$0xff] %vm24_vm0, %v905_v14  ;;  %v929_v22 = vmul.f32 %v905_v14, %v1563_v7  ;;  %1189 = vrsqrt.f32 %v892_v18  ;;  %v877_v27 = vmax.f32 %v869_v20, 0.0  ;;  %v854_v29 = vmul.f32 0.0061728396, %v846_v24 }
 0x1d2   :  { %912 = vst.msk [vmem:[%s1724_s5] sm:$0xff] %vm24_vm0, %v904_v23  ;;  %v928_v7 = vmul.f32 %v904_v23, %v1561_v6  ;;  %v839_v32 = vmul.f32 0.0061728396, %v831_v30  ;;  %v883_v6 = vld [vmem:[%s1722_s2 + $0x18] sm:$0xff] }
 0x1d3   :  { %v937_v31 = vsub.f32 %v921_v17, %v929_v22  ;;  %v1186_v33 = vpop.eup %1185  ;;  %v893_v34 = vadd.f32 1e-05, %v877_v27  ;;  %v870_v35 = vsub.f32 %v854_v29, %v862_v28 }
 0x1d4   :  { %v936_v36 = vsub.f32 %v920_v25, %v928_v7  ;;  %v906_v38 = vmul.f32 %v1186_v33, %v882_v26  ;;  %v847_v39 = vld [vmem:[#allocation3 + $0x38] sm:$0xff]  ;;  %v863_v42 = vmul.f32 %v839_v32, %v839_v32 }
 0x1d5   :  { %945 = vst.msk [vmem:[%s1725_s6 + $0x8] sm:$0xff] %vm24_vm0, %v937_v31  ;;  %1191 = vrsqrt.f32 %v893_v34  ;;  %v878_v41 = vmax.f32 %v870_v35, 0.0  ;;  %v855_v43 = vmul.f32 0.0061728396, %v847_v39 }
 0x1d6   :  { %944 = vst.msk [vmem:[%s1725_s6] sm:$0xff] %vm24_vm0, %v936_v36  ;;  %914 = vst.msk [vmem:[%s1724_s5 + $0x10] sm:$0xff] %vm24_vm0, %v906_v38  ;;  %v930_v44 = vmul.f32 %v906_v38, %v1571_v21 }
 0x1d7   :  { %v1188_v45 = vpop.eup %1187  ;;  %v894_v46 = vadd.f32 1e-05, %v878_v41  ;;  %v871_v47 = vsub.f32 %v855_v43, %v863_v42 }
 0x1d8   :  { %v938_v48 = vsub.f32 %v922_v40, %v930_v44  ;;  %v907_v49 = vmul.f32 %v1188_v45, %v883_v6 }
 0x1d9   :  { %1193 = vrsqrt.f32 %v894_v46  ;;  %v879_v52 = vmax.f32 %v871_v47, 0.0 }
 0x1da   :  { %946 = vst.msk [vmem:[%s1725_s6 + $0x10] sm:$0xff] %vm24_vm0, %v938_v48  ;;  %915 = vst.msk [vmem:[%s1724_s5 + $0x18] sm:$0xff] %vm24_vm0, %v907_v49  ;;  %v931_v21 = vmul.f32 %v907_v49, %v1578_v37 }
 0x1db   :  { %v1190_v53 = vpop.eup %1189  ;;  %v895_v54 = vadd.f32 1e-05, %v879_v52 }
 0x1dc   :  { %v939_v55 = vsub.f32 %v923_v19, %v931_v21  ;;  %v908_v56 = vmul.f32 %v1190_v53, %v884_v51 }
 0x1dd   :  { %1195 = vrsqrt.f32 %v895_v54 }
 0x1de   :  { %947 = vst.msk [vmem:[%s1725_s6 + $0x18] sm:$0xff] %vm24_vm0, %v939_v55  ;;  %916 = vst.msk [vmem:[%s1724_s5 + $0x20] sm:$0xff] %vm24_vm0, %v908_v56  ;;  %v932_v37 = vmul.f32 %v908_v56, %v1583_v50 }
 0x1df   :  { %v1192_v59 = vpop.eup %1191 }
 0x1e0   :  { %v940_v60 = vsub.f32 %v924_v57, %v932_v37  ;;  %v909_v61 = vmul.f32 %v1192_v59, %v885_v58 }
 0x1e2   :  { %948 = vst.msk [vmem:[%s1725_s6 + $0x20] sm:$0xff] %vm24_vm0, %v940_v60  ;;  %917 = vst.msk [vmem:[%s1724_s5 + $0x28] sm:$0xff] %vm24_vm0, %v909_v61  ;;  %v933_v50 = vmul.f32 %v909_v61, %v1590_v63 }
 0x1e3   :  { %v1194_v1 = vpop.eup %1193 }
 0x1e4   :  { %v941_v2 = vsub.f32 %v925_v62, %v933_v50  ;;  %v910_v3 = vmul.f32 %v1194_v1, %v886_v0 }
 0x1e6   :  { %949 = vst.msk [vmem:[%s1725_s6 + $0x28] sm:$0xff] %vm24_vm0, %v941_v2  ;;  %918 = vst.msk [vmem:[%s1724_s5 + $0x30] sm:$0xff] %vm24_vm0, %v910_v3  ;;  %v934_v63 = vmul.f32 %v910_v3, %v1602_v15 }
 0x1e7   :  { %v1196_v8 = vpop.eup %1195 }
 0x1e8   :  { %v942_v9 = vsub.f32 %v926_v4, %v934_v63  ;;  %v911_v10 = vmul.f32 %v1196_v8, %v887_v5 }
 0x1ea   :  { %950 = vst.msk [vmem:[%s1725_s6 + $0x30] sm:$0xff] %vm24_vm0, %v942_v9  ;;  %919 = vst.msk [vmem:[%s1724_s5 + $0x38] sm:$0xff] %vm24_vm0, %v911_v10  ;;  %v935_v12 = vmul.f32 %v911_v10, %v839_v32 }
 0x1ec   :  { %v943_v13 = vsub.f32 %v927_v11, %v935_v12 }
 0x1ee   :  { %951 = vst.msk [vmem:[%s1725_s6 + $0x38] sm:$0xff] %vm24_vm0, %v943_v13 }

// kernel: conv_initiation_classifier_forward.12
= control target key start
LH: loop header
LB: loop body
LE: loop exit
PB: predicated region body
PF: predicated region fallthrough
CT: control target
= control target key end

     0   :  { %v228_v0 = vmov 0   ;;  %s333_s1 = inlined_call_operand.vmem [shape: f32[64,1], index: 1, kind: input, shape index: {}]   ;;  %s334_s2 = inlined_call_operand.vmem [shape: f32[64,1], index: 2, kind: input, shape index: {}]   ;;  %s335_s0 = inlined_call_operand.vmem [shape: f32[64,98], index: 0, kind: input, shape index: {}]   ;;  %s336_s3 = inlined_call_operand.vmem [shape: bf16[64,98], index: 3, kind: output, shape index: {}]  }
   0x1   :  { %227 = vset.pattern.permute.xlu1 %v228_v0  ;;  %226 = vset.pattern.permute.xlu0 %v228_v0  ;;  %v24_v1 = vld [vmem:[%s333_s1 + $0x10] sm:$0xff]  ;;  %v22_v2 = vld [vmem:[%s333_s1] sm:$0xff]  ;;  %v25_v3 = vld [vmem:[%s333_s1 + $0x18] sm:$0xff] }
   0x2   :  { %42 = vperm.xlu1 %227, %v24_v1   ;;  %32 = vperm.xlu0 %226, %v22_v2   ;;  %v23_v4 = vld [vmem:[%s333_s1 + $0x8] sm:$0xff]  ;;  %v26_v6 = vld [vmem:[%s333_s1 + $0x20] sm:$0xff]  ;;  %v29_v7 = vld [vmem:[%s333_s1 + $0x38] sm:$0xff] }
   0x3   :  { %v27_v5 = vld [vmem:[%s333_s1 + $0x28] sm:$0xff]  ;;  %v28_v8 = vld [vmem:[%s333_s1 + $0x30] sm:$0xff]  ;;  %v78_v10 = vld [vmem:[%s334_s2] sm:$0xff] }
   0x4   :  { %v79_v9 = vld [vmem:[%s334_s2 + $0x8] sm:$0xff]  ;;  %v81_v11 = vld [vmem:[%s334_s2 + $0x18] sm:$0xff]  ;;  %v80_v12 = vld [vmem:[%s334_s2 + $0x10] sm:$0xff] }
   0x5   :  { %v83_v13 = vld [vmem:[%s334_s2 + $0x28] sm:$0xff]  ;;  %v82_v14 = vld [vmem:[%s334_s2 + $0x20] sm:$0xff]  ;;  %v85_v15 = vld [vmem:[%s334_s2 + $0x38] sm:$0xff] }
   0x6   :  { %47 = vperm.xlu1 %227, %v25_v3   ;;  %37 = vperm.xlu0 %226, %v23_v4   ;;  %v84_v16 = vld [vmem:[%s334_s2 + $0x30] sm:$0xff]  ;;  %v14_v23 = vld [vmem:[%s335_s0] sm:$0xff]  ;;  %v15_v24 = vld [vmem:[%s335_s0 + $0x8] sm:$0xff] }
   0x7   :  { %v16_v29 = vld [vmem:[%s335_s0 + $0x10] sm:$0xff]  ;;  %v17_v30 = vld [vmem:[%s335_s0 + $0x18] sm:$0xff]  ;;  %v19_v39 = vld [vmem:[%s335_s0 + $0x28] sm:$0xff] }
   0x8   :  { %v18_v40 = vld [vmem:[%s335_s0 + $0x20] sm:$0xff]  ;;  %v21_v50 = vld [vmem:[%s335_s0 + $0x38] sm:$0xff]  ;;  %v20_v51 = vld [vmem:[%s335_s0 + $0x30] sm:$0xff] }
   0xa   :  { %57 = vperm.xlu1 %227, %v27_v5   ;;  %52 = vperm.xlu0 %226, %v26_v6  }
   0xe   :  { %67 = vperm.xlu1 %227, %v29_v7   ;;  %62 = vperm.xlu0 %226, %v28_v8  }
  0x12   :  { %93 = vperm.xlu1 %227, %v79_v9   ;;  %88 = vperm.xlu0 %226, %v78_v10  }
  0x16   :  { %103 = vperm.xlu1 %227, %v81_v11   ;;  %98 = vperm.xlu0 %226, %v80_v12  }
  0x1a   :  { %113 = vperm.xlu1 %227, %v83_v13   ;;  %108 = vperm.xlu0 %226, %v82_v14  }
  0x1e   :  { %123 = vperm.xlu1 %227, %v85_v15   ;;  %118 = vperm.xlu0 %226, %v84_v16  }
  0x81   :  { %v43_v17 = vpop.permute.xlu1 %42  ;;  %v33_v18 = vpop.permute.xlu0 %32 }
  0x82   :  { %v70_v27 = vmul.f32 %v33_v18, %v14_v23  ;;  %v72_v35 = vmul.f32 %v43_v17, %v16_v29 }
  0x85   :  { %v48_v19 = vpop.permute.xlu1 %47  ;;  %v38_v20 = vpop.permute.xlu0 %37 }
  0x86   :  { %v71_v28 = vmul.f32 %v38_v20, %v15_v24  ;;  %v73_v36 = vmul.f32 %v48_v19, %v17_v30 }
  0x89   :  { %v58_v21 = vpop.permute.xlu1 %57  ;;  %v53_v22 = vpop.permute.xlu0 %52 }
  0x8a   :  { %v75_v46 = vmul.f32 %v58_v21, %v19_v39  ;;  %v74_v47 = vmul.f32 %v53_v22, %v18_v40 }
  0x8d   :  { %v68_v25 = vpop.permute.xlu1 %67  ;;  %v63_v26 = vpop.permute.xlu0 %62 }
  0x8e   :  { %v77_v57 = vmul.f32 %v68_v25, %v21_v50  ;;  %v76_v58 = vmul.f32 %v63_v26, %v20_v51 }
  0x91   :  { %v94_v31 = vpop.permute.xlu1 %93  ;;  %v89_v32 = vpop.permute.xlu0 %88 }
  0x92   :  { %v127_v33 = vadd.f32 %v94_v31, %v71_v28  ;;  %v126_v34 = vadd.f32 %v89_v32, %v70_v27 }
  0x94   :  { %v135_v37 = vmax.f32 %v127_v33, 0.0  ;;  %v134_v38 = vmax.f32 %v126_v34, 0.0 }
  0x95   :  { %v104_v41 = vpop.permute.xlu1 %103  ;;  %v99_v42 = vpop.permute.xlu0 %98 }
  0x96   :  { %v205_v43 = vpack.c.bf16 %v135_v37, %v134_v38  ;;  %v129_v44 = vadd.f32 %v104_v41, %v73_v36  ;;  %v128_v45 = vadd.f32 %v99_v42, %v72_v35 }
  0x98   :  { %206 = vst [vmem:[%s336_s3] sm:$0xff] %v205_v43   ;;  %v137_v48 = vmax.f32 %v129_v44, 0.0  ;;  %v136_v49 = vmax.f32 %v128_v45, 0.0 }
  0x99   :  { %v114_v52 = vpop.permute.xlu1 %113  ;;  %v109_v53 = vpop.permute.xlu0 %108 }
  0x9a   :  { %v210_v54 = vpack.c.bf16 %v137_v48, %v136_v49  ;;  %v131_v55 = vadd.f32 %v114_v52, %v75_v46  ;;  %v130_v56 = vadd.f32 %v109_v53, %v74_v47 }
  0x9c   :  { %222 = vst [vmem:[%s336_s3 + $0x8] sm:$0xff] %v210_v54   ;;  %v139_v59 = vmax.f32 %v131_v55, 0.0  ;;  %v138_v60 = vmax.f32 %v130_v56, 0.0 }
  0x9d   :  { %v124_v61 = vpop.permute.xlu1 %123  ;;  %v119_v62 = vpop.permute.xlu0 %118 }
  0x9e   :  { %v215_v63 = vpack.c.bf16 %v139_v59, %v138_v60  ;;  %v133_v0 = vadd.f32 %v124_v61, %v77_v57  ;;  %v132_v1 = vadd.f32 %v119_v62, %v76_v58 }
  0xa0   :  { %223 = vst [vmem:[%s336_s3 + $0x10] sm:$0xff] %v215_v63   ;;  %v141_v2 = vmax.f32 %v133_v0, 0.0  ;;  %v140_v3 = vmax.f32 %v132_v1, 0.0 }
  0xa2   :  { %v220_v4 = vpack.c.bf16 %v141_v2, %v140_v3 }
  0xa4   :  { %224 = vst [vmem:[%s336_s3 + $0x18] sm:$0xff] %v220_v4  }

// kernel: conv_initiation_classifier_forward.11
= control target key start
LH: loop header
LB: loop body
LE: loop exit
PB: predicated region body
PF: predicated region fallthrough
CT: control target
= control target key end

     0   :  { %vm454_vm0 = vcmask 523264   ;;  %vm25_vm1 = vcmask 7168   ;;  %v1169_v56 = vmov 0.0   ;;  %s1592_s1 = inlined_call_operand.vmem [shape: bf16[576,98], index: 1, kind: input, shape index: {}]   ;;  %s1593_s0 = inlined_call_operand.vmem [shape: bf16[64,576], index: 0, kind: input, shape index: {}]   ;;  %s1594_s4 = inlined_call_operand.vmem [shape: f32[64,98], index: 4, kind: output, shape index: {0}]   ;;  %s1595_s2 = inlined_call_operand.vmem [shape: f32[64,1], index: 2, kind: input, shape index: {}]   ;;  %s1596_s3 = inlined_call_operand.vmem [shape: f32[64,1], index: 3, kind: input, shape index: {}]   ;;  %s1597_s5 = inlined_call_operand.vmem [shape: f32[64,1], index: 5, kind: output, shape index: {1}]   ;;  %s1598_s6 = inlined_call_operand.vmem [shape: f32[64,1], index: 6, kind: output, shape index: {2}]  }
   0x1   :  { %v1089_v0 = vld [vmem:[%s1592_s1 + $0x40] sm:$0xff]   ;;  %v1093_v4 = vld [vmem:[%s1592_s1 + $0x48] sm:$0xff]   ;;  %v1097_v8 = vld [vmem:[%s1592_s1 + $0x50] sm:$0xff]   ;;  %32 = vst.msk [vmem:[#allocation2 + $0x30] sm:$0xff] %vm25_vm1, %v1169_v56 }
   0x2   :  { %v1090_v1 = vld [vmem:[%s1592_s1 + $0xc0] sm:$0xff]   ;;  %976 = vmatprep.subr.bf16.mxu0 %v1089_v0  ;;  %v1094_v5 = vld [vmem:[%s1592_s1 + $0xc8] sm:$0xff]   ;;  %v1098_v9 = vld [vmem:[%s1592_s1 + $0xd0] sm:$0xff]   ;;  %26 = vst.msk [vmem:[#allocation2] sm:$0xff] %vm25_vm1, %v1169_v56 }
   0x3   :  { %v1091_v2 = vld [vmem:[%s1592_s1] sm:$0xff]   ;;  %1016 = vmatprep.subr.bf16.mxu1 %v1090_v1  ;;  %v1095_v6 = vld [vmem:[%s1592_s1 + $0x8] sm:$0xff]   ;;  %v1099_v10 = vld [vmem:[%s1592_s1 + $0x10] sm:$0xff]   ;;  %27 = vst.msk [vmem:[#allocation2 + $0x8] sm:$0xff] %vm25_vm1, %v1169_v56 }
   0x4   :  { %v1092_v3 = vld [vmem:[%s1592_s1 + $0x80] sm:$0xff]   ;;  %977 = vmatpush3.bf16.msra.mxu0 %v1091_v2  ;;  %v1096_v7 = vld [vmem:[%s1592_s1 + $0x88] sm:$0xff]   ;;  %v1100_v11 = vld [vmem:[%s1592_s1 + $0x90] sm:$0xff]   ;;  %28 = vst.msk [vmem:[#allocation2 + $0x10] sm:$0xff] %vm25_vm1, %v1169_v56 }
   0x5   :  { %1017 = vmatpush3.bf16.msra.mxu1 %v1092_v3  ;;  %978 = vmatprep.subr.bf16.mxu0 %v1093_v4  ;;  %v1101_v12 = vld [vmem:[%s1592_s1 + $0x58] sm:$0xff]   ;;  %v1105_v16 = vld [vmem:[%s1592_s1 + $0x60] sm:$0xff]   ;;  %v1109_v20 = vld [vmem:[%s1592_s1 + $0x68] sm:$0xff]   ;;  %29 = vst.msk [vmem:[#allocation2 + $0x18] sm:$0xff] %vm25_vm1, %v1169_v56 }
   0x6   :  { %1018 = vmatprep.subr.bf16.mxu1 %v1094_v5  ;;  %v1102_v13 = vld [vmem:[%s1592_s1 + $0xd8] sm:$0xff]   ;;  %v1106_v17 = vld [vmem:[%s1592_s1 + $0xe0] sm:$0xff]   ;;  %v1110_v21 = vld [vmem:[%s1592_s1 + $0xe8] sm:$0xff]   ;;  %30 = vst.msk [vmem:[#allocation2 + $0x20] sm:$0xff] %vm25_vm1, %v1169_v56 }
   0x7   :  { %v1103_v14 = vld [vmem:[%s1592_s1 + $0x18] sm:$0xff]   ;;  %v1107_v18 = vld [vmem:[%s1592_s1 + $0x20] sm:$0xff]   ;;  %v1111_v22 = vld [vmem:[%s1592_s1 + $0x28] sm:$0xff]   ;;  %31 = vst.msk [vmem:[#allocation2 + $0x28] sm:$0xff] %vm25_vm1, %v1169_v56 }
   0x8   :  { %979 = vmatpush3.bf16.msra.mxu0 %v1095_v6  ;;  %v1104_v15 = vld [vmem:[%s1592_s1 + $0x98] sm:$0xff]   ;;  %v1108_v19 = vld [vmem:[%s1592_s1 + $0xa0] sm:$0xff]   ;;  %v1112_v23 = vld [vmem:[%s1592_s1 + $0xa8] sm:$0xff]   ;;  %33 = vst.msk [vmem:[#allocation2 + $0x38] sm:$0xff] %vm25_vm1, %v1169_v56 }
   0x9   :  { %1019 = vmatpush3.bf16.msra.mxu1 %v1096_v7  ;;  %980 = vmatprep.subr.bf16.mxu0 %v1097_v8  ;;  %v1113_v24 = vld [vmem:[%s1592_s1 + $0x70] sm:$0xff]   ;;  %v1117_v28 = vld [vmem:[%s1592_s1 + $0x78] sm:$0xff]   ;;  %v1126_v35 = vld [vmem:[%s1593_s0 + $0xc] ss:$20 sps:$4 sm:$0xff]   ;;  %34 = vst.msk [vmem:[#allocation3] sm:$0xff] %vm25_vm1, %v1169_v56 }
   0xa   :  { %1020 = vmatprep.subr.bf16.mxu1 %v1098_v9  ;;  %v1114_v25 = vld [vmem:[%s1592_s1 + $0xf0] sm:$0xff]   ;;  %v1118_v29 = vld [vmem:[%s1592_s1 + $0xf8] sm:$0xff]   ;;  %v1127_v36 = vld [vmem:[%s1592_s1 + $0x100] sm:$0xff]   ;;  %564 = vmatprep.mubr.bf16.mxu1 %v1126_v35  ;;  %35 = vst.msk [vmem:[#allocation3 + $0x8] sm:$0xff] %vm25_vm1, %v1169_v56 }
   0xb   :  { %v1115_v26 = vld [vmem:[%s1592_s1 + $0x30] sm:$0xff]   ;;  %v1119_v30 = vld [vmem:[%s1592_s1 + $0x38] sm:$0xff]   ;;  %v1128_v37 = vld [vmem:[%s1593_s0 + $0x2c] ss:$20 sps:$4 sm:$0xff]   ;;  %36 = vst.msk [vmem:[#allocation3 + $0x10] sm:$0xff] %vm25_vm1, %v1169_v56 }
   0xc   :  { %981 = vmatpush3.bf16.msra.mxu0 %v1099_v10  ;;  %v1116_v27 = vld [vmem:[%s1592_s1 + $0xb0] sm:$0xff]   ;;  %v1120_v31 = vld [vmem:[%s1592_s1 + $0xb8] sm:$0xff]   ;;  %v1134_v39 = vld [vmem:[%s1592_s1 + $0x108] sm:$0xff]   ;;  %37 = vst.msk [vmem:[#allocation3 + $0x18] sm:$0xff] %vm25_vm1, %v1169_v56 }
   0xd   :  { %1021 = vmatpush3.bf16.msra.mxu1 %v1100_v11  ;;  %982 = vmatprep.subr.bf16.mxu0 %v1101_v12  ;;  %v1121_v32 = vld [vmem:[%s1593_s0] ss:$20 sps:$4 sm:$0xff]   ;;  %v1123_v33 = vld [vmem:[%s1593_s0 + $0x4] ss:$20 sps:$4 sm:$0xff]   ;;  %v1124_v34 = vld [vmem:[%s1593_s0 + $0x8] ss:$20 sps:$4 sm:$0xff]  }
   0xe   :  { %1022 = vmatprep.subr.bf16.mxu1 %v1102_v13  ;;  %499 = vmatprep.mubr.bf16.mxu0 %v1123_v33  ;;  %v1130_v38 = vld [vmem:[%s1593_s0 + $0x34] ss:$20 sps:$4 sm:$0xff]   ;;  %v1133_v41 = vld [vmem:[%s1593_s0 + $0x30] ss:$20 sps:$4 sm:$0xff]   ;;  %v1148_v45 = vld [vmem:[%s1592_s1 + $0x118] sm:$0xff]   ;;  %38 = vst.msk [vmem:[#allocation3 + $0x20] sm:$0xff] %vm25_vm1, %v1169_v56 }
   0xf   :  { %v1132_v40 = vld [vmem:[%s1593_s0 + $0x28] ss:$20 sps:$4 sm:$0xff]   ;;  %v1141_v44 = vld [vmem:[%s1592_s1 + $0x110] sm:$0xff]   ;;  %v1140_v47 = vld [vmem:[%s1593_s0 + $0x58] ss:$20 sps:$4 sm:$0xff]   ;;  %39 = vst.msk [vmem:[#allocation3 + $0x28] sm:$0xff] %vm25_vm1, %v1169_v56 }
  0x10   :  { %983 = vmatpush3.bf16.msra.mxu0 %v1103_v14  ;;  %v1135_v42 = vld [vmem:[%s1593_s0 + $0x54] ss:$20 sps:$4 sm:$0xff]   ;;  %v1137_v43 = vld [vmem:[%s1593_s0 + $0x5c] ss:$20 sps:$4 sm:$0xff]   ;;  %v1144_v49 = vld [vmem:[%s1593_s0 + $0x84] ss:$20 sps:$4 sm:$0xff]  }
  0x11   :  { %1023 = vmatpush3.bf16.msra.mxu1 %v1104_v15  ;;  %984 = vmatprep.subr.bf16.mxu0 %v1105_v16  ;;  %v1139_v46 = vld [vmem:[%s1593_s0 + $0x50] ss:$20 sps:$4 sm:$0xff]   ;;  %v1146_v50 = vld [vmem:[%s1593_s0 + $0x78] ss:$20 sps:$4 sm:$0xff]   ;;  %v1147_v51 = vld [vmem:[%s1593_s0 + $0x80] ss:$20 sps:$4 sm:$0xff]  }
  0x12   :  { %1024 = vmatprep.subr.bf16.mxu1 %v1106_v17  ;;  %v1142_v48 = vld [vmem:[%s1593_s0 + $0x7c] ss:$20 sps:$4 sm:$0xff]   ;;  %v1150_v53 = vld [vmem:[%s1593_s0 + $0x60] ss:$20 sps:$4 sm:$0xff]   ;;  %v1151_v54 = vld [vmem:[%s1593_s0 + $0x38] ss:$20 sps:$4 sm:$0xff]  }
  0x13   :  { %v1149_v52 = vld [vmem:[%s1593_s0 + $0x10] ss:$20 sps:$4 sm:$0xff]   ;;  %v1152_v55 = vld [vmem:[%s1593_s0 + $0x88] ss:$20 sps:$4 sm:$0xff]   ;;  %40 = vst.msk [vmem:[#allocation3 + $0x30] sm:$0xff] %vm25_vm1, %v1169_v56  ;;  %41 = vst.msk [vmem:[#allocation3 + $0x38] sm:$0xff] %vm25_vm1, %v1169_v56 }
  0x14   :  { %985 = vmatpush3.bf16.msra.mxu0 %v1107_v18 }
  0x15   :  { %1025 = vmatpush3.bf16.msra.mxu1 %v1108_v19  ;;  %986 = vmatprep.subr.bf16.mxu0 %v1109_v20 }
  0x16   :  { %1026 = vmatprep.subr.bf16.mxu1 %v1110_v21 }
  0x18   :  { %987 = vmatpush3.bf16.msra.mxu0 %v1111_v22 }
  0x19   :  { %1027 = vmatpush3.bf16.msra.mxu1 %v1112_v23  ;;  %988 = vmatprep.subr.bf16.mxu0 %v1113_v24 }
  0x1a   :  { %1028 = vmatprep.subr.bf16.mxu1 %v1114_v25 }
  0x1c   :  { %989 = vmatpush3.bf16.msra.mxu0 %v1115_v26 }
  0x1d   :  { %1029 = vmatpush3.bf16.msra.mxu1 %v1116_v27  ;;  %990 = vmatprep.subr.bf16.mxu0 %v1117_v28 }
  0x1e   :  { %1030 = vmatprep.subr.bf16.mxu1 %v1118_v29 }
  0x20   :  { %991 = vmatpush3.bf16.msra.mxu0 %v1119_v30 }
  0x21   :  { %1031 = vmatpush3.bf16.msra.mxu1 %v1120_v31  ;;  %1064 = vmatprep.subr.bf16.mxu0 %v1127_v36 }
  0x22   :  { %1080 = vmatprep.subr.bf16.mxu1 %v1127_v36 }
  0x23   :  { %500 = vmatmul.mubr.bf16.vlgmr.msra.gmra.mrb[0].mxu0 %v1121_v32 }
  0x24   :  { %565 = vmatmul.mubr.bf16.vlgmr.msra.gmra.mrb[0].mxu1 %v1124_v34  ;;  %1065 = vmatpush3.bf16.msra.mxu0 %v1127_v36 }
  0x25   :  { %1084 = vmatpush3.bf16.msra.mxu1 %v1127_v36  ;;  %507 = vmatprep.mubr.bf16.mxu0 %v1128_v37  ;;  %v670_v36 = vlaneseq }
  0x26   :  { %572 = vmatprep.mubr.bf16.mxu1 %v1130_v38  ;;  %1066 = vmatprep.subr.bf16.mxu0 %v1134_v39 }
  0x27   :  { %1081 = vmatprep.subr.bf16.mxu1 %v1134_v39 }
  0x28   :  { %1067 = vmatpush3.bf16.msra.mxu0 %v1134_v39 }
  0x29   :  { %1085 = vmatpush3.bf16.msra.mxu1 %v1134_v39  ;;  %1068 = vmatprep.subr.bf16.mxu0 %v1141_v44 }
  0x2a   :  { %1082 = vmatprep.subr.bf16.mxu1 %v1141_v44 }
  0x2b   :  { %508 = vmatmul.mubr.bf16.gmra.mrb[4].mxu0 %v1132_v40 }
  0x2c   :  { %573 = vmatmul.mubr.bf16.gmra.mrb[4].mxu1 %v1133_v41  ;;  %515 = vmatprep.mubr.bf16.mxu0 %v1135_v42 }
  0x2d   :  { %580 = vmatprep.mubr.bf16.mxu1 %v1137_v43  ;;  %1069 = vmatpush3.bf16.msra.mxu0 %v1141_v44 }
  0x2e   :  { %1086 = vmatpush3.bf16.msra.mxu1 %v1141_v44  ;;  %1070 = vmatprep.subr.bf16.mxu0 %v1148_v45 }
  0x2f   :  { %1083 = vmatprep.subr.bf16.mxu1 %v1148_v45 }
  0x31   :  { %1071 = vmatpush3.bf16.msra.mxu0 %v1148_v45 }
  0x32   :  { %1087 = vmatpush3.bf16.msra.mxu1 %v1148_v45 }
  0x33   :  { %516 = vmatmul.mubr.bf16.gmra.mrb[8].mxu0 %v1139_v46 }
  0x34   :  { %581 = vmatmul.mubr.bf16.gmra.mrb[8].mxu1 %v1140_v47  ;;  %523 = vmatprep.mubr.bf16.mxu0 %v1142_v48  ;;  %v671_v47 = vand.u32 127, %v670_v36 }
  0x35   :  { %588 = vmatprep.mubr.bf16.mxu1 %v1144_v49 }
  0x36   :  { %vm675_vm2 = vcmp.lt.s32.totalorder %v671_v47, 98 }
  0x3b   :  { %524 = vmatmul.mubr.bf16.gmra.mrb[12].mxu0 %v1146_v50 }
  0x3c   :  { %589 = vmatmul.mubr.bf16.gmra.mrb[12].mxu1 %v1147_v51  ;;  %1072 = vmatprep.mubr.msk.bf16.mxu0 %vm454_vm0, %v1149_v52 }
  0x3d   :  { %1076 = vmatprep.mubr.msk.bf16.mxu1 %vm454_vm0, %v1150_v53 }
  0x43   :  { %1073 = vmatmul.mubr.msk.bf16.vlgmr.msra.gmra.mrb[16].mxu0 %vm454_vm0, %v1151_v54 }
  0x44   :  { %1077 = vmatmul.mubr.msk.bf16.vlgmr.msra.gmra.mrb[16].mxu1 %vm454_vm0, %v1152_v55 }
  0xf6   :  { %v992_v57 = vpop.f32.mrb[0].mxu0 }
  0xf7   :  { %v1032_v58 = vpop.f32.mrb[0].mxu1  ;;  %v993_v59 = vpop.f32.mrb[1].mxu0 }
  0xf8   :  { %v994_v60 = vadd.f32 %v993_v59, %v992_v57  ;;  %v1033_v61 = vpop.f32.mrb[1].mxu1  ;;  %v995_v62 = vpop.f32.mrb[2].mxu0 }
  0xf9   :  { %v1034_v63 = vadd.f32 %v1033_v61, %v1032_v58  ;;  %v1035_v0 = vpop.f32.mrb[2].mxu1  ;;  %v996_v1 = vpop.f32.mrb[3].mxu0 }
  0xfa   :  { %v997_v2 = vadd.f32 %v996_v1, %v995_v62  ;;  %v1036_v3 = vpop.f32.mrb[3].mxu1 }
  0xfb   :  { %v1037_v4 = vadd.f32 %v1036_v3, %v1035_v0  ;;  %v567_v5 = vadd.f32 %v1034_v63, %v994_v60 }
  0xfd   :  { %v1389_v6 = vadd.f32 %v1037_v4, %v997_v2 }
  0xfe   :  { %v998_v7 = vpop.f32.mrb[4].mxu0 }
  0xff   :  { %v1038_v8 = vpop.f32.mrb[4].mxu1  ;;  %v999_v9 = vpop.f32.mrb[5].mxu0 }
 0x100   :  { %v1000_v10 = vadd.f32 %v999_v9, %v998_v7  ;;  %v1039_v11 = vpop.f32.mrb[5].mxu1  ;;  %v1001_v12 = vpop.f32.mrb[6].mxu0 }
 0x101   :  { %v1040_v13 = vadd.f32 %v1039_v11, %v1038_v8  ;;  %v1041_v14 = vpop.f32.mrb[6].mxu1  ;;  %v1002_v15 = vpop.f32.mrb[7].mxu0 }
 0x102   :  { %v1003_v16 = vadd.f32 %v1002_v15, %v1001_v12  ;;  %v1042_v17 = vpop.f32.mrb[7].mxu1 }
 0x103   :  { %v1043_v18 = vadd.f32 %v1042_v17, %v1041_v14  ;;  %v575_v19 = vadd.f32 %v1040_v13, %v1000_v10 }
 0x105   :  { %v578_v20 = vadd.f32 %v1043_v18, %v1003_v16 }
 0x106   :  { %v1004_v21 = vpop.f32.mrb[8].mxu0 }
 0x107   :  { %v1044_v22 = vpop.f32.mrb[8].mxu1  ;;  %v1005_v23 = vpop.f32.mrb[9].mxu0 }
 0x108   :  { %v1006_v24 = vadd.f32 %v1005_v23, %v1004_v21  ;;  %v1045_v25 = vpop.f32.mrb[9].mxu1  ;;  %v1007_v26 = vpop.f32.mrb[10].mxu0 }
 0x109   :  { %v1046_v27 = vadd.f32 %v1045_v25, %v1044_v22  ;;  %v1047_v28 = vpop.f32.mrb[10].mxu1  ;;  %v1008_v29 = vpop.f32.mrb[11].mxu0  ;;  %v687_v25 = vld [vmem:[#allocation2 + $0x18] sm:$0xff] }
 0x10a   :  { %v1009_v30 = vadd.f32 %v1008_v29, %v1007_v26  ;;  %v1048_v31 = vpop.f32.mrb[11].mxu1  ;;  %v684_v26 = vld [vmem:[#allocation2] sm:$0xff] }
 0x10b   :  { %v1049_v32 = vadd.f32 %v1048_v31, %v1047_v28  ;;  %v583_v33 = vadd.f32 %v1046_v27, %v1006_v24  ;;  %v691_v31 = vld [vmem:[#allocation2 + $0x38] sm:$0xff] }
 0x10d   :  { %v586_v34 = vadd.f32 %v1049_v32, %v1009_v30  ;;  %v688_v32 = vld [vmem:[#allocation2 + $0x20] sm:$0xff] }
 0x10e   :  { %v1010_v35 = vpop.f32.mrb[12].mxu0 }
 0x10f   :  { %v1050_v37 = vpop.f32.mrb[12].mxu1  ;;  %v1011_v38 = vpop.f32.mrb[13].mxu0 }
 0x110   :  { %v1012_v39 = vadd.f32 %v1011_v38, %v1010_v35  ;;  %v1051_v40 = vpop.f32.mrb[13].mxu1  ;;  %v1013_v41 = vpop.f32.mrb[14].mxu0  ;;  %v727_v38 = vld [vmem:[#allocation3 + $0x10] sm:$0xff] }
 0x111   :  { %v1052_v42 = vadd.f32 %v1051_v40, %v1050_v37  ;;  %v1053_v43 = vpop.f32.mrb[14].mxu1  ;;  %v1014_v44 = vpop.f32.mrb[15].mxu0  ;;  %v689_v37 = vld [vmem:[#allocation2 + $0x28] sm:$0xff] }
 0x112   :  { %v1015_v45 = vadd.f32 %v1014_v44, %v1013_v41  ;;  %v1054_v46 = vpop.f32.mrb[15].mxu1  ;;  %v685_v44 = vld [vmem:[#allocation2 + $0x8] sm:$0xff] }
 0x113   :  { %v1055_v48 = vadd.f32 %v1054_v46, %v1053_v43  ;;  %v591_v49 = vadd.f32 %v1052_v42, %v1012_v39  ;;  %v728_v43 = vld [vmem:[#allocation3 + $0x18] sm:$0xff] }
 0x115   :  { %v594_v50 = vadd.f32 %v1055_v48, %v1015_v45 }
 0x116   :  { %v1074_v51 = vpop.f32.mrb[16].mxu0 }
 0x117   :  { %v640_v52 = vadd.f32 %v1074_v51, %v575_v19  ;;  %v1078_v53 = vpop.f32.mrb[16].mxu1  ;;  %v631_v54 = vpop.f32.mrb[17].mxu0  ;;  %v686_v19 = vld [vmem:[#allocation2 + $0x10] sm:$0xff]  ;;  %v725_v51 = vld [vmem:[#allocation3] sm:$0xff] }
 0x118   :  { %v656_v55 = vadd.f32 %v1078_v53, %v591_v49  ;;  %v632_v56 = vadd.f32 %v631_v54, %v567_v5  ;;  %v647_v57 = vpop.f32.mrb[17].mxu1  ;;  %v1075_v58 = vpop.f32.mrb[18].mxu0 }
 0x119   :  { %664 = vst [vmem:[%s1594_s4 + $0x10] sm:$0xff] %v640_v52  ;;  %v648_v59 = vadd.f32 %v647_v57, %v583_v33  ;;  %v643_v60 = vadd.f32 %v1075_v58, %v578_v20  ;;  %v1079_v61 = vpop.f32.mrb[18].mxu1  ;;  %v634_v62 = vpop.f32.mrb[19].mxu0  ;;  %v678_v63 = vsel %vm675_vm2, %v640_v52, 0.0  ;;  %v690_v20 = vld [vmem:[#allocation2 + $0x30] sm:$0xff]  ;;  %v730_v58 = vld [vmem:[#allocation3 + $0x28] sm:$0xff] }
 0x11a   :  { %668 = vst [vmem:[%s1594_s4 + $0x30] sm:$0xff] %v656_v55  ;;  %662 = vst [vmem:[%s1594_s4] sm:$0xff] %v632_v56  ;;  %v659_v0 = vadd.f32 %v1079_v61, %v594_v50  ;;  %v635_v1 = vadd.f32 %v634_v62, %v1389_v6  ;;  %v650_v2 = vpop.f32.mrb[19].mxu1  ;;  %v682_v3 = vsel %vm675_vm2, %v656_v55, 0.0  ;;  %696 = vadd.xlane.f32.xlu1 %v678_v63  ;;  %v676_v6 = vsel %vm675_vm2, %v632_v56, 0.0  ;;  %v726_v50 = vld [vmem:[#allocation3 + $0x8] sm:$0xff]  ;;  %v729_v61 = vld [vmem:[#allocation3 + $0x20] sm:$0xff] }
 0x11b   :  { %666 = vst [vmem:[%s1594_s4 + $0x20] sm:$0xff] %v648_v59  ;;  %665 = vst [vmem:[%s1594_s4 + $0x18] sm:$0xff] %v643_v60  ;;  %v651_v4 = vadd.f32 %v650_v2, %v586_v34  ;;  %704 = vadd.xlane.f32.xlu0 %v682_v3  ;;  %v679_v5 = vsel %vm675_vm2, %v643_v60, 0.0  ;;  %v680_v8 = vsel %vm675_vm2, %v648_v59, 0.0  ;;  %v735_v10 = vmul.f32 %v678_v63, %v678_v63 }
 0x11c   :  { %669 = vst [vmem:[%s1594_s4 + $0x38] sm:$0xff] %v659_v0  ;;  %663 = vst [vmem:[%s1594_s4 + $0x8] sm:$0xff] %v635_v1  ;;  %v683_v7 = vsel %vm675_vm2, %v659_v0, 0.0  ;;  %v736_v11 = vmul.f32 %v679_v5, %v679_v5  ;;  %v677_v12 = vsel %vm675_vm2, %v635_v1, 0.0  ;;  %v733_v14 = vmul.f32 %v676_v6, %v676_v6 }
 0x11d   :  { %667 = vst [vmem:[%s1594_s4 + $0x28] sm:$0xff] %v651_v4  ;;  %v681_v9 = vsel %vm675_vm2, %v651_v4, 0.0  ;;  %v734_v13 = vmul.f32 %v677_v12, %v677_v12  ;;  %v737_v16 = vmul.f32 %v680_v8, %v680_v8  ;;  %v740_v17 = vmul.f32 %v683_v7, %v683_v7 }
 0x11e   :  { %698 = vadd.xlane.f32.xlu1 %v679_v5  ;;  %v738_v15 = vmul.f32 %v681_v9, %v681_v9  ;;  %v739_v18 = vmul.f32 %v682_v3, %v682_v3 }
 0x11f   :  { %692 = vadd.xlane.f32.xlu0 %v676_v6 }
 0x122   :  { %706 = vadd.xlane.f32.xlu1 %v683_v7  ;;  %v732_v7 = vld [vmem:[#allocation3 + $0x38] sm:$0xff] }
 0x123   :  { %700 = vadd.xlane.f32.xlu0 %v680_v8 }
 0x126   :  { %702 = vadd.xlane.f32.xlu1 %v681_v9 }
 0x127   :  { %745 = vadd.xlane.f32.xlu0 %v735_v10 }
 0x12a   :  { %747 = vadd.xlane.f32.xlu1 %v736_v11  ;;  %v731_v11 = vld [vmem:[#allocation3 + $0x30] sm:$0xff] }
 0x12b   :  { %694 = vadd.xlane.f32.xlu0 %v677_v12 }
 0x12e   :  { %743 = vadd.xlane.f32.xlu1 %v734_v13 }
 0x12f   :  { %741 = vadd.xlane.f32.xlu0 %v733_v14 }
 0x132   :  { %751 = vadd.xlane.f32.xlu1 %v738_v15 }
 0x133   :  { %749 = vadd.xlane.f32.xlu0 %v737_v16 }
 0x136   :  { %755 = vadd.xlane.f32.xlu1 %v740_v17 }
 0x137   :  { %753 = vadd.xlane.f32.xlu0 %v739_v18 }
 0x1a7   :  { %v697_v21 = vpop.xlane.xlu1 %696 }
 0x1a8   :  { %v705_v22 = vpop.xlane.xlu0 %704  ;;  %v710_v23 = vadd.f32 %v697_v21, %v686_v19 }
 0x1a9   :  { %v714_v24 = vadd.f32 %v705_v22, %v690_v20 }
 0x1aa   :  { %719 = vst.msk [vmem:[#allocation2 + $0x10] sm:$0xff] %vm25_vm1, %v710_v23 }
 0x1ab   :  { %723 = vst.msk [vmem:[#allocation2 + $0x30] sm:$0xff] %vm25_vm1, %v714_v24  ;;  %v699_v27 = vpop.xlane.xlu1 %698 }
 0x1ac   :  { %v711_v28 = vadd.f32 %v699_v27, %v687_v25  ;;  %v693_v29 = vpop.xlane.xlu0 %692 }
 0x1ad   :  { %v708_v30 = vadd.f32 %v693_v29, %v684_v26 }
 0x1ae   :  { %720 = vst.msk [vmem:[#allocation2 + $0x18] sm:$0xff] %vm25_vm1, %v711_v28 }
 0x1af   :  { %717 = vst.msk [vmem:[#allocation2] sm:$0xff] %vm25_vm1, %v708_v30  ;;  %v707_v33 = vpop.xlane.xlu1 %706 }
 0x1b0   :  { %v715_v34 = vadd.f32 %v707_v33, %v691_v31  ;;  %v701_v35 = vpop.xlane.xlu0 %700 }
 0x1b1   :  { %v712_v36 = vadd.f32 %v701_v35, %v688_v32  ;;  %v778_v46 = vld [vmem:[#allocation2 + $0x10] sm:$0xff] }
 0x1b2   :  { %724 = vst.msk [vmem:[#allocation2 + $0x38] sm:$0xff] %vm25_vm1, %v715_v34  ;;  %v1433_v52 = vmul.f32 0.010204081, %v778_v46  ;;  %v782_v33 = vld [vmem:[#allocation2 + $0x30] sm:$0xff] }
 0x1b3   :  { %721 = vst.msk [vmem:[#allocation2 + $0x20] sm:$0xff] %vm25_vm1, %v712_v36  ;;  %v703_v39 = vpop.xlane.xlu1 %702 }
 0x1b4   :  { %v713_v40 = vadd.f32 %v703_v39, %v689_v37  ;;  %v746_v41 = vpop.xlane.xlu0 %745  ;;  %v810_v62 = vmul.f32 %v1433_v52, %v1433_v52 }
 0x1b5   :  { %v759_v42 = vadd.f32 %v746_v41, %v727_v38  ;;  %v779_v53 = vld [vmem:[#allocation2 + $0x18] sm:$0xff] }
 0x1b6   :  { %722 = vst.msk [vmem:[#allocation2 + $0x28] sm:$0xff] %vm25_vm1, %v713_v40  ;;  %v1436_v59 = vmul.f32 0.010204081, %v779_v53  ;;  %v776_v1 = vld [vmem:[#allocation2] sm:$0xff] }
 0x1b7   :  { %767 = vst.msk [vmem:[#allocation3 + $0x10] sm:$0xff] %vm25_vm1, %v759_v42  ;;  %v748_v45 = vpop.xlane.xlu1 %747  ;;  %v1445_v12 = vmul.f32 0.010204081, %v776_v1 }
 0x1b8   :  { %v760_v47 = vadd.f32 %v748_v45, %v728_v43  ;;  %v695_v48 = vpop.xlane.xlu0 %694  ;;  %v811_v8 = vmul.f32 %v1436_v59, %v1436_v59  ;;  %v1464_v43 = vmul.f32 0.010204081, %v782_v33 }
 0x1b9   :  { %v709_v49 = vadd.f32 %v695_v48, %v685_v44  ;;  %v783_v21 = vld [vmem:[#allocation2 + $0x38] sm:$0xff]  ;;  %v808_v30 = vmul.f32 %v1445_v12, %v1445_v12 }
 0x1ba   :  { %768 = vst.msk [vmem:[#allocation3 + $0x18] sm:$0xff] %vm25_vm1, %v760_v47  ;;  %v780_v17 = vld [vmem:[#allocation2 + $0x20] sm:$0xff]  ;;  %v1460_v36 = vmul.f32 0.010204081, %v783_v21 }
 0x1bb   :  { %718 = vst.msk [vmem:[#allocation2 + $0x8] sm:$0xff] %vm25_vm1, %v709_v49  ;;  %v744_v54 = vpop.xlane.xlu1 %743  ;;  %v1457_v31 = vmul.f32 0.010204081, %v780_v17  ;;  %v833_v17 = vld [vmem:[%s1595_s2 + $0x8] sm:$0xff] }
 0x1bc   :  { %v758_v55 = vadd.f32 %v744_v54, %v726_v50  ;;  %v742_v56 = vpop.xlane.xlu0 %741  ;;  %v815_v53 = vmul.f32 %v1460_v36, %v1460_v36 }
 0x1bd   :  { %v757_v57 = vadd.f32 %v742_v56, %v725_v51  ;;  %v781_v13 = vld [vmem:[#allocation2 + $0x28] sm:$0xff]  ;;  %v812_v44 = vmul.f32 %v1457_v31, %v1457_v31 }
 0x1be   :  { %v794_v60 = vld [vmem:[#allocation3 + $0x10] sm:$0xff]  ;;  %766 = vst.msk [vmem:[#allocation3 + $0x8] sm:$0xff] %vm25_vm1, %v758_v55  ;;  %v1450_v25 = vmul.f32 0.010204081, %v781_v13 }
 0x1bf   :  { %v802_v63 = vmul.f32 0.010204081, %v794_v60  ;;  %765 = vst.msk [vmem:[#allocation3] sm:$0xff] %vm25_vm1, %v757_v57  ;;  %v752_v0 = vpop.xlane.xlu1 %751  ;;  %v814_v57 = vmul.f32 %v1464_v43, %v1464_v43 }
 0x1c0   :  { %v762_v2 = vadd.f32 %v752_v0, %v730_v58  ;;  %v750_v3 = vpop.xlane.xlu0 %749  ;;  %v813_v39 = vmul.f32 %v1450_v25, %v1450_v25  ;;  %v834_v58 = vld [vmem:[%s1595_s2 + $0x10] sm:$0xff] }
 0x1c1   :  { %v818_v4 = vsub.f32 %v802_v63, %v810_v62  ;;  %v795_v5 = vld [vmem:[#allocation3 + $0x18] sm:$0xff]  ;;  %v761_v6 = vadd.f32 %v750_v3, %v729_v61 }
 0x1c2   :  { %v803_v9 = vmul.f32 0.010204081, %v795_v5  ;;  %v777_v10 = vld [vmem:[#allocation2 + $0x8] sm:$0xff]  ;;  %770 = vst.msk [vmem:[#allocation3 + $0x28] sm:$0xff] %vm25_vm1, %v762_v2 }
 0x1c3   :  { %v826_v14 = vmax.f32 %v818_v4, 0.0  ;;  %v1447_v15 = vmul.f32 0.010204081, %v777_v10  ;;  %769 = vst.msk [vmem:[#allocation3 + $0x20] sm:$0xff] %vm25_vm1, %v761_v6  ;;  %v756_v16 = vpop.xlane.xlu1 %755  ;;  %v835_v4 = vld [vmem:[%s1595_s2 + $0x18] sm:$0xff]  ;;  %v874_v6 = vld [vmem:[%s1596_s3 + $0x10] sm:$0xff] }
 0x1c4   :  { %v819_v18 = vsub.f32 %v803_v9, %v811_v8  ;;  %v764_v19 = vadd.f32 %v756_v16, %v732_v7  ;;  %v754_v20 = vpop.xlane.xlu0 %753  ;;  %v875_v16 = vld [vmem:[%s1596_s3 + $0x18] sm:$0xff] }
 0x1c5   :  { %v842_v22 = vadd.f32 1e-05, %v826_v14  ;;  %v793_v23 = vld [vmem:[#allocation3 + $0x8] sm:$0xff]  ;;  %v763_v24 = vadd.f32 %v754_v20, %v731_v11  ;;  %v809_v27 = vmul.f32 %v1447_v15, %v1447_v15 }
 0x1c6   :  { %v827_v26 = vmax.f32 %v819_v18, 0.0  ;;  %v801_v28 = vmul.f32 0.010204081, %v793_v23  ;;  %v792_v29 = vld [vmem:[#allocation3] sm:$0xff]  ;;  %772 = vst.msk [vmem:[#allocation3 + $0x38] sm:$0xff] %vm25_vm1, %v764_v19  ;;  %v873_v23 = vld [vmem:[%s1596_s3 + $0x8] sm:$0xff] }
 0x1c7   :  { %1153 = vrsqrt.f32 %v842_v22  ;;  %v800_v32 = vmul.f32 0.010204081, %v792_v29  ;;  %771 = vst.msk [vmem:[#allocation3 + $0x30] sm:$0xff] %vm25_vm1, %v763_v24  ;;  %v832_v18 = vld [vmem:[%s1595_s2] sm:$0xff] }
 0x1c8   :  { %v843_v34 = vadd.f32 1e-05, %v827_v26  ;;  %v817_v35 = vsub.f32 %v801_v28, %v809_v27  ;;  %v872_v27 = vld [vmem:[%s1596_s3] sm:$0xff] }
 0x1c9   :  { %v816_v37 = vsub.f32 %v800_v32, %v808_v30  ;;  %v797_v38 = vld [vmem:[#allocation3 + $0x28] sm:$0xff]  ;;  %v836_v28 = vld [vmem:[%s1595_s2 + $0x20] sm:$0xff] }
 0x1ca   :  { %1155 = vrsqrt.f32 %v843_v34  ;;  %v825_v40 = vmax.f32 %v817_v35, 0.0  ;;  %v805_v41 = vmul.f32 0.010204081, %v797_v38  ;;  %v796_v42 = vld [vmem:[#allocation3 + $0x20] sm:$0xff]  ;;  %v877_v35 = vld [vmem:[%s1596_s3 + $0x28] sm:$0xff]  ;;  %v839_v38 = vld [vmem:[%s1595_s2 + $0x38] sm:$0xff] }
 0x1cb   :  { %v824_v45 = vmax.f32 %v816_v37, 0.0  ;;  %v804_v46 = vmul.f32 0.010204081, %v796_v42 }
 0x1cc   :  { %v841_v47 = vadd.f32 1e-05, %v825_v40  ;;  %v821_v48 = vsub.f32 %v805_v41, %v813_v39  ;;  %v876_v39 = vld [vmem:[%s1596_s3 + $0x20] sm:$0xff]  ;;  %v838_v40 = vld [vmem:[%s1595_s2 + $0x30] sm:$0xff] }
 0x1cd   :  { %v840_v49 = vadd.f32 1e-05, %v824_v45  ;;  %v820_v50 = vsub.f32 %v804_v46, %v812_v44  ;;  %v799_v51 = vld [vmem:[#allocation3 + $0x38] sm:$0xff] }
 0x1ce   :  { %1157 = vrsqrt.f32 %v841_v47  ;;  %v829_v54 = vmax.f32 %v821_v48, 0.0  ;;  %v807_v55 = vmul.f32 0.010204081, %v799_v51  ;;  %v798_v56 = vld [vmem:[#allocation3 + $0x30] sm:$0xff]  ;;  %v879_v47 = vld [vmem:[%s1596_s3 + $0x38] sm:$0xff] }
 0x1cf   :  { %1159 = vrsqrt.f32 %v840_v49  ;;  %v828_v60 = vmax.f32 %v820_v50, 0.0  ;;  %v806_v61 = vmul.f32 0.010204081, %v798_v56  ;;  %v878_v49 = vld [vmem:[%s1596_s3 + $0x30] sm:$0xff] }
 0x1d0   :  { %v845_v62 = vadd.f32 1e-05, %v829_v54  ;;  %v823_v63 = vsub.f32 %v807_v55, %v815_v53 }
 0x1d1   :  { %v1154_v0 = vpop.eup %1153  ;;  %v844_v1 = vadd.f32 1e-05, %v828_v60  ;;  %v822_v2 = vsub.f32 %v806_v61, %v814_v57 }
 0x1d2   :  { %v858_v3 = vmul.f32 %v1154_v0, %v834_v58  ;;  %1161 = vrsqrt.f32 %v845_v62  ;;  %v831_v5 = vmax.f32 %v823_v63, 0.0 }
 0x1d3   :  { %1163 = vrsqrt.f32 %v844_v1  ;;  %v830_v7 = vmax.f32 %v822_v2, 0.0 }
 0x1d4   :  { %v1156_v8 = vpop.eup %1155  ;;  %866 = vst.msk [vmem:[%s1597_s5 + $0x10] sm:$0xff] %vm25_vm1, %v858_v3  ;;  %v882_v9 = vmul.f32 %v858_v3, %v1433_v52  ;;  %v847_v10 = vadd.f32 1e-05, %v831_v5 }
 0x1d5   :  { %v859_v11 = vmul.f32 %v1156_v8, %v835_v4  ;;  %v846_v13 = vadd.f32 1e-05, %v830_v7 }
 0x1d6   :  { %v890_v14 = vsub.f32 %v874_v6, %v882_v9  ;;  %1165 = vrsqrt.f32 %v847_v10 }
 0x1d7   :  { %867 = vst.msk [vmem:[%s1597_s5 + $0x18] sm:$0xff] %vm25_vm1, %v859_v11  ;;  %v883_v52 = vmul.f32 %v859_v11, %v1436_v59  ;;  %1167 = vrsqrt.f32 %v846_v13  ;;  %v837_v59 = vld [vmem:[%s1595_s2 + $0x28] sm:$0xff] }
 0x1d8   :  { %v1158_v19 = vpop.eup %1157  ;;  %898 = vst.msk [vmem:[%s1598_s6 + $0x10] sm:$0xff] %vm25_vm1, %v890_v14 }
 0x1d9   :  { %v1160_v20 = vpop.eup %1159  ;;  %v891_v21 = vsub.f32 %v875_v16, %v883_v52  ;;  %v857_v22 = vmul.f32 %v1158_v19, %v833_v17 }
 0x1da   :  { %v856_v24 = vmul.f32 %v1160_v20, %v832_v18 }
 0x1db   :  { %899 = vst.msk [vmem:[%s1598_s6 + $0x18] sm:$0xff] %vm25_vm1, %v891_v21  ;;  %865 = vst.msk [vmem:[%s1597_s5 + $0x8] sm:$0xff] %vm25_vm1, %v857_v22  ;;  %v881_v26 = vmul.f32 %v857_v22, %v1447_v15 }
 0x1dc   :  { %v1162_v29 = vpop.eup %1161  ;;  %864 = vst.msk [vmem:[%s1597_s5] sm:$0xff] %vm25_vm1, %v856_v24  ;;  %v880_v30 = vmul.f32 %v856_v24, %v1445_v12 }
 0x1dd   :  { %v1164_v32 = vpop.eup %1163  ;;  %v889_v33 = vsub.f32 %v873_v23, %v881_v26  ;;  %v861_v34 = vmul.f32 %v1162_v29, %v837_v59 }
 0x1de   :  { %v888_v15 = vsub.f32 %v872_v27, %v880_v30  ;;  %v860_v37 = vmul.f32 %v1164_v32, %v836_v28 }
 0x1df   :  { %897 = vst.msk [vmem:[%s1598_s6 + $0x8] sm:$0xff] %vm25_vm1, %v889_v33  ;;  %869 = vst.msk [vmem:[%s1597_s5 + $0x28] sm:$0xff] %vm25_vm1, %v861_v34  ;;  %v885_v12 = vmul.f32 %v861_v34, %v1450_v25 }
 0x1e0   :  { %v1166_v41 = vpop.eup %1165  ;;  %896 = vst.msk [vmem:[%s1598_s6] sm:$0xff] %vm25_vm1, %v888_v15  ;;  %868 = vst.msk [vmem:[%s1597_s5 + $0x20] sm:$0xff] %vm25_vm1, %v860_v37  ;;  %v884_v25 = vmul.f32 %v860_v37, %v1457_v31 }
 0x1e1   :  { %v1168_v42 = vpop.eup %1167  ;;  %v893_v44 = vsub.f32 %v877_v35, %v885_v12  ;;  %v863_v45 = vmul.f32 %v1166_v41, %v839_v38 }
 0x1e2   :  { %v892_v46 = vsub.f32 %v876_v39, %v884_v25  ;;  %v862_v48 = vmul.f32 %v1168_v42, %v838_v40 }
 0x1e3   :  { %901 = vst.msk [vmem:[%s1598_s6 + $0x28] sm:$0xff] %vm25_vm1, %v893_v44  ;;  %871 = vst.msk [vmem:[%s1597_s5 + $0x38] sm:$0xff] %vm25_vm1, %v863_v45  ;;  %v887_v31 = vmul.f32 %v863_v45, %v1460_v36 }
 0x1e4   :  { %900 = vst.msk [vmem:[%s1598_s6 + $0x20] sm:$0xff] %vm25_vm1, %v892_v46  ;;  %870 = vst.msk [vmem:[%s1597_s5 + $0x30] sm:$0xff] %vm25_vm1, %v862_v48  ;;  %v886_v50 = vmul.f32 %v862_v48, %v1464_v43 }
 0x1e5   :  { %v895_v51 = vsub.f32 %v879_v47, %v887_v31 }
 0x1e6   :  { %v894_v53 = vsub.f32 %v878_v49, %v886_v50 }
 0x1e7   :  { %903 = vst.msk [vmem:[%s1598_s6 + $0x38] sm:$0xff] %vm25_vm1, %v895_v51 }
 0x1e8   :  { %902 = vst.msk [vmem:[%s1598_s6 + $0x30] sm:$0xff] %vm25_vm1, %v894_v53 }

// kernel: conv_initiation_classifier_forward.13
= control target key start
LH: loop header
LB: loop body
LE: loop exit
PB: predicated region body
PF: predicated region fallthrough
CT: control target
= control target key end

     0   :  { %s11349_s0 = inlined_call_operand.vmem [shape: bf16[2,3136], index: 0, kind: input, shape index: {}]   ;;  %s11350_s1 = inlined_call_operand.vmem [shape: bf16[3136,512], index: 1, kind: input, shape index: {}]   ;;  %s11351_s2 = inlined_call_operand.vmem [shape: f32[1,512], index: 2, kind: input, shape index: {}]   ;;  %s11352_s3 = inlined_call_operand.vmem [shape: f32[512,1], index: 3, kind: input, shape index: {}]   ;;  %s11353_s4 = inlined_call_operand.<no memory space> [shape: f32[1,1], index: 4, kind: input, shape index: {}]   ;;  %s11354_s5 = inlined_call_operand.vmem [shape: f32[2,1], index: 5, kind: output, shape index: {}]  }
   0x1   :  { %v10_v0 = vstv %s11353_s4 }
   0x2   :  { %11 = vst [vmem:[#allocation2] sm:$0x1] %v10_v0 }
   0x3   :  { %v7382_v1 = vld [vmem:[%s11350_s1 + $0x4] ss:$16 sps:$4 sm:$0xff]   ;;  %v7384_v2 = vld [vmem:[%s11350_s1 + $0xc] ss:$16 sps:$4 sm:$0xff]   ;;  %v7386_v3 = vld [vmem:[%s11350_s1] ss:$16 sps:$4 sm:$0xff]   ;;  %v825_v39 = vlaneseq }
   0x4   :  { %5037 = vmatprep.subr.bf16.mxu0 %v7382_v1  ;;  %v7387_v4 = vld [vmem:[%s11350_s1 + $0x8] ss:$16 sps:$4 sm:$0xff]   ;;  %5570 = vmatprep.subr.bf16.mxu1 %v7384_v2  ;;  %v7388_v5 = vld [vmem:[%s11350_s1 + $0x24] ss:$16 sps:$4 sm:$0xff]   ;;  %v7390_v6 = vld [vmem:[%s11350_s1 + $0x2c] ss:$16 sps:$4 sm:$0xff]  }
   0x5   :  { %5038 = vmatpush1.bf16.msra.mxu0 %v7386_v3  ;;  %5571 = vmatpush1.bf16.msra.mxu1 %v7387_v4  ;;  %v7392_v7 = vld [vmem:[%s11350_s1 + $0x20] ss:$16 sps:$4 sm:$0xff]   ;;  %v7393_v8 = vld [vmem:[%s11350_s1 + $0x28] ss:$16 sps:$4 sm:$0xff]   ;;  %v7394_v9 = vld [vmem:[%s11350_s1 + $0x44] ss:$16 sps:$4 sm:$0xff]  }
   0x6   :  { %5039 = vmatprep.subr.bf16.mxu0 %v7388_v5  ;;  %5572 = vmatprep.subr.bf16.mxu1 %v7390_v6  ;;  %v7396_v10 = vld [vmem:[%s11350_s1 + $0x4c] ss:$16 sps:$4 sm:$0xff]   ;;  %v7398_v11 = vld [vmem:[%s11350_s1 + $0x40] ss:$16 sps:$4 sm:$0xff]   ;;  %v7399_v12 = vld [vmem:[%s11350_s1 + $0x48] ss:$16 sps:$4 sm:$0xff]  }
   0x7   :  { %v7400_v13 = vld [vmem:[%s11350_s1 + $0x64] ss:$16 sps:$4 sm:$0xff]   ;;  %v7402_v14 = vld [vmem:[%s11350_s1 + $0x6c] ss:$16 sps:$4 sm:$0xff]   ;;  %v7404_v15 = vld [vmem:[%s11350_s1 + $0x60] ss:$16 sps:$4 sm:$0xff]  }
   0x8   :  { %v7405_v16 = vld [vmem:[%s11350_s1 + $0x68] ss:$16 sps:$4 sm:$0xff]   ;;  %v7406_v17 = vld [vmem:[%s11350_s1 + $0x84] ss:$16 sps:$4 sm:$0xff]   ;;  %v7408_v18 = vld [vmem:[%s11350_s1 + $0x8c] ss:$16 sps:$4 sm:$0xff]  }
   0x9   :  { %5040 = vmatpush1.bf16.msra.mxu0 %v7392_v7  ;;  %5573 = vmatpush1.bf16.msra.mxu1 %v7393_v8  ;;  %v7410_v19 = vld [vmem:[%s11350_s1 + $0x80] ss:$16 sps:$4 sm:$0xff]   ;;  %v7411_v20 = vld [vmem:[%s11350_s1 + $0x88] ss:$16 sps:$4 sm:$0xff]   ;;  %v7412_v21 = vld [vmem:[%s11350_s1 + $0xa4] ss:$16 sps:$4 sm:$0xff]  }
   0xa   :  { %5041 = vmatprep.subr.bf16.mxu0 %v7394_v9  ;;  %5574 = vmatprep.subr.bf16.mxu1 %v7396_v10  ;;  %v7414_v22 = vld [vmem:[%s11350_s1 + $0xac] ss:$16 sps:$4 sm:$0xff]   ;;  %v7416_v23 = vld [vmem:[%s11350_s1 + $0xa0] ss:$16 sps:$4 sm:$0xff]   ;;  %v7417_v24 = vld [vmem:[%s11350_s1 + $0xa8] ss:$16 sps:$4 sm:$0xff]  }
   0xb   :  { %v7418_v25 = vld [vmem:[%s11350_s1 + $0xc4] ss:$16 sps:$4 sm:$0xff]   ;;  %v7420_v26 = vld [vmem:[%s11350_s1 + $0xcc] ss:$16 sps:$4 sm:$0xff]   ;;  %v7422_v27 = vld [vmem:[%s11350_s1 + $0xc0] ss:$16 sps:$4 sm:$0xff]  }
   0xc   :  { %v7423_v28 = vld [vmem:[%s11350_s1 + $0xc8] ss:$16 sps:$4 sm:$0xff]   ;;  %v7424_v29 = vld [vmem:[%s11350_s1 + $0xe4] ss:$16 sps:$4 sm:$0xff]   ;;  %v7426_v30 = vld [vmem:[%s11350_s1 + $0xec] ss:$16 sps:$4 sm:$0xff]  }
   0xd   :  { %5042 = vmatpush1.bf16.msra.mxu0 %v7398_v11  ;;  %5575 = vmatpush1.bf16.msra.mxu1 %v7399_v12  ;;  %v7428_v31 = vld [vmem:[%s11350_s1 + $0xe0] ss:$16 sps:$4 sm:$0xff]   ;;  %v7429_v32 = vld [vmem:[%s11350_s1 + $0xe8] ss:$16 sps:$4 sm:$0xff]   ;;  %v7430_v33 = vld [vmem:[%s11350_s1 + $0x104] ss:$16 sps:$4 sm:$0xff]  }
   0xe   :  { %5043 = vmatprep.subr.bf16.mxu0 %v7400_v13  ;;  %5576 = vmatprep.subr.bf16.mxu1 %v7402_v14  ;;  %v7432_v34 = vld [vmem:[%s11350_s1 + $0x10c] ss:$16 sps:$4 sm:$0xff]   ;;  %v7434_v35 = vld [vmem:[%s11350_s1 + $0x100] ss:$16 sps:$4 sm:$0xff]   ;;  %v7435_v36 = vld [vmem:[%s11350_s1 + $0x108] ss:$16 sps:$4 sm:$0xff]  }
   0xf   :  { %v7436_v37 = vld [vmem:[%s11350_s1 + $0x124] ss:$16 sps:$4 sm:$0xff]   ;;  %v7438_v38 = vld [vmem:[%s11350_s1 + $0x12c] ss:$16 sps:$4 sm:$0xff]   ;;  %v8578_v40 = vmov 1966171168  }
  0x10   :  { %v866_v41 = vunpack.c.l.s4 %v8578_v40  ;;  %v7440_v42 = vld [vmem:[%s11350_s1 + $0x120] ss:$16 sps:$4 sm:$0xff]   ;;  %v7441_v43 = vld [vmem:[%s11350_s1 + $0x128] ss:$16 sps:$4 sm:$0xff]   ;;  %v7442_v44 = vld [vmem:[%s11350_s1 + $0x144] ss:$16 sps:$4 sm:$0xff]  }
  0x11   :  { %5044 = vmatpush1.bf16.msra.mxu0 %v7404_v15  ;;  %5577 = vmatpush1.bf16.msra.mxu1 %v7405_v16  ;;  %v7444_v45 = vld [vmem:[%s11350_s1 + $0x14c] ss:$16 sps:$4 sm:$0xff]   ;;  %v8739_v46 = vshrl.u32 %v825_v39, 7  ;;  %v7446_v48 = vld [vmem:[%s11350_s1 + $0x140] ss:$16 sps:$4 sm:$0xff]   ;;  %vm5033_vm0 = vcmask 523264  }
  0x12   :  { %5045 = vmatprep.subr.bf16.mxu0 %v7406_v17  ;;  %5578 = vmatprep.subr.bf16.mxu1 %v7408_v18  ;;  %v867_v47 = vunpack.c.0.s8 %v866_v41  ;;  %v7447_v49 = vld [vmem:[%s11350_s1 + $0x148] ss:$16 sps:$4 sm:$0xff]   ;;  %v7448_v50 = vld [vmem:[%s11350_s1 + $0x164] ss:$16 sps:$4 sm:$0xff]   ;;  %v7450_v51 = vld [vmem:[%s11350_s1 + $0x16c] ss:$16 sps:$4 sm:$0xff]  }
  0x13   :  { %v7452_v52 = vld [vmem:[%s11350_s1 + $0x160] ss:$16 sps:$4 sm:$0xff]   ;;  %v7453_v53 = vld [vmem:[%s11350_s1 + $0x168] ss:$16 sps:$4 sm:$0xff]   ;;  %v7454_v57 = vld [vmem:[%s11350_s1 + $0x184] ss:$16 sps:$4 sm:$0xff]  }
  0x14   :  { %v8760_v54 = vsub.s32 %v867_v47, %v8739_v46  ;;  %v7478_v55 = vld [vmem:[%s11349_s0] ss:$25 sps:$4 sm:$0xff]   ;;  %v7480_v56 = vld [vmem:[%s11349_s0 + $0x32] ss:$25 sps:$4 sm:$0xff]   ;;  %vm6318_vm1 = vcmask 7168  }
  0x15   :  { %5046 = vmatpush1.bf16.msra.mxu0 %v7410_v19  ;;  %5579 = vmatpush1.bf16.msra.mxu1 %v7411_v20  ;;  %v7456_v58 = vld [vmem:[%s11350_s1 + $0x18c] ss:$16 sps:$4 sm:$0xff]   ;;  %v7458_v61 = vld [vmem:[%s11350_s1 + $0x180] ss:$16 sps:$4 sm:$0xff]   ;;  %v7459_v62 = vld [vmem:[%s11350_s1 + $0x188] ss:$16 sps:$4 sm:$0xff]  }
  0x16   :  { %5047 = vmatprep.subr.bf16.mxu0 %v7412_v21  ;;  %5580 = vmatprep.subr.bf16.mxu1 %v7414_v22  ;;  %v871_v59 = vrot.slane %v7478_v55, %v8760_v54  ;;  %v885_v60 = vrot.slane %v7480_v56, %v8760_v54  ;;  %v7460_v0 = vld [vmem:[%s11350_s1 + $0x1a4] ss:$16 sps:$4 sm:$0xff]   ;;  %v7462_v1 = vld [vmem:[%s11350_s1 + $0x1ac] ss:$16 sps:$4 sm:$0xff]   ;;  %v7464_v3 = vld [vmem:[%s11350_s1 + $0x1a0] ss:$16 sps:$4 sm:$0xff]  }
  0x17   :  { %v7465_v4 = vld [vmem:[%s11350_s1 + $0x1a8] ss:$16 sps:$4 sm:$0xff]   ;;  %v7466_v5 = vld [vmem:[%s11350_s1 + $0x1c4] ss:$16 sps:$4 sm:$0xff]   ;;  %v7468_v6 = vld [vmem:[%s11350_s1 + $0x1cc] ss:$16 sps:$4 sm:$0xff]  }
  0x18   :  { %v894_v63 = vcombine.high %v871_v59, %v885_v60  ;;  %v7470_v7 = vld [vmem:[%s11350_s1 + $0x1c0] ss:$16 sps:$4 sm:$0xff]   ;;  %v7471_v8 = vld [vmem:[%s11350_s1 + $0x1c8] ss:$16 sps:$4 sm:$0xff]   ;;  %v7472_v9 = vld [vmem:[%s11350_s1 + $0x1e4] ss:$16 sps:$4 sm:$0xff]   ;;  %v893_v11 = vcombine.low %v871_v59, %v885_v60 }
  0x19   :  { %5048 = vmatpush1.bf16.msra.mxu0 %v7416_v23  ;;  %5581 = vmatpush1.bf16.msra.mxu1 %v7417_v24  ;;  %v7474_v10 = vld [vmem:[%s11350_s1 + $0x1ec] ss:$16 sps:$4 sm:$0xff]   ;;  %v7476_v12 = vld [vmem:[%s11350_s1 + $0x1e0] ss:$16 sps:$4 sm:$0xff]   ;;  %v7477_v13 = vld [vmem:[%s11350_s1 + $0x1e8] ss:$16 sps:$4 sm:$0xff]  }
  0x1a   :  { %5049 = vmatprep.subr.bf16.mxu0 %v7418_v25  ;;  %5582 = vmatprep.subr.bf16.mxu1 %v7420_v26  ;;  %v917_v2 = vrot.slane %v894_v63, %v8760_v54  ;;  %v7484_v14 = vld [vmem:[%s11350_s1 + $0x204] ss:$16 sps:$4 sm:$0xff]   ;;  %v7487_v15 = vld [vmem:[%s11350_s1 + $0x20c] ss:$16 sps:$4 sm:$0xff]   ;;  %v8826_v16 = vrot.slane %v893_v11, %v8760_v54  ;;  %v7482_v17 = vld [vmem:[%s11350_s1 + $0x200] ss:$16 sps:$4 sm:$0xff]  }
  0x1b   :  { %v7485_v18 = vld [vmem:[%s11350_s1 + $0x208] ss:$16 sps:$4 sm:$0xff]   ;;  %v7490_v19 = vld [vmem:[%s11350_s1 + $0x224] ss:$16 sps:$4 sm:$0xff]   ;;  %v7493_v20 = vld [vmem:[%s11350_s1 + $0x22c] ss:$16 sps:$4 sm:$0xff]  }
  0x1c   :  { %5069 = vmatprep.mubr.bf16.mxu0 %v917_v2  ;;  %5602 = vmatprep.mubr.bf16.mxu1 %v917_v2  ;;  %v927_v21 = vcombine.high %v917_v2, %v917_v2  ;;  %v7488_v22 = vld [vmem:[%s11350_s1 + $0x220] ss:$16 sps:$4 sm:$0xff]   ;;  %v7491_v23 = vld [vmem:[%s11350_s1 + $0x228] ss:$16 sps:$4 sm:$0xff]   ;;  %v7496_v24 = vld [vmem:[%s11350_s1 + $0x244] ss:$16 sps:$4 sm:$0xff]  }
  0x1d   :  { %5050 = vmatpush1.bf16.msra.mxu0 %v7422_v27  ;;  %5583 = vmatpush1.bf16.msra.mxu1 %v7423_v28  ;;  %v7499_v25 = vld [vmem:[%s11350_s1 + $0x24c] ss:$16 sps:$4 sm:$0xff]   ;;  %v7494_v26 = vld [vmem:[%s11350_s1 + $0x240] ss:$16 sps:$4 sm:$0xff]   ;;  %v7497_v27 = vld [vmem:[%s11350_s1 + $0x248] ss:$16 sps:$4 sm:$0xff]  }
  0x1e   :  { %5051 = vmatprep.subr.bf16.mxu0 %v7424_v29  ;;  %5584 = vmatprep.subr.bf16.mxu1 %v7426_v30  ;;  %v7502_v28 = vld [vmem:[%s11350_s1 + $0x264] ss:$16 sps:$4 sm:$0xff]   ;;  %v7505_v29 = vld [vmem:[%s11350_s1 + $0x26c] ss:$16 sps:$4 sm:$0xff]   ;;  %v7500_v30 = vld [vmem:[%s11350_s1 + $0x260] ss:$16 sps:$4 sm:$0xff]  }
  0x1f   :  { %v7515_v39 = vld [vmem:[%s11350_s1 + $0x2a8] ss:$16 sps:$4 sm:$0xff]   ;;  %v7520_v40 = vld [vmem:[%s11350_s1 + $0x2c4] ss:$16 sps:$4 sm:$0xff]   ;;  %v7523_v41 = vld [vmem:[%s11350_s1 + $0x2cc] ss:$16 sps:$4 sm:$0xff]  }
  0x20   :  { %v7524_v47 = vld [vmem:[%s11350_s1 + $0x2e0] ss:$16 sps:$4 sm:$0xff]   ;;  %v7541_v55 = vld [vmem:[%s11350_s1 + $0x32c] ss:$16 sps:$4 sm:$0xff]   ;;  %v7556_v2 = vld [vmem:[%s11350_s1 + $0x384] ss:$16 sps:$4 sm:$0xff]  }
  0x21   :  { %5052 = vmatpush1.bf16.msra.mxu0 %v7428_v31  ;;  %5585 = vmatpush1.bf16.msra.mxu1 %v7429_v32  ;;  %v7503_v31 = vld [vmem:[%s11350_s1 + $0x268] ss:$16 sps:$4 sm:$0xff]   ;;  %v7508_v32 = vld [vmem:[%s11350_s1 + $0x284] ss:$16 sps:$4 sm:$0xff]   ;;  %v7536_v56 = vld [vmem:[%s11350_s1 + $0x320] ss:$16 sps:$4 sm:$0xff]  }
  0x22   :  { %5053 = vmatprep.subr.bf16.mxu0 %v7430_v33  ;;  %5586 = vmatprep.subr.bf16.mxu1 %v7432_v34  ;;  %v7511_v33 = vld [vmem:[%s11350_s1 + $0x28c] ss:$16 sps:$4 sm:$0xff]   ;;  %v7506_v34 = vld [vmem:[%s11350_s1 + $0x280] ss:$16 sps:$4 sm:$0xff]  }
  0x23   :  { %v7547_v59 = vld [vmem:[%s11350_s1 + $0x34c] ss:$16 sps:$4 sm:$0xff]   ;;  %v7542_v60 = vld [vmem:[%s11350_s1 + $0x340] ss:$16 sps:$4 sm:$0xff]  }
  0x24   :  { %v7553_v63 = vld [vmem:[%s11350_s1 + $0x36c] ss:$16 sps:$4 sm:$0xff]  }
  0x25   :  { %5054 = vmatpush1.bf16.msra.mxu0 %v7434_v35  ;;  %5587 = vmatpush1.bf16.msra.mxu1 %v7435_v36  ;;  %v7509_v35 = vld [vmem:[%s11350_s1 + $0x288] ss:$16 sps:$4 sm:$0xff]   ;;  %v7514_v36 = vld [vmem:[%s11350_s1 + $0x2a4] ss:$16 sps:$4 sm:$0xff]   ;;  %v7571_v11 = vld [vmem:[%s11350_s1 + $0x3cc] ss:$16 sps:$4 sm:$0xff]  }
  0x26   :  { %5055 = vmatprep.subr.bf16.mxu0 %v7436_v37  ;;  %5588 = vmatprep.subr.bf16.mxu1 %v7438_v38  ;;  %v7517_v37 = vld [vmem:[%s11350_s1 + $0x2ac] ss:$16 sps:$4 sm:$0xff]   ;;  %v7512_v38 = vld [vmem:[%s11350_s1 + $0x2a0] ss:$16 sps:$4 sm:$0xff]  }
  0x29   :  { %5056 = vmatpush1.bf16.msra.mxu0 %v7440_v42  ;;  %5589 = vmatpush1.bf16.msra.mxu1 %v7441_v43  ;;  %v7518_v42 = vld [vmem:[%s11350_s1 + $0x2c0] ss:$16 sps:$4 sm:$0xff]   ;;  %v7521_v43 = vld [vmem:[%s11350_s1 + $0x2c8] ss:$16 sps:$4 sm:$0xff]  }
  0x2a   :  { %5057 = vmatprep.subr.bf16.mxu0 %v7442_v44  ;;  %5590 = vmatprep.subr.bf16.mxu1 %v7444_v45  ;;  %v7526_v44 = vld [vmem:[%s11350_s1 + $0x2e4] ss:$16 sps:$4 sm:$0xff]   ;;  %v7529_v45 = vld [vmem:[%s11350_s1 + $0x2ec] ss:$16 sps:$4 sm:$0xff]  }
  0x2d   :  { %5058 = vmatpush1.bf16.msra.mxu0 %v7446_v48  ;;  %5591 = vmatpush1.bf16.msra.mxu1 %v7447_v49  ;;  %v7527_v48 = vld [vmem:[%s11350_s1 + $0x2e8] ss:$16 sps:$4 sm:$0xff]   ;;  %v7532_v49 = vld [vmem:[%s11350_s1 + $0x304] ss:$16 sps:$4 sm:$0xff]  }
  0x2e   :  { %5059 = vmatprep.subr.bf16.mxu0 %v7448_v50  ;;  %5592 = vmatprep.subr.bf16.mxu1 %v7450_v51  ;;  %v7535_v50 = vld [vmem:[%s11350_s1 + $0x30c] ss:$16 sps:$4 sm:$0xff]   ;;  %v7530_v51 = vld [vmem:[%s11350_s1 + $0x300] ss:$16 sps:$4 sm:$0xff]  }
  0x31   :  { %5060 = vmatpush1.bf16.msra.mxu0 %v7452_v52  ;;  %5593 = vmatpush1.bf16.msra.mxu1 %v7453_v53  ;;  %v7533_v52 = vld [vmem:[%s11350_s1 + $0x308] ss:$16 sps:$4 sm:$0xff]   ;;  %v7538_v53 = vld [vmem:[%s11350_s1 + $0x324] ss:$16 sps:$4 sm:$0xff]  }
  0x32   :  { %5061 = vmatprep.subr.bf16.mxu0 %v7454_v57  ;;  %5594 = vmatprep.subr.bf16.mxu1 %v7456_v58  ;;  %v7539_v57 = vld [vmem:[%s11350_s1 + $0x328] ss:$16 sps:$4 sm:$0xff]   ;;  %v7544_v58 = vld [vmem:[%s11350_s1 + $0x344] ss:$16 sps:$4 sm:$0xff]  }
  0x35   :  { %5062 = vmatpush1.bf16.msra.mxu0 %v7458_v61  ;;  %5595 = vmatpush1.bf16.msra.mxu1 %v7459_v62  ;;  %v7545_v61 = vld [vmem:[%s11350_s1 + $0x348] ss:$16 sps:$4 sm:$0xff]   ;;  %v7550_v62 = vld [vmem:[%s11350_s1 + $0x364] ss:$16 sps:$4 sm:$0xff]  }
  0x36   :  { %5063 = vmatprep.subr.bf16.mxu0 %v7460_v0  ;;  %5596 = vmatprep.subr.bf16.mxu1 %v7462_v1  ;;  %v7548_v0 = vld [vmem:[%s11350_s1 + $0x360] ss:$16 sps:$4 sm:$0xff]   ;;  %v7551_v1 = vld [vmem:[%s11350_s1 + $0x368] ss:$16 sps:$4 sm:$0xff]  }
  0x39   :  { %5064 = vmatpush1.bf16.msra.mxu0 %v7464_v3  ;;  %5597 = vmatpush1.bf16.msra.mxu1 %v7465_v4  ;;  %v7559_v3 = vld [vmem:[%s11350_s1 + $0x38c] ss:$16 sps:$4 sm:$0xff]   ;;  %v7554_v4 = vld [vmem:[%s11350_s1 + $0x380] ss:$16 sps:$4 sm:$0xff]  }
  0x3a   :  { %5065 = vmatprep.subr.bf16.mxu0 %v7466_v5  ;;  %5598 = vmatprep.subr.bf16.mxu1 %v7468_v6  ;;  %v7557_v5 = vld [vmem:[%s11350_s1 + $0x388] ss:$16 sps:$4 sm:$0xff]   ;;  %v7562_v6 = vld [vmem:[%s11350_s1 + $0x3a4] ss:$16 sps:$4 sm:$0xff]  }
  0x3d   :  { %5066 = vmatpush1.bf16.msra.mxu0 %v7470_v7  ;;  %5599 = vmatpush1.bf16.msra.mxu1 %v7471_v8  ;;  %v7565_v7 = vld [vmem:[%s11350_s1 + $0x3ac] ss:$16 sps:$4 sm:$0xff]   ;;  %v7560_v8 = vld [vmem:[%s11350_s1 + $0x3a0] ss:$16 sps:$4 sm:$0xff]  }
  0x3e   :  { %5067 = vmatprep.subr.bf16.mxu0 %v7472_v9  ;;  %5600 = vmatprep.subr.bf16.mxu1 %v7474_v10  ;;  %v7563_v9 = vld [vmem:[%s11350_s1 + $0x3a8] ss:$16 sps:$4 sm:$0xff]   ;;  %v7568_v10 = vld [vmem:[%s11350_s1 + $0x3c4] ss:$16 sps:$4 sm:$0xff]  }
  0x41   :  { %5068 = vmatpush1.bf16.msra.mxu0 %v7476_v12  ;;  %5601 = vmatpush1.bf16.msra.mxu1 %v7477_v13  ;;  %v7566_v12 = vld [vmem:[%s11350_s1 + $0x3c0] ss:$16 sps:$4 sm:$0xff]   ;;  %v7569_v13 = vld [vmem:[%s11350_s1 + $0x3c8] ss:$16 sps:$4 sm:$0xff]  }
  0x42   :  { %5078 = vmatprep.subr.bf16.mxu0 %v7484_v14  ;;  %5611 = vmatprep.subr.bf16.mxu1 %v7487_v15  ;;  %v7574_v14 = vld [vmem:[%s11350_s1 + $0x3e4] ss:$16 sps:$4 sm:$0xff]   ;;  %v7577_v15 = vld [vmem:[%s11350_s1 + $0x3ec] ss:$16 sps:$4 sm:$0xff]  }
  0x44   :  { %5070 = vmatmul.mubr.bf16.vlgmr.msra.gmra.mrb[0].mxu0 %v8826_v16  ;;  %5603 = vmatmul.mubr.bf16.vlgmr.msra.gmra.mrb[0].mxu1 %v8826_v16 }
  0x45   :  { %5079 = vmatpush1.bf16.msra.mxu0 %v7482_v17  ;;  %5612 = vmatpush1.bf16.msra.mxu1 %v7485_v18  ;;  %v7572_v17 = vld [vmem:[%s11350_s1 + $0x3e0] ss:$16 sps:$4 sm:$0xff]   ;;  %v7575_v18 = vld [vmem:[%s11350_s1 + $0x3e8] ss:$16 sps:$4 sm:$0xff]  }
  0x46   :  { %5080 = vmatprep.subr.bf16.mxu0 %v7490_v19  ;;  %5613 = vmatprep.subr.bf16.mxu1 %v7493_v20  ;;  %v7580_v19 = vld [vmem:[%s11350_s1 + $0x404] ss:$16 sps:$4 sm:$0xff]   ;;  %v7583_v20 = vld [vmem:[%s11350_s1 + $0x40c] ss:$16 sps:$4 sm:$0xff]  }
  0x47   :  { %5110 = vmatprep.mubr.bf16.mxu0 %v927_v21  ;;  %5643 = vmatprep.mubr.bf16.mxu1 %v927_v21  ;;  %v925_v21 = vcombine.high %v8826_v16, %v8826_v16  ;;  %v7589_v16 = vld [vmem:[%s11350_s1 + $0x42c] ss:$16 sps:$4 sm:$0xff]  }
  0x49   :  { %5081 = vmatpush1.bf16.msra.mxu0 %v7488_v22  ;;  %5614 = vmatpush1.bf16.msra.mxu1 %v7491_v23  ;;  %v7578_v22 = vld [vmem:[%s11350_s1 + $0x400] ss:$16 sps:$4 sm:$0xff]   ;;  %v7581_v23 = vld [vmem:[%s11350_s1 + $0x408] ss:$16 sps:$4 sm:$0xff]  }
  0x4a   :  { %5082 = vmatprep.subr.bf16.mxu0 %v7496_v24  ;;  %5615 = vmatprep.subr.bf16.mxu1 %v7499_v25  ;;  %v7586_v24 = vld [vmem:[%s11350_s1 + $0x424] ss:$16 sps:$4 sm:$0xff]  }
  0x4b   :  { %v7674_v25 = vld [vmem:[%s11349_s0 + $0x4] ss:$25 sps:$4 sm:$0xff]  }
  0x4d   :  { %5083 = vmatpush1.bf16.msra.mxu0 %v7494_v26  ;;  %5616 = vmatpush1.bf16.msra.mxu1 %v7497_v27  ;;  %v7675_v26 = vld [vmem:[%s11349_s0 + $0x36] ss:$25 sps:$4 sm:$0xff]  }
  0x4e   :  { %5084 = vmatprep.subr.bf16.mxu0 %v7502_v28  ;;  %5617 = vmatprep.subr.bf16.mxu1 %v7505_v29  ;;  %v7584_v27 = vld [vmem:[%s11350_s1 + $0x420] ss:$16 sps:$4 sm:$0xff]   ;;  %v7587_v28 = vld [vmem:[%s11350_s1 + $0x428] ss:$16 sps:$4 sm:$0xff]   ;;  %v7592_v29 = vld [vmem:[%s11350_s1 + $0x444] ss:$16 sps:$4 sm:$0xff]  }
  0x51   :  { %5085 = vmatpush1.bf16.msra.mxu0 %v7500_v30  ;;  %5618 = vmatpush1.bf16.msra.mxu1 %v7503_v31  ;;  %v9052_v30 = vrot.slane %v7674_v25, %v8760_v54  ;;  %v9055_v31 = vrot.slane %v7675_v26, %v8760_v54  ;;  %v7668_v25 = vld [vmem:[%s11350_s1 + $0x5e0] ss:$16 sps:$4 sm:$0xff]   ;;  %v7671_v26 = vld [vmem:[%s11350_s1 + $0x5e8] ss:$16 sps:$4 sm:$0xff]  }
  0x52   :  { %5086 = vmatprep.subr.bf16.mxu0 %v7508_v32  ;;  %5619 = vmatprep.subr.bf16.mxu1 %v7511_v33  ;;  %v7595_v32 = vld [vmem:[%s11350_s1 + $0x44c] ss:$16 sps:$4 sm:$0xff]  }
  0x53   :  { %v896_v33 = vcombine.high %v9052_v30, %v9055_v31 }
  0x55   :  { %5087 = vmatpush1.bf16.msra.mxu0 %v7506_v34  ;;  %5620 = vmatpush1.bf16.msra.mxu1 %v7509_v35  ;;  %v7590_v34 = vld [vmem:[%s11350_s1 + $0x440] ss:$16 sps:$4 sm:$0xff]   ;;  %v7593_v35 = vld [vmem:[%s11350_s1 + $0x448] ss:$16 sps:$4 sm:$0xff]  }
  0x56   :  { %5088 = vmatprep.subr.bf16.mxu0 %v7514_v36  ;;  %5621 = vmatprep.subr.bf16.mxu1 %v7517_v37  ;;  %v7598_v36 = vld [vmem:[%s11350_s1 + $0x464] ss:$16 sps:$4 sm:$0xff]   ;;  %v9072_v37 = vrot.slane %v896_v33, %v8760_v54 }
  0x57   :  { %v7684_v33 = vld [vmem:[%s11350_s1 + $0x624] ss:$16 sps:$4 sm:$0xff]  }
  0x59   :  { %5089 = vmatpush1.bf16.msra.mxu0 %v7512_v38  ;;  %5622 = vmatpush1.bf16.msra.mxu1 %v7515_v39  ;;  %v7601_v38 = vld [vmem:[%s11350_s1 + $0x46c] ss:$16 sps:$4 sm:$0xff]   ;;  %v7596_v39 = vld [vmem:[%s11350_s1 + $0x460] ss:$16 sps:$4 sm:$0xff]  }
  0x5a   :  { %5090 = vmatprep.subr.bf16.mxu0 %v7520_v40  ;;  %5623 = vmatprep.subr.bf16.mxu1 %v7523_v41  ;;  %v7599_v40 = vld [vmem:[%s11350_s1 + $0x468] ss:$16 sps:$4 sm:$0xff]   ;;  %v7604_v41 = vld [vmem:[%s11350_s1 + $0x484] ss:$16 sps:$4 sm:$0xff]  }
  0x5d   :  { %5091 = vmatpush1.bf16.msra.mxu0 %v7518_v42  ;;  %5624 = vmatpush1.bf16.msra.mxu1 %v7521_v43  ;;  %v7607_v42 = vld [vmem:[%s11350_s1 + $0x48c] ss:$16 sps:$4 sm:$0xff]   ;;  %v7602_v43 = vld [vmem:[%s11350_s1 + $0x480] ss:$16 sps:$4 sm:$0xff]  }
  0x5e   :  { %5092 = vmatprep.subr.bf16.mxu0 %v7526_v44  ;;  %5625 = vmatprep.subr.bf16.mxu1 %v7529_v45  ;;  %v7605_v44 = vld [vmem:[%s11350_s1 + $0x488] ss:$16 sps:$4 sm:$0xff]   ;;  %v7610_v45 = vld [vmem:[%s11350_s1 + $0x4a4] ss:$16 sps:$4 sm:$0xff]  }
  0x61   :  { %5093 = vmatpush1.bf16.msra.mxu0 %v7524_v47  ;;  %5626 = vmatpush1.bf16.msra.mxu1 %v7527_v48  ;;  %v7613_v47 = vld [vmem:[%s11350_s1 + $0x4ac] ss:$16 sps:$4 sm:$0xff]   ;;  %v7608_v48 = vld [vmem:[%s11350_s1 + $0x4a0] ss:$16 sps:$4 sm:$0xff]  }
  0x62   :  { %5094 = vmatprep.subr.bf16.mxu0 %v7532_v49  ;;  %5627 = vmatprep.subr.bf16.mxu1 %v7535_v50  ;;  %v7611_v49 = vld [vmem:[%s11350_s1 + $0x4a8] ss:$16 sps:$4 sm:$0xff]   ;;  %v7616_v50 = vld [vmem:[%s11350_s1 + $0x4c4] ss:$16 sps:$4 sm:$0xff]  }
  0x65   :  { %5095 = vmatpush1.bf16.msra.mxu0 %v7530_v51  ;;  %5628 = vmatpush1.bf16.msra.mxu1 %v7533_v52  ;;  %v7619_v51 = vld [vmem:[%s11350_s1 + $0x4cc] ss:$16 sps:$4 sm:$0xff]   ;;  %v7614_v52 = vld [vmem:[%s11350_s1 + $0x4c0] ss:$16 sps:$4 sm:$0xff]  }
  0x66   :  { %5096 = vmatprep.subr.bf16.mxu0 %v7538_v53  ;;  %5629 = vmatprep.subr.bf16.mxu1 %v7541_v55  ;;  %v7617_v53 = vld [vmem:[%s11350_s1 + $0x4c8] ss:$16 sps:$4 sm:$0xff]   ;;  %v7622_v55 = vld [vmem:[%s11350_s1 + $0x4e4] ss:$16 sps:$4 sm:$0xff]  }
  0x69   :  { %5097 = vmatpush1.bf16.msra.mxu0 %v7536_v56  ;;  %5630 = vmatpush1.bf16.msra.mxu1 %v7539_v57  ;;  %v7625_v56 = vld [vmem:[%s11350_s1 + $0x4ec] ss:$16 sps:$4 sm:$0xff]   ;;  %v7620_v57 = vld [vmem:[%s11350_s1 + $0x4e0] ss:$16 sps:$4 sm:$0xff]  }
  0x6a   :  { %5098 = vmatprep.subr.bf16.mxu0 %v7544_v58  ;;  %5631 = vmatprep.subr.bf16.mxu1 %v7547_v59  ;;  %v7623_v58 = vld [vmem:[%s11350_s1 + $0x4e8] ss:$16 sps:$4 sm:$0xff]   ;;  %v7628_v59 = vld [vmem:[%s11350_s1 + $0x504] ss:$16 sps:$4 sm:$0xff]  }
  0x6d   :  { %5099 = vmatpush1.bf16.msra.mxu0 %v7542_v60  ;;  %5632 = vmatpush1.bf16.msra.mxu1 %v7545_v61  ;;  %v7631_v60 = vld [vmem:[%s11350_s1 + $0x50c] ss:$16 sps:$4 sm:$0xff]   ;;  %v7626_v61 = vld [vmem:[%s11350_s1 + $0x500] ss:$16 sps:$4 sm:$0xff]  }
  0x6e   :  { %5100 = vmatprep.subr.bf16.mxu0 %v7550_v62  ;;  %5633 = vmatprep.subr.bf16.mxu1 %v7553_v63  ;;  %v7629_v62 = vld [vmem:[%s11350_s1 + $0x508] ss:$16 sps:$4 sm:$0xff]   ;;  %v7634_v63 = vld [vmem:[%s11350_s1 + $0x524] ss:$16 sps:$4 sm:$0xff]  }
  0x71   :  { %5101 = vmatpush1.bf16.msra.mxu0 %v7548_v0  ;;  %5634 = vmatpush1.bf16.msra.mxu1 %v7551_v1  ;;  %v7637_v0 = vld [vmem:[%s11350_s1 + $0x52c] ss:$16 sps:$4 sm:$0xff]   ;;  %v7632_v1 = vld [vmem:[%s11350_s1 + $0x520] ss:$16 sps:$4 sm:$0xff]  }
  0x72   :  { %5102 = vmatprep.subr.bf16.mxu0 %v7556_v2  ;;  %5635 = vmatprep.subr.bf16.mxu1 %v7559_v3  ;;  %v7635_v2 = vld [vmem:[%s11350_s1 + $0x528] ss:$16 sps:$4 sm:$0xff]   ;;  %v7640_v3 = vld [vmem:[%s11350_s1 + $0x544] ss:$16 sps:$4 sm:$0xff]  }
  0x75   :  { %5103 = vmatpush1.bf16.msra.mxu0 %v7554_v4  ;;  %5636 = vmatpush1.bf16.msra.mxu1 %v7557_v5  ;;  %v7643_v4 = vld [vmem:[%s11350_s1 + $0x54c] ss:$16 sps:$4 sm:$0xff]   ;;  %v7638_v5 = vld [vmem:[%s11350_s1 + $0x540] ss:$16 sps:$4 sm:$0xff]  }
  0x76   :  { %5104 = vmatprep.subr.bf16.mxu0 %v7562_v6  ;;  %5637 = vmatprep.subr.bf16.mxu1 %v7565_v7  ;;  %v7641_v6 = vld [vmem:[%s11350_s1 + $0x548] ss:$16 sps:$4 sm:$0xff]   ;;  %v7646_v7 = vld [vmem:[%s11350_s1 + $0x564] ss:$16 sps:$4 sm:$0xff]  }
  0x79   :  { %5105 = vmatpush1.bf16.msra.mxu0 %v7560_v8  ;;  %5638 = vmatpush1.bf16.msra.mxu1 %v7563_v9  ;;  %v7649_v8 = vld [vmem:[%s11350_s1 + $0x56c] ss:$16 sps:$4 sm:$0xff]   ;;  %v7644_v9 = vld [vmem:[%s11350_s1 + $0x560] ss:$16 sps:$4 sm:$0xff]  }
  0x7a   :  { %5106 = vmatprep.subr.bf16.mxu0 %v7568_v10  ;;  %5639 = vmatprep.subr.bf16.mxu1 %v7571_v11  ;;  %v7647_v10 = vld [vmem:[%s11350_s1 + $0x568] ss:$16 sps:$4 sm:$0xff]   ;;  %v7652_v11 = vld [vmem:[%s11350_s1 + $0x584] ss:$16 sps:$4 sm:$0xff]  }
  0x7d   :  { %5107 = vmatpush1.bf16.msra.mxu0 %v7566_v12  ;;  %5640 = vmatpush1.bf16.msra.mxu1 %v7569_v13  ;;  %v7655_v12 = vld [vmem:[%s11350_s1 + $0x58c] ss:$16 sps:$4 sm:$0xff]   ;;  %v7650_v13 = vld [vmem:[%s11350_s1 + $0x580] ss:$16 sps:$4 sm:$0xff]  }
  0x7e   :  { %5108 = vmatprep.subr.bf16.mxu0 %v7574_v14  ;;  %5641 = vmatprep.subr.bf16.mxu1 %v7577_v15  ;;  %v7653_v14 = vld [vmem:[%s11350_s1 + $0x588] ss:$16 sps:$4 sm:$0xff]   ;;  %v7658_v15 = vld [vmem:[%s11350_s1 + $0x5a4] ss:$16 sps:$4 sm:$0xff]  }
  0x81   :  { %5109 = vmatpush1.bf16.msra.mxu0 %v7572_v17  ;;  %5642 = vmatpush1.bf16.msra.mxu1 %v7575_v18  ;;  %v7661_v17 = vld [vmem:[%s11350_s1 + $0x5ac] ss:$16 sps:$4 sm:$0xff]   ;;  %v7656_v18 = vld [vmem:[%s11350_s1 + $0x5a0] ss:$16 sps:$4 sm:$0xff]  }
  0x82   :  { %5119 = vmatprep.subr.bf16.mxu0 %v7580_v19  ;;  %5652 = vmatprep.subr.bf16.mxu1 %v7583_v20  ;;  %v7659_v19 = vld [vmem:[%s11350_s1 + $0x5a8] ss:$16 sps:$4 sm:$0xff]   ;;  %v7664_v20 = vld [vmem:[%s11350_s1 + $0x5c4] ss:$16 sps:$4 sm:$0xff]  }
  0x84   :  { %5111 = vmatmul.mubr.bf16.vlgmr.msra.gmra.mrb[0].mxu0 %v925_v21  ;;  %5644 = vmatmul.mubr.bf16.vlgmr.msra.gmra.mrb[0].mxu1 %v925_v21  ;;  %v7667_v21 = vld [vmem:[%s11350_s1 + $0x5cc] ss:$16 sps:$4 sm:$0xff]  }
  0x85   :  { %5120 = vmatpush1.bf16.msra.mxu0 %v7578_v22  ;;  %5653 = vmatpush1.bf16.msra.mxu1 %v7581_v23  ;;  %v7662_v22 = vld [vmem:[%s11350_s1 + $0x5c0] ss:$16 sps:$4 sm:$0xff]   ;;  %v7665_v23 = vld [vmem:[%s11350_s1 + $0x5c8] ss:$16 sps:$4 sm:$0xff]  }
  0x86   :  { %5121 = vmatprep.subr.bf16.mxu0 %v7586_v24  ;;  %5654 = vmatprep.subr.bf16.mxu1 %v7589_v16  ;;  %v7670_v24 = vld [vmem:[%s11350_s1 + $0x5e4] ss:$16 sps:$4 sm:$0xff]   ;;  %v7673_v16 = vld [vmem:[%s11350_s1 + $0x5ec] ss:$16 sps:$4 sm:$0xff]  }
  0x87   :  { %5151 = vmatprep.mubr.bf16.mxu0 %v9072_v37  ;;  %5684 = vmatprep.mubr.bf16.mxu1 %v9072_v37 }
  0x89   :  { %5122 = vmatpush1.bf16.msra.mxu0 %v7584_v27  ;;  %5655 = vmatpush1.bf16.msra.mxu1 %v7587_v28  ;;  %v895_v27 = vcombine.low %v9052_v30, %v9055_v31  ;;  %v7678_v28 = vld [vmem:[%s11350_s1 + $0x604] ss:$16 sps:$4 sm:$0xff]   ;;  %v7679_v30 = vld [vmem:[%s11350_s1 + $0x608] ss:$16 sps:$4 sm:$0xff]  }
  0x8a   :  { %5123 = vmatprep.subr.bf16.mxu0 %v7592_v29  ;;  %5656 = vmatprep.subr.bf16.mxu1 %v7595_v32  ;;  %v7681_v29 = vld [vmem:[%s11350_s1 + $0x60c] ss:$16 sps:$4 sm:$0xff]   ;;  %v7676_v32 = vld [vmem:[%s11350_s1 + $0x600] ss:$16 sps:$4 sm:$0xff]  }
  0x8b   :  { %v9244_v31 = vrot.slane %v895_v27, %v8760_v54  ;;  %v7870_v27 = vld [vmem:[%s11349_s0 + $0x3a] ss:$25 sps:$4 sm:$0xff]  }
  0x8d   :  { %5124 = vmatpush1.bf16.msra.mxu0 %v7590_v34  ;;  %5657 = vmatpush1.bf16.msra.mxu1 %v7593_v35  ;;  %v7687_v34 = vld [vmem:[%s11350_s1 + $0x62c] ss:$16 sps:$4 sm:$0xff]   ;;  %v928_v35 = vcombine.high %v9072_v37, %v9072_v37 }
  0x8e   :  { %5125 = vmatprep.subr.bf16.mxu0 %v7598_v36  ;;  %5658 = vmatprep.subr.bf16.mxu1 %v7601_v38  ;;  %v7682_v36 = vld [vmem:[%s11350_s1 + $0x620] ss:$16 sps:$4 sm:$0xff]   ;;  %v7685_v38 = vld [vmem:[%s11350_s1 + $0x628] ss:$16 sps:$4 sm:$0xff]   ;;  %v7693_v37 = vld [vmem:[%s11350_s1 + $0x64c] ss:$16 sps:$4 sm:$0xff]  }
  0x91   :  { %5126 = vmatpush1.bf16.msra.mxu0 %v7596_v39  ;;  %5659 = vmatpush1.bf16.msra.mxu1 %v7599_v40  ;;  %v7690_v39 = vld [vmem:[%s11350_s1 + $0x644] ss:$16 sps:$4 sm:$0xff]   ;;  %v7688_v40 = vld [vmem:[%s11350_s1 + $0x640] ss:$16 sps:$4 sm:$0xff]  }
  0x92   :  { %5127 = vmatprep.subr.bf16.mxu0 %v7604_v41  ;;  %5660 = vmatprep.subr.bf16.mxu1 %v7607_v42  ;;  %v7691_v41 = vld [vmem:[%s11350_s1 + $0x648] ss:$16 sps:$4 sm:$0xff]   ;;  %v7696_v42 = vld [vmem:[%s11350_s1 + $0x664] ss:$16 sps:$4 sm:$0xff]  }
  0x95   :  { %5128 = vmatpush1.bf16.msra.mxu0 %v7602_v43  ;;  %5661 = vmatpush1.bf16.msra.mxu1 %v7605_v44  ;;  %v7699_v43 = vld [vmem:[%s11350_s1 + $0x66c] ss:$16 sps:$4 sm:$0xff]   ;;  %v7694_v44 = vld [vmem:[%s11350_s1 + $0x660] ss:$16 sps:$4 sm:$0xff]  }
  0x96   :  { %5129 = vmatprep.subr.bf16.mxu0 %v7610_v45  ;;  %5662 = vmatprep.subr.bf16.mxu1 %v7613_v47  ;;  %v7697_v45 = vld [vmem:[%s11350_s1 + $0x668] ss:$16 sps:$4 sm:$0xff]   ;;  %v7702_v47 = vld [vmem:[%s11350_s1 + $0x684] ss:$16 sps:$4 sm:$0xff]  }
  0x99   :  { %5130 = vmatpush1.bf16.msra.mxu0 %v7608_v48  ;;  %5663 = vmatpush1.bf16.msra.mxu1 %v7611_v49  ;;  %v7705_v48 = vld [vmem:[%s11350_s1 + $0x68c] ss:$16 sps:$4 sm:$0xff]   ;;  %v7700_v49 = vld [vmem:[%s11350_s1 + $0x680] ss:$16 sps:$4 sm:$0xff]  }
  0x9a   :  { %5131 = vmatprep.subr.bf16.mxu0 %v7616_v50  ;;  %5664 = vmatprep.subr.bf16.mxu1 %v7619_v51  ;;  %v7703_v50 = vld [vmem:[%s11350_s1 + $0x688] ss:$16 sps:$4 sm:$0xff]   ;;  %v7708_v51 = vld [vmem:[%s11350_s1 + $0x6a4] ss:$16 sps:$4 sm:$0xff]  }
  0x9d   :  { %5132 = vmatpush1.bf16.msra.mxu0 %v7614_v52  ;;  %5665 = vmatpush1.bf16.msra.mxu1 %v7617_v53  ;;  %v7711_v52 = vld [vmem:[%s11350_s1 + $0x6ac] ss:$16 sps:$4 sm:$0xff]   ;;  %v7706_v53 = vld [vmem:[%s11350_s1 + $0x6a0] ss:$16 sps:$4 sm:$0xff]  }
  0x9e   :  { %5133 = vmatprep.subr.bf16.mxu0 %v7622_v55  ;;  %5666 = vmatprep.subr.bf16.mxu1 %v7625_v56  ;;  %v7709_v55 = vld [vmem:[%s11350_s1 + $0x6a8] ss:$16 sps:$4 sm:$0xff]   ;;  %v7714_v56 = vld [vmem:[%s11350_s1 + $0x6c4] ss:$16 sps:$4 sm:$0xff]  }
  0xa1   :  { %5134 = vmatpush1.bf16.msra.mxu0 %v7620_v57  ;;  %5667 = vmatpush1.bf16.msra.mxu1 %v7623_v58  ;;  %v7717_v57 = vld [vmem:[%s11350_s1 + $0x6cc] ss:$16 sps:$4 sm:$0xff]   ;;  %v7712_v58 = vld [vmem:[%s11350_s1 + $0x6c0] ss:$16 sps:$4 sm:$0xff]  }
  0xa2   :  { %5135 = vmatprep.subr.bf16.mxu0 %v7628_v59  ;;  %5668 = vmatprep.subr.bf16.mxu1 %v7631_v60  ;;  %v7715_v59 = vld [vmem:[%s11350_s1 + $0x6c8] ss:$16 sps:$4 sm:$0xff]   ;;  %v7720_v60 = vld [vmem:[%s11350_s1 + $0x6e4] ss:$16 sps:$4 sm:$0xff]  }
  0xa5   :  { %5136 = vmatpush1.bf16.msra.mxu0 %v7626_v61  ;;  %5669 = vmatpush1.bf16.msra.mxu1 %v7629_v62  ;;  %v7723_v61 = vld [vmem:[%s11350_s1 + $0x6ec] ss:$16 sps:$4 sm:$0xff]   ;;  %v7718_v62 = vld [vmem:[%s11350_s1 + $0x6e0] ss:$16 sps:$4 sm:$0xff]  }
  0xa6   :  { %5137 = vmatprep.subr.bf16.mxu0 %v7634_v63  ;;  %5670 = vmatprep.subr.bf16.mxu1 %v7637_v0  ;;  %v7721_v63 = vld [vmem:[%s11350_s1 + $0x6e8] ss:$16 sps:$4 sm:$0xff]   ;;  %v7726_v0 = vld [vmem:[%s11350_s1 + $0x704] ss:$16 sps:$4 sm:$0xff]  }
  0xa9   :  { %5138 = vmatpush1.bf16.msra.mxu0 %v7632_v1  ;;  %5671 = vmatpush1.bf16.msra.mxu1 %v7635_v2  ;;  %v7729_v1 = vld [vmem:[%s11350_s1 + $0x70c] ss:$16 sps:$4 sm:$0xff]   ;;  %v7724_v2 = vld [vmem:[%s11350_s1 + $0x700] ss:$16 sps:$4 sm:$0xff]  }
  0xaa   :  { %5139 = vmatprep.subr.bf16.mxu0 %v7640_v3  ;;  %5672 = vmatprep.subr.bf16.mxu1 %v7643_v4  ;;  %v7727_v3 = vld [vmem:[%s11350_s1 + $0x708] ss:$16 sps:$4 sm:$0xff]   ;;  %v7732_v4 = vld [vmem:[%s11350_s1 + $0x724] ss:$16 sps:$4 sm:$0xff]  }
  0xad   :  { %5140 = vmatpush1.bf16.msra.mxu0 %v7638_v5  ;;  %5673 = vmatpush1.bf16.msra.mxu1 %v7641_v6  ;;  %v7735_v5 = vld [vmem:[%s11350_s1 + $0x72c] ss:$16 sps:$4 sm:$0xff]   ;;  %v7730_v6 = vld [vmem:[%s11350_s1 + $0x720] ss:$16 sps:$4 sm:$0xff]  }
  0xae   :  { %5141 = vmatprep.subr.bf16.mxu0 %v7646_v7  ;;  %5674 = vmatprep.subr.bf16.mxu1 %v7649_v8  ;;  %v7733_v7 = vld [vmem:[%s11350_s1 + $0x728] ss:$16 sps:$4 sm:$0xff]   ;;  %v7738_v8 = vld [vmem:[%s11350_s1 + $0x744] ss:$16 sps:$4 sm:$0xff]  }
  0xb1   :  { %5142 = vmatpush1.bf16.msra.mxu0 %v7644_v9  ;;  %5675 = vmatpush1.bf16.msra.mxu1 %v7647_v10  ;;  %v7741_v9 = vld [vmem:[%s11350_s1 + $0x74c] ss:$16 sps:$4 sm:$0xff]   ;;  %v7736_v10 = vld [vmem:[%s11350_s1 + $0x740] ss:$16 sps:$4 sm:$0xff]  }
  0xb2   :  { %5143 = vmatprep.subr.bf16.mxu0 %v7652_v11  ;;  %5676 = vmatprep.subr.bf16.mxu1 %v7655_v12  ;;  %v7739_v11 = vld [vmem:[%s11350_s1 + $0x748] ss:$16 sps:$4 sm:$0xff]   ;;  %v7744_v12 = vld [vmem:[%s11350_s1 + $0x764] ss:$16 sps:$4 sm:$0xff]  }
  0xb5   :  { %5144 = vmatpush1.bf16.msra.mxu0 %v7650_v13  ;;  %5677 = vmatpush1.bf16.msra.mxu1 %v7653_v14  ;;  %v7747_v13 = vld [vmem:[%s11350_s1 + $0x76c] ss:$16 sps:$4 sm:$0xff]   ;;  %v7742_v14 = vld [vmem:[%s11350_s1 + $0x760] ss:$16 sps:$4 sm:$0xff]  }
  0xb6   :  { %5145 = vmatprep.subr.bf16.mxu0 %v7658_v15  ;;  %5678 = vmatprep.subr.bf16.mxu1 %v7661_v17  ;;  %v7745_v15 = vld [vmem:[%s11350_s1 + $0x768] ss:$16 sps:$4 sm:$0xff]   ;;  %v7750_v17 = vld [vmem:[%s11350_s1 + $0x784] ss:$16 sps:$4 sm:$0xff]  }
  0xb9   :  { %5146 = vmatpush1.bf16.msra.mxu0 %v7656_v18  ;;  %5679 = vmatpush1.bf16.msra.mxu1 %v7659_v19  ;;  %v7753_v18 = vld [vmem:[%s11350_s1 + $0x78c] ss:$16 sps:$4 sm:$0xff]   ;;  %v7748_v19 = vld [vmem:[%s11350_s1 + $0x780] ss:$16 sps:$4 sm:$0xff]  }
  0xba   :  { %5147 = vmatprep.subr.bf16.mxu0 %v7664_v20  ;;  %5680 = vmatprep.subr.bf16.mxu1 %v7667_v21  ;;  %v7751_v20 = vld [vmem:[%s11350_s1 + $0x788] ss:$16 sps:$4 sm:$0xff]   ;;  %v7756_v21 = vld [vmem:[%s11350_s1 + $0x7a4] ss:$16 sps:$4 sm:$0xff]  }
  0xbd   :  { %5148 = vmatpush1.bf16.msra.mxu0 %v7662_v22  ;;  %5681 = vmatpush1.bf16.msra.mxu1 %v7665_v23  ;;  %v7759_v22 = vld [vmem:[%s11350_s1 + $0x7ac] ss:$16 sps:$4 sm:$0xff]   ;;  %v7754_v23 = vld [vmem:[%s11350_s1 + $0x7a0] ss:$16 sps:$4 sm:$0xff]  }
  0xbe   :  { %5149 = vmatprep.subr.bf16.mxu0 %v7670_v24  ;;  %5682 = vmatprep.subr.bf16.mxu1 %v7673_v16  ;;  %v7757_v24 = vld [vmem:[%s11350_s1 + $0x7a8] ss:$16 sps:$4 sm:$0xff]   ;;  %v7762_v16 = vld [vmem:[%s11350_s1 + $0x7c4] ss:$16 sps:$4 sm:$0xff]  }
  0xc1   :  { %5150 = vmatpush1.bf16.msra.mxu0 %v7668_v25  ;;  %5683 = vmatpush1.bf16.msra.mxu1 %v7671_v26  ;;  %v7765_v25 = vld [vmem:[%s11350_s1 + $0x7cc] ss:$16 sps:$4 sm:$0xff]   ;;  %v7868_v26 = vld [vmem:[%s11349_s0 + $0x8] ss:$25 sps:$4 sm:$0xff]  }
  0xc2   :  { %5160 = vmatprep.subr.bf16.mxu0 %v7678_v28  ;;  %5693 = vmatprep.subr.bf16.mxu1 %v7681_v29  ;;  %v7760_v28 = vld [vmem:[%s11350_s1 + $0x7c0] ss:$16 sps:$4 sm:$0xff]   ;;  %v7763_v29 = vld [vmem:[%s11350_s1 + $0x7c8] ss:$16 sps:$4 sm:$0xff]  }
  0xc4   :  { %5152 = vmatmul.mubr.bf16.vlgmr.msra.gmra.mrb[0].mxu0 %v9244_v31  ;;  %5685 = vmatmul.mubr.bf16.vlgmr.msra.gmra.mrb[0].mxu1 %v9244_v31 }
  0xc5   :  { %5161 = vmatpush1.bf16.msra.mxu0 %v7676_v32  ;;  %5694 = vmatpush1.bf16.msra.mxu1 %v7679_v30  ;;  %v7768_v32 = vld [vmem:[%s11350_s1 + $0x7e4] ss:$16 sps:$4 sm:$0xff]   ;;  %v7771_v30 = vld [vmem:[%s11350_s1 + $0x7ec] ss:$16 sps:$4 sm:$0xff]  }
  0xc6   :  { %5162 = vmatprep.subr.bf16.mxu0 %v7684_v33  ;;  %5695 = vmatprep.subr.bf16.mxu1 %v7687_v34  ;;  %v9431_v33 = vrot.slane %v7868_v26, %v8760_v54  ;;  %v9434_v34 = vrot.slane %v7870_v27, %v8760_v54  ;;  %v7849_v26 = vld [vmem:[%s11350_s1 + $0x98c] ss:$16 sps:$4 sm:$0xff]   ;;  %v7844_v27 = vld [vmem:[%s11350_s1 + $0x980] ss:$16 sps:$4 sm:$0xff]  }
  0xc7   :  { %5192 = vmatprep.mubr.bf16.mxu0 %v928_v35  ;;  %5725 = vmatprep.mubr.bf16.mxu1 %v928_v35  ;;  %v7766_v35 = vld [vmem:[%s11350_s1 + $0x7e0] ss:$16 sps:$4 sm:$0xff]  }
  0xc9   :  { %5163 = vmatpush1.bf16.msra.mxu0 %v7682_v36  ;;  %5696 = vmatpush1.bf16.msra.mxu1 %v7685_v38  ;;  %v7769_v36 = vld [vmem:[%s11350_s1 + $0x7e8] ss:$16 sps:$4 sm:$0xff]   ;;  %v7774_v38 = vld [vmem:[%s11350_s1 + $0x804] ss:$16 sps:$4 sm:$0xff]  }
  0xca   :  { %5164 = vmatprep.subr.bf16.mxu0 %v7690_v39  ;;  %5697 = vmatprep.subr.bf16.mxu1 %v7693_v37  ;;  %v7777_v39 = vld [vmem:[%s11350_s1 + $0x80c] ss:$16 sps:$4 sm:$0xff]   ;;  %v962_v37 = vcombine.high %v9431_v33, %v9434_v34 }
  0xcd   :  { %5165 = vmatpush1.bf16.msra.mxu0 %v7688_v40  ;;  %5698 = vmatpush1.bf16.msra.mxu1 %v7691_v41  ;;  %v926_v40 = vcombine.high %v9244_v31, %v9244_v31  ;;  %v7772_v41 = vld [vmem:[%s11350_s1 + $0x800] ss:$16 sps:$4 sm:$0xff]   ;;  %v7783_v31 = vld [vmem:[%s11350_s1 + $0x82c] ss:$16 sps:$4 sm:$0xff]  }
  0xce   :  { %5166 = vmatprep.subr.bf16.mxu0 %v7696_v42  ;;  %5699 = vmatprep.subr.bf16.mxu1 %v7699_v43  ;;  %v7775_v42 = vld [vmem:[%s11350_s1 + $0x808] ss:$16 sps:$4 sm:$0xff]   ;;  %v7780_v43 = vld [vmem:[%s11350_s1 + $0x824] ss:$16 sps:$4 sm:$0xff]  }
  0xd1   :  { %5167 = vmatpush1.bf16.msra.mxu0 %v7694_v44  ;;  %5700 = vmatpush1.bf16.msra.mxu1 %v7697_v45  ;;  %v9465_v44 = vrot.slane %v962_v37, %v8760_v54  ;;  %v7778_v45 = vld [vmem:[%s11350_s1 + $0x820] ss:$16 sps:$4 sm:$0xff]   ;;  %v7859_v37 = vld [vmem:[%s11350_s1 + $0x9c8] ss:$16 sps:$4 sm:$0xff]  }
  0xd2   :  { %5168 = vmatprep.subr.bf16.mxu0 %v7702_v47  ;;  %5701 = vmatprep.subr.bf16.mxu1 %v7705_v48  ;;  %v7781_v47 = vld [vmem:[%s11350_s1 + $0x828] ss:$16 sps:$4 sm:$0xff]   ;;  %v7786_v48 = vld [vmem:[%s11350_s1 + $0x844] ss:$16 sps:$4 sm:$0xff]  }
  0xd5   :  { %5169 = vmatpush1.bf16.msra.mxu0 %v7700_v49  ;;  %5702 = vmatpush1.bf16.msra.mxu1 %v7703_v50  ;;  %v7789_v49 = vld [vmem:[%s11350_s1 + $0x84c] ss:$16 sps:$4 sm:$0xff]   ;;  %v7784_v50 = vld [vmem:[%s11350_s1 + $0x840] ss:$16 sps:$4 sm:$0xff]  }
  0xd6   :  { %5170 = vmatprep.subr.bf16.mxu0 %v7708_v51  ;;  %5703 = vmatprep.subr.bf16.mxu1 %v7711_v52  ;;  %v7787_v51 = vld [vmem:[%s11350_s1 + $0x848] ss:$16 sps:$4 sm:$0xff]   ;;  %v7792_v52 = vld [vmem:[%s11350_s1 + $0x864] ss:$16 sps:$4 sm:$0xff]  }
  0xd9   :  { %5171 = vmatpush1.bf16.msra.mxu0 %v7706_v53  ;;  %5704 = vmatpush1.bf16.msra.mxu1 %v7709_v55  ;;  %v7795_v53 = vld [vmem:[%s11350_s1 + $0x86c] ss:$16 sps:$4 sm:$0xff]   ;;  %v7790_v55 = vld [vmem:[%s11350_s1 + $0x860] ss:$16 sps:$4 sm:$0xff]  }
  0xda   :  { %5172 = vmatprep.subr.bf16.mxu0 %v7714_v56  ;;  %5705 = vmatprep.subr.bf16.mxu1 %v7717_v57  ;;  %v7793_v56 = vld [vmem:[%s11350_s1 + $0x868] ss:$16 sps:$4 sm:$0xff]   ;;  %v7798_v57 = vld [vmem:[%s11350_s1 + $0x884] ss:$16 sps:$4 sm:$0xff]  }
  0xdd   :  { %5173 = vmatpush1.bf16.msra.mxu0 %v7712_v58  ;;  %5706 = vmatpush1.bf16.msra.mxu1 %v7715_v59  ;;  %v7801_v58 = vld [vmem:[%s11350_s1 + $0x88c] ss:$16 sps:$4 sm:$0xff]   ;;  %v7796_v59 = vld [vmem:[%s11350_s1 + $0x880] ss:$16 sps:$4 sm:$0xff]  }
  0xde   :  { %5174 = vmatprep.subr.bf16.mxu0 %v7720_v60  ;;  %5707 = vmatprep.subr.bf16.mxu1 %v7723_v61  ;;  %v7799_v60 = vld [vmem:[%s11350_s1 + $0x888] ss:$16 sps:$4 sm:$0xff]   ;;  %v7804_v61 = vld [vmem:[%s11350_s1 + $0x8a4] ss:$16 sps:$4 sm:$0xff]  }
  0xe1   :  { %5175 = vmatpush1.bf16.msra.mxu0 %v7718_v62  ;;  %5708 = vmatpush1.bf16.msra.mxu1 %v7721_v63  ;;  %v7807_v62 = vld [vmem:[%s11350_s1 + $0x8ac] ss:$16 sps:$4 sm:$0xff]   ;;  %v7802_v63 = vld [vmem:[%s11350_s1 + $0x8a0] ss:$16 sps:$4 sm:$0xff]  }
  0xe2   :  { %5176 = vmatprep.subr.bf16.mxu0 %v7726_v0  ;;  %5709 = vmatprep.subr.bf16.mxu1 %v7729_v1  ;;  %v7805_v0 = vld [vmem:[%s11350_s1 + $0x8a8] ss:$16 sps:$4 sm:$0xff]   ;;  %v7810_v1 = vld [vmem:[%s11350_s1 + $0x8c4] ss:$16 sps:$4 sm:$0xff]  }
  0xe5   :  { %5177 = vmatpush1.bf16.msra.mxu0 %v7724_v2  ;;  %5710 = vmatpush1.bf16.msra.mxu1 %v7727_v3  ;;  %v7813_v2 = vld [vmem:[%s11350_s1 + $0x8cc] ss:$16 sps:$4 sm:$0xff]   ;;  %v7808_v3 = vld [vmem:[%s11350_s1 + $0x8c0] ss:$16 sps:$4 sm:$0xff]  }
  0xe6   :  { %5178 = vmatprep.subr.bf16.mxu0 %v7732_v4  ;;  %5711 = vmatprep.subr.bf16.mxu1 %v7735_v5  ;;  %v7811_v4 = vld [vmem:[%s11350_s1 + $0x8c8] ss:$16 sps:$4 sm:$0xff]   ;;  %v7816_v5 = vld [vmem:[%s11350_s1 + $0x8e4] ss:$16 sps:$4 sm:$0xff]  }
  0xe9   :  { %5179 = vmatpush1.bf16.msra.mxu0 %v7730_v6  ;;  %5712 = vmatpush1.bf16.msra.mxu1 %v7733_v7  ;;  %v7819_v6 = vld [vmem:[%s11350_s1 + $0x8ec] ss:$16 sps:$4 sm:$0xff]   ;;  %v7814_v7 = vld [vmem:[%s11350_s1 + $0x8e0] ss:$16 sps:$4 sm:$0xff]  }
  0xea   :  { %5180 = vmatprep.subr.bf16.mxu0 %v7738_v8  ;;  %5713 = vmatprep.subr.bf16.mxu1 %v7741_v9  ;;  %v7817_v8 = vld [vmem:[%s11350_s1 + $0x8e8] ss:$16 sps:$4 sm:$0xff]   ;;  %v7822_v9 = vld [vmem:[%s11350_s1 + $0x904] ss:$16 sps:$4 sm:$0xff]  }
  0xed   :  { %5181 = vmatpush1.bf16.msra.mxu0 %v7736_v10  ;;  %5714 = vmatpush1.bf16.msra.mxu1 %v7739_v11  ;;  %v7825_v10 = vld [vmem:[%s11350_s1 + $0x90c] ss:$16 sps:$4 sm:$0xff]   ;;  %v7820_v11 = vld [vmem:[%s11350_s1 + $0x900] ss:$16 sps:$4 sm:$0xff]  }
  0xee   :  { %5182 = vmatprep.subr.bf16.mxu0 %v7744_v12  ;;  %5715 = vmatprep.subr.bf16.mxu1 %v7747_v13  ;;  %v7823_v12 = vld [vmem:[%s11350_s1 + $0x908] ss:$16 sps:$4 sm:$0xff]   ;;  %v7828_v13 = vld [vmem:[%s11350_s1 + $0x924] ss:$16 sps:$4 sm:$0xff]  }
  0xf1   :  { %5183 = vmatpush1.bf16.msra.mxu0 %v7742_v14  ;;  %5716 = vmatpush1.bf16.msra.mxu1 %v7745_v15  ;;  %v7831_v14 = vld [vmem:[%s11350_s1 + $0x92c] ss:$16 sps:$4 sm:$0xff]   ;;  %v7826_v15 = vld [vmem:[%s11350_s1 + $0x920] ss:$16 sps:$4 sm:$0xff]  }
  0xf2   :  { %5184 = vmatprep.subr.bf16.mxu0 %v7750_v17  ;;  %5717 = vmatprep.subr.bf16.mxu1 %v7753_v18  ;;  %v7829_v17 = vld [vmem:[%s11350_s1 + $0x928] ss:$16 sps:$4 sm:$0xff]   ;;  %v7834_v18 = vld [vmem:[%s11350_s1 + $0x944] ss:$16 sps:$4 sm:$0xff]  }
  0xf5   :  { %5185 = vmatpush1.bf16.msra.mxu0 %v7748_v19  ;;  %5718 = vmatpush1.bf16.msra.mxu1 %v7751_v20  ;;  %v7837_v19 = vld [vmem:[%s11350_s1 + $0x94c] ss:$16 sps:$4 sm:$0xff]   ;;  %v7832_v20 = vld [vmem:[%s11350_s1 + $0x940] ss:$16 sps:$4 sm:$0xff]  }
  0xf6   :  { %5186 = vmatprep.subr.bf16.mxu0 %v7756_v21  ;;  %5719 = vmatprep.subr.bf16.mxu1 %v7759_v22  ;;  %v7835_v21 = vld [vmem:[%s11350_s1 + $0x948] ss:$16 sps:$4 sm:$0xff]   ;;  %v7840_v22 = vld [vmem:[%s11350_s1 + $0x964] ss:$16 sps:$4 sm:$0xff]  }
  0xf9   :  { %5187 = vmatpush1.bf16.msra.mxu0 %v7754_v23  ;;  %5720 = vmatpush1.bf16.msra.mxu1 %v7757_v24  ;;  %v7843_v23 = vld [vmem:[%s11350_s1 + $0x96c] ss:$16 sps:$4 sm:$0xff]   ;;  %v7838_v24 = vld [vmem:[%s11350_s1 + $0x960] ss:$16 sps:$4 sm:$0xff]  }
  0xfa   :  { %5188 = vmatprep.subr.bf16.mxu0 %v7762_v16  ;;  %5721 = vmatprep.subr.bf16.mxu1 %v7765_v25  ;;  %v7841_v16 = vld [vmem:[%s11350_s1 + $0x968] ss:$16 sps:$4 sm:$0xff]   ;;  %v7846_v25 = vld [vmem:[%s11350_s1 + $0x984] ss:$16 sps:$4 sm:$0xff]  }
  0xfd   :  { %5189 = vmatpush1.bf16.msra.mxu0 %v7760_v28  ;;  %5722 = vmatpush1.bf16.msra.mxu1 %v7763_v29  ;;  %v7847_v28 = vld [vmem:[%s11350_s1 + $0x988] ss:$16 sps:$4 sm:$0xff]   ;;  %v7852_v29 = vld [vmem:[%s11350_s1 + $0x9a4] ss:$16 sps:$4 sm:$0xff]  }
  0xfe   :  { %5190 = vmatprep.subr.bf16.mxu0 %v7768_v32  ;;  %5723 = vmatprep.subr.bf16.mxu1 %v7771_v30  ;;  %v7855_v32 = vld [vmem:[%s11350_s1 + $0x9ac] ss:$16 sps:$4 sm:$0xff]   ;;  %v7850_v30 = vld [vmem:[%s11350_s1 + $0x9a0] ss:$16 sps:$4 sm:$0xff]  }
 0x101   :  { %5191 = vmatpush1.bf16.msra.mxu0 %v7766_v35  ;;  %5724 = vmatpush1.bf16.msra.mxu1 %v7769_v36  ;;  %v7853_v35 = vld [vmem:[%s11350_s1 + $0x9a8] ss:$16 sps:$4 sm:$0xff]   ;;  %v7858_v36 = vld [vmem:[%s11350_s1 + $0x9c4] ss:$16 sps:$4 sm:$0xff]  }
 0x102   :  { %5201 = vmatprep.subr.bf16.mxu0 %v7774_v38  ;;  %5734 = vmatprep.subr.bf16.mxu1 %v7777_v39  ;;  %v7861_v38 = vld [vmem:[%s11350_s1 + $0x9cc] ss:$16 sps:$4 sm:$0xff]   ;;  %v7856_v39 = vld [vmem:[%s11350_s1 + $0x9c0] ss:$16 sps:$4 sm:$0xff]  }
 0x104   :  { %5193 = vmatmul.mubr.bf16.vlgmr.msra.gmra.mrb[0].mxu0 %v926_v40  ;;  %5726 = vmatmul.mubr.bf16.vlgmr.msra.gmra.mrb[0].mxu1 %v926_v40  ;;  %v7864_v40 = vld [vmem:[%s11350_s1 + $0x9e4] ss:$16 sps:$4 sm:$0xff]  }
 0x105   :  { %5202 = vmatpush1.bf16.msra.mxu0 %v7772_v41  ;;  %5735 = vmatpush1.bf16.msra.mxu1 %v7775_v42  ;;  %v7867_v41 = vld [vmem:[%s11350_s1 + $0x9ec] ss:$16 sps:$4 sm:$0xff]   ;;  %v961_v42 = vcombine.low %v9431_v33, %v9434_v34 }
 0x106   :  { %5203 = vmatprep.subr.bf16.mxu0 %v7780_v43  ;;  %5736 = vmatprep.subr.bf16.mxu1 %v7783_v31  ;;  %v7862_v43 = vld [vmem:[%s11350_s1 + $0x9e0] ss:$16 sps:$4 sm:$0xff]   ;;  %v7865_v31 = vld [vmem:[%s11350_s1 + $0x9e8] ss:$16 sps:$4 sm:$0xff]   ;;  %v7877_v33 = vld [vmem:[%s11350_s1 + $0xa0c] ss:$16 sps:$4 sm:$0xff]  }
 0x107   :  { %5233 = vmatprep.mubr.bf16.mxu0 %v9465_v44  ;;  %5766 = vmatprep.mubr.bf16.mxu1 %v9465_v44  ;;  %v9652_v34 = vrot.slane %v961_v42, %v8760_v54  ;;  %v7961_v42 = vld [vmem:[%s11350_s1 + $0xbcc] ss:$16 sps:$4 sm:$0xff]  }
 0x109   :  { %5204 = vmatpush1.bf16.msra.mxu0 %v7778_v45  ;;  %5737 = vmatpush1.bf16.msra.mxu1 %v7781_v47  ;;  %v7874_v45 = vld [vmem:[%s11350_s1 + $0xa04] ss:$16 sps:$4 sm:$0xff]   ;;  %v7872_v47 = vld [vmem:[%s11350_s1 + $0xa00] ss:$16 sps:$4 sm:$0xff]  }
 0x10a   :  { %5205 = vmatprep.subr.bf16.mxu0 %v7786_v48  ;;  %5738 = vmatprep.subr.bf16.mxu1 %v7789_v49  ;;  %v7875_v48 = vld [vmem:[%s11350_s1 + $0xa08] ss:$16 sps:$4 sm:$0xff]   ;;  %v7880_v49 = vld [vmem:[%s11350_s1 + $0xa24] ss:$16 sps:$4 sm:$0xff]  }
 0x10d   :  { %5206 = vmatpush1.bf16.msra.mxu0 %v7784_v50  ;;  %5739 = vmatpush1.bf16.msra.mxu1 %v7787_v51  ;;  %v7883_v50 = vld [vmem:[%s11350_s1 + $0xa2c] ss:$16 sps:$4 sm:$0xff]   ;;  %v995_v51 = vcombine.high %v9465_v44, %v9465_v44  ;;  %v7886_v44 = vld [vmem:[%s11350_s1 + $0xa44] ss:$16 sps:$4 sm:$0xff]  }
 0x10e   :  { %5207 = vmatprep.subr.bf16.mxu0 %v7792_v52  ;;  %5740 = vmatprep.subr.bf16.mxu1 %v7795_v53  ;;  %v7878_v52 = vld [vmem:[%s11350_s1 + $0xa20] ss:$16 sps:$4 sm:$0xff]   ;;  %v7881_v53 = vld [vmem:[%s11350_s1 + $0xa28] ss:$16 sps:$4 sm:$0xff]  }
 0x111   :  { %5208 = vmatpush1.bf16.msra.mxu0 %v7790_v55  ;;  %5741 = vmatpush1.bf16.msra.mxu1 %v7793_v56  ;;  %v7889_v55 = vld [vmem:[%s11350_s1 + $0xa4c] ss:$16 sps:$4 sm:$0xff]   ;;  %v7884_v56 = vld [vmem:[%s11350_s1 + $0xa40] ss:$16 sps:$4 sm:$0xff]  }
 0x112   :  { %5209 = vmatprep.subr.bf16.mxu0 %v7798_v57  ;;  %5742 = vmatprep.subr.bf16.mxu1 %v7801_v58  ;;  %v7887_v57 = vld [vmem:[%s11350_s1 + $0xa48] ss:$16 sps:$4 sm:$0xff]   ;;  %v7892_v58 = vld [vmem:[%s11350_s1 + $0xa64] ss:$16 sps:$4 sm:$0xff]  }
 0x115   :  { %5210 = vmatpush1.bf16.msra.mxu0 %v7796_v59  ;;  %5743 = vmatpush1.bf16.msra.mxu1 %v7799_v60  ;;  %v7895_v59 = vld [vmem:[%s11350_s1 + $0xa6c] ss:$16 sps:$4 sm:$0xff]   ;;  %v7890_v60 = vld [vmem:[%s11350_s1 + $0xa60] ss:$16 sps:$4 sm:$0xff]  }
 0x116   :  { %5211 = vmatprep.subr.bf16.mxu0 %v7804_v61  ;;  %5744 = vmatprep.subr.bf16.mxu1 %v7807_v62  ;;  %v7893_v61 = vld [vmem:[%s11350_s1 + $0xa68] ss:$16 sps:$4 sm:$0xff]   ;;  %v7898_v62 = vld [vmem:[%s11350_s1 + $0xa84] ss:$16 sps:$4 sm:$0xff]  }
 0x119   :  { %5212 = vmatpush1.bf16.msra.mxu0 %v7802_v63  ;;  %5745 = vmatpush1.bf16.msra.mxu1 %v7805_v0  ;;  %v7901_v63 = vld [vmem:[%s11350_s1 + $0xa8c] ss:$16 sps:$4 sm:$0xff]   ;;  %v7896_v0 = vld [vmem:[%s11350_s1 + $0xa80] ss:$16 sps:$4 sm:$0xff]  }
 0x11a   :  { %5213 = vmatprep.subr.bf16.mxu0 %v7810_v1  ;;  %5746 = vmatprep.subr.bf16.mxu1 %v7813_v2  ;;  %v7899_v1 = vld [vmem:[%s11350_s1 + $0xa88] ss:$16 sps:$4 sm:$0xff]   ;;  %v7904_v2 = vld [vmem:[%s11350_s1 + $0xaa4] ss:$16 sps:$4 sm:$0xff]  }
 0x11d   :  { %5214 = vmatpush1.bf16.msra.mxu0 %v7808_v3  ;;  %5747 = vmatpush1.bf16.msra.mxu1 %v7811_v4  ;;  %v7907_v3 = vld [vmem:[%s11350_s1 + $0xaac] ss:$16 sps:$4 sm:$0xff]   ;;  %v7902_v4 = vld [vmem:[%s11350_s1 + $0xaa0] ss:$16 sps:$4 sm:$0xff]  }
 0x11e   :  { %5215 = vmatprep.subr.bf16.mxu0 %v7816_v5  ;;  %5748 = vmatprep.subr.bf16.mxu1 %v7819_v6  ;;  %v7905_v5 = vld [vmem:[%s11350_s1 + $0xaa8] ss:$16 sps:$4 sm:$0xff]   ;;  %v7910_v6 = vld [vmem:[%s11350_s1 + $0xac4] ss:$16 sps:$4 sm:$0xff]  }
 0x121   :  { %5216 = vmatpush1.bf16.msra.mxu0 %v7814_v7  ;;  %5749 = vmatpush1.bf16.msra.mxu1 %v7817_v8  ;;  %v7913_v7 = vld [vmem:[%s11350_s1 + $0xacc] ss:$16 sps:$4 sm:$0xff]   ;;  %v7908_v8 = vld [vmem:[%s11350_s1 + $0xac0] ss:$16 sps:$4 sm:$0xff]  }
 0x122   :  { %5217 = vmatprep.subr.bf16.mxu0 %v7822_v9  ;;  %5750 = vmatprep.subr.bf16.mxu1 %v7825_v10  ;;  %v7911_v9 = vld [vmem:[%s11350_s1 + $0xac8] ss:$16 sps:$4 sm:$0xff]   ;;  %v7916_v10 = vld [vmem:[%s11350_s1 + $0xae4] ss:$16 sps:$4 sm:$0xff]  }
 0x125   :  { %5218 = vmatpush1.bf16.msra.mxu0 %v7820_v11  ;;  %5751 = vmatpush1.bf16.msra.mxu1 %v7823_v12  ;;  %v7919_v11 = vld [vmem:[%s11350_s1 + $0xaec] ss:$16 sps:$4 sm:$0xff]   ;;  %v7914_v12 = vld [vmem:[%s11350_s1 + $0xae0] ss:$16 sps:$4 sm:$0xff]  }
 0x126   :  { %5219 = vmatprep.subr.bf16.mxu0 %v7828_v13  ;;  %5752 = vmatprep.subr.bf16.mxu1 %v7831_v14  ;;  %v7917_v13 = vld [vmem:[%s11350_s1 + $0xae8] ss:$16 sps:$4 sm:$0xff]   ;;  %v7922_v14 = vld [vmem:[%s11350_s1 + $0xb04] ss:$16 sps:$4 sm:$0xff]  }
 0x129   :  { %5220 = vmatpush1.bf16.msra.mxu0 %v7826_v15  ;;  %5753 = vmatpush1.bf16.msra.mxu1 %v7829_v17  ;;  %v7925_v15 = vld [vmem:[%s11350_s1 + $0xb0c] ss:$16 sps:$4 sm:$0xff]   ;;  %v7920_v17 = vld [vmem:[%s11350_s1 + $0xb00] ss:$16 sps:$4 sm:$0xff]  }
 0x12a   :  { %5221 = vmatprep.subr.bf16.mxu0 %v7834_v18  ;;  %5754 = vmatprep.subr.bf16.mxu1 %v7837_v19  ;;  %v7923_v18 = vld [vmem:[%s11350_s1 + $0xb08] ss:$16 sps:$4 sm:$0xff]   ;;  %v7928_v19 = vld [vmem:[%s11350_s1 + $0xb24] ss:$16 sps:$4 sm:$0xff]  }
 0x12d   :  { %5222 = vmatpush1.bf16.msra.mxu0 %v7832_v20  ;;  %5755 = vmatpush1.bf16.msra.mxu1 %v7835_v21  ;;  %v7931_v20 = vld [vmem:[%s11350_s1 + $0xb2c] ss:$16 sps:$4 sm:$0xff]   ;;  %v7926_v21 = vld [vmem:[%s11350_s1 + $0xb20] ss:$16 sps:$4 sm:$0xff]  }
 0x12e   :  { %5223 = vmatprep.subr.bf16.mxu0 %v7840_v22  ;;  %5756 = vmatprep.subr.bf16.mxu1 %v7843_v23  ;;  %v7929_v22 = vld [vmem:[%s11350_s1 + $0xb28] ss:$16 sps:$4 sm:$0xff]   ;;  %v7934_v23 = vld [vmem:[%s11350_s1 + $0xb44] ss:$16 sps:$4 sm:$0xff]  }
 0x131   :  { %5224 = vmatpush1.bf16.msra.mxu0 %v7838_v24  ;;  %5757 = vmatpush1.bf16.msra.mxu1 %v7841_v16  ;;  %v7937_v24 = vld [vmem:[%s11350_s1 + $0xb4c] ss:$16 sps:$4 sm:$0xff]   ;;  %v7932_v16 = vld [vmem:[%s11350_s1 + $0xb40] ss:$16 sps:$4 sm:$0xff]  }
 0x132   :  { %5225 = vmatprep.subr.bf16.mxu0 %v7846_v25  ;;  %5758 = vmatprep.subr.bf16.mxu1 %v7849_v26  ;;  %v7935_v25 = vld [vmem:[%s11350_s1 + $0xb48] ss:$16 sps:$4 sm:$0xff]   ;;  %v7940_v26 = vld [vmem:[%s11350_s1 + $0xb64] ss:$16 sps:$4 sm:$0xff]  }
 0x135   :  { %5226 = vmatpush1.bf16.msra.mxu0 %v7844_v27  ;;  %5759 = vmatpush1.bf16.msra.mxu1 %v7847_v28  ;;  %v7943_v27 = vld [vmem:[%s11350_s1 + $0xb6c] ss:$16 sps:$4 sm:$0xff]   ;;  %v7938_v28 = vld [vmem:[%s11350_s1 + $0xb60] ss:$16 sps:$4 sm:$0xff]  }
 0x136   :  { %5227 = vmatprep.subr.bf16.mxu0 %v7852_v29  ;;  %5760 = vmatprep.subr.bf16.mxu1 %v7855_v32  ;;  %v7941_v29 = vld [vmem:[%s11350_s1 + $0xb68] ss:$16 sps:$4 sm:$0xff]   ;;  %v7946_v32 = vld [vmem:[%s11350_s1 + $0xb84] ss:$16 sps:$4 sm:$0xff]  }
 0x139   :  { %5228 = vmatpush1.bf16.msra.mxu0 %v7850_v30  ;;  %5761 = vmatpush1.bf16.msra.mxu1 %v7853_v35  ;;  %v7949_v30 = vld [vmem:[%s11350_s1 + $0xb8c] ss:$16 sps:$4 sm:$0xff]   ;;  %v7944_v35 = vld [vmem:[%s11350_s1 + $0xb80] ss:$16 sps:$4 sm:$0xff]  }
 0x13a   :  { %5229 = vmatprep.subr.bf16.mxu0 %v7858_v36  ;;  %5762 = vmatprep.subr.bf16.mxu1 %v7861_v38  ;;  %v7947_v36 = vld [vmem:[%s11350_s1 + $0xb88] ss:$16 sps:$4 sm:$0xff]   ;;  %v7952_v38 = vld [vmem:[%s11350_s1 + $0xba4] ss:$16 sps:$4 sm:$0xff]  }
 0x13d   :  { %5230 = vmatpush1.bf16.msra.mxu0 %v7856_v39  ;;  %5763 = vmatpush1.bf16.msra.mxu1 %v7859_v37  ;;  %v7955_v39 = vld [vmem:[%s11350_s1 + $0xbac] ss:$16 sps:$4 sm:$0xff]   ;;  %v7950_v37 = vld [vmem:[%s11350_s1 + $0xba0] ss:$16 sps:$4 sm:$0xff]  }
 0x13e   :  { %5231 = vmatprep.subr.bf16.mxu0 %v7864_v40  ;;  %5764 = vmatprep.subr.bf16.mxu1 %v7867_v41  ;;  %v7953_v40 = vld [vmem:[%s11350_s1 + $0xba8] ss:$16 sps:$4 sm:$0xff]   ;;  %v7958_v41 = vld [vmem:[%s11350_s1 + $0xbc4] ss:$16 sps:$4 sm:$0xff]  }
 0x141   :  { %5232 = vmatpush1.bf16.msra.mxu0 %v7862_v43  ;;  %5765 = vmatpush1.bf16.msra.mxu1 %v7865_v31  ;;  %v8064_v43 = vld [vmem:[%s11349_s0 + $0xc] ss:$25 sps:$4 sm:$0xff]   ;;  %v8065_v31 = vld [vmem:[%s11349_s0 + $0x3e] ss:$25 sps:$4 sm:$0xff]  }
 0x142   :  { %5242 = vmatprep.subr.bf16.mxu0 %v7874_v45  ;;  %5775 = vmatprep.subr.bf16.mxu1 %v7877_v33  ;;  %v7956_v45 = vld [vmem:[%s11350_s1 + $0xbc0] ss:$16 sps:$4 sm:$0xff]   ;;  %v7959_v33 = vld [vmem:[%s11350_s1 + $0xbc8] ss:$16 sps:$4 sm:$0xff]  }
 0x144   :  { %5234 = vmatmul.mubr.bf16.vlgmr.msra.gmra.mrb[0].mxu0 %v9652_v34  ;;  %5767 = vmatmul.mubr.bf16.vlgmr.msra.gmra.mrb[0].mxu1 %v9652_v34 }
 0x145   :  { %5243 = vmatpush1.bf16.msra.mxu0 %v7872_v47  ;;  %5776 = vmatpush1.bf16.msra.mxu1 %v7875_v48  ;;  %v7964_v47 = vld [vmem:[%s11350_s1 + $0xbe4] ss:$16 sps:$4 sm:$0xff]   ;;  %v7967_v48 = vld [vmem:[%s11350_s1 + $0xbec] ss:$16 sps:$4 sm:$0xff]  }
 0x146   :  { %5244 = vmatprep.subr.bf16.mxu0 %v7880_v49  ;;  %5777 = vmatprep.subr.bf16.mxu1 %v7883_v50  ;;  %v9845_v49 = vrot.slane %v8064_v43, %v8760_v54  ;;  %v9848_v50 = vrot.slane %v8065_v31, %v8760_v54  ;;  %v8045_v43 = vld [vmem:[%s11350_s1 + $0xd8c] ss:$16 sps:$4 sm:$0xff]   ;;  %v8040_v31 = vld [vmem:[%s11350_s1 + $0xd80] ss:$16 sps:$4 sm:$0xff]  }
 0x147   :  { %5274 = vmatprep.mubr.bf16.mxu0 %v995_v51  ;;  %5807 = vmatprep.mubr.bf16.mxu1 %v995_v51  ;;  %v7962_v51 = vld [vmem:[%s11350_s1 + $0xbe0] ss:$16 sps:$4 sm:$0xff]  }
 0x149   :  { %5245 = vmatpush1.bf16.msra.mxu0 %v7878_v52  ;;  %5778 = vmatpush1.bf16.msra.mxu1 %v7881_v53  ;;  %v7965_v52 = vld [vmem:[%s11350_s1 + $0xbe8] ss:$16 sps:$4 sm:$0xff]   ;;  %v7970_v53 = vld [vmem:[%s11350_s1 + $0xc04] ss:$16 sps:$4 sm:$0xff]  }
 0x14a   :  { %5246 = vmatprep.subr.bf16.mxu0 %v7886_v44  ;;  %5779 = vmatprep.subr.bf16.mxu1 %v7889_v55  ;;  %v7973_v44 = vld [vmem:[%s11350_s1 + $0xc0c] ss:$16 sps:$4 sm:$0xff]   ;;  %v964_v55 = vcombine.high %v9845_v49, %v9848_v50 }
 0x14d   :  { %5247 = vmatpush1.bf16.msra.mxu0 %v7884_v56  ;;  %5780 = vmatpush1.bf16.msra.mxu1 %v7887_v57  ;;  %v993_v56 = vcombine.high %v9652_v34, %v9652_v34  ;;  %v7968_v57 = vld [vmem:[%s11350_s1 + $0xc00] ss:$16 sps:$4 sm:$0xff]   ;;  %v7979_v34 = vld [vmem:[%s11350_s1 + $0xc2c] ss:$16 sps:$4 sm:$0xff]  }
 0x14e   :  { %5248 = vmatprep.subr.bf16.mxu0 %v7892_v58  ;;  %5781 = vmatprep.subr.bf16.mxu1 %v7895_v59  ;;  %v7971_v58 = vld [vmem:[%s11350_s1 + $0xc08] ss:$16 sps:$4 sm:$0xff]   ;;  %v7976_v59 = vld [vmem:[%s11350_s1 + $0xc24] ss:$16 sps:$4 sm:$0xff]  }
 0x151   :  { %5249 = vmatpush1.bf16.msra.mxu0 %v7890_v60  ;;  %5782 = vmatpush1.bf16.msra.mxu1 %v7893_v61  ;;  %v9879_v60 = vrot.slane %v964_v55, %v8760_v54  ;;  %v7974_v61 = vld [vmem:[%s11350_s1 + $0xc20] ss:$16 sps:$4 sm:$0xff]   ;;  %v8055_v55 = vld [vmem:[%s11350_s1 + $0xdc8] ss:$16 sps:$4 sm:$0xff]  }
 0x152   :  { %5250 = vmatprep.subr.bf16.mxu0 %v7898_v62  ;;  %5783 = vmatprep.subr.bf16.mxu1 %v7901_v63  ;;  %v7977_v62 = vld [vmem:[%s11350_s1 + $0xc28] ss:$16 sps:$4 sm:$0xff]   ;;  %v7982_v63 = vld [vmem:[%s11350_s1 + $0xc44] ss:$16 sps:$4 sm:$0xff]  }
 0x155   :  { %5251 = vmatpush1.bf16.msra.mxu0 %v7896_v0  ;;  %5784 = vmatpush1.bf16.msra.mxu1 %v7899_v1  ;;  %v7985_v0 = vld [vmem:[%s11350_s1 + $0xc4c] ss:$16 sps:$4 sm:$0xff]   ;;  %v7980_v1 = vld [vmem:[%s11350_s1 + $0xc40] ss:$16 sps:$4 sm:$0xff]  }
 0x156   :  { %5252 = vmatprep.subr.bf16.mxu0 %v7904_v2  ;;  %5785 = vmatprep.subr.bf16.mxu1 %v7907_v3  ;;  %v7983_v2 = vld [vmem:[%s11350_s1 + $0xc48] ss:$16 sps:$4 sm:$0xff]   ;;  %v7988_v3 = vld [vmem:[%s11350_s1 + $0xc64] ss:$16 sps:$4 sm:$0xff]  }
 0x159   :  { %5253 = vmatpush1.bf16.msra.mxu0 %v7902_v4  ;;  %5786 = vmatpush1.bf16.msra.mxu1 %v7905_v5  ;;  %v7991_v4 = vld [vmem:[%s11350_s1 + $0xc6c] ss:$16 sps:$4 sm:$0xff]   ;;  %v7986_v5 = vld [vmem:[%s11350_s1 + $0xc60] ss:$16 sps:$4 sm:$0xff]  }
 0x15a   :  { %5254 = vmatprep.subr.bf16.mxu0 %v7910_v6  ;;  %5787 = vmatprep.subr.bf16.mxu1 %v7913_v7  ;;  %v7989_v6 = vld [vmem:[%s11350_s1 + $0xc68] ss:$16 sps:$4 sm:$0xff]   ;;  %v7994_v7 = vld [vmem:[%s11350_s1 + $0xc84] ss:$16 sps:$4 sm:$0xff]  }
 0x15d   :  { %5255 = vmatpush1.bf16.msra.mxu0 %v7908_v8  ;;  %5788 = vmatpush1.bf16.msra.mxu1 %v7911_v9  ;;  %v7997_v8 = vld [vmem:[%s11350_s1 + $0xc8c] ss:$16 sps:$4 sm:$0xff]   ;;  %v7992_v9 = vld [vmem:[%s11350_s1 + $0xc80] ss:$16 sps:$4 sm:$0xff]  }
 0x15e   :  { %5256 = vmatprep.subr.bf16.mxu0 %v7916_v10  ;;  %5789 = vmatprep.subr.bf16.mxu1 %v7919_v11  ;;  %v7995_v10 = vld [vmem:[%s11350_s1 + $0xc88] ss:$16 sps:$4 sm:$0xff]   ;;  %v8000_v11 = vld [vmem:[%s11350_s1 + $0xca4] ss:$16 sps:$4 sm:$0xff]  }
 0x161   :  { %5257 = vmatpush1.bf16.msra.mxu0 %v7914_v12  ;;  %5790 = vmatpush1.bf16.msra.mxu1 %v7917_v13  ;;  %v8003_v12 = vld [vmem:[%s11350_s1 + $0xcac] ss:$16 sps:$4 sm:$0xff]   ;;  %v7998_v13 = vld [vmem:[%s11350_s1 + $0xca0] ss:$16 sps:$4 sm:$0xff]  }
 0x162   :  { %5258 = vmatprep.subr.bf16.mxu0 %v7922_v14  ;;  %5791 = vmatprep.subr.bf16.mxu1 %v7925_v15  ;;  %v8001_v14 = vld [vmem:[%s11350_s1 + $0xca8] ss:$16 sps:$4 sm:$0xff]   ;;  %v8006_v15 = vld [vmem:[%s11350_s1 + $0xcc4] ss:$16 sps:$4 sm:$0xff]  }
 0x165   :  { %5259 = vmatpush1.bf16.msra.mxu0 %v7920_v17  ;;  %5792 = vmatpush1.bf16.msra.mxu1 %v7923_v18  ;;  %v8009_v17 = vld [vmem:[%s11350_s1 + $0xccc] ss:$16 sps:$4 sm:$0xff]   ;;  %v8004_v18 = vld [vmem:[%s11350_s1 + $0xcc0] ss:$16 sps:$4 sm:$0xff]  }
 0x166   :  { %5260 = vmatprep.subr.bf16.mxu0 %v7928_v19  ;;  %5793 = vmatprep.subr.bf16.mxu1 %v7931_v20  ;;  %v8007_v19 = vld [vmem:[%s11350_s1 + $0xcc8] ss:$16 sps:$4 sm:$0xff]   ;;  %v8012_v20 = vld [vmem:[%s11350_s1 + $0xce4] ss:$16 sps:$4 sm:$0xff]  }
 0x169   :  { %5261 = vmatpush1.bf16.msra.mxu0 %v7926_v21  ;;  %5794 = vmatpush1.bf16.msra.mxu1 %v7929_v22  ;;  %v8015_v21 = vld [vmem:[%s11350_s1 + $0xcec] ss:$16 sps:$4 sm:$0xff]   ;;  %v8010_v22 = vld [vmem:[%s11350_s1 + $0xce0] ss:$16 sps:$4 sm:$0xff]  }
 0x16a   :  { %5262 = vmatprep.subr.bf16.mxu0 %v7934_v23  ;;  %5795 = vmatprep.subr.bf16.mxu1 %v7937_v24  ;;  %v8013_v23 = vld [vmem:[%s11350_s1 + $0xce8] ss:$16 sps:$4 sm:$0xff]   ;;  %v8018_v24 = vld [vmem:[%s11350_s1 + $0xd04] ss:$16 sps:$4 sm:$0xff]  }
 0x16d   :  { %5263 = vmatpush1.bf16.msra.mxu0 %v7932_v16  ;;  %5796 = vmatpush1.bf16.msra.mxu1 %v7935_v25  ;;  %v8021_v16 = vld [vmem:[%s11350_s1 + $0xd0c] ss:$16 sps:$4 sm:$0xff]   ;;  %v8016_v25 = vld [vmem:[%s11350_s1 + $0xd00] ss:$16 sps:$4 sm:$0xff]  }
 0x16e   :  { %5264 = vmatprep.subr.bf16.mxu0 %v7940_v26  ;;  %5797 = vmatprep.subr.bf16.mxu1 %v7943_v27  ;;  %v8019_v26 = vld [vmem:[%s11350_s1 + $0xd08] ss:$16 sps:$4 sm:$0xff]   ;;  %v8024_v27 = vld [vmem:[%s11350_s1 + $0xd24] ss:$16 sps:$4 sm:$0xff]  }
 0x171   :  { %5265 = vmatpush1.bf16.msra.mxu0 %v7938_v28  ;;  %5798 = vmatpush1.bf16.msra.mxu1 %v7941_v29  ;;  %v8027_v28 = vld [vmem:[%s11350_s1 + $0xd2c] ss:$16 sps:$4 sm:$0xff]   ;;  %v8022_v29 = vld [vmem:[%s11350_s1 + $0xd20] ss:$16 sps:$4 sm:$0xff]  }
 0x172   :  { %5266 = vmatprep.subr.bf16.mxu0 %v7946_v32  ;;  %5799 = vmatprep.subr.bf16.mxu1 %v7949_v30  ;;  %v8025_v32 = vld [vmem:[%s11350_s1 + $0xd28] ss:$16 sps:$4 sm:$0xff]   ;;  %v8030_v30 = vld [vmem:[%s11350_s1 + $0xd44] ss:$16 sps:$4 sm:$0xff]  }
 0x175   :  { %5267 = vmatpush1.bf16.msra.mxu0 %v7944_v35  ;;  %5800 = vmatpush1.bf16.msra.mxu1 %v7947_v36  ;;  %v8033_v35 = vld [vmem:[%s11350_s1 + $0xd4c] ss:$16 sps:$4 sm:$0xff]   ;;  %v8028_v36 = vld [vmem:[%s11350_s1 + $0xd40] ss:$16 sps:$4 sm:$0xff]  }
 0x176   :  { %5268 = vmatprep.subr.bf16.mxu0 %v7952_v38  ;;  %5801 = vmatprep.subr.bf16.mxu1 %v7955_v39  ;;  %v8031_v38 = vld [vmem:[%s11350_s1 + $0xd48] ss:$16 sps:$4 sm:$0xff]   ;;  %v8036_v39 = vld [vmem:[%s11350_s1 + $0xd64] ss:$16 sps:$4 sm:$0xff]  }
 0x179   :  { %5269 = vmatpush1.bf16.msra.mxu0 %v7950_v37  ;;  %5802 = vmatpush1.bf16.msra.mxu1 %v7953_v40  ;;  %v8039_v37 = vld [vmem:[%s11350_s1 + $0xd6c] ss:$16 sps:$4 sm:$0xff]   ;;  %v8034_v40 = vld [vmem:[%s11350_s1 + $0xd60] ss:$16 sps:$4 sm:$0xff]  }
 0x17a   :  { %5270 = vmatprep.subr.bf16.mxu0 %v7958_v41  ;;  %5803 = vmatprep.subr.bf16.mxu1 %v7961_v42  ;;  %v8037_v41 = vld [vmem:[%s11350_s1 + $0xd68] ss:$16 sps:$4 sm:$0xff]   ;;  %v8042_v42 = vld [vmem:[%s11350_s1 + $0xd84] ss:$16 sps:$4 sm:$0xff]  }
 0x17d   :  { %5271 = vmatpush1.bf16.msra.mxu0 %v7956_v45  ;;  %5804 = vmatpush1.bf16.msra.mxu1 %v7959_v33  ;;  %v8043_v45 = vld [vmem:[%s11350_s1 + $0xd88] ss:$16 sps:$4 sm:$0xff]   ;;  %v8048_v33 = vld [vmem:[%s11350_s1 + $0xda4] ss:$16 sps:$4 sm:$0xff]  }
 0x17e   :  { %5272 = vmatprep.subr.bf16.mxu0 %v7964_v47  ;;  %5805 = vmatprep.subr.bf16.mxu1 %v7967_v48  ;;  %v8051_v47 = vld [vmem:[%s11350_s1 + $0xdac] ss:$16 sps:$4 sm:$0xff]   ;;  %v8046_v48 = vld [vmem:[%s11350_s1 + $0xda0] ss:$16 sps:$4 sm:$0xff]  }
 0x181   :  { %5273 = vmatpush1.bf16.msra.mxu0 %v7962_v51  ;;  %5806 = vmatpush1.bf16.msra.mxu1 %v7965_v52  ;;  %v8049_v51 = vld [vmem:[%s11350_s1 + $0xda8] ss:$16 sps:$4 sm:$0xff]   ;;  %v8054_v52 = vld [vmem:[%s11350_s1 + $0xdc4] ss:$16 sps:$4 sm:$0xff]  }
 0x182   :  { %5283 = vmatprep.subr.bf16.mxu0 %v7970_v53  ;;  %5816 = vmatprep.subr.bf16.mxu1 %v7973_v44  ;;  %v8057_v53 = vld [vmem:[%s11350_s1 + $0xdcc] ss:$16 sps:$4 sm:$0xff]   ;;  %v8052_v44 = vld [vmem:[%s11350_s1 + $0xdc0] ss:$16 sps:$4 sm:$0xff]  }
 0x184   :  { %5275 = vmatmul.mubr.bf16.vlgmr.msra.gmra.mrb[0].mxu0 %v993_v56  ;;  %5808 = vmatmul.mubr.bf16.vlgmr.msra.gmra.mrb[0].mxu1 %v993_v56  ;;  %v8060_v56 = vld [vmem:[%s11350_s1 + $0xde4] ss:$16 sps:$4 sm:$0xff]  }
 0x185   :  { %5284 = vmatpush1.bf16.msra.mxu0 %v7968_v57  ;;  %5817 = vmatpush1.bf16.msra.mxu1 %v7971_v58  ;;  %v8063_v57 = vld [vmem:[%s11350_s1 + $0xdec] ss:$16 sps:$4 sm:$0xff]   ;;  %v963_v58 = vcombine.low %v9845_v49, %v9848_v50 }
 0x186   :  { %5285 = vmatprep.subr.bf16.mxu0 %v7976_v59  ;;  %5818 = vmatprep.subr.bf16.mxu1 %v7979_v34  ;;  %v8058_v59 = vld [vmem:[%s11350_s1 + $0xde0] ss:$16 sps:$4 sm:$0xff]   ;;  %v8061_v34 = vld [vmem:[%s11350_s1 + $0xde8] ss:$16 sps:$4 sm:$0xff]   ;;  %v8071_v49 = vld [vmem:[%s11350_s1 + $0xe0c] ss:$16 sps:$4 sm:$0xff]  }
 0x187   :  { %5315 = vmatprep.mubr.bf16.mxu0 %v9879_v60  ;;  %5848 = vmatprep.mubr.bf16.mxu1 %v9879_v60  ;;  %v10066_v50 = vrot.slane %v963_v58, %v8760_v54  ;;  %v8155_v58 = vld [vmem:[%s11350_s1 + $0xfcc] ss:$16 sps:$4 sm:$0xff]  }
 0x189   :  { %5286 = vmatpush1.bf16.msra.mxu0 %v7974_v61  ;;  %5819 = vmatpush1.bf16.msra.mxu1 %v7977_v62  ;;  %v8068_v61 = vld [vmem:[%s11350_s1 + $0xe04] ss:$16 sps:$4 sm:$0xff]   ;;  %v8066_v62 = vld [vmem:[%s11350_s1 + $0xe00] ss:$16 sps:$4 sm:$0xff]  }
 0x18a   :  { %5287 = vmatprep.subr.bf16.mxu0 %v7982_v63  ;;  %5820 = vmatprep.subr.bf16.mxu1 %v7985_v0  ;;  %v8069_v63 = vld [vmem:[%s11350_s1 + $0xe08] ss:$16 sps:$4 sm:$0xff]   ;;  %v8074_v0 = vld [vmem:[%s11350_s1 + $0xe24] ss:$16 sps:$4 sm:$0xff]  }
 0x18d   :  { %5288 = vmatpush1.bf16.msra.mxu0 %v7980_v1  ;;  %5821 = vmatpush1.bf16.msra.mxu1 %v7983_v2  ;;  %v8077_v1 = vld [vmem:[%s11350_s1 + $0xe2c] ss:$16 sps:$4 sm:$0xff]   ;;  %v996_v2 = vcombine.high %v9879_v60, %v9879_v60  ;;  %v8080_v60 = vld [vmem:[%s11350_s1 + $0xe44] ss:$16 sps:$4 sm:$0xff]  }
 0x18e   :  { %5289 = vmatprep.subr.bf16.mxu0 %v7988_v3  ;;  %5822 = vmatprep.subr.bf16.mxu1 %v7991_v4  ;;  %v8072_v3 = vld [vmem:[%s11350_s1 + $0xe20] ss:$16 sps:$4 sm:$0xff]   ;;  %v8075_v4 = vld [vmem:[%s11350_s1 + $0xe28] ss:$16 sps:$4 sm:$0xff]  }
 0x191   :  { %5290 = vmatpush1.bf16.msra.mxu0 %v7986_v5  ;;  %5823 = vmatpush1.bf16.msra.mxu1 %v7989_v6  ;;  %v8083_v5 = vld [vmem:[%s11350_s1 + $0xe4c] ss:$16 sps:$4 sm:$0xff]   ;;  %v8078_v6 = vld [vmem:[%s11350_s1 + $0xe40] ss:$16 sps:$4 sm:$0xff]  }
 0x192   :  { %5291 = vmatprep.subr.bf16.mxu0 %v7994_v7  ;;  %5824 = vmatprep.subr.bf16.mxu1 %v7997_v8  ;;  %v8081_v7 = vld [vmem:[%s11350_s1 + $0xe48] ss:$16 sps:$4 sm:$0xff]   ;;  %v8086_v8 = vld [vmem:[%s11350_s1 + $0xe64] ss:$16 sps:$4 sm:$0xff]  }
 0x195   :  { %5292 = vmatpush1.bf16.msra.mxu0 %v7992_v9  ;;  %5825 = vmatpush1.bf16.msra.mxu1 %v7995_v10  ;;  %v8089_v9 = vld [vmem:[%s11350_s1 + $0xe6c] ss:$16 sps:$4 sm:$0xff]   ;;  %v8084_v10 = vld [vmem:[%s11350_s1 + $0xe60] ss:$16 sps:$4 sm:$0xff]  }
 0x196   :  { %5293 = vmatprep.subr.bf16.mxu0 %v8000_v11  ;;  %5826 = vmatprep.subr.bf16.mxu1 %v8003_v12  ;;  %v8087_v11 = vld [vmem:[%s11350_s1 + $0xe68] ss:$16 sps:$4 sm:$0xff]   ;;  %v8092_v12 = vld [vmem:[%s11350_s1 + $0xe84] ss:$16 sps:$4 sm:$0xff]  }
 0x199   :  { %5294 = vmatpush1.bf16.msra.mxu0 %v7998_v13  ;;  %5827 = vmatpush1.bf16.msra.mxu1 %v8001_v14  ;;  %v8095_v13 = vld [vmem:[%s11350_s1 + $0xe8c] ss:$16 sps:$4 sm:$0xff]   ;;  %v8090_v14 = vld [vmem:[%s11350_s1 + $0xe80] ss:$16 sps:$4 sm:$0xff]  }
 0x19a   :  { %5295 = vmatprep.subr.bf16.mxu0 %v8006_v15  ;;  %5828 = vmatprep.subr.bf16.mxu1 %v8009_v17  ;;  %v8093_v15 = vld [vmem:[%s11350_s1 + $0xe88] ss:$16 sps:$4 sm:$0xff]   ;;  %v8098_v17 = vld [vmem:[%s11350_s1 + $0xea4] ss:$16 sps:$4 sm:$0xff]  }
 0x19d   :  { %5296 = vmatpush1.bf16.msra.mxu0 %v8004_v18  ;;  %5829 = vmatpush1.bf16.msra.mxu1 %v8007_v19  ;;  %v8101_v18 = vld [vmem:[%s11350_s1 + $0xeac] ss:$16 sps:$4 sm:$0xff]   ;;  %v8096_v19 = vld [vmem:[%s11350_s1 + $0xea0] ss:$16 sps:$4 sm:$0xff]  }
 0x19e   :  { %5297 = vmatprep.subr.bf16.mxu0 %v8012_v20  ;;  %5830 = vmatprep.subr.bf16.mxu1 %v8015_v21  ;;  %v8099_v20 = vld [vmem:[%s11350_s1 + $0xea8] ss:$16 sps:$4 sm:$0xff]   ;;  %v8104_v21 = vld [vmem:[%s11350_s1 + $0xec4] ss:$16 sps:$4 sm:$0xff]  }
 0x1a1   :  { %5298 = vmatpush1.bf16.msra.mxu0 %v8010_v22  ;;  %5831 = vmatpush1.bf16.msra.mxu1 %v8013_v23  ;;  %v8107_v22 = vld [vmem:[%s11350_s1 + $0xecc] ss:$16 sps:$4 sm:$0xff]   ;;  %v8102_v23 = vld [vmem:[%s11350_s1 + $0xec0] ss:$16 sps:$4 sm:$0xff]  }
 0x1a2   :  { %5299 = vmatprep.subr.bf16.mxu0 %v8018_v24  ;;  %5832 = vmatprep.subr.bf16.mxu1 %v8021_v16  ;;  %v8105_v24 = vld [vmem:[%s11350_s1 + $0xec8] ss:$16 sps:$4 sm:$0xff]   ;;  %v8110_v16 = vld [vmem:[%s11350_s1 + $0xee4] ss:$16 sps:$4 sm:$0xff]  }
 0x1a5   :  { %5300 = vmatpush1.bf16.msra.mxu0 %v8016_v25  ;;  %5833 = vmatpush1.bf16.msra.mxu1 %v8019_v26  ;;  %v8113_v25 = vld [vmem:[%s11350_s1 + $0xeec] ss:$16 sps:$4 sm:$0xff]   ;;  %v8108_v26 = vld [vmem:[%s11350_s1 + $0xee0] ss:$16 sps:$4 sm:$0xff]  }
 0x1a6   :  { %5301 = vmatprep.subr.bf16.mxu0 %v8024_v27  ;;  %5834 = vmatprep.subr.bf16.mxu1 %v8027_v28  ;;  %v8111_v27 = vld [vmem:[%s11350_s1 + $0xee8] ss:$16 sps:$4 sm:$0xff]   ;;  %v8116_v28 = vld [vmem:[%s11350_s1 + $0xf04] ss:$16 sps:$4 sm:$0xff]  }
 0x1a9   :  { %5302 = vmatpush1.bf16.msra.mxu0 %v8022_v29  ;;  %5835 = vmatpush1.bf16.msra.mxu1 %v8025_v32  ;;  %v8119_v29 = vld [vmem:[%s11350_s1 + $0xf0c] ss:$16 sps:$4 sm:$0xff]   ;;  %v8114_v32 = vld [vmem:[%s11350_s1 + $0xf00] ss:$16 sps:$4 sm:$0xff]  }
 0x1aa   :  { %5303 = vmatprep.subr.bf16.mxu0 %v8030_v30  ;;  %5836 = vmatprep.subr.bf16.mxu1 %v8033_v35  ;;  %v8117_v30 = vld [vmem:[%s11350_s1 + $0xf08] ss:$16 sps:$4 sm:$0xff]   ;;  %v8122_v35 = vld [vmem:[%s11350_s1 + $0xf24] ss:$16 sps:$4 sm:$0xff]  }
 0x1ad   :  { %5304 = vmatpush1.bf16.msra.mxu0 %v8028_v36  ;;  %5837 = vmatpush1.bf16.msra.mxu1 %v8031_v38  ;;  %v8125_v36 = vld [vmem:[%s11350_s1 + $0xf2c] ss:$16 sps:$4 sm:$0xff]   ;;  %v8120_v38 = vld [vmem:[%s11350_s1 + $0xf20] ss:$16 sps:$4 sm:$0xff]  }
 0x1ae   :  { %5305 = vmatprep.subr.bf16.mxu0 %v8036_v39  ;;  %5838 = vmatprep.subr.bf16.mxu1 %v8039_v37  ;;  %v8123_v39 = vld [vmem:[%s11350_s1 + $0xf28] ss:$16 sps:$4 sm:$0xff]   ;;  %v8128_v37 = vld [vmem:[%s11350_s1 + $0xf44] ss:$16 sps:$4 sm:$0xff]  }
 0x1b1   :  { %5306 = vmatpush1.bf16.msra.mxu0 %v8034_v40  ;;  %5839 = vmatpush1.bf16.msra.mxu1 %v8037_v41  ;;  %v8131_v40 = vld [vmem:[%s11350_s1 + $0xf4c] ss:$16 sps:$4 sm:$0xff]   ;;  %v8126_v41 = vld [vmem:[%s11350_s1 + $0xf40] ss:$16 sps:$4 sm:$0xff]  }
 0x1b2   :  { %5307 = vmatprep.subr.bf16.mxu0 %v8042_v42  ;;  %5840 = vmatprep.subr.bf16.mxu1 %v8045_v43  ;;  %v8129_v42 = vld [vmem:[%s11350_s1 + $0xf48] ss:$16 sps:$4 sm:$0xff]   ;;  %v8134_v43 = vld [vmem:[%s11350_s1 + $0xf64] ss:$16 sps:$4 sm:$0xff]  }
 0x1b5   :  { %5308 = vmatpush1.bf16.msra.mxu0 %v8040_v31  ;;  %5841 = vmatpush1.bf16.msra.mxu1 %v8043_v45  ;;  %v8137_v31 = vld [vmem:[%s11350_s1 + $0xf6c] ss:$16 sps:$4 sm:$0xff]   ;;  %v8132_v45 = vld [vmem:[%s11350_s1 + $0xf60] ss:$16 sps:$4 sm:$0xff]  }
 0x1b6   :  { %5309 = vmatprep.subr.bf16.mxu0 %v8048_v33  ;;  %5842 = vmatprep.subr.bf16.mxu1 %v8051_v47  ;;  %v8135_v33 = vld [vmem:[%s11350_s1 + $0xf68] ss:$16 sps:$4 sm:$0xff]   ;;  %v8140_v47 = vld [vmem:[%s11350_s1 + $0xf84] ss:$16 sps:$4 sm:$0xff]  }
 0x1b9   :  { %5310 = vmatpush1.bf16.msra.mxu0 %v8046_v48  ;;  %5843 = vmatpush1.bf16.msra.mxu1 %v8049_v51  ;;  %v8143_v48 = vld [vmem:[%s11350_s1 + $0xf8c] ss:$16 sps:$4 sm:$0xff]   ;;  %v8138_v51 = vld [vmem:[%s11350_s1 + $0xf80] ss:$16 sps:$4 sm:$0xff]  }
 0x1ba   :  { %5311 = vmatprep.subr.bf16.mxu0 %v8054_v52  ;;  %5844 = vmatprep.subr.bf16.mxu1 %v8057_v53  ;;  %v8141_v52 = vld [vmem:[%s11350_s1 + $0xf88] ss:$16 sps:$4 sm:$0xff]   ;;  %v8146_v53 = vld [vmem:[%s11350_s1 + $0xfa4] ss:$16 sps:$4 sm:$0xff]  }
 0x1bd   :  { %5312 = vmatpush1.bf16.msra.mxu0 %v8052_v44  ;;  %5845 = vmatpush1.bf16.msra.mxu1 %v8055_v55  ;;  %v8149_v44 = vld [vmem:[%s11350_s1 + $0xfac] ss:$16 sps:$4 sm:$0xff]   ;;  %v8144_v55 = vld [vmem:[%s11350_s1 + $0xfa0] ss:$16 sps:$4 sm:$0xff]  }
 0x1be   :  { %5313 = vmatprep.subr.bf16.mxu0 %v8060_v56  ;;  %5846 = vmatprep.subr.bf16.mxu1 %v8063_v57  ;;  %v8147_v56 = vld [vmem:[%s11350_s1 + $0xfa8] ss:$16 sps:$4 sm:$0xff]   ;;  %v8152_v57 = vld [vmem:[%s11350_s1 + $0xfc4] ss:$16 sps:$4 sm:$0xff]  }
 0x1c1   :  { %5314 = vmatpush1.bf16.msra.mxu0 %v8058_v59  ;;  %5847 = vmatpush1.bf16.msra.mxu1 %v8061_v34  ;;  %v8258_v59 = vld [vmem:[%s11349_s0 + $0x10] ss:$25 sps:$4 sm:$0xff]   ;;  %v8260_v34 = vld [vmem:[%s11349_s0 + $0x42] ss:$25 sps:$4 sm:$0xff]  }
 0x1c2   :  { %5324 = vmatprep.subr.bf16.mxu0 %v8068_v61  ;;  %5857 = vmatprep.subr.bf16.mxu1 %v8071_v49  ;;  %v8150_v61 = vld [vmem:[%s11350_s1 + $0xfc0] ss:$16 sps:$4 sm:$0xff]   ;;  %v8153_v49 = vld [vmem:[%s11350_s1 + $0xfc8] ss:$16 sps:$4 sm:$0xff]  }
 0x1c4   :  { %5316 = vmatmul.mubr.bf16.vlgmr.msra.gmra.mrb[0].mxu0 %v10066_v50  ;;  %5849 = vmatmul.mubr.bf16.vlgmr.msra.gmra.mrb[0].mxu1 %v10066_v50 }
 0x1c5   :  { %5325 = vmatpush1.bf16.msra.mxu0 %v8066_v62  ;;  %5858 = vmatpush1.bf16.msra.mxu1 %v8069_v63  ;;  %v8158_v62 = vld [vmem:[%s11350_s1 + $0xfe4] ss:$16 sps:$4 sm:$0xff]   ;;  %v8161_v63 = vld [vmem:[%s11350_s1 + $0xfec] ss:$16 sps:$4 sm:$0xff]  }
 0x1c6   :  { %5326 = vmatprep.subr.bf16.mxu0 %v8074_v0  ;;  %5859 = vmatprep.subr.bf16.mxu1 %v8077_v1  ;;  %v10259_v0 = vrot.slane %v8258_v59, %v8760_v54  ;;  %v10262_v1 = vrot.slane %v8260_v34, %v8760_v54  ;;  %v8239_v59 = vld [vmem:[%s11350_s1 + $0x118c] ss:$16 sps:$4 sm:$0xff]   ;;  %v8234_v34 = vld [vmem:[%s11350_s1 + $0x1180] ss:$16 sps:$4 sm:$0xff]  }
 0x1c7   :  { %5356 = vmatprep.mubr.bf16.mxu0 %v996_v2  ;;  %5889 = vmatprep.mubr.bf16.mxu1 %v996_v2  ;;  %v8156_v2 = vld [vmem:[%s11350_s1 + $0xfe0] ss:$16 sps:$4 sm:$0xff]  }
 0x1c9   :  { %5327 = vmatpush1.bf16.msra.mxu0 %v8072_v3  ;;  %5860 = vmatpush1.bf16.msra.mxu1 %v8075_v4  ;;  %v8159_v3 = vld [vmem:[%s11350_s1 + $0xfe8] ss:$16 sps:$4 sm:$0xff]   ;;  %v8164_v4 = vld [vmem:[%s11350_s1 + $0x1004] ss:$16 sps:$4 sm:$0xff]  }
 0x1ca   :  { %5328 = vmatprep.subr.bf16.mxu0 %v8080_v60  ;;  %5861 = vmatprep.subr.bf16.mxu1 %v8083_v5  ;;  %v8167_v60 = vld [vmem:[%s11350_s1 + $0x100c] ss:$16 sps:$4 sm:$0xff]   ;;  %v1030_v5 = vcombine.high %v10259_v0, %v10262_v1 }
 0x1cd   :  { %5329 = vmatpush1.bf16.msra.mxu0 %v8078_v6  ;;  %5862 = vmatpush1.bf16.msra.mxu1 %v8081_v7  ;;  %v994_v6 = vcombine.high %v10066_v50, %v10066_v50  ;;  %v8162_v7 = vld [vmem:[%s11350_s1 + $0x1000] ss:$16 sps:$4 sm:$0xff]   ;;  %v8173_v50 = vld [vmem:[%s11350_s1 + $0x102c] ss:$16 sps:$4 sm:$0xff]  }
 0x1ce   :  { %5330 = vmatprep.subr.bf16.mxu0 %v8086_v8  ;;  %5863 = vmatprep.subr.bf16.mxu1 %v8089_v9  ;;  %v8165_v8 = vld [vmem:[%s11350_s1 + $0x1008] ss:$16 sps:$4 sm:$0xff]   ;;  %v8170_v9 = vld [vmem:[%s11350_s1 + $0x1024] ss:$16 sps:$4 sm:$0xff]  }
 0x1d1   :  { %5331 = vmatpush1.bf16.msra.mxu0 %v8084_v10  ;;  %5864 = vmatpush1.bf16.msra.mxu1 %v8087_v11  ;;  %v10293_v10 = vrot.slane %v1030_v5, %v8760_v54  ;;  %v8168_v11 = vld [vmem:[%s11350_s1 + $0x1020] ss:$16 sps:$4 sm:$0xff]   ;;  %v8249_v5 = vld [vmem:[%s11350_s1 + $0x11c8] ss:$16 sps:$4 sm:$0xff]  }
 0x1d2   :  { %5332 = vmatprep.subr.bf16.mxu0 %v8092_v12  ;;  %5865 = vmatprep.subr.bf16.mxu1 %v8095_v13  ;;  %v8171_v12 = vld [vmem:[%s11350_s1 + $0x1028] ss:$16 sps:$4 sm:$0xff]   ;;  %v8176_v13 = vld [vmem:[%s11350_s1 + $0x1044] ss:$16 sps:$4 sm:$0xff]  }
 0x1d5   :  { %5333 = vmatpush1.bf16.msra.mxu0 %v8090_v14  ;;  %5866 = vmatpush1.bf16.msra.mxu1 %v8093_v15  ;;  %v8179_v14 = vld [vmem:[%s11350_s1 + $0x104c] ss:$16 sps:$4 sm:$0xff]   ;;  %v8174_v15 = vld [vmem:[%s11350_s1 + $0x1040] ss:$16 sps:$4 sm:$0xff]  }
 0x1d6   :  { %5334 = vmatprep.subr.bf16.mxu0 %v8098_v17  ;;  %5867 = vmatprep.subr.bf16.mxu1 %v8101_v18  ;;  %v8177_v17 = vld [vmem:[%s11350_s1 + $0x1048] ss:$16 sps:$4 sm:$0xff]   ;;  %v8182_v18 = vld [vmem:[%s11350_s1 + $0x1064] ss:$16 sps:$4 sm:$0xff]  }
 0x1d9   :  { %5335 = vmatpush1.bf16.msra.mxu0 %v8096_v19  ;;  %5868 = vmatpush1.bf16.msra.mxu1 %v8099_v20  ;;  %v8185_v19 = vld [vmem:[%s11350_s1 + $0x106c] ss:$16 sps:$4 sm:$0xff]   ;;  %v8180_v20 = vld [vmem:[%s11350_s1 + $0x1060] ss:$16 sps:$4 sm:$0xff]  }
 0x1da   :  { %5336 = vmatprep.subr.bf16.mxu0 %v8104_v21  ;;  %5869 = vmatprep.subr.bf16.mxu1 %v8107_v22  ;;  %v8183_v21 = vld [vmem:[%s11350_s1 + $0x1068] ss:$16 sps:$4 sm:$0xff]   ;;  %v8188_v22 = vld [vmem:[%s11350_s1 + $0x1084] ss:$16 sps:$4 sm:$0xff]  }
 0x1dd   :  { %5337 = vmatpush1.bf16.msra.mxu0 %v8102_v23  ;;  %5870 = vmatpush1.bf16.msra.mxu1 %v8105_v24  ;;  %v8191_v23 = vld [vmem:[%s11350_s1 + $0x108c] ss:$16 sps:$4 sm:$0xff]   ;;  %v8186_v24 = vld [vmem:[%s11350_s1 + $0x1080] ss:$16 sps:$4 sm:$0xff]  }
 0x1de   :  { %5338 = vmatprep.subr.bf16.mxu0 %v8110_v16  ;;  %5871 = vmatprep.subr.bf16.mxu1 %v8113_v25  ;;  %v8189_v16 = vld [vmem:[%s11350_s1 + $0x1088] ss:$16 sps:$4 sm:$0xff]   ;;  %v8194_v25 = vld [vmem:[%s11350_s1 + $0x10a4] ss:$16 sps:$4 sm:$0xff]  }
 0x1e1   :  { %5339 = vmatpush1.bf16.msra.mxu0 %v8108_v26  ;;  %5872 = vmatpush1.bf16.msra.mxu1 %v8111_v27  ;;  %v8197_v26 = vld [vmem:[%s11350_s1 + $0x10ac] ss:$16 sps:$4 sm:$0xff]   ;;  %v8192_v27 = vld [vmem:[%s11350_s1 + $0x10a0] ss:$16 sps:$4 sm:$0xff]  }
 0x1e2   :  { %5340 = vmatprep.subr.bf16.mxu0 %v8116_v28  ;;  %5873 = vmatprep.subr.bf16.mxu1 %v8119_v29  ;;  %v8195_v28 = vld [vmem:[%s11350_s1 + $0x10a8] ss:$16 sps:$4 sm:$0xff]   ;;  %v8200_v29 = vld [vmem:[%s11350_s1 + $0x10c4] ss:$16 sps:$4 sm:$0xff]  }
 0x1e5   :  { %5341 = vmatpush1.bf16.msra.mxu0 %v8114_v32  ;;  %5874 = vmatpush1.bf16.msra.mxu1 %v8117_v30  ;;  %v8203_v32 = vld [vmem:[%s11350_s1 + $0x10cc] ss:$16 sps:$4 sm:$0xff]   ;;  %v8198_v30 = vld [vmem:[%s11350_s1 + $0x10c0] ss:$16 sps:$4 sm:$0xff]  }
 0x1e6   :  { %5342 = vmatprep.subr.bf16.mxu0 %v8122_v35  ;;  %5875 = vmatprep.subr.bf16.mxu1 %v8125_v36  ;;  %v8201_v35 = vld [vmem:[%s11350_s1 + $0x10c8] ss:$16 sps:$4 sm:$0xff]   ;;  %v8206_v36 = vld [vmem:[%s11350_s1 + $0x10e4] ss:$16 sps:$4 sm:$0xff]  }
 0x1e9   :  { %5343 = vmatpush1.bf16.msra.mxu0 %v8120_v38  ;;  %5876 = vmatpush1.bf16.msra.mxu1 %v8123_v39  ;;  %v8209_v38 = vld [vmem:[%s11350_s1 + $0x10ec] ss:$16 sps:$4 sm:$0xff]   ;;  %v8204_v39 = vld [vmem:[%s11350_s1 + $0x10e0] ss:$16 sps:$4 sm:$0xff]  }
 0x1ea   :  { %5344 = vmatprep.subr.bf16.mxu0 %v8128_v37  ;;  %5877 = vmatprep.subr.bf16.mxu1 %v8131_v40  ;;  %v8207_v37 = vld [vmem:[%s11350_s1 + $0x10e8] ss:$16 sps:$4 sm:$0xff]   ;;  %v8212_v40 = vld [vmem:[%s11350_s1 + $0x1104] ss:$16 sps:$4 sm:$0xff]  }
 0x1ed   :  { %5345 = vmatpush1.bf16.msra.mxu0 %v8126_v41  ;;  %5878 = vmatpush1.bf16.msra.mxu1 %v8129_v42  ;;  %v8215_v41 = vld [vmem:[%s11350_s1 + $0x110c] ss:$16 sps:$4 sm:$0xff]   ;;  %v8210_v42 = vld [vmem:[%s11350_s1 + $0x1100] ss:$16 sps:$4 sm:$0xff]  }
 0x1ee   :  { %5346 = vmatprep.subr.bf16.mxu0 %v8134_v43  ;;  %5879 = vmatprep.subr.bf16.mxu1 %v8137_v31  ;;  %v8213_v43 = vld [vmem:[%s11350_s1 + $0x1108] ss:$16 sps:$4 sm:$0xff]   ;;  %v8218_v31 = vld [vmem:[%s11350_s1 + $0x1124] ss:$16 sps:$4 sm:$0xff]  }
 0x1f1   :  { %5347 = vmatpush1.bf16.msra.mxu0 %v8132_v45  ;;  %5880 = vmatpush1.bf16.msra.mxu1 %v8135_v33  ;;  %v8221_v45 = vld [vmem:[%s11350_s1 + $0x112c] ss:$16 sps:$4 sm:$0xff]   ;;  %v8216_v33 = vld [vmem:[%s11350_s1 + $0x1120] ss:$16 sps:$4 sm:$0xff]  }
 0x1f2   :  { %5348 = vmatprep.subr.bf16.mxu0 %v8140_v47  ;;  %5881 = vmatprep.subr.bf16.mxu1 %v8143_v48  ;;  %v8219_v47 = vld [vmem:[%s11350_s1 + $0x1128] ss:$16 sps:$4 sm:$0xff]   ;;  %v8224_v48 = vld [vmem:[%s11350_s1 + $0x1144] ss:$16 sps:$4 sm:$0xff]  }
 0x1f5   :  { %5349 = vmatpush1.bf16.msra.mxu0 %v8138_v51  ;;  %5882 = vmatpush1.bf16.msra.mxu1 %v8141_v52  ;;  %v8227_v51 = vld [vmem:[%s11350_s1 + $0x114c] ss:$16 sps:$4 sm:$0xff]   ;;  %v8222_v52 = vld [vmem:[%s11350_s1 + $0x1140] ss:$16 sps:$4 sm:$0xff]  }
 0x1f6   :  { %5350 = vmatprep.subr.bf16.mxu0 %v8146_v53  ;;  %5883 = vmatprep.subr.bf16.mxu1 %v8149_v44  ;;  %v8225_v53 = vld [vmem:[%s11350_s1 + $0x1148] ss:$16 sps:$4 sm:$0xff]   ;;  %v8230_v44 = vld [vmem:[%s11350_s1 + $0x1164] ss:$16 sps:$4 sm:$0xff]  }
 0x1f9   :  { %5351 = vmatpush1.bf16.msra.mxu0 %v8144_v55  ;;  %5884 = vmatpush1.bf16.msra.mxu1 %v8147_v56  ;;  %v8233_v55 = vld [vmem:[%s11350_s1 + $0x116c] ss:$16 sps:$4 sm:$0xff]   ;;  %v8228_v56 = vld [vmem:[%s11350_s1 + $0x1160] ss:$16 sps:$4 sm:$0xff]  }
 0x1fa   :  { %5352 = vmatprep.subr.bf16.mxu0 %v8152_v57  ;;  %5885 = vmatprep.subr.bf16.mxu1 %v8155_v58  ;;  %v8231_v57 = vld [vmem:[%s11350_s1 + $0x1168] ss:$16 sps:$4 sm:$0xff]   ;;  %v8236_v58 = vld [vmem:[%s11350_s1 + $0x1184] ss:$16 sps:$4 sm:$0xff]  }
 0x1fd   :  { %5353 = vmatpush1.bf16.msra.mxu0 %v8150_v61  ;;  %5886 = vmatpush1.bf16.msra.mxu1 %v8153_v49  ;;  %v8237_v61 = vld [vmem:[%s11350_s1 + $0x1188] ss:$16 sps:$4 sm:$0xff]   ;;  %v8242_v49 = vld [vmem:[%s11350_s1 + $0x11a4] ss:$16 sps:$4 sm:$0xff]  }
 0x1fe   :  { %5354 = vmatprep.subr.bf16.mxu0 %v8158_v62  ;;  %5887 = vmatprep.subr.bf16.mxu1 %v8161_v63  ;;  %v8245_v62 = vld [vmem:[%s11350_s1 + $0x11ac] ss:$16 sps:$4 sm:$0xff]   ;;  %v8240_v63 = vld [vmem:[%s11350_s1 + $0x11a0] ss:$16 sps:$4 sm:$0xff]  }
 0x201   :  { %5355 = vmatpush1.bf16.msra.mxu0 %v8156_v2  ;;  %5888 = vmatpush1.bf16.msra.mxu1 %v8159_v3  ;;  %v8243_v2 = vld [vmem:[%s11350_s1 + $0x11a8] ss:$16 sps:$4 sm:$0xff]   ;;  %v8248_v3 = vld [vmem:[%s11350_s1 + $0x11c4] ss:$16 sps:$4 sm:$0xff]  }
 0x202   :  { %5365 = vmatprep.subr.bf16.mxu0 %v8164_v4  ;;  %5898 = vmatprep.subr.bf16.mxu1 %v8167_v60  ;;  %v8251_v4 = vld [vmem:[%s11350_s1 + $0x11cc] ss:$16 sps:$4 sm:$0xff]   ;;  %v8246_v60 = vld [vmem:[%s11350_s1 + $0x11c0] ss:$16 sps:$4 sm:$0xff]  }
 0x204   :  { %5357 = vmatmul.mubr.bf16.vlgmr.msra.gmra.mrb[0].mxu0 %v994_v6  ;;  %5890 = vmatmul.mubr.bf16.vlgmr.msra.gmra.mrb[0].mxu1 %v994_v6  ;;  %v8254_v6 = vld [vmem:[%s11350_s1 + $0x11e4] ss:$16 sps:$4 sm:$0xff]  }
 0x205   :  { %5366 = vmatpush1.bf16.msra.mxu0 %v8162_v7  ;;  %5899 = vmatpush1.bf16.msra.mxu1 %v8165_v8  ;;  %v8257_v7 = vld [vmem:[%s11350_s1 + $0x11ec] ss:$16 sps:$4 sm:$0xff]   ;;  %v1029_v8 = vcombine.low %v10259_v0, %v10262_v1 }
 0x206   :  { %5367 = vmatprep.subr.bf16.mxu0 %v8170_v9  ;;  %5900 = vmatprep.subr.bf16.mxu1 %v8173_v50  ;;  %v8252_v9 = vld [vmem:[%s11350_s1 + $0x11e0] ss:$16 sps:$4 sm:$0xff]   ;;  %v8255_v50 = vld [vmem:[%s11350_s1 + $0x11e8] ss:$16 sps:$4 sm:$0xff]   ;;  %v8267_v0 = vld [vmem:[%s11350_s1 + $0x120c] ss:$16 sps:$4 sm:$0xff]  }
 0x207   :  { %5397 = vmatprep.mubr.bf16.mxu0 %v10293_v10  ;;  %5930 = vmatprep.mubr.bf16.mxu1 %v10293_v10  ;;  %v10480_v1 = vrot.slane %v1029_v8, %v8760_v54  ;;  %v8351_v8 = vld [vmem:[%s11350_s1 + $0x13cc] ss:$16 sps:$4 sm:$0xff]  }
 0x209   :  { %5368 = vmatpush1.bf16.msra.mxu0 %v8168_v11  ;;  %5901 = vmatpush1.bf16.msra.mxu1 %v8171_v12  ;;  %v8264_v11 = vld [vmem:[%s11350_s1 + $0x1204] ss:$16 sps:$4 sm:$0xff]   ;;  %v8262_v12 = vld [vmem:[%s11350_s1 + $0x1200] ss:$16 sps:$4 sm:$0xff]  }
 0x20a   :  { %5369 = vmatprep.subr.bf16.mxu0 %v8176_v13  ;;  %5902 = vmatprep.subr.bf16.mxu1 %v8179_v14  ;;  %v8265_v13 = vld [vmem:[%s11350_s1 + $0x1208] ss:$16 sps:$4 sm:$0xff]   ;;  %v8270_v14 = vld [vmem:[%s11350_s1 + $0x1224] ss:$16 sps:$4 sm:$0xff]  }
 0x20d   :  { %5370 = vmatpush1.bf16.msra.mxu0 %v8174_v15  ;;  %5903 = vmatpush1.bf16.msra.mxu1 %v8177_v17  ;;  %v8273_v15 = vld [vmem:[%s11350_s1 + $0x122c] ss:$16 sps:$4 sm:$0xff]   ;;  %v1063_v17 = vcombine.high %v10293_v10, %v10293_v10  ;;  %v8276_v10 = vld [vmem:[%s11350_s1 + $0x1244] ss:$16 sps:$4 sm:$0xff]  }
 0x20e   :  { %5371 = vmatprep.subr.bf16.mxu0 %v8182_v18  ;;  %5904 = vmatprep.subr.bf16.mxu1 %v8185_v19  ;;  %v8268_v18 = vld [vmem:[%s11350_s1 + $0x1220] ss:$16 sps:$4 sm:$0xff]   ;;  %v8271_v19 = vld [vmem:[%s11350_s1 + $0x1228] ss:$16 sps:$4 sm:$0xff]  }
 0x211   :  { %5372 = vmatpush1.bf16.msra.mxu0 %v8180_v20  ;;  %5905 = vmatpush1.bf16.msra.mxu1 %v8183_v21  ;;  %v8279_v20 = vld [vmem:[%s11350_s1 + $0x124c] ss:$16 sps:$4 sm:$0xff]   ;;  %v8274_v21 = vld [vmem:[%s11350_s1 + $0x1240] ss:$16 sps:$4 sm:$0xff]  }
 0x212   :  { %5373 = vmatprep.subr.bf16.mxu0 %v8188_v22  ;;  %5906 = vmatprep.subr.bf16.mxu1 %v8191_v23  ;;  %v8277_v22 = vld [vmem:[%s11350_s1 + $0x1248] ss:$16 sps:$4 sm:$0xff]   ;;  %v8282_v23 = vld [vmem:[%s11350_s1 + $0x1264] ss:$16 sps:$4 sm:$0xff]  }
 0x215   :  { %5374 = vmatpush1.bf16.msra.mxu0 %v8186_v24  ;;  %5907 = vmatpush1.bf16.msra.mxu1 %v8189_v16  ;;  %v8285_v24 = vld [vmem:[%s11350_s1 + $0x126c] ss:$16 sps:$4 sm:$0xff]   ;;  %v8280_v16 = vld [vmem:[%s11350_s1 + $0x1260] ss:$16 sps:$4 sm:$0xff]  }
 0x216   :  { %5375 = vmatprep.subr.bf16.mxu0 %v8194_v25  ;;  %5908 = vmatprep.subr.bf16.mxu1 %v8197_v26  ;;  %v8283_v25 = vld [vmem:[%s11350_s1 + $0x1268] ss:$16 sps:$4 sm:$0xff]   ;;  %v8288_v26 = vld [vmem:[%s11350_s1 + $0x1284] ss:$16 sps:$4 sm:$0xff]  }
 0x219   :  { %5376 = vmatpush1.bf16.msra.mxu0 %v8192_v27  ;;  %5909 = vmatpush1.bf16.msra.mxu1 %v8195_v28  ;;  %v8291_v27 = vld [vmem:[%s11350_s1 + $0x128c] ss:$16 sps:$4 sm:$0xff]   ;;  %v8286_v28 = vld [vmem:[%s11350_s1 + $0x1280] ss:$16 sps:$4 sm:$0xff]  }
 0x21a   :  { %5377 = vmatprep.subr.bf16.mxu0 %v8200_v29  ;;  %5910 = vmatprep.subr.bf16.mxu1 %v8203_v32  ;;  %v8289_v29 = vld [vmem:[%s11350_s1 + $0x1288] ss:$16 sps:$4 sm:$0xff]   ;;  %v8294_v32 = vld [vmem:[%s11350_s1 + $0x12a4] ss:$16 sps:$4 sm:$0xff]  }
 0x21d   :  { %5378 = vmatpush1.bf16.msra.mxu0 %v8198_v30  ;;  %5911 = vmatpush1.bf16.msra.mxu1 %v8201_v35  ;;  %v8297_v30 = vld [vmem:[%s11350_s1 + $0x12ac] ss:$16 sps:$4 sm:$0xff]   ;;  %v8292_v35 = vld [vmem:[%s11350_s1 + $0x12a0] ss:$16 sps:$4 sm:$0xff]  }
 0x21e   :  { %5379 = vmatprep.subr.bf16.mxu0 %v8206_v36  ;;  %5912 = vmatprep.subr.bf16.mxu1 %v8209_v38  ;;  %v8295_v36 = vld [vmem:[%s11350_s1 + $0x12a8] ss:$16 sps:$4 sm:$0xff]   ;;  %v8300_v38 = vld [vmem:[%s11350_s1 + $0x12c4] ss:$16 sps:$4 sm:$0xff]  }
 0x221   :  { %5380 = vmatpush1.bf16.msra.mxu0 %v8204_v39  ;;  %5913 = vmatpush1.bf16.msra.mxu1 %v8207_v37  ;;  %v8303_v39 = vld [vmem:[%s11350_s1 + $0x12cc] ss:$16 sps:$4 sm:$0xff]   ;;  %v8298_v37 = vld [vmem:[%s11350_s1 + $0x12c0] ss:$16 sps:$4 sm:$0xff]  }
 0x222   :  { %5381 = vmatprep.subr.bf16.mxu0 %v8212_v40  ;;  %5914 = vmatprep.subr.bf16.mxu1 %v8215_v41  ;;  %v8301_v40 = vld [vmem:[%s11350_s1 + $0x12c8] ss:$16 sps:$4 sm:$0xff]   ;;  %v8306_v41 = vld [vmem:[%s11350_s1 + $0x12e4] ss:$16 sps:$4 sm:$0xff]  }
 0x225   :  { %5382 = vmatpush1.bf16.msra.mxu0 %v8210_v42  ;;  %5915 = vmatpush1.bf16.msra.mxu1 %v8213_v43  ;;  %v8309_v42 = vld [vmem:[%s11350_s1 + $0x12ec] ss:$16 sps:$4 sm:$0xff]   ;;  %v8304_v43 = vld [vmem:[%s11350_s1 + $0x12e0] ss:$16 sps:$4 sm:$0xff]  }
 0x226   :  { %5383 = vmatprep.subr.bf16.mxu0 %v8218_v31  ;;  %5916 = vmatprep.subr.bf16.mxu1 %v8221_v45  ;;  %v8307_v31 = vld [vmem:[%s11350_s1 + $0x12e8] ss:$16 sps:$4 sm:$0xff]   ;;  %v8312_v45 = vld [vmem:[%s11350_s1 + $0x1304] ss:$16 sps:$4 sm:$0xff]  }
 0x229   :  { %5384 = vmatpush1.bf16.msra.mxu0 %v8216_v33  ;;  %5917 = vmatpush1.bf16.msra.mxu1 %v8219_v47  ;;  %v8315_v33 = vld [vmem:[%s11350_s1 + $0x130c] ss:$16 sps:$4 sm:$0xff]   ;;  %v8310_v47 = vld [vmem:[%s11350_s1 + $0x1300] ss:$16 sps:$4 sm:$0xff]  }
 0x22a   :  { %5385 = vmatprep.subr.bf16.mxu0 %v8224_v48  ;;  %5918 = vmatprep.subr.bf16.mxu1 %v8227_v51  ;;  %v8313_v48 = vld [vmem:[%s11350_s1 + $0x1308] ss:$16 sps:$4 sm:$0xff]   ;;  %v8318_v51 = vld [vmem:[%s11350_s1 + $0x1324] ss:$16 sps:$4 sm:$0xff]  }
 0x22d   :  { %5386 = vmatpush1.bf16.msra.mxu0 %v8222_v52  ;;  %5919 = vmatpush1.bf16.msra.mxu1 %v8225_v53  ;;  %v8321_v52 = vld [vmem:[%s11350_s1 + $0x132c] ss:$16 sps:$4 sm:$0xff]   ;;  %v8316_v53 = vld [vmem:[%s11350_s1 + $0x1320] ss:$16 sps:$4 sm:$0xff]  }
 0x22e   :  { %5387 = vmatprep.subr.bf16.mxu0 %v8230_v44  ;;  %5920 = vmatprep.subr.bf16.mxu1 %v8233_v55  ;;  %v8319_v44 = vld [vmem:[%s11350_s1 + $0x1328] ss:$16 sps:$4 sm:$0xff]   ;;  %v8324_v55 = vld [vmem:[%s11350_s1 + $0x1344] ss:$16 sps:$4 sm:$0xff]  }
 0x231   :  { %5388 = vmatpush1.bf16.msra.mxu0 %v8228_v56  ;;  %5921 = vmatpush1.bf16.msra.mxu1 %v8231_v57  ;;  %v8327_v56 = vld [vmem:[%s11350_s1 + $0x134c] ss:$16 sps:$4 sm:$0xff]   ;;  %v8322_v57 = vld [vmem:[%s11350_s1 + $0x1340] ss:$16 sps:$4 sm:$0xff]  }
 0x232   :  { %5389 = vmatprep.subr.bf16.mxu0 %v8236_v58  ;;  %5922 = vmatprep.subr.bf16.mxu1 %v8239_v59  ;;  %v8325_v58 = vld [vmem:[%s11350_s1 + $0x1348] ss:$16 sps:$4 sm:$0xff]   ;;  %v8330_v59 = vld [vmem:[%s11350_s1 + $0x1364] ss:$16 sps:$4 sm:$0xff]  }
 0x235   :  { %5390 = vmatpush1.bf16.msra.mxu0 %v8234_v34  ;;  %5923 = vmatpush1.bf16.msra.mxu1 %v8237_v61  ;;  %v8333_v34 = vld [vmem:[%s11350_s1 + $0x136c] ss:$16 sps:$4 sm:$0xff]   ;;  %v8328_v61 = vld [vmem:[%s11350_s1 + $0x1360] ss:$16 sps:$4 sm:$0xff]  }
 0x236   :  { %5391 = vmatprep.subr.bf16.mxu0 %v8242_v49  ;;  %5924 = vmatprep.subr.bf16.mxu1 %v8245_v62  ;;  %v8331_v49 = vld [vmem:[%s11350_s1 + $0x1368] ss:$16 sps:$4 sm:$0xff]   ;;  %v8336_v62 = vld [vmem:[%s11350_s1 + $0x1384] ss:$16 sps:$4 sm:$0xff]  }
 0x239   :  { %5392 = vmatpush1.bf16.msra.mxu0 %v8240_v63  ;;  %5925 = vmatpush1.bf16.msra.mxu1 %v8243_v2  ;;  %v8339_v63 = vld [vmem:[%s11350_s1 + $0x138c] ss:$16 sps:$4 sm:$0xff]   ;;  %v8334_v2 = vld [vmem:[%s11350_s1 + $0x1380] ss:$16 sps:$4 sm:$0xff]  }
 0x23a   :  { %5393 = vmatprep.subr.bf16.mxu0 %v8248_v3  ;;  %5926 = vmatprep.subr.bf16.mxu1 %v8251_v4  ;;  %v8337_v3 = vld [vmem:[%s11350_s1 + $0x1388] ss:$16 sps:$4 sm:$0xff]   ;;  %v8342_v4 = vld [vmem:[%s11350_s1 + $0x13a4] ss:$16 sps:$4 sm:$0xff]  }
 0x23d   :  { %5394 = vmatpush1.bf16.msra.mxu0 %v8246_v60  ;;  %5927 = vmatpush1.bf16.msra.mxu1 %v8249_v5  ;;  %v8345_v60 = vld [vmem:[%s11350_s1 + $0x13ac] ss:$16 sps:$4 sm:$0xff]   ;;  %v8340_v5 = vld [vmem:[%s11350_s1 + $0x13a0] ss:$16 sps:$4 sm:$0xff]  }
 0x23e   :  { %5395 = vmatprep.subr.bf16.mxu0 %v8254_v6  ;;  %5928 = vmatprep.subr.bf16.mxu1 %v8257_v7  ;;  %v8343_v6 = vld [vmem:[%s11350_s1 + $0x13a8] ss:$16 sps:$4 sm:$0xff]   ;;  %v8348_v7 = vld [vmem:[%s11350_s1 + $0x13c4] ss:$16 sps:$4 sm:$0xff]  }
 0x241   :  { %5396 = vmatpush1.bf16.msra.mxu0 %v8252_v9  ;;  %5929 = vmatpush1.bf16.msra.mxu1 %v8255_v50  ;;  %v8454_v9 = vld [vmem:[%s11349_s0 + $0x14] ss:$25 sps:$4 sm:$0xff]   ;;  %v8455_v50 = vld [vmem:[%s11349_s0 + $0x46] ss:$25 sps:$4 sm:$0xff]  }
 0x242   :  { %5406 = vmatprep.subr.bf16.mxu0 %v8264_v11  ;;  %5939 = vmatprep.subr.bf16.mxu1 %v8267_v0  ;;  %v8346_v11 = vld [vmem:[%s11350_s1 + $0x13c0] ss:$16 sps:$4 sm:$0xff]   ;;  %v8349_v0 = vld [vmem:[%s11350_s1 + $0x13c8] ss:$16 sps:$4 sm:$0xff]  }
 0x244   :  { %5398 = vmatmul.mubr.bf16.vlgmr.msra.gmra.mrb[0].mxu0 %v10480_v1  ;;  %5931 = vmatmul.mubr.bf16.vlgmr.msra.gmra.mrb[0].mxu1 %v10480_v1 }
 0x245   :  { %5407 = vmatpush1.bf16.msra.mxu0 %v8262_v12  ;;  %5940 = vmatpush1.bf16.msra.mxu1 %v8265_v13  ;;  %v8354_v12 = vld [vmem:[%s11350_s1 + $0x13e4] ss:$16 sps:$4 sm:$0xff]   ;;  %v8357_v13 = vld [vmem:[%s11350_s1 + $0x13ec] ss:$16 sps:$4 sm:$0xff]  }
 0x246   :  { %5408 = vmatprep.subr.bf16.mxu0 %v8270_v14  ;;  %5941 = vmatprep.subr.bf16.mxu1 %v8273_v15  ;;  %v10673_v14 = vrot.slane %v8454_v9, %v8760_v54  ;;  %v10676_v15 = vrot.slane %v8455_v50, %v8760_v54  ;;  %v8435_v9 = vld [vmem:[%s11350_s1 + $0x158c] ss:$16 sps:$4 sm:$0xff]   ;;  %v8430_v50 = vld [vmem:[%s11350_s1 + $0x1580] ss:$16 sps:$4 sm:$0xff]  }
 0x247   :  { %5438 = vmatprep.mubr.bf16.mxu0 %v1063_v17  ;;  %5971 = vmatprep.mubr.bf16.mxu1 %v1063_v17  ;;  %v8352_v17 = vld [vmem:[%s11350_s1 + $0x13e0] ss:$16 sps:$4 sm:$0xff]  }
 0x249   :  { %5409 = vmatpush1.bf16.msra.mxu0 %v8268_v18  ;;  %5942 = vmatpush1.bf16.msra.mxu1 %v8271_v19  ;;  %v8355_v18 = vld [vmem:[%s11350_s1 + $0x13e8] ss:$16 sps:$4 sm:$0xff]   ;;  %v8360_v19 = vld [vmem:[%s11350_s1 + $0x1404] ss:$16 sps:$4 sm:$0xff]  }
 0x24a   :  { %5410 = vmatprep.subr.bf16.mxu0 %v8276_v10  ;;  %5943 = vmatprep.subr.bf16.mxu1 %v8279_v20  ;;  %v8363_v10 = vld [vmem:[%s11350_s1 + $0x140c] ss:$16 sps:$4 sm:$0xff]   ;;  %v1032_v20 = vcombine.high %v10673_v14, %v10676_v15 }
 0x24d   :  { %5411 = vmatpush1.bf16.msra.mxu0 %v8274_v21  ;;  %5944 = vmatpush1.bf16.msra.mxu1 %v8277_v22  ;;  %v1061_v21 = vcombine.high %v10480_v1, %v10480_v1  ;;  %v8358_v22 = vld [vmem:[%s11350_s1 + $0x1400] ss:$16 sps:$4 sm:$0xff]   ;;  %v8369_v1 = vld [vmem:[%s11350_s1 + $0x142c] ss:$16 sps:$4 sm:$0xff]  }
 0x24e   :  { %5412 = vmatprep.subr.bf16.mxu0 %v8282_v23  ;;  %5945 = vmatprep.subr.bf16.mxu1 %v8285_v24  ;;  %v8361_v23 = vld [vmem:[%s11350_s1 + $0x1408] ss:$16 sps:$4 sm:$0xff]   ;;  %v8366_v24 = vld [vmem:[%s11350_s1 + $0x1424] ss:$16 sps:$4 sm:$0xff]  }
 0x251   :  { %5413 = vmatpush1.bf16.msra.mxu0 %v8280_v16  ;;  %5946 = vmatpush1.bf16.msra.mxu1 %v8283_v25  ;;  %v10707_v16 = vrot.slane %v1032_v20, %v8760_v54  ;;  %v8364_v25 = vld [vmem:[%s11350_s1 + $0x1420] ss:$16 sps:$4 sm:$0xff]   ;;  %v8445_v20 = vld [vmem:[%s11350_s1 + $0x15c8] ss:$16 sps:$4 sm:$0xff]  }
 0x252   :  { %5414 = vmatprep.subr.bf16.mxu0 %v8288_v26  ;;  %5947 = vmatprep.subr.bf16.mxu1 %v8291_v27  ;;  %v8367_v26 = vld [vmem:[%s11350_s1 + $0x1428] ss:$16 sps:$4 sm:$0xff]   ;;  %v8372_v27 = vld [vmem:[%s11350_s1 + $0x1444] ss:$16 sps:$4 sm:$0xff]  }
 0x255   :  { %5415 = vmatpush1.bf16.msra.mxu0 %v8286_v28  ;;  %5948 = vmatpush1.bf16.msra.mxu1 %v8289_v29  ;;  %v8375_v28 = vld [vmem:[%s11350_s1 + $0x144c] ss:$16 sps:$4 sm:$0xff]   ;;  %v8370_v29 = vld [vmem:[%s11350_s1 + $0x1440] ss:$16 sps:$4 sm:$0xff]  }
 0x256   :  { %5416 = vmatprep.subr.bf16.mxu0 %v8294_v32  ;;  %5949 = vmatprep.subr.bf16.mxu1 %v8297_v30  ;;  %v8373_v32 = vld [vmem:[%s11350_s1 + $0x1448] ss:$16 sps:$4 sm:$0xff]   ;;  %v8378_v30 = vld [vmem:[%s11350_s1 + $0x1464] ss:$16 sps:$4 sm:$0xff]  }
 0x259   :  { %5417 = vmatpush1.bf16.msra.mxu0 %v8292_v35  ;;  %5950 = vmatpush1.bf16.msra.mxu1 %v8295_v36  ;;  %v8381_v35 = vld [vmem:[%s11350_s1 + $0x146c] ss:$16 sps:$4 sm:$0xff]   ;;  %v8376_v36 = vld [vmem:[%s11350_s1 + $0x1460] ss:$16 sps:$4 sm:$0xff]  }
 0x25a   :  { %5418 = vmatprep.subr.bf16.mxu0 %v8300_v38  ;;  %5951 = vmatprep.subr.bf16.mxu1 %v8303_v39  ;;  %v8379_v38 = vld [vmem:[%s11350_s1 + $0x1468] ss:$16 sps:$4 sm:$0xff]   ;;  %v8384_v39 = vld [vmem:[%s11350_s1 + $0x1484] ss:$16 sps:$4 sm:$0xff]  }
 0x25d   :  { %5419 = vmatpush1.bf16.msra.mxu0 %v8298_v37  ;;  %5952 = vmatpush1.bf16.msra.mxu1 %v8301_v40  ;;  %v8387_v37 = vld [vmem:[%s11350_s1 + $0x148c] ss:$16 sps:$4 sm:$0xff]   ;;  %v8382_v40 = vld [vmem:[%s11350_s1 + $0x1480] ss:$16 sps:$4 sm:$0xff]  }
 0x25e   :  { %5420 = vmatprep.subr.bf16.mxu0 %v8306_v41  ;;  %5953 = vmatprep.subr.bf16.mxu1 %v8309_v42  ;;  %v8385_v41 = vld [vmem:[%s11350_s1 + $0x1488] ss:$16 sps:$4 sm:$0xff]   ;;  %v8390_v42 = vld [vmem:[%s11350_s1 + $0x14a4] ss:$16 sps:$4 sm:$0xff]  }
 0x261   :  { %5421 = vmatpush1.bf16.msra.mxu0 %v8304_v43  ;;  %5954 = vmatpush1.bf16.msra.mxu1 %v8307_v31  ;;  %v8393_v43 = vld [vmem:[%s11350_s1 + $0x14ac] ss:$16 sps:$4 sm:$0xff]   ;;  %v8388_v31 = vld [vmem:[%s11350_s1 + $0x14a0] ss:$16 sps:$4 sm:$0xff]  }
 0x262   :  { %5422 = vmatprep.subr.bf16.mxu0 %v8312_v45  ;;  %5955 = vmatprep.subr.bf16.mxu1 %v8315_v33  ;;  %v8391_v45 = vld [vmem:[%s11350_s1 + $0x14a8] ss:$16 sps:$4 sm:$0xff]   ;;  %v8396_v33 = vld [vmem:[%s11350_s1 + $0x14c4] ss:$16 sps:$4 sm:$0xff]  }
 0x265   :  { %5423 = vmatpush1.bf16.msra.mxu0 %v8310_v47  ;;  %5956 = vmatpush1.bf16.msra.mxu1 %v8313_v48  ;;  %v8399_v47 = vld [vmem:[%s11350_s1 + $0x14cc] ss:$16 sps:$4 sm:$0xff]   ;;  %v8394_v48 = vld [vmem:[%s11350_s1 + $0x14c0] ss:$16 sps:$4 sm:$0xff]  }
 0x266   :  { %5424 = vmatprep.subr.bf16.mxu0 %v8318_v51  ;;  %5957 = vmatprep.subr.bf16.mxu1 %v8321_v52  ;;  %v8397_v51 = vld [vmem:[%s11350_s1 + $0x14c8] ss:$16 sps:$4 sm:$0xff]   ;;  %v8402_v52 = vld [vmem:[%s11350_s1 + $0x14e4] ss:$16 sps:$4 sm:$0xff]  }
 0x269   :  { %5425 = vmatpush1.bf16.msra.mxu0 %v8316_v53  ;;  %5958 = vmatpush1.bf16.msra.mxu1 %v8319_v44  ;;  %v8405_v53 = vld [vmem:[%s11350_s1 + $0x14ec] ss:$16 sps:$4 sm:$0xff]   ;;  %v8400_v44 = vld [vmem:[%s11350_s1 + $0x14e0] ss:$16 sps:$4 sm:$0xff]  }
 0x26a   :  { %5426 = vmatprep.subr.bf16.mxu0 %v8324_v55  ;;  %5959 = vmatprep.subr.bf16.mxu1 %v8327_v56  ;;  %v8403_v55 = vld [vmem:[%s11350_s1 + $0x14e8] ss:$16 sps:$4 sm:$0xff]   ;;  %v8408_v56 = vld [vmem:[%s11350_s1 + $0x1504] ss:$16 sps:$4 sm:$0xff]  }
 0x26d   :  { %5427 = vmatpush1.bf16.msra.mxu0 %v8322_v57  ;;  %5960 = vmatpush1.bf16.msra.mxu1 %v8325_v58  ;;  %v8411_v57 = vld [vmem:[%s11350_s1 + $0x150c] ss:$16 sps:$4 sm:$0xff]   ;;  %v8406_v58 = vld [vmem:[%s11350_s1 + $0x1500] ss:$16 sps:$4 sm:$0xff]  }
 0x26e   :  { %5428 = vmatprep.subr.bf16.mxu0 %v8330_v59  ;;  %5961 = vmatprep.subr.bf16.mxu1 %v8333_v34  ;;  %v8409_v59 = vld [vmem:[%s11350_s1 + $0x1508] ss:$16 sps:$4 sm:$0xff]   ;;  %v8414_v34 = vld [vmem:[%s11350_s1 + $0x1524] ss:$16 sps:$4 sm:$0xff]  }
 0x271   :  { %5429 = vmatpush1.bf16.msra.mxu0 %v8328_v61  ;;  %5962 = vmatpush1.bf16.msra.mxu1 %v8331_v49  ;;  %v8417_v61 = vld [vmem:[%s11350_s1 + $0x152c] ss:$16 sps:$4 sm:$0xff]   ;;  %v8412_v49 = vld [vmem:[%s11350_s1 + $0x1520] ss:$16 sps:$4 sm:$0xff]  }
 0x272   :  { %5430 = vmatprep.subr.bf16.mxu0 %v8336_v62  ;;  %5963 = vmatprep.subr.bf16.mxu1 %v8339_v63  ;;  %v8415_v62 = vld [vmem:[%s11350_s1 + $0x1528] ss:$16 sps:$4 sm:$0xff]   ;;  %v8420_v63 = vld [vmem:[%s11350_s1 + $0x1544] ss:$16 sps:$4 sm:$0xff]  }
 0x275   :  { %5431 = vmatpush1.bf16.msra.mxu0 %v8334_v2  ;;  %5964 = vmatpush1.bf16.msra.mxu1 %v8337_v3  ;;  %v8423_v2 = vld [vmem:[%s11350_s1 + $0x154c] ss:$16 sps:$4 sm:$0xff]   ;;  %v8418_v3 = vld [vmem:[%s11350_s1 + $0x1540] ss:$16 sps:$4 sm:$0xff]  }
 0x276   :  { %5432 = vmatprep.subr.bf16.mxu0 %v8342_v4  ;;  %5965 = vmatprep.subr.bf16.mxu1 %v8345_v60  ;;  %v8421_v4 = vld [vmem:[%s11350_s1 + $0x1548] ss:$16 sps:$4 sm:$0xff]   ;;  %v8426_v60 = vld [vmem:[%s11350_s1 + $0x1564] ss:$16 sps:$4 sm:$0xff]  }
 0x279   :  { %5433 = vmatpush1.bf16.msra.mxu0 %v8340_v5  ;;  %5966 = vmatpush1.bf16.msra.mxu1 %v8343_v6  ;;  %v8429_v5 = vld [vmem:[%s11350_s1 + $0x156c] ss:$16 sps:$4 sm:$0xff]   ;;  %v8424_v6 = vld [vmem:[%s11350_s1 + $0x1560] ss:$16 sps:$4 sm:$0xff]  }
 0x27a   :  { %5434 = vmatprep.subr.bf16.mxu0 %v8348_v7  ;;  %5967 = vmatprep.subr.bf16.mxu1 %v8351_v8  ;;  %v8427_v7 = vld [vmem:[%s11350_s1 + $0x1568] ss:$16 sps:$4 sm:$0xff]   ;;  %v8432_v8 = vld [vmem:[%s11350_s1 + $0x1584] ss:$16 sps:$4 sm:$0xff]  }
 0x27d   :  { %5435 = vmatpush1.bf16.msra.mxu0 %v8346_v11  ;;  %5968 = vmatpush1.bf16.msra.mxu1 %v8349_v0  ;;  %v8433_v11 = vld [vmem:[%s11350_s1 + $0x1588] ss:$16 sps:$4 sm:$0xff]   ;;  %v8438_v0 = vld [vmem:[%s11350_s1 + $0x15a4] ss:$16 sps:$4 sm:$0xff]  }
 0x27e   :  { %5436 = vmatprep.subr.bf16.mxu0 %v8354_v12  ;;  %5969 = vmatprep.subr.bf16.mxu1 %v8357_v13  ;;  %v8441_v12 = vld [vmem:[%s11350_s1 + $0x15ac] ss:$16 sps:$4 sm:$0xff]   ;;  %v8436_v13 = vld [vmem:[%s11350_s1 + $0x15a0] ss:$16 sps:$4 sm:$0xff]  }
 0x281   :  { %5437 = vmatpush1.bf16.msra.mxu0 %v8352_v17  ;;  %5970 = vmatpush1.bf16.msra.mxu1 %v8355_v18  ;;  %v8439_v17 = vld [vmem:[%s11350_s1 + $0x15a8] ss:$16 sps:$4 sm:$0xff]   ;;  %v8444_v18 = vld [vmem:[%s11350_s1 + $0x15c4] ss:$16 sps:$4 sm:$0xff]  }
 0x282   :  { %5447 = vmatprep.subr.bf16.mxu0 %v8360_v19  ;;  %5980 = vmatprep.subr.bf16.mxu1 %v8363_v10  ;;  %v8447_v19 = vld [vmem:[%s11350_s1 + $0x15cc] ss:$16 sps:$4 sm:$0xff]   ;;  %v8442_v10 = vld [vmem:[%s11350_s1 + $0x15c0] ss:$16 sps:$4 sm:$0xff]  }
 0x284   :  { %5439 = vmatmul.mubr.bf16.vlgmr.msra.gmra.mrb[0].mxu0 %v1061_v21  ;;  %5972 = vmatmul.mubr.bf16.vlgmr.msra.gmra.mrb[0].mxu1 %v1061_v21  ;;  %v8450_v21 = vld [vmem:[%s11350_s1 + $0x15e4] ss:$16 sps:$4 sm:$0xff]  }
 0x285   :  { %5448 = vmatpush1.bf16.msra.mxu0 %v8358_v22  ;;  %5981 = vmatpush1.bf16.msra.mxu1 %v8361_v23  ;;  %v8453_v22 = vld [vmem:[%s11350_s1 + $0x15ec] ss:$16 sps:$4 sm:$0xff]   ;;  %v1031_v23 = vcombine.low %v10673_v14, %v10676_v15 }
 0x286   :  { %5449 = vmatprep.subr.bf16.mxu0 %v8366_v24  ;;  %5982 = vmatprep.subr.bf16.mxu1 %v8369_v1  ;;  %v8448_v24 = vld [vmem:[%s11350_s1 + $0x15e0] ss:$16 sps:$4 sm:$0xff]   ;;  %v8451_v1 = vld [vmem:[%s11350_s1 + $0x15e8] ss:$16 sps:$4 sm:$0xff]   ;;  %v8461_v14 = vld [vmem:[%s11350_s1 + $0x160c] ss:$16 sps:$4 sm:$0xff]  }
 0x287   :  { %5479 = vmatprep.mubr.bf16.mxu0 %v10707_v16  ;;  %6012 = vmatprep.mubr.bf16.mxu1 %v10707_v16  ;;  %v10894_v15 = vrot.slane %v1031_v23, %v8760_v54  ;;  %v8545_v23 = vld [vmem:[%s11350_s1 + $0x17cc] ss:$16 sps:$4 sm:$0xff]  }
 0x289   :  { %5450 = vmatpush1.bf16.msra.mxu0 %v8364_v25  ;;  %5983 = vmatpush1.bf16.msra.mxu1 %v8367_v26  ;;  %v8458_v25 = vld [vmem:[%s11350_s1 + $0x1604] ss:$16 sps:$4 sm:$0xff]   ;;  %v8456_v26 = vld [vmem:[%s11350_s1 + $0x1600] ss:$16 sps:$4 sm:$0xff]  }
 0x28a   :  { %5451 = vmatprep.subr.bf16.mxu0 %v8372_v27  ;;  %5984 = vmatprep.subr.bf16.mxu1 %v8375_v28  ;;  %v8459_v27 = vld [vmem:[%s11350_s1 + $0x1608] ss:$16 sps:$4 sm:$0xff]   ;;  %v8464_v28 = vld [vmem:[%s11350_s1 + $0x1624] ss:$16 sps:$4 sm:$0xff]  }
 0x28d   :  { %5452 = vmatpush1.bf16.msra.mxu0 %v8370_v29  ;;  %5985 = vmatpush1.bf16.msra.mxu1 %v8373_v32  ;;  %v8467_v29 = vld [vmem:[%s11350_s1 + $0x162c] ss:$16 sps:$4 sm:$0xff]   ;;  %v1064_v32 = vcombine.high %v10707_v16, %v10707_v16  ;;  %v8470_v16 = vld [vmem:[%s11350_s1 + $0x1644] ss:$16 sps:$4 sm:$0xff]  }
 0x28e   :  { %5453 = vmatprep.subr.bf16.mxu0 %v8378_v30  ;;  %5986 = vmatprep.subr.bf16.mxu1 %v8381_v35  ;;  %v8462_v30 = vld [vmem:[%s11350_s1 + $0x1620] ss:$16 sps:$4 sm:$0xff]   ;;  %v8465_v35 = vld [vmem:[%s11350_s1 + $0x1628] ss:$16 sps:$4 sm:$0xff]  }
 0x291   :  { %5454 = vmatpush1.bf16.msra.mxu0 %v8376_v36  ;;  %5987 = vmatpush1.bf16.msra.mxu1 %v8379_v38  ;;  %v8473_v36 = vld [vmem:[%s11350_s1 + $0x164c] ss:$16 sps:$4 sm:$0xff]   ;;  %v8468_v38 = vld [vmem:[%s11350_s1 + $0x1640] ss:$16 sps:$4 sm:$0xff]  }
 0x292   :  { %5455 = vmatprep.subr.bf16.mxu0 %v8384_v39  ;;  %5988 = vmatprep.subr.bf16.mxu1 %v8387_v37  ;;  %v8471_v39 = vld [vmem:[%s11350_s1 + $0x1648] ss:$16 sps:$4 sm:$0xff]   ;;  %v8476_v37 = vld [vmem:[%s11350_s1 + $0x1664] ss:$16 sps:$4 sm:$0xff]  }
 0x295   :  { %5456 = vmatpush1.bf16.msra.mxu0 %v8382_v40  ;;  %5989 = vmatpush1.bf16.msra.mxu1 %v8385_v41  ;;  %v8479_v40 = vld [vmem:[%s11350_s1 + $0x166c] ss:$16 sps:$4 sm:$0xff]   ;;  %v8474_v41 = vld [vmem:[%s11350_s1 + $0x1660] ss:$16 sps:$4 sm:$0xff]  }
 0x296   :  { %5457 = vmatprep.subr.bf16.mxu0 %v8390_v42  ;;  %5990 = vmatprep.subr.bf16.mxu1 %v8393_v43  ;;  %v8477_v42 = vld [vmem:[%s11350_s1 + $0x1668] ss:$16 sps:$4 sm:$0xff]   ;;  %v8482_v43 = vld [vmem:[%s11350_s1 + $0x1684] ss:$16 sps:$4 sm:$0xff]  }
 0x299   :  { %5458 = vmatpush1.bf16.msra.mxu0 %v8388_v31  ;;  %5991 = vmatpush1.bf16.msra.mxu1 %v8391_v45  ;;  %v8485_v31 = vld [vmem:[%s11350_s1 + $0x168c] ss:$16 sps:$4 sm:$0xff]   ;;  %v8480_v45 = vld [vmem:[%s11350_s1 + $0x1680] ss:$16 sps:$4 sm:$0xff]  }
 0x29a   :  { %5459 = vmatprep.subr.bf16.mxu0 %v8396_v33  ;;  %5992 = vmatprep.subr.bf16.mxu1 %v8399_v47  ;;  %v8483_v33 = vld [vmem:[%s11350_s1 + $0x1688] ss:$16 sps:$4 sm:$0xff]   ;;  %v8488_v47 = vld [vmem:[%s11350_s1 + $0x16a4] ss:$16 sps:$4 sm:$0xff]  }
 0x29d   :  { %5460 = vmatpush1.bf16.msra.mxu0 %v8394_v48  ;;  %5993 = vmatpush1.bf16.msra.mxu1 %v8397_v51  ;;  %v8491_v48 = vld [vmem:[%s11350_s1 + $0x16ac] ss:$16 sps:$4 sm:$0xff]   ;;  %v8486_v51 = vld [vmem:[%s11350_s1 + $0x16a0] ss:$16 sps:$4 sm:$0xff]  }
 0x29e   :  { %5461 = vmatprep.subr.bf16.mxu0 %v8402_v52  ;;  %5994 = vmatprep.subr.bf16.mxu1 %v8405_v53  ;;  %v8489_v52 = vld [vmem:[%s11350_s1 + $0x16a8] ss:$16 sps:$4 sm:$0xff]   ;;  %v8494_v53 = vld [vmem:[%s11350_s1 + $0x16c4] ss:$16 sps:$4 sm:$0xff]  }
 0x2a1   :  { %5462 = vmatpush1.bf16.msra.mxu0 %v8400_v44  ;;  %5995 = vmatpush1.bf16.msra.mxu1 %v8403_v55  ;;  %v8497_v44 = vld [vmem:[%s11350_s1 + $0x16cc] ss:$16 sps:$4 sm:$0xff]   ;;  %v8492_v55 = vld [vmem:[%s11350_s1 + $0x16c0] ss:$16 sps:$4 sm:$0xff]  }
 0x2a2   :  { %5463 = vmatprep.subr.bf16.mxu0 %v8408_v56  ;;  %5996 = vmatprep.subr.bf16.mxu1 %v8411_v57  ;;  %v8495_v56 = vld [vmem:[%s11350_s1 + $0x16c8] ss:$16 sps:$4 sm:$0xff]   ;;  %v8500_v57 = vld [vmem:[%s11350_s1 + $0x16e4] ss:$16 sps:$4 sm:$0xff]  }
 0x2a5   :  { %5464 = vmatpush1.bf16.msra.mxu0 %v8406_v58  ;;  %5997 = vmatpush1.bf16.msra.mxu1 %v8409_v59  ;;  %v8503_v58 = vld [vmem:[%s11350_s1 + $0x16ec] ss:$16 sps:$4 sm:$0xff]   ;;  %v8498_v59 = vld [vmem:[%s11350_s1 + $0x16e0] ss:$16 sps:$4 sm:$0xff]  }
 0x2a6   :  { %5465 = vmatprep.subr.bf16.mxu0 %v8414_v34  ;;  %5998 = vmatprep.subr.bf16.mxu1 %v8417_v61  ;;  %v8501_v34 = vld [vmem:[%s11350_s1 + $0x16e8] ss:$16 sps:$4 sm:$0xff]   ;;  %v8506_v61 = vld [vmem:[%s11350_s1 + $0x1704] ss:$16 sps:$4 sm:$0xff]  }
 0x2a9   :  { %5466 = vmatpush1.bf16.msra.mxu0 %v8412_v49  ;;  %5999 = vmatpush1.bf16.msra.mxu1 %v8415_v62  ;;  %v8509_v49 = vld [vmem:[%s11350_s1 + $0x170c] ss:$16 sps:$4 sm:$0xff]   ;;  %v8504_v62 = vld [vmem:[%s11350_s1 + $0x1700] ss:$16 sps:$4 sm:$0xff]  }
 0x2aa   :  { %5467 = vmatprep.subr.bf16.mxu0 %v8420_v63  ;;  %6000 = vmatprep.subr.bf16.mxu1 %v8423_v2  ;;  %v8507_v63 = vld [vmem:[%s11350_s1 + $0x1708] ss:$16 sps:$4 sm:$0xff]   ;;  %v8512_v2 = vld [vmem:[%s11350_s1 + $0x1724] ss:$16 sps:$4 sm:$0xff]  }
 0x2ad   :  { %5468 = vmatpush1.bf16.msra.mxu0 %v8418_v3  ;;  %6001 = vmatpush1.bf16.msra.mxu1 %v8421_v4  ;;  %v8515_v3 = vld [vmem:[%s11350_s1 + $0x172c] ss:$16 sps:$4 sm:$0xff]   ;;  %v8510_v4 = vld [vmem:[%s11350_s1 + $0x1720] ss:$16 sps:$4 sm:$0xff]  }
 0x2ae   :  { %5469 = vmatprep.subr.bf16.mxu0 %v8426_v60  ;;  %6002 = vmatprep.subr.bf16.mxu1 %v8429_v5  ;;  %v8513_v60 = vld [vmem:[%s11350_s1 + $0x1728] ss:$16 sps:$4 sm:$0xff]   ;;  %v8518_v5 = vld [vmem:[%s11350_s1 + $0x1744] ss:$16 sps:$4 sm:$0xff]  }
 0x2b1   :  { %5470 = vmatpush1.bf16.msra.mxu0 %v8424_v6  ;;  %6003 = vmatpush1.bf16.msra.mxu1 %v8427_v7  ;;  %v8521_v6 = vld [vmem:[%s11350_s1 + $0x174c] ss:$16 sps:$4 sm:$0xff]   ;;  %v8516_v7 = vld [vmem:[%s11350_s1 + $0x1740] ss:$16 sps:$4 sm:$0xff]  }
 0x2b2   :  { %5471 = vmatprep.subr.bf16.mxu0 %v8432_v8  ;;  %6004 = vmatprep.subr.bf16.mxu1 %v8435_v9  ;;  %v8519_v8 = vld [vmem:[%s11350_s1 + $0x1748] ss:$16 sps:$4 sm:$0xff]   ;;  %v8524_v9 = vld [vmem:[%s11350_s1 + $0x1764] ss:$16 sps:$4 sm:$0xff]  }
 0x2b5   :  { %5472 = vmatpush1.bf16.msra.mxu0 %v8430_v50  ;;  %6005 = vmatpush1.bf16.msra.mxu1 %v8433_v11  ;;  %v8527_v50 = vld [vmem:[%s11350_s1 + $0x176c] ss:$16 sps:$4 sm:$0xff]   ;;  %v8522_v11 = vld [vmem:[%s11350_s1 + $0x1760] ss:$16 sps:$4 sm:$0xff]  }
 0x2b6   :  { %5473 = vmatprep.subr.bf16.mxu0 %v8438_v0  ;;  %6006 = vmatprep.subr.bf16.mxu1 %v8441_v12  ;;  %v8525_v0 = vld [vmem:[%s11350_s1 + $0x1768] ss:$16 sps:$4 sm:$0xff]   ;;  %v8530_v12 = vld [vmem:[%s11350_s1 + $0x1784] ss:$16 sps:$4 sm:$0xff]  }
 0x2b9   :  { %5474 = vmatpush1.bf16.msra.mxu0 %v8436_v13  ;;  %6007 = vmatpush1.bf16.msra.mxu1 %v8439_v17  ;;  %v8533_v13 = vld [vmem:[%s11350_s1 + $0x178c] ss:$16 sps:$4 sm:$0xff]   ;;  %v8528_v17 = vld [vmem:[%s11350_s1 + $0x1780] ss:$16 sps:$4 sm:$0xff]  }
 0x2ba   :  { %5475 = vmatprep.subr.bf16.mxu0 %v8444_v18  ;;  %6008 = vmatprep.subr.bf16.mxu1 %v8447_v19  ;;  %v8531_v18 = vld [vmem:[%s11350_s1 + $0x1788] ss:$16 sps:$4 sm:$0xff]   ;;  %v8536_v19 = vld [vmem:[%s11350_s1 + $0x17a4] ss:$16 sps:$4 sm:$0xff]  }
 0x2bd   :  { %5476 = vmatpush1.bf16.msra.mxu0 %v8442_v10  ;;  %6009 = vmatpush1.bf16.msra.mxu1 %v8445_v20  ;;  %v8539_v10 = vld [vmem:[%s11350_s1 + $0x17ac] ss:$16 sps:$4 sm:$0xff]   ;;  %v8534_v20 = vld [vmem:[%s11350_s1 + $0x17a0] ss:$16 sps:$4 sm:$0xff]  }
 0x2be   :  { %5477 = vmatprep.subr.bf16.mxu0 %v8450_v21  ;;  %6010 = vmatprep.subr.bf16.mxu1 %v8453_v22  ;;  %v8537_v21 = vld [vmem:[%s11350_s1 + $0x17a8] ss:$16 sps:$4 sm:$0xff]   ;;  %v8542_v22 = vld [vmem:[%s11350_s1 + $0x17c4] ss:$16 sps:$4 sm:$0xff]  }
 0x2c1   :  { %5478 = vmatpush1.bf16.msra.mxu0 %v8448_v24  ;;  %6011 = vmatpush1.bf16.msra.mxu1 %v8451_v1  ;;  %v8540_v24 = vld [vmem:[%s11350_s1 + $0x17c0] ss:$16 sps:$4 sm:$0xff]   ;;  %v8543_v1 = vld [vmem:[%s11350_s1 + $0x17c8] ss:$16 sps:$4 sm:$0xff]  }
 0x2c2   :  { %5488 = vmatprep.subr.bf16.mxu0 %v8458_v25  ;;  %6021 = vmatprep.subr.bf16.mxu1 %v8461_v14  ;;  %v8548_v25 = vld [vmem:[%s11350_s1 + $0x17e4] ss:$16 sps:$4 sm:$0xff]   ;;  %v8551_v14 = vld [vmem:[%s11350_s1 + $0x17ec] ss:$16 sps:$4 sm:$0xff]  }
 0x2c4   :  { %5480 = vmatmul.mubr.bf16.vlgmr.msra.gmra.mrb[0].mxu0 %v10894_v15  ;;  %6013 = vmatmul.mubr.bf16.vlgmr.msra.gmra.mrb[0].mxu1 %v10894_v15 }
 0x2c5   :  { %5489 = vmatpush1.bf16.msra.mxu0 %v8456_v26  ;;  %6022 = vmatpush1.bf16.msra.mxu1 %v8459_v27  ;;  %v8546_v26 = vld [vmem:[%s11350_s1 + $0x17e0] ss:$16 sps:$4 sm:$0xff]   ;;  %v8549_v27 = vld [vmem:[%s11350_s1 + $0x17e8] ss:$16 sps:$4 sm:$0xff]  }
 0x2c6   :  { %5490 = vmatprep.subr.bf16.mxu0 %v8464_v28  ;;  %6023 = vmatprep.subr.bf16.mxu1 %v8467_v29  ;;  %v8554_v28 = vld [vmem:[%s11350_s1 + $0x1804] ss:$16 sps:$4 sm:$0xff]   ;;  %v8557_v29 = vld [vmem:[%s11350_s1 + $0x180c] ss:$16 sps:$4 sm:$0xff]  }
 0x2c7   :  { %5520 = vmatprep.mubr.bf16.mxu0 %v1064_v32  ;;  %6053 = vmatprep.mubr.bf16.mxu1 %v1064_v32  ;;  %v1062_v32 = vcombine.high %v10894_v15, %v10894_v15  ;;  %v8563_v15 = vld [vmem:[%s11350_s1 + $0x182c] ss:$16 sps:$4 sm:$0xff]  }
 0x2c9   :  { %5491 = vmatpush1.bf16.msra.mxu0 %v8462_v30  ;;  %6024 = vmatpush1.bf16.msra.mxu1 %v8465_v35  ;;  %v8552_v30 = vld [vmem:[%s11350_s1 + $0x1800] ss:$16 sps:$4 sm:$0xff]   ;;  %v8555_v35 = vld [vmem:[%s11350_s1 + $0x1808] ss:$16 sps:$4 sm:$0xff]  }
 0x2ca   :  { %5492 = vmatprep.subr.bf16.mxu0 %v8470_v16  ;;  %6025 = vmatprep.subr.bf16.mxu1 %v8473_v36  ;;  %v8560_v16 = vld [vmem:[%s11350_s1 + $0x1824] ss:$16 sps:$4 sm:$0xff]   ;;  %v8576_v36 = vld [vmem:[%s11349_s0 + $0x18] ss:$25 sps:$4 sm:$0x11]  }
 0x2cd   :  { %5493 = vmatpush1.bf16.msra.mxu0 %v8468_v38  ;;  %6026 = vmatpush1.bf16.msra.mxu1 %v8471_v39  ;;  %v8577_v38 = vld [vmem:[%s11349_s0 + $0x4a] ss:$25 sps:$4 sm:$0x11]  }
 0x2ce   :  { %5494 = vmatprep.subr.bf16.mxu0 %v8476_v37  ;;  %6027 = vmatprep.subr.bf16.mxu1 %v8479_v40  ;;  %v8558_v39 = vld [vmem:[%s11350_s1 + $0x1820] ss:$16 sps:$4 sm:$0xff]   ;;  %v8561_v37 = vld [vmem:[%s11350_s1 + $0x1828] ss:$16 sps:$4 sm:$0xff]   ;;  %v8566_v40 = vld [vmem:[%s11350_s1 + $0x1844] ss:$16 sps:$4 sm:$0xff]  }
 0x2d1   :  { %5495 = vmatpush1.bf16.msra.mxu0 %v8474_v41  ;;  %6028 = vmatpush1.bf16.msra.mxu1 %v8477_v42  ;;  %v8569_v41 = vld [vmem:[%s11350_s1 + $0x184c] ss:$16 sps:$4 sm:$0xff]   ;;  %v8579_v42 = vmov 0  }
 0x2d2   :  { %5496 = vmatprep.subr.bf16.mxu0 %v8482_v43  ;;  %6029 = vmatprep.subr.bf16.mxu1 %v8485_v31  ;;  %v1073_v43 = vrot.slane %v8576_v36, %v8760_v54  ;;  %v1080_v31 = vrot.slane %v8577_v38, %v8760_v54  ;;  %v6131_v36 = vld [vmem:[%s11352_s3 + $0xc0] sm:$0xff]  ;;  %v6132_v38 = vld [vmem:[%s11352_s3 + $0xc8] sm:$0xff] }
 0x2d5   :  { %5497 = vmatpush1.bf16.msra.mxu0 %v8480_v45  ;;  %6030 = vmatpush1.bf16.msra.mxu1 %v8483_v33  ;;  %v8564_v45 = vld [vmem:[%s11350_s1 + $0x1840] ss:$16 sps:$4 sm:$0xff]   ;;  %v8567_v33 = vld [vmem:[%s11350_s1 + $0x1848] ss:$16 sps:$4 sm:$0xff]  }
 0x2d6   :  { %5498 = vmatprep.subr.bf16.mxu0 %v8488_v47  ;;  %6031 = vmatprep.subr.bf16.mxu1 %v8491_v48  ;;  %v8572_v47 = vld [vmem:[%s11350_s1 + $0x1864] ss:$16 sps:$4 sm:$0xff]   ;;  %v8575_v48 = vld [vmem:[%s11350_s1 + $0x186c] ss:$16 sps:$4 sm:$0xff]  }
 0x2d9   :  { %5499 = vmatpush1.bf16.msra.mxu0 %v8486_v51  ;;  %6032 = vmatpush1.bf16.msra.mxu1 %v8489_v52  ;;  %v6123_v51 = vld [vmem:[%s11352_s3 + $0x80] sm:$0xff]  ;;  %v6124_v52 = vld [vmem:[%s11352_s3 + $0x88] sm:$0xff] }
 0x2da   :  { %5500 = vmatprep.subr.bf16.mxu0 %v8494_v53  ;;  %6033 = vmatprep.subr.bf16.mxu1 %v8497_v44  ;;  %v6155_v53 = vld [vmem:[%s11352_s3 + $0x180] sm:$0xff]  ;;  %v6156_v44 = vld [vmem:[%s11352_s3 + $0x188] sm:$0xff] }
 0x2dd   :  { %5501 = vmatpush1.bf16.msra.mxu0 %v8492_v55  ;;  %6034 = vmatpush1.bf16.msra.mxu1 %v8495_v56  ;;  %v8570_v55 = vld [vmem:[%s11350_s1 + $0x1860] ss:$16 sps:$4 sm:$0xff]   ;;  %v1081_v56 = vcombine.low %v1073_v43, %v1080_v31  ;;  %v6116_v43 = vld [vmem:[%s11352_s3 + $0x48] sm:$0xff]  ;;  %v7232_v31 = vpack.c.bf16 %v6132_v38, %v6131_v36 }
 0x2de   :  { %5502 = vmatprep.subr.bf16.mxu0 %v8500_v57  ;;  %6035 = vmatprep.subr.bf16.mxu1 %v8503_v58  ;;  %v8573_v57 = vld [vmem:[%s11350_s1 + $0x1868] ss:$16 sps:$4 sm:$0xff]   ;;  %v6107_v58 = vld [vmem:[%s11352_s3] sm:$0xff] }
 0x2e1   :  { %5503 = vmatpush1.bf16.msra.mxu0 %v8498_v59  ;;  %6036 = vmatpush1.bf16.msra.mxu1 %v8501_v34  ;;  %v6108_v59 = vld [vmem:[%s11352_s3 + $0x8] sm:$0xff]  ;;  %v7216_v34 = vpack.c.bf16 %v6124_v52, %v6123_v51  ;;  %v6134_v51 = vld [vmem:[%s11352_s3 + $0xd8] sm:$0xff]  ;;  %v6165_v52 = vld [vmem:[%s11352_s3 + $0x1d0] sm:$0xff] }
 0x2e2   :  { %5504 = vmatprep.subr.bf16.mxu0 %v8506_v61  ;;  %6037 = vmatprep.subr.bf16.mxu1 %v8509_v49  ;;  %v7248_v61 = vpack.c.bf16 %v6156_v44, %v6155_v53  ;;  %v6139_v49 = vld [vmem:[%s11352_s3 + $0x100] sm:$0xff]  ;;  %v6166_v53 = vld [vmem:[%s11352_s3 + $0x1d8] sm:$0xff] }
 0x2e5   :  { %5505 = vmatpush1.bf16.msra.mxu0 %v8504_v62  ;;  %6038 = vmatpush1.bf16.msra.mxu1 %v8507_v63  ;;  %v6140_v62 = vld [vmem:[%s11352_s3 + $0x108] sm:$0xff]  ;;  %v6125_v63 = vld [vmem:[%s11352_s3 + $0x90] sm:$0xff] }
 0x2e6   :  { %5506 = vmatprep.subr.bf16.mxu0 %v8512_v2  ;;  %6039 = vmatprep.subr.bf16.mxu1 %v8515_v3  ;;  %v6126_v2 = vld [vmem:[%s11352_s3 + $0x98] sm:$0xff]  ;;  %v6157_v3 = vld [vmem:[%s11352_s3 + $0x190] sm:$0xff] }
 0x2e9   :  { %5507 = vmatpush1.bf16.msra.mxu0 %v8510_v4  ;;  %6040 = vmatpush1.bf16.msra.mxu1 %v8513_v60  ;;  %v6158_v4 = vld [vmem:[%s11352_s3 + $0x198] sm:$0xff]  ;;  %v1088_v60 = vrot.slane %v1081_v56, %v8760_v54  ;;  %v6141_v54 = vld [vmem:[%s11352_s3 + $0x110] sm:$0xff] }
 0x2ea   :  { %5508 = vmatprep.subr.bf16.mxu0 %v8518_v5  ;;  %6041 = vmatprep.subr.bf16.mxu1 %v8521_v6  ;;  %v7218_v5 = vpack.c.bf16 %v6108_v59, %v6107_v58  ;;  %v7250_v6 = vpack.c.bf16 %v6140_v62, %v6139_v49  ;;  %v6117_v56 = vld [vmem:[%s11352_s3 + $0x50] sm:$0xff]  ;;  %v7268_v59 = vpack.c.bf16 %v6166_v53, %v6165_v52  ;;  %v6135_v49 = vld [vmem:[%s11352_s3 + $0xe0] sm:$0xff]  ;;  %v6136_v62 = vld [vmem:[%s11352_s3 + $0xe8] sm:$0xff] }
 0x2ed   :  { %5509 = vmatpush1.bf16.msra.mxu0 %v8516_v7  ;;  %6042 = vmatpush1.bf16.msra.mxu1 %v8519_v8  ;;  %v6109_v7 = vld [vmem:[%s11352_s3 + $0x10] sm:$0xff]  ;;  %v6110_v8 = vld [vmem:[%s11352_s3 + $0x18] sm:$0xff] }
 0x2ee   :  { %5510 = vmatprep.subr.bf16.mxu0 %v8524_v9  ;;  %6043 = vmatprep.subr.bf16.mxu1 %v8527_v50  ;;  %v7220_v9 = vpack.c.bf16 %v6126_v2, %v6125_v63  ;;  %v7252_v50 = vpack.c.bf16 %v6158_v4, %v6157_v3  ;;  %v6167_v63 = vld [vmem:[%s11352_s3 + $0x1e0] sm:$0xff]  ;;  %v6168_v2 = vld [vmem:[%s11352_s3 + $0x1e8] sm:$0xff] }
 0x2f1   :  { %5511 = vmatpush1.bf16.msra.mxu0 %v8522_v11  ;;  %6044 = vmatpush1.bf16.msra.mxu1 %v8525_v0  ;;  %v6142_v11 = vld [vmem:[%s11352_s3 + $0x118] sm:$0xff]  ;;  %v6127_v0 = vld [vmem:[%s11352_s3 + $0xa0] sm:$0xff] }
 0x2f2   :  { %5512 = vmatprep.subr.bf16.mxu0 %v8530_v12  ;;  %6045 = vmatprep.subr.bf16.mxu1 %v8533_v13  ;;  %v6128_v12 = vld [vmem:[%s11352_s3 + $0xa8] sm:$0xff]  ;;  %v6159_v13 = vld [vmem:[%s11352_s3 + $0x1a0] sm:$0xff] }
 0x2f5   :  { %5513 = vmatpush1.bf16.msra.mxu0 %v8528_v17  ;;  %6046 = vmatpush1.bf16.msra.mxu1 %v8531_v18  ;;  %v6160_v17 = vld [vmem:[%s11352_s3 + $0x1a8] sm:$0xff]  ;;  %v7222_v18 = vpack.c.bf16 %v6110_v8, %v6109_v7  ;;  %v6151_v8 = vld [vmem:[%s11352_s3 + $0x160] sm:$0xff] }
 0x2f6   :  { %5514 = vmatprep.subr.bf16.mxu0 %v8536_v19  ;;  %6047 = vmatprep.subr.bf16.mxu1 %v8539_v10  ;;  %v7254_v19 = vpack.c.bf16 %v6142_v11, %v6141_v54  ;;  %v6111_v10 = vld [vmem:[%s11352_s3 + $0x20] sm:$0xff]  ;;  %v6120_v7 = vld [vmem:[%s11352_s3 + $0x68] sm:$0xff]  ;;  %v6137_v11 = vld [vmem:[%s11352_s3 + $0xf0] sm:$0xff] }
 0x2f9   :  { %5515 = vmatpush1.bf16.msra.mxu0 %v8534_v20  ;;  %6048 = vmatpush1.bf16.msra.mxu1 %v8537_v21  ;;  %v6112_v20 = vld [vmem:[%s11352_s3 + $0x28] sm:$0xff]  ;;  %v7224_v21 = vpack.c.bf16 %v6128_v12, %v6127_v0  ;;  %v6138_v0 = vld [vmem:[%s11352_s3 + $0xf8] sm:$0xff]  ;;  %v6169_v12 = vld [vmem:[%s11352_s3 + $0x1f0] sm:$0xff] }
 0x2fa   :  { %5516 = vmatprep.subr.bf16.mxu0 %v8542_v22  ;;  %6049 = vmatprep.subr.bf16.mxu1 %v8545_v23  ;;  %v7256_v22 = vpack.c.bf16 %v6160_v17, %v6159_v13  ;;  %v6143_v23 = vld [vmem:[%s11352_s3 + $0x120] sm:$0xff]  ;;  %v7244_v13 = vpack.c.bf16 %v6138_v0, %v6137_v11  ;;  %v6170_v17 = vld [vmem:[%s11352_s3 + $0x1f8] sm:$0xff] }
 0x2fd   :  { %5517 = vmatpush1.bf16.msra.mxu0 %v8540_v24  ;;  %6050 = vmatpush1.bf16.msra.mxu1 %v8543_v1  ;;  %v6144_v24 = vld [vmem:[%s11352_s3 + $0x128] sm:$0xff]  ;;  %v6129_v1 = vld [vmem:[%s11352_s3 + $0xb0] sm:$0xff] }
 0x2fe   :  { %5518 = vmatprep.subr.bf16.mxu0 %v8548_v25  ;;  %6051 = vmatprep.subr.bf16.mxu1 %v8551_v14  ;;  %v6130_v25 = vld [vmem:[%s11352_s3 + $0xb8] sm:$0xff]  ;;  %v6161_v14 = vld [vmem:[%s11352_s3 + $0x1b0] sm:$0xff] }
 0x301   :  { %5519 = vmatpush1.bf16.msra.mxu0 %v8546_v26  ;;  %6052 = vmatpush1.bf16.msra.mxu1 %v8549_v27  ;;  %v6162_v26 = vld [vmem:[%s11352_s3 + $0x1b8] sm:$0xff]  ;;  %v7226_v27 = vpack.c.bf16 %v6112_v20, %v6111_v10  ;;  %v7276_v10 = vpack.c.bf16 %v6170_v17, %v6169_v12 }
 0x302   :  { %5529 = vmatprep.subr.bf16.mxu0 %v8554_v28  ;;  %6062 = vmatprep.subr.bf16.mxu1 %v8557_v29  ;;  %v7258_v28 = vpack.c.bf16 %v6144_v24, %v6143_v23  ;;  %v6113_v29 = vld [vmem:[%s11352_s3 + $0x30] sm:$0xff]  ;;  %v827_v24 = vsub.s32 0, %v8739_v46 }
 0x304   :  { %5521 = vmatmul.mubr.bf16.vlgmr.msra.gmra.mrb[0].mxu0 %v1062_v32  ;;  %6054 = vmatmul.mubr.bf16.vlgmr.msra.gmra.mrb[0].mxu1 %v1062_v32  ;;  %v6114_v32 = vld [vmem:[%s11352_s3 + $0x38] sm:$0xff] }
 0x305   :  { %5530 = vmatpush1.bf16.msra.mxu0 %v8552_v30  ;;  %6063 = vmatpush1.bf16.msra.mxu1 %v8555_v35  ;;  %v7228_v30 = vpack.c.bf16 %v6130_v25, %v6129_v1  ;;  %v7260_v35 = vpack.c.bf16 %v6162_v26, %v6161_v14  ;;  %v835_v1 = vsub.s32 2, %v8739_v46  ;;  %v823_v25 = vld [vmem:[%s11351_s2] sm:$0xf]  ;;  %v831_v14 = vsub.s32 1, %v8739_v46 }
 0x306   :  { %5531 = vmatprep.subr.bf16.mxu0 %v8560_v16  ;;  %6064 = vmatprep.subr.bf16.mxu1 %v8563_v15  ;;  %v6145_v16 = vld [vmem:[%s11352_s3 + $0x130] sm:$0xff]  ;;  %v6146_v15 = vld [vmem:[%s11352_s3 + $0x138] sm:$0xff]  ;;  %v839_v26 = vsub.s32 3, %v8739_v46 }
 0x307   :  { %5561 = vmatprep.mubr.bf16.mxu0 %v8579_v42  ;;  %6094 = vmatprep.mubr.bf16.mxu1 %v8579_v42  ;;  %v6115_v42 = vld [vmem:[%s11352_s3 + $0x40] sm:$0xff] }
 0x308   :  { %v7234_v44 = vpack.c.bf16 %v6116_v43, %v6115_v42 }
 0x309   :  { %5532 = vmatpush1.bf16.msra.mxu0 %v8558_v39  ;;  %6065 = vmatpush1.bf16.msra.mxu1 %v8561_v37  ;;  %v6163_v39 = vld [vmem:[%s11352_s3 + $0x1c0] sm:$0xff]  ;;  %v6164_v37 = vld [vmem:[%s11352_s3 + $0x1c8] sm:$0xff] }
 0x30a   :  { %5533 = vmatprep.subr.bf16.mxu0 %v8566_v40  ;;  %6066 = vmatprep.subr.bf16.mxu1 %v8569_v41  ;;  %v7230_v40 = vpack.c.bf16 %v6114_v32, %v6113_v29  ;;  %v7262_v41 = vpack.c.bf16 %v6146_v15, %v6145_v16  ;;  %v832_v29 = vrot.slane %v823_v25, %v831_v14 }
 0x30b   :  { %v840_v32 = vrot.slane %v823_v25, %v839_v26 }
 0x30d   :  { %5534 = vmatpush1.bf16.msra.mxu0 %v8564_v45  ;;  %6067 = vmatpush1.bf16.msra.mxu1 %v8567_v33  ;;  %v7264_v45 = vpack.c.bf16 %v6164_v37, %v6163_v39  ;;  %v6147_v33 = vld [vmem:[%s11352_s3 + $0x140] sm:$0xff] }
 0x30e   :  { %5535 = vmatprep.subr.bf16.mxu0 %v8572_v47  ;;  %6068 = vmatprep.subr.bf16.mxu1 %v8575_v48  ;;  %v6148_v47 = vld [vmem:[%s11352_s3 + $0x148] sm:$0xff]  ;;  %v6133_v48 = vld [vmem:[%s11352_s3 + $0xd0] sm:$0xff] }
 0x30f   :  { %v7236_v58 = vpack.c.bf16 %v6134_v51, %v6133_v48  ;;  %v7145_v51 = vld [vmem:[#allocation2] ss:$0 sm:$0xff] }
 0x311   :  { %5536 = vmatpush1.bf16.msra.mxu0 %v8570_v55  ;;  %6069 = vmatpush1.bf16.msra.mxu1 %v8573_v57  ;;  %v7266_v55 = vpack.c.bf16 %v6148_v47, %v6147_v33  ;;  %v6118_v57 = vld [vmem:[%s11352_s3 + $0x58] sm:$0xff] }
 0x312   :  { %7217 = vmatprep.subr.bf16.mxu0 %v7216_v34  ;;  %7249 = vmatprep.subr.bf16.mxu1 %v7248_v61  ;;  %v6149_v34 = vld [vmem:[%s11352_s3 + $0x150] sm:$0xff]  ;;  %v6150_v61 = vld [vmem:[%s11352_s3 + $0x158] sm:$0xff]  ;;  %v7238_v3 = vpack.c.bf16 %v6118_v57, %v6117_v56 }
 0x313   :  { %v7270_v4 = vpack.c.bf16 %v6150_v61, %v6149_v34 }
 0x314   :  { %7143 = vmatmul.mubr.msk.bf16.vlgmr.msra.gmra.mrb[0].mxu0 %vm5033_vm0, %v1088_v60  ;;  %7144 = vmatmul.mubr.msk.bf16.vlgmr.msra.gmra.mrb[0].mxu1 %vm5033_vm0, %v1088_v60  ;;  %v7240_v60 = vpack.c.bf16 %v6136_v62, %v6135_v49 }
 0x315   :  { %7219 = vmatpush3.bf16.msra.mxu0 %v7218_v5  ;;  %7251 = vmatpush3.bf16.msra.mxu1 %v7250_v6  ;;  %v7272_v5 = vpack.c.bf16 %v6168_v2, %v6167_v63  ;;  %v6119_v6 = vld [vmem:[%s11352_s3 + $0x60] sm:$0xff] }
 0x316   :  { %7221 = vmatprep.subr.bf16.mxu0 %v7220_v9  ;;  %7253 = vmatprep.subr.bf16.mxu1 %v7252_v50  ;;  %v7242_v9 = vpack.c.bf16 %v6120_v7, %v6119_v6  ;;  %v6152_v50 = vld [vmem:[%s11352_s3 + $0x168] sm:$0xff] }
 0x317   :  { %v7274_v54 = vpack.c.bf16 %v6152_v50, %v6151_v8 }
 0x319   :  { %7223 = vmatpush3.bf16.msra.mxu0 %v7222_v18  ;;  %7255 = vmatpush3.bf16.msra.mxu1 %v7254_v19  ;;  %v6121_v18 = vld [vmem:[%s11352_s3 + $0x70] sm:$0xff]  ;;  %v6122_v19 = vld [vmem:[%s11352_s3 + $0x78] sm:$0xff] }
 0x31a   :  { %7225 = vmatprep.subr.bf16.mxu0 %v7224_v21  ;;  %7257 = vmatprep.subr.bf16.mxu1 %v7256_v22  ;;  %v7246_v20 = vpack.c.bf16 %v6122_v19, %v6121_v18  ;;  %v6153_v21 = vld [vmem:[%s11352_s3 + $0x170] sm:$0xff]  ;;  %v6154_v22 = vld [vmem:[%s11352_s3 + $0x178] sm:$0xff] }
 0x31b   :  { %v7278_v23 = vpack.c.bf16 %v6154_v22, %v6153_v21 }
 0x31d   :  { %7227 = vmatpush3.bf16.msra.mxu0 %v7226_v27  ;;  %7259 = vmatpush3.bf16.msra.mxu1 %v7258_v28  ;;  %v828_v27 = vrot.slane %v823_v25, %v827_v24  ;;  %v836_v28 = vrot.slane %v823_v25, %v835_v1 }
 0x31e   :  { %7229 = vmatprep.subr.bf16.mxu0 %v7228_v30  ;;  %7261 = vmatprep.subr.bf16.mxu1 %v7260_v35 }
 0x321   :  { %7231 = vmatpush3.bf16.msra.mxu0 %v7230_v40  ;;  %7263 = vmatpush3.bf16.msra.mxu1 %v7262_v41 }
 0x322   :  { %7233 = vmatprep.subr.bf16.mxu0 %v7232_v31  ;;  %7265 = vmatprep.subr.bf16.mxu1 %v7264_v45 }
 0x325   :  { %7235 = vmatpush3.bf16.msra.mxu0 %v7234_v44  ;;  %7267 = vmatpush3.bf16.msra.mxu1 %v7266_v55 }
 0x326   :  { %7237 = vmatprep.subr.bf16.mxu0 %v7236_v58  ;;  %7269 = vmatprep.subr.bf16.mxu1 %v7268_v59 }
 0x329   :  { %7239 = vmatpush3.bf16.msra.mxu0 %v7238_v3  ;;  %7271 = vmatpush3.bf16.msra.mxu1 %v7270_v4 }
 0x32a   :  { %7241 = vmatprep.subr.bf16.mxu0 %v7240_v60  ;;  %7273 = vmatprep.subr.bf16.mxu1 %v7272_v5 }
 0x32d   :  { %7243 = vmatpush3.bf16.msra.mxu0 %v7242_v9  ;;  %7275 = vmatpush3.bf16.msra.mxu1 %v7274_v54 }
 0x32e   :  { %7245 = vmatprep.subr.bf16.mxu0 %v7244_v13  ;;  %7277 = vmatprep.subr.bf16.mxu1 %v7276_v10 }
 0x331   :  { %7247 = vmatpush3.bf16.msra.mxu0 %v7246_v20  ;;  %7279 = vmatpush3.bf16.msra.mxu1 %v7278_v23 }
 0x3e7   :  { %v5563_v30 = vpop.f32.mrb[0].mxu0  ;;  %v6096_v35 = vpop.f32.mrb[0].mxu1 }
 0x3e8   :  { %v7280_v16 = vadd.f32 %v5563_v30, %v828_v27  ;;  %v7282_v15 = vadd.f32 %v6096_v35, %v836_v28  ;;  %v5565_v36 = vpop.f32.mrb[1].mxu0  ;;  %v6098_v38 = vpop.f32.mrb[1].mxu1 }
 0x3e9   :  { %v7281_v39 = vadd.f32 %v5565_v36, %v832_v29  ;;  %v7283_v37 = vadd.f32 %v6098_v38, %v840_v32  ;;  %v5567_v40 = vpop.f32.mrb[2].mxu0  ;;  %v6100_v41 = vpop.f32.mrb[2].mxu1 }
 0x3ea   :  { %v5568_v42 = vpop.f32.mrb[3].mxu0  ;;  %v6101_v43 = vpop.f32.mrb[3].mxu1  ;;  %v6103_v33 = vmax.f32 %v7280_v16, 0.0  ;;  %v6105_v46 = vmax.f32 %v7282_v15, 0.0 }
 0x3eb   :  { %v6104_v31 = vmax.f32 %v7281_v39, 0.0  ;;  %v6106_v45 = vmax.f32 %v7283_v37, 0.0 }
 0x3ed   :  { %6242 = vmatprep.mubr.f32.mxu0 %v6104_v31  ;;  %6312 = vmatprep.mubr.f32.mxu1 %v6106_v45 }
 0x3ee   :  { %6243 = vmatmul.mubr.f32.vlgmr.msra.gmra.mrb[4].mxu0 %v6103_v33  ;;  %6313 = vmatmul.mubr.f32.vlgmr.msra.gmra.mrb[4].mxu1 %v6105_v46 }
 0x4c1   :  { %v7178_v47 = vpop.f32.mrb[4].mxu0  ;;  %v7213_v48 = vpop.f32.mrb[4].mxu1 }
 0x4c2   :  { %v7179_v52 = vpop.f32.mrb[5].mxu0  ;;  %v7214_v53 = vpop.f32.mrb[5].mxu1 }
 0x4c3   :  { %v7180_v44 = vadd.f32 %v7179_v52, %v7178_v47  ;;  %v7215_v55 = vadd.f32 %v7214_v53, %v7213_v48 }
 0x4c5   :  { %v6245_v56 = vadd.f32 %v7180_v44, %v7145_v51 }
 0x4c7   :  { %v6315_v57 = vadd.f32 %v7215_v55, %v6245_v56 }
 0x4c9   :  { %6319 = vst.msk [vmem:[#allocation3] sm:$0xff] %vm6318_vm1, %v6315_v57 }
 0x4d0   :  { %v6337_v58 = vld [vmem:[#allocation3] sm:$0x3] }
 0x4d1   :  { %6338 = vst [vmem:[%s11354_s5] sm:$0x3] %v6337_v58 }

</bundles_post_ra>
